<compile_context>
chip_gen: v7x
topology: tpu7x:2x2x1
jax: 0.10.0
libtpu: 0.0.40
codegen_flags: <defaults>
</compile_context>

<pallas_src>
import jax
import jax.numpy as jnp
import numpy as np
from jax.experimental import pallas as pl
from jax.experimental.pallas import tpu as pltpu


# ----------------------------------------------------------------------------- kernel

def _conv_relu_pool(r_ref, t_ref, b_ref, hw, c_out):
    """5x5 'same' conv + bias + ReLU + 2x2 maxpool on a lane-dense padded scratch.

    r_ref : (hw + 10, hw*c_in) f32 scratch; rows 8..8+hw-1 hold the image in
            lane-dense (y, x*c_in + c) layout, rows 6,7 and 8+hw.. are zero (y halo).
            The x halo is folded into t_ref (zero entries).
    t_ref : (5, hw*c_in, hw*c_out) bf16 banded weights; output columns are grouped
            [even output x | odd output x] so pooling needs no lane movement.
    b_ref : (1, hw*c_out) f32 lane-tiled bias.
    returns (hw//2, (hw//2)*c_out) f32 pooled activation, lane = x'*c_out + c.
    """
    l_out = hw * c_out
    acc = jnp.zeros((hw, l_out), jnp.float32)
    for ky in range(5):                                   # 5 big-K MXU matmuls
        lhs = r_ref[6 + ky: 6 + ky + hw, :].astype(jnp.bfloat16)
        acc = acc + jnp.dot(lhs, t_ref[ky], preferred_element_type=jnp.float32)
    acc = jnp.maximum(acc + b_ref[...], 0.0)              # bias + ReLU (f32, VPU)
    half = (hw // 2) * c_out
    px = jnp.maximum(acc[:, :half], acc[:, half:])        # max over x-pairs (lane-aligned)
    return jnp.max(px.reshape(hw // 2, 2, half), axis=1)  # max over y-pairs


def _fused_cnn_kernel(x_ref, t1_ref, t2_ref, t3_ref, wf_ref,
                      b1_ref, b2_ref, b3_ref, bl_ref,
                      out_ref, r1, r2, r3):
    # ---------- layer 1: 3 -> 32 channels, 32x32 -> 16x16 ----------
    r1[...] = jnp.zeros_like(r1)
    r1[8:40, :] = x_ref[0]                                # aligned interior store
    p1 = _conv_relu_pool(r1, t1_ref, b1_ref, 32, 32)      # (16, 512)

    # ---------- layer 2: 32 -> 32 channels, 16x16 -> 8x8 ----------
    r2[...] = jnp.zeros_like(r2)
    r2[8:24, :] = p1
    p2 = _conv_relu_pool(r2, t2_ref, b2_ref, 16, 32)      # (8, 256)

    # ---------- layer 3: 32 -> 64 channels, 8x8 -> 4x4 ----------
    r3[...] = jnp.zeros_like(r3)
    r3[8:16, :] = p2
    p3 = _conv_relu_pool(r3, t3_ref, b3_ref, 8, 64)       # (4, 256)

    # ---------- flatten (NCHW order folded into wf) + linear + softmax ----------
    logits = bl_ref[...].astype(jnp.float32)              # (1, 10)
    for y in range(4):
        logits = logits + jnp.dot(p3[y:y + 1, :].astype(jnp.bfloat16), wf_ref[y],
                                  preferred_element_type=jnp.float32)
    m = jnp.max(logits, axis=-1, keepdims=True)
    e = jnp.exp(logits - m)
    out_ref[0] = (e / jnp.sum(e, axis=-1, keepdims=True)).astype(out_ref.dtype)


# ------------------------------------------------------------------- weight preparation

def _banded_conv_weights(w, size):
    """w: (5, 5, cin, cout) HWIO conv kernel.  Returns (5, size*cin, size*cout) banded
    matrices T with T[ky, xi*cin + c, col(x, o)] = w[ky, xi - x + 2, c, o] when the tap
    is in range (zero otherwise -> implicit 'same' x-padding).  Output columns are
    ordered [all even x | all odd x] so the 2x2 pool is a lane-aligned elementwise max.
    """
    k, _, cin, cout = w.shape
    xi = np.arange(size)[:, None]                    # input x position (row blocks)
    x = np.arange(size)[None, :]                     # output x position (col blocks)
    kx = xi - x + 2                                  # tap linking input xi to output x
    valid = ((kx >= 0) & (kx < k)).astype(np.float32)
    kx = np.clip(kx, 0, k - 1)
    band = w[:, kx, :, :] * valid[None, :, :, None, None]   # (5, xi, x, cin, cout)
    band = band.transpose(0, 1, 3, 2, 4)                    # (5, xi, cin, x, cout)
    band = band.reshape(k, size, cin, size // 2, 2, cout)   # x -> (x', parity)
    band = band.transpose(0, 1, 2, 4, 3, 5)                 # (5, xi, cin, parity, x', cout)
    return band.reshape(k, size * cin, size * cout)


def _head_weight(wl):
    """wl: (1024, 10) = torch Linear weight transposed (rows in NCHW flatten order
    c*16 + y*4 + x).  Re-index rows to the kernel's (y', x'*64 + c) layout."""
    w = wl.reshape(64, 4, 4, 10).transpose(1, 2, 0, 3)      # (y', x', c, 10)
    return w.reshape(4, 256, 10)


# ----------------------------------------------------------------------------- wrapper

def model_forward(x_nchw, params):
    n = x_nchw.shape[0]
    # lane-dense input rows: (N, 32, 32*3), lane = x*3 + c  (single tiny input op)
    x_ld = jnp.transpose(x_nchw, (0, 2, 3, 1)).reshape(n, 32, 96)

    bf16 = jnp.bfloat16
    t1 = _banded_conv_weights(params["w1"], 32).astype(bf16)   # (5,  96, 1024)
    t2 = _banded_conv_weights(params["w2"], 16).astype(bf16)   # (5, 512,  512)
    t3 = _banded_conv_weights(params["w3"], 8).astype(bf16)    # (5, 256,  512)
    wf = _head_weight(params["wl"]).astype(bf16)               # (4, 256,   10)
    b1 = jnp.tile(params["b1"], 32).reshape(1, 1024)
    b2 = jnp.tile(params["b2"], 16).reshape(1, 512)
    b3 = jnp.tile(params["b3"], 8).reshape(1, 512)
    bl = params["bl"].reshape(1, 10)

    out = pl.pallas_call(
        _fused_cnn_kernel,
        out_shape=jax.ShapeDtypeStruct((n, 1, 10), jnp.float32),
        grid_spec=pltpu.PrefetchScalarGridSpec(
            num_scalar_prefetch=0,
            grid=(n,),                       # one image per step; weights stay resident
            in_specs=[
                pl.BlockSpec((1, 32, 96), lambda i: (i, 0, 0)),
                pl.BlockSpec((5, 96, 1024), lambda i: (0, 0, 0)),
                pl.BlockSpec((5, 512, 512), lambda i: (0, 0, 0)),
                pl.BlockSpec((5, 256, 512), lambda i: (0, 0, 0)),
                pl.BlockSpec((4, 256, 10), lambda i: (0, 0, 0)),
                pl.BlockSpec((1, 1024), lambda i: (0, 0)),
                pl.BlockSpec((1, 512), lambda i: (0, 0)),
                pl.BlockSpec((1, 512), lambda i: (0, 0)),
                pl.BlockSpec((1, 10), lambda i: (0, 0)),
            ],
            out_specs=pl.BlockSpec((1, 1, 10), lambda i: (i, 0, 0)),
            scratch_shapes=[
                pltpu.VMEM((42, 96), jnp.float32),    # y-padded 32x32x3 input rows
                pltpu.VMEM((26, 512), jnp.float32),   # y-padded 16x16x32
                pltpu.VMEM((18, 256), jnp.float32),   # y-padded 8x8x32
            ],
        ),
        compiler_params=pltpu.CompilerParams(
            dimension_semantics=("parallel",),        # v7x: both TCs take batch elements
            vmem_limit_bytes=32 * 1024 * 1024,
        ),
    )(x_ld, t1, t2, t3, wf, b1, b2, b3, bl)
    return out.reshape(n, 10)


# ----------------------------------------------------------------------------- params

def init_params(key):
    """Deterministic synthetic init (uniform +-1/sqrt(fan_in), same shapes as torch)."""
    ks = jax.random.split(key, 8)

    def u(k, shape, fan_in):
        bound = 1.0 / jnp.sqrt(jnp.float32(fan_in))
        return jax.random.uniform(k, shape, jnp.float32, -bound, bound)

    return {
        "w1": u(ks[0], (5, 5, 3, 32), 3 * 25),    # torch Conv2d(3, 32, 5) in HWIO
        "b1": u(ks[1], (32,), 3 * 25),
        "w2": u(ks[2], (5, 5, 32, 32), 32 * 25),  # torch Conv2d(32, 32, 5)
        "b2": u(ks[3], (32,), 32 * 25),
        "w3": u(ks[4], (5, 5, 32, 64), 32 * 25),  # torch Conv2d(32, 64, 5)
        "b3": u(ks[5], (64,), 32 * 25),
        "wl": u(ks[6], (1024, 10), 1024),         # torch Linear(1024, 10), stored transposed
        "bl": u(ks[7], (10,), 1024),
    }


# ----------------------------------------------------------------------------- reference

def reference_forward(x_nchw, params):
    """Pure-JAX (f32) reference matching the PyTorch module."""
    x = jnp.transpose(x_nchw, (0, 2, 3, 1))                       # NHWC
    for wk, bk in (("w1", "b1"), ("w2", "b2"), ("w3", "b3")):
        x = jax.lax.conv_general_dilated(
            x, params[wk], window_strides=(1, 1), padding=((2, 2), (2, 2)),
            dimension_numbers=("NHWC", "HWIO", "NHWC"))
        x = jax.nn.relu(x + params[bk])
        n, h, w, c = x.shape
        x = x.reshape(n, h // 2, 2, w // 2, 2, c).max(axis=(2, 4))  # MaxPool2d(2)
    n = x.shape[0]
    feat = jnp.transpose(x, (0, 3, 1, 2)).reshape(n, -1)          # NCHW flatten
    logits = feat @ params["wl"] + params["bl"]
    return jax.nn.softmax(logits, axis=-1)


# ----------------------------------------------------------------------------- main

if __name__ == "__main__":
    key = jax.random.PRNGKey(0)
    pkey, xkey = jax.random.split(key)
    params = init_params(pkey)

    # Linear(in_features=1024) implies 3x32x32 inputs (32 -> 16 -> 8 -> 4; 64*4*4 = 1024).
    x = jax.random.normal(xkey, (2, 3, 32, 32), jnp.float32)      # NCHW, like PyTorch

    out = jax.jit(model_forward)(x, params)
    out = jax.block_until_ready(out)

    assert out.shape == (2, 10), out.shape
    assert bool(jnp.all(jnp.isfinite(out)))
    assert bool(jnp.allclose(jnp.sum(out, axis=-1), 1.0, atol=1e-4))

    ref = reference_forward(x, params)
    max_diff = float(jnp.max(jnp.abs(out - ref)))
    assert max_diff < 2e-2, f"mismatch vs f32 reference, max |diff| = {max_diff}"

    print("KERNEL_OK")
</pallas_src>

<mosaic_0001>
module attributes {stable_mosaic.version = 11 : i64} {
  func.func @_fused_cnn_kernel(%arg0: i32, %arg1: memref<1x32x96xf32, #tpu.memory_space<vmem>>, %arg2: memref<5x96x1024xbf16, #tpu.memory_space<vmem>>, %arg3: memref<5x512x512xbf16, #tpu.memory_space<vmem>>, %arg4: memref<5x256x512xbf16, #tpu.memory_space<vmem>>, %arg5: memref<4x256x10xbf16, #tpu.memory_space<vmem>>, %arg6: memref<1x1024xf32, #tpu.memory_space<vmem>>, %arg7: memref<1x512xf32, #tpu.memory_space<vmem>>, %arg8: memref<1x512xf32, #tpu.memory_space<vmem>>, %arg9: memref<1x10xf32, #tpu.memory_space<vmem>>, %arg10: memref<1x1x10xf32, #tpu.memory_space<vmem>>, %arg11: memref<42x96xf32, #tpu.memory_space<vmem>>, %arg12: memref<26x512xf32, #tpu.memory_space<vmem>>, %arg13: memref<18x256xf32, #tpu.memory_space<vmem>>) attributes {dimension_semantics = [#tpu.dimension_semantics<parallel>], iteration_bounds = array<i64: 2>, scalar_prefetch = 0 : i64, scratch_operands = 3 : i64, tpu.core_type = #tpu.core_type<tc>, window_params = [{transform_indices = @transform_0, window_bounds = array<i64: 1, 32, 96>}, {pipeline_mode = #tpu.pipeline_mode<synchronous>, transform_indices = @transform_1, window_bounds = array<i64: 5, 96, 1024>}, {pipeline_mode = #tpu.pipeline_mode<synchronous>, transform_indices = @transform_2, window_bounds = array<i64: 5, 512, 512>}, {pipeline_mode = #tpu.pipeline_mode<synchronous>, transform_indices = @transform_3, window_bounds = array<i64: 5, 256, 512>}, {pipeline_mode = #tpu.pipeline_mode<synchronous>, transform_indices = @transform_4, window_bounds = array<i64: 4, 256, 10>}, {pipeline_mode = #tpu.pipeline_mode<synchronous>, transform_indices = @transform_5, window_bounds = array<i64: 1, 1024>}, {pipeline_mode = #tpu.pipeline_mode<synchronous>, transform_indices = @transform_6, window_bounds = array<i64: 1, 512>}, {pipeline_mode = #tpu.pipeline_mode<synchronous>, transform_indices = @transform_7, window_bounds = array<i64: 1, 512>}, {pipeline_mode = #tpu.pipeline_mode<synchronous>, transform_indices = @transform_8, window_bounds = array<i64: 1, 10>}, {transform_indices = @transform_9, window_bounds = array<i64: 1, 1, 10>}]} {
    %cst = arith.constant 0.000000e+00 : f32
    %0 = vector.broadcast %cst : f32 to vector<42x96xf32>
    %c0 = arith.constant 0 : index
    %c0_0 = arith.constant 0 : index
    %1 = vector.load %arg11[%c0, %c0_0] : memref<42x96xf32, #tpu.memory_space<vmem>>, vector<42x96xf32>
    tpu.vector_store %arg11[%c0, %c0_0], %0 {strides = array<i32>} : memref<42x96xf32, #tpu.memory_space<vmem>>, vector<42x96xf32>,
    %c0_1 = arith.constant 0 : index
    %c0_2 = arith.constant 0 : index
    %c0_3 = arith.constant 0 : index
    %2 = vector.load %arg1[%c0_1, %c0_2, %c0_3] : memref<1x32x96xf32, #tpu.memory_space<vmem>>, vector<1x32x96xf32>
    %3 = vector.shape_cast %2 : vector<1x32x96xf32> to vector<32x96xf32>
    %c8 = arith.constant 8 : index
    %c0_4 = arith.constant 0 : index
    %4 = vector.load %arg11[%c8, %c0_4] : memref<42x96xf32, #tpu.memory_space<vmem>>, vector<32x96xf32>
    tpu.vector_store %arg11[%c8, %c0_4], %3 {strides = array<i32>} : memref<42x96xf32, #tpu.memory_space<vmem>>, vector<32x96xf32>,
    %cst_5 = arith.constant 0.000000e+00 : f32
    %5 = vector.broadcast %cst_5 : f32 to vector<32x1024xf32>
    %c6 = arith.constant 6 : index
    %c0_6 = arith.constant 0 : index
    %6 = vector.load %arg11[%c6, %c0_6] : memref<42x96xf32, #tpu.memory_space<vmem>>, vector<32x96xf32>
    %7 = arith.truncf %6 : vector<32x96xf32> to vector<32x96xbf16>
    %c0_7 = arith.constant 0 : index
    %c0_8 = arith.constant 0 : index
    %c0_9 = arith.constant 0 : index
    %8 = vector.load %arg2[%c0_7, %c0_8, %c0_9] : memref<5x96x1024xbf16, #tpu.memory_space<vmem>>, vector<1x96x1024xbf16>
    %9 = vector.shape_cast %8 : vector<1x96x1024xbf16> to vector<96x1024xbf16>
    %cst_10 = arith.constant dense<0.000000e+00> : vector<32x1024xf32>
    %10 = tpu.matmul %7, %9, %cst_10 {dimension_numbers = #tpu.dot_dimension_numbers<[1], [0], [0], [1], [0, 0, 1, 1], [], []>} : vector<32x96xbf16>, vector<96x1024xbf16>, vector<32x1024xf32> -> vector<32x1024xf32>
    %11 = arith.addf %5, %10 : vector<32x1024xf32>
    %c7 = arith.constant 7 : index
    %c0_11 = arith.constant 0 : index
    %12 = vector.load %arg11[%c7, %c0_11] : memref<42x96xf32, #tpu.memory_space<vmem>>, vector<32x96xf32>
    %13 = arith.truncf %12 : vector<32x96xf32> to vector<32x96xbf16>
    %c1 = arith.constant 1 : index
    %c0_12 = arith.constant 0 : index
    %c0_13 = arith.constant 0 : index
    %14 = vector.load %arg2[%c1, %c0_12, %c0_13] : memref<5x96x1024xbf16, #tpu.memory_space<vmem>>, vector<1x96x1024xbf16>
    %15 = vector.shape_cast %14 : vector<1x96x1024xbf16> to vector<96x1024xbf16>
    %cst_14 = arith.constant dense<0.000000e+00> : vector<32x1024xf32>
    %16 = tpu.matmul %13, %15, %cst_14 {dimension_numbers = #tpu.dot_dimension_numbers<[1], [0], [0], [1], [0, 0, 1, 1], [], []>} : vector<32x96xbf16>, vector<96x1024xbf16>, vector<32x1024xf32> -> vector<32x1024xf32>
    %17 = arith.addf %11, %16 : vector<32x1024xf32>
    %c8_15 = arith.constant 8 : index
    %c0_16 = arith.constant 0 : index
    %18 = vector.load %arg11[%c8_15, %c0_16] : memref<42x96xf32, #tpu.memory_space<vmem>>, vector<32x96xf32>
    %19 = arith.truncf %18 : vector<32x96xf32> to vector<32x96xbf16>
    %c2 = arith.constant 2 : index
    %c0_17 = arith.constant 0 : index
    %c0_18 = arith.constant 0 : index
    %20 = vector.load %arg2[%c2, %c0_17, %c0_18] : memref<5x96x1024xbf16, #tpu.memory_space<vmem>>, vector<1x96x1024xbf16>
    %21 = vector.shape_cast %20 : vector<1x96x1024xbf16> to vector<96x1024xbf16>
    %cst_19 = arith.constant dense<0.000000e+00> : vector<32x1024xf32>
    %22 = tpu.matmul %19, %21, %cst_19 {dimension_numbers = #tpu.dot_dimension_numbers<[1], [0], [0], [1], [0, 0, 1, 1], [], []>} : vector<32x96xbf16>, vector<96x1024xbf16>, vector<32x1024xf32> -> vector<32x1024xf32>
    %23 = arith.addf %17, %22 : vector<32x1024xf32>
    %c9 = arith.constant 9 : index
    %c0_20 = arith.constant 0 : index
    %24 = vector.load %arg11[%c9, %c0_20] : memref<42x96xf32, #tpu.memory_space<vmem>>, vector<32x96xf32>
    %25 = arith.truncf %24 : vector<32x96xf32> to vector<32x96xbf16>
    %c3 = arith.constant 3 : index
    %c0_21 = arith.constant 0 : index
    %c0_22 = arith.constant 0 : index
    %26 = vector.load %arg2[%c3, %c0_21, %c0_22] : memref<5x96x1024xbf16, #tpu.memory_space<vmem>>, vector<1x96x1024xbf16>
    %27 = vector.shape_cast %26 : vector<1x96x1024xbf16> to vector<96x1024xbf16>
    %cst_23 = arith.constant dense<0.000000e+00> : vector<32x1024xf32>
    %28 = tpu.matmul %25, %27, %cst_23 {dimension_numbers = #tpu.dot_dimension_numbers<[1], [0], [0], [1], [0, 0, 1, 1], [], []>} : vector<32x96xbf16>, vector<96x1024xbf16>, vector<32x1024xf32> -> vector<32x1024xf32>
    %29 = arith.addf %23, %28 : vector<32x1024xf32>
    %c10 = arith.constant 10 : index
    %c0_24 = arith.constant 0 : index
    %30 = vector.load %arg11[%c10, %c0_24] : memref<42x96xf32, #tpu.memory_space<vmem>>, vector<32x96xf32>
    %31 = arith.truncf %30 : vector<32x96xf32> to vector<32x96xbf16>
    %c4 = arith.constant 4 : index
    %c0_25 = arith.constant 0 : index
    %c0_26 = arith.constant 0 : index
    %32 = vector.load %arg2[%c4, %c0_25, %c0_26] : memref<5x96x1024xbf16, #tpu.memory_space<vmem>>, vector<1x96x1024xbf16>
    %33 = vector.shape_cast %32 : vector<1x96x1024xbf16> to vector<96x1024xbf16>
    %cst_27 = arith.constant dense<0.000000e+00> : vector<32x1024xf32>
    %34 = tpu.matmul %31, %33, %cst_27 {dimension_numbers = #tpu.dot_dimension_numbers<[1], [0], [0], [1], [0, 0, 1, 1], [], []>} : vector<32x96xbf16>, vector<96x1024xbf16>, vector<32x1024xf32> -> vector<32x1024xf32>
    %35 = arith.addf %29, %34 : vector<32x1024xf32>
    %c0_28 = arith.constant 0 : index
    %c0_29 = arith.constant 0 : index
    %36 = vector.load %arg6[%c0_28, %c0_29] : memref<1x1024xf32, #tpu.memory_space<vmem>>, vector<1x1024xf32>
    %37 = vector.broadcast %36 : vector<1x1024xf32> to vector<32x1024xf32>
    %38 = arith.addf %35, %37 : vector<32x1024xf32>
    %cst_30 = arith.constant 0.000000e+00 : f32
    %39 = vector.broadcast %cst_30 : f32 to vector<32x1024xf32>
    %40 = arith.maximumf %38, %39 : vector<32x1024xf32>
    %41 = vector.extract_strided_slice %40 {offsets = [0, 0], sizes = [32, 512], strides = [1, 1]} : vector<32x1024xf32> to vector<32x512xf32>
    %42 = vector.extract_strided_slice %40 {offsets = [0, 512], sizes = [32, 512], strides = [1, 1]} : vector<32x1024xf32> to vector<32x512xf32>
    %43 = arith.maximumf %41, %42 : vector<32x512xf32>
    %44 = vector.shape_cast %43 : vector<32x512xf32> to vector<16x2x512xf32>
    %cst_31 = arith.constant dense<0xFF800000> : vector<16x512xf32>
    %45 = vector.multi_reduction <maximumf>, %44, %cst_31 [1] : vector<16x2x512xf32> to vector<16x512xf32>
    %cst_32 = arith.constant 0.000000e+00 : f32
    %46 = vector.broadcast %cst_32 : f32 to vector<26x512xf32>
    %c0_33 = arith.constant 0 : index
    %c0_34 = arith.constant 0 : index
    %47 = vector.load %arg12[%c0_33, %c0_34] : memref<26x512xf32, #tpu.memory_space<vmem>>, vector<26x512xf32>
    tpu.vector_store %arg12[%c0_33, %c0_34], %46 {strides = array<i32>} : memref<26x512xf32, #tpu.memory_space<vmem>>, vector<26x512xf32>,
    %c8_35 = arith.constant 8 : index
    %c0_36 = arith.constant 0 : index
    %48 = vector.load %arg12[%c8_35, %c0_36] : memref<26x512xf32, #tpu.memory_space<vmem>>, vector<16x512xf32>
    tpu.vector_store %arg12[%c8_35, %c0_36], %45 {strides = array<i32>} : memref<26x512xf32, #tpu.memory_space<vmem>>, vector<16x512xf32>,
    %cst_37 = arith.constant 0.000000e+00 : f32
    %49 = vector.broadcast %cst_37 : f32 to vector<16x512xf32>
    %c6_38 = arith.constant 6 : index
    %c0_39 = arith.constant 0 : index
    %50 = vector.load %arg12[%c6_38, %c0_39] : memref<26x512xf32, #tpu.memory_space<vmem>>, vector<16x512xf32>
    %51 = arith.truncf %50 : vector<16x512xf32> to vector<16x512xbf16>
    %c0_40 = arith.constant 0 : index
    %c0_41 = arith.constant 0 : index
    %c0_42 = arith.constant 0 : index
    %52 = vector.load %arg3[%c0_40, %c0_41, %c0_42] : memref<5x512x512xbf16, #tpu.memory_space<vmem>>, vector<1x512x512xbf16>
    %53 = vector.shape_cast %52 : vector<1x512x512xbf16> to vector<512x512xbf16>
    %cst_43 = arith.constant dense<0.000000e+00> : vector<16x512xf32>
    %54 = tpu.matmul %51, %53, %cst_43 {dimension_numbers = #tpu.dot_dimension_numbers<[1], [0], [0], [1], [0, 0, 1, 1], [], []>} : vector<16x512xbf16>, vector<512x512xbf16>, vector<16x512xf32> -> vector<16x512xf32>
    %55 = arith.addf %49, %54 : vector<16x512xf32>
    %c7_44 = arith.constant 7 : index
    %c0_45 = arith.constant 0 : index
    %56 = vector.load %arg12[%c7_44, %c0_45] : memref<26x512xf32, #tpu.memory_space<vmem>>, vector<16x512xf32>
    %57 = arith.truncf %56 : vector<16x512xf32> to vector<16x512xbf16>
    %c1_46 = arith.constant 1 : index
    %c0_47 = arith.constant 0 : index
    %c0_48 = arith.constant 0 : index
    %58 = vector.load %arg3[%c1_46, %c0_47, %c0_48] : memref<5x512x512xbf16, #tpu.memory_space<vmem>>, vector<1x512x512xbf16>
    %59 = vector.shape_cast %58 : vector<1x512x512xbf16> to vector<512x512xbf16>
    %cst_49 = arith.constant dense<0.000000e+00> : vector<16x512xf32>
    %60 = tpu.matmul %57, %59, %cst_49 {dimension_numbers = #tpu.dot_dimension_numbers<[1], [0], [0], [1], [0, 0, 1, 1], [], []>} : vector<16x512xbf16>, vector<512x512xbf16>, vector<16x512xf32> -> vector<16x512xf32>
    %61 = arith.addf %55, %60 : vector<16x512xf32>
    %c8_50 = arith.constant 8 : index
    %c0_51 = arith.constant 0 : index
    %62 = vector.load %arg12[%c8_50, %c0_51] : memref<26x512xf32, #tpu.memory_space<vmem>>, vector<16x512xf32>
    %63 = arith.truncf %62 : vector<16x512xf32> to vector<16x512xbf16>
    %c2_52 = arith.constant 2 : index
    %c0_53 = arith.constant 0 : index
    %c0_54 = arith.constant 0 : index
    %64 = vector.load %arg3[%c2_52, %c0_53, %c0_54] : memref<5x512x512xbf16, #tpu.memory_space<vmem>>, vector<1x512x512xbf16>
    %65 = vector.shape_cast %64 : vector<1x512x512xbf16> to vector<512x512xbf16>
    %cst_55 = arith.constant dense<0.000000e+00> : vector<16x512xf32>
    %66 = tpu.matmul %63, %65, %cst_55 {dimension_numbers = #tpu.dot_dimension_numbers<[1], [0], [0], [1], [0, 0, 1, 1], [], []>} : vector<16x512xbf16>, vector<512x512xbf16>, vector<16x512xf32> -> vector<16x512xf32>
    %67 = arith.addf %61, %66 : vector<16x512xf32>
    %c9_56 = arith.constant 9 : index
    %c0_57 = arith.constant 0 : index
    %68 = vector.load %arg12[%c9_56, %c0_57] : memref<26x512xf32, #tpu.memory_space<vmem>>, vector<16x512xf32>
    %69 = arith.truncf %68 : vector<16x512xf32> to vector<16x512xbf16>
    %c3_58 = arith.constant 3 : index
    %c0_59 = arith.constant 0 : index
    %c0_60 = arith.constant 0 : index
    %70 = vector.load %arg3[%c3_58, %c0_59, %c0_60] : memref<5x512x512xbf16, #tpu.memory_space<vmem>>, vector<1x512x512xbf16>
    %71 = vector.shape_cast %70 : vector<1x512x512xbf16> to vector<512x512xbf16>
    %cst_61 = arith.constant dense<0.000000e+00> : vector<16x512xf32>
    %72 = tpu.matmul %69, %71, %cst_61 {dimension_numbers = #tpu.dot_dimension_numbers<[1], [0], [0], [1], [0, 0, 1, 1], [], []>} : vector<16x512xbf16>, vector<512x512xbf16>, vector<16x512xf32> -> vector<16x512xf32>
    %73 = arith.addf %67, %72 : vector<16x512xf32>
    %c10_62 = arith.constant 10 : index
    %c0_63 = arith.constant 0 : index
    %74 = vector.load %arg12[%c10_62, %c0_63] : memref<26x512xf32, #tpu.memory_space<vmem>>, vector<16x512xf32>
    %75 = arith.truncf %74 : vector<16x512xf32> to vector<16x512xbf16>
    %c4_64 = arith.constant 4 : index
    %c0_65 = arith.constant 0 : index
    %c0_66 = arith.constant 0 : index
    %76 = vector.load %arg3[%c4_64, %c0_65, %c0_66] : memref<5x512x512xbf16, #tpu.memory_space<vmem>>, vector<1x512x512xbf16>
    %77 = vector.shape_cast %76 : vector<1x512x512xbf16> to vector<512x512xbf16>
    %cst_67 = arith.constant dense<0.000000e+00> : vector<16x512xf32>
    %78 = tpu.matmul %75, %77, %cst_67 {dimension_numbers = #tpu.dot_dimension_numbers<[1], [0], [0], [1], [0, 0, 1, 1], [], []>} : vector<16x512xbf16>, vector<512x512xbf16>, vector<16x512xf32> -> vector<16x512xf32>
    %79 = arith.addf %73, %78 : vector<16x512xf32>
    %c0_68 = arith.constant 0 : index
    %c0_69 = arith.constant 0 : index
    %80 = vector.load %arg7[%c0_68, %c0_69] : memref<1x512xf32, #tpu.memory_space<vmem>>, vector<1x512xf32>
    %81 = vector.broadcast %80 : vector<1x512xf32> to vector<16x512xf32>
    %82 = arith.addf %79, %81 : vector<16x512xf32>
    %cst_70 = arith.constant 0.000000e+00 : f32
    %83 = vector.broadcast %cst_70 : f32 to vector<16x512xf32>
    %84 = arith.maximumf %82, %83 : vector<16x512xf32>
    %85 = vector.extract_strided_slice %84 {offsets = [0, 0], sizes = [16, 256], strides = [1, 1]} : vector<16x512xf32> to vector<16x256xf32>
    %86 = vector.extract_strided_slice %84 {offsets = [0, 256], sizes = [16, 256], strides = [1, 1]} : vector<16x512xf32> to vector<16x256xf32>
    %87 = arith.maximumf %85, %86 : vector<16x256xf32>
    %88 = vector.shape_cast %87 : vector<16x256xf32> to vector<8x2x256xf32>
    %cst_71 = arith.constant dense<0xFF800000> : vector<8x256xf32>
    %89 = vector.multi_reduction <maximumf>, %88, %cst_71 [1] : vector<8x2x256xf32> to vector<8x256xf32>
    %cst_72 = arith.constant 0.000000e+00 : f32
    %90 = vector.broadcast %cst_72 : f32 to vector<18x256xf32>
    %c0_73 = arith.constant 0 : index
    %c0_74 = arith.constant 0 : index
    %91 = vector.load %arg13[%c0_73, %c0_74] : memref<18x256xf32, #tpu.memory_space<vmem>>, vector<18x256xf32>
    tpu.vector_store %arg13[%c0_73, %c0_74], %90 {strides = array<i32>} : memref<18x256xf32, #tpu.memory_space<vmem>>, vector<18x256xf32>,
    %c8_75 = arith.constant 8 : index
    %c0_76 = arith.constant 0 : index
    %92 = vector.load %arg13[%c8_75, %c0_76] : memref<18x256xf32, #tpu.memory_space<vmem>>, vector<8x256xf32>
    tpu.vector_store %arg13[%c8_75, %c0_76], %89 {strides = array<i32>} : memref<18x256xf32, #tpu.memory_space<vmem>>, vector<8x256xf32>,
    %cst_77 = arith.constant 0.000000e+00 : f32
    %93 = vector.broadcast %cst_77 : f32 to vector<8x512xf32>
    %c6_78 = arith.constant 6 : index
    %c0_79 = arith.constant 0 : index
    %94 = vector.load %arg13[%c6_78, %c0_79] : memref<18x256xf32, #tpu.memory_space<vmem>>, vector<8x256xf32>
    %95 = arith.truncf %94 : vector<8x256xf32> to vector<8x256xbf16>
    %c0_80 = arith.constant 0 : index
    %c0_81 = arith.constant 0 : index
    %c0_82 = arith.constant 0 : index
    %96 = vector.load %arg4[%c0_80, %c0_81, %c0_82] : memref<5x256x512xbf16, #tpu.memory_space<vmem>>, vector<1x256x512xbf16>
    %97 = vector.shape_cast %96 : vector<1x256x512xbf16> to vector<256x512xbf16>
    %cst_83 = arith.constant dense<0.000000e+00> : vector<8x512xf32>
    %98 = tpu.matmul %95, %97, %cst_83 {dimension_numbers = #tpu.dot_dimension_numbers<[1], [0], [0], [1], [0, 0, 1, 1], [], []>} : vector<8x256xbf16>, vector<256x512xbf16>, vector<8x512xf32> -> vector<8x512xf32>
    %99 = arith.addf %93, %98 : vector<8x512xf32>
    %c7_84 = arith.constant 7 : index
    %c0_85 = arith.constant 0 : index
    %100 = vector.load %arg13[%c7_84, %c0_85] : memref<18x256xf32, #tpu.memory_space<vmem>>, vector<8x256xf32>
    %101 = arith.truncf %100 : vector<8x256xf32> to vector<8x256xbf16>
    %c1_86 = arith.constant 1 : index
    %c0_87 = arith.constant 0 : index
    %c0_88 = arith.constant 0 : index
    %102 = vector.load %arg4[%c1_86, %c0_87, %c0_88] : memref<5x256x512xbf16, #tpu.memory_space<vmem>>, vector<1x256x512xbf16>
    %103 = vector.shape_cast %102 : vector<1x256x512xbf16> to vector<256x512xbf16>
    %cst_89 = arith.constant dense<0.000000e+00> : vector<8x512xf32>
    %104 = tpu.matmul %101, %103, %cst_89 {dimension_numbers = #tpu.dot_dimension_numbers<[1], [0], [0], [1], [0, 0, 1, 1], [], []>} : vector<8x256xbf16>, vector<256x512xbf16>, vector<8x512xf32> -> vector<8x512xf32>
    %105 = arith.addf %99, %104 : vector<8x512xf32>
    %c8_90 = arith.constant 8 : index
    %c0_91 = arith.constant 0 : index
    %106 = vector.load %arg13[%c8_90, %c0_91] : memref<18x256xf32, #tpu.memory_space<vmem>>, vector<8x256xf32>
    %107 = arith.truncf %106 : vector<8x256xf32> to vector<8x256xbf16>
    %c2_92 = arith.constant 2 : index
    %c0_93 = arith.constant 0 : index
    %c0_94 = arith.constant 0 : index
    %108 = vector.load %arg4[%c2_92, %c0_93, %c0_94] : memref<5x256x512xbf16, #tpu.memory_space<vmem>>, vector<1x256x512xbf16>
    %109 = vector.shape_cast %108 : vector<1x256x512xbf16> to vector<256x512xbf16>
    %cst_95 = arith.constant dense<0.000000e+00> : vector<8x512xf32>
    %110 = tpu.matmul %107, %109, %cst_95 {dimension_numbers = #tpu.dot_dimension_numbers<[1], [0], [0], [1], [0, 0, 1, 1], [], []>} : vector<8x256xbf16>, vector<256x512xbf16>, vector<8x512xf32> -> vector<8x512xf32>
    %111 = arith.addf %105, %110 : vector<8x512xf32>
    %c9_96 = arith.constant 9 : index
    %c0_97 = arith.constant 0 : index
    %112 = vector.load %arg13[%c9_96, %c0_97] : memref<18x256xf32, #tpu.memory_space<vmem>>, vector<8x256xf32>
    %113 = arith.truncf %112 : vector<8x256xf32> to vector<8x256xbf16>
    %c3_98 = arith.constant 3 : index
    %c0_99 = arith.constant 0 : index
    %c0_100 = arith.constant 0 : index
    %114 = vector.load %arg4[%c3_98, %c0_99, %c0_100] : memref<5x256x512xbf16, #tpu.memory_space<vmem>>, vector<1x256x512xbf16>
    %115 = vector.shape_cast %114 : vector<1x256x512xbf16> to vector<256x512xbf16>
    %cst_101 = arith.constant dense<0.000000e+00> : vector<8x512xf32>
    %116 = tpu.matmul %113, %115, %cst_101 {dimension_numbers = #tpu.dot_dimension_numbers<[1], [0], [0], [1], [0, 0, 1, 1], [], []>} : vector<8x256xbf16>, vector<256x512xbf16>, vector<8x512xf32> -> vector<8x512xf32>
    %117 = arith.addf %111, %116 : vector<8x512xf32>
    %c10_102 = arith.constant 10 : index
    %c0_103 = arith.constant 0 : index
    %118 = vector.load %arg13[%c10_102, %c0_103] : memref<18x256xf32, #tpu.memory_space<vmem>>, vector<8x256xf32>
    %119 = arith.truncf %118 : vector<8x256xf32> to vector<8x256xbf16>
    %c4_104 = arith.constant 4 : index
    %c0_105 = arith.constant 0 : index
    %c0_106 = arith.constant 0 : index
    %120 = vector.load %arg4[%c4_104, %c0_105, %c0_106] : memref<5x256x512xbf16, #tpu.memory_space<vmem>>, vector<1x256x512xbf16>
    %121 = vector.shape_cast %120 : vector<1x256x512xbf16> to vector<256x512xbf16>
    %cst_107 = arith.constant dense<0.000000e+00> : vector<8x512xf32>
    %122 = tpu.matmul %119, %121, %cst_107 {dimension_numbers = #tpu.dot_dimension_numbers<[1], [0], [0], [1], [0, 0, 1, 1], [], []>} : vector<8x256xbf16>, vector<256x512xbf16>, vector<8x512xf32> -> vector<8x512xf32>
    %123 = arith.addf %117, %122 : vector<8x512xf32>
    %c0_108 = arith.constant 0 : index
    %c0_109 = arith.constant 0 : index
    %124 = vector.load %arg8[%c0_108, %c0_109] : memref<1x512xf32, #tpu.memory_space<vmem>>, vector<1x512xf32>
    %125 = vector.broadcast %124 : vector<1x512xf32> to vector<8x512xf32>
    %126 = arith.addf %123, %125 : vector<8x512xf32>
    %cst_110 = arith.constant 0.000000e+00 : f32
    %127 = vector.broadcast %cst_110 : f32 to vector<8x512xf32>
    %128 = arith.maximumf %126, %127 : vector<8x512xf32>
    %129 = vector.extract_strided_slice %128 {offsets = [0, 0], sizes = [8, 256], strides = [1, 1]} : vector<8x512xf32> to vector<8x256xf32>
    %130 = vector.extract_strided_slice %128 {offsets = [0, 256], sizes = [8, 256], strides = [1, 1]} : vector<8x512xf32> to vector<8x256xf32>
    %131 = arith.maximumf %129, %130 : vector<8x256xf32>
    %132 = vector.shape_cast %131 : vector<8x256xf32> to vector<4x2x256xf32>
    %cst_111 = arith.constant dense<0xFF800000> : vector<4x256xf32>
    %133 = vector.multi_reduction <maximumf>, %132, %cst_111 [1] : vector<4x2x256xf32> to vector<4x256xf32>
    %c0_112 = arith.constant 0 : index
    %c0_113 = arith.constant 0 : index
    %134 = vector.load %arg9[%c0_112, %c0_113] : memref<1x10xf32, #tpu.memory_space<vmem>>, vector<1x10xf32>
    %135 = vector.extract_strided_slice %133 {offsets = [0, 0], sizes = [1, 256], strides = [1, 1]} : vector<4x256xf32> to vector<1x256xf32>
    %136 = arith.truncf %135 : vector<1x256xf32> to vector<1x256xbf16>
    %c0_114 = arith.constant 0 : index
    %c0_115 = arith.constant 0 : index
    %c0_116 = arith.constant 0 : index
    %137 = vector.load %arg5[%c0_114, %c0_115, %c0_116] : memref<4x256x10xbf16, #tpu.memory_space<vmem>>, vector<1x256x10xbf16>
    %138 = vector.shape_cast %137 : vector<1x256x10xbf16> to vector<256x10xbf16>
    %cst_117 = arith.constant dense<0.000000e+00> : vector<1x10xf32>
    %139 = tpu.matmul %136, %138, %cst_117 {dimension_numbers = #tpu.dot_dimension_numbers<[1], [0], [0], [1], [0, 0, 1, 1], [], []>} : vector<1x256xbf16>, vector<256x10xbf16>, vector<1x10xf32> -> vector<1x10xf32>
    %140 = arith.addf %134, %139 : vector<1x10xf32>
    %141 = vector.extract_strided_slice %133 {offsets = [1, 0], sizes = [1, 256], strides = [1, 1]} : vector<4x256xf32> to vector<1x256xf32>
    %142 = arith.truncf %141 : vector<1x256xf32> to vector<1x256xbf16>
    %c1_118 = arith.constant 1 : index
    %c0_119 = arith.constant 0 : index
    %c0_120 = arith.constant 0 : index
    %143 = vector.load %arg5[%c1_118, %c0_119, %c0_120] : memref<4x256x10xbf16, #tpu.memory_space<vmem>>, vector<1x256x10xbf16>
    %144 = vector.shape_cast %143 : vector<1x256x10xbf16> to vector<256x10xbf16>
    %cst_121 = arith.constant dense<0.000000e+00> : vector<1x10xf32>
    %145 = tpu.matmul %142, %144, %cst_121 {dimension_numbers = #tpu.dot_dimension_numbers<[1], [0], [0], [1], [0, 0, 1, 1], [], []>} : vector<1x256xbf16>, vector<256x10xbf16>, vector<1x10xf32> -> vector<1x10xf32>
    %146 = arith.addf %140, %145 : vector<1x10xf32>
    %147 = vector.extract_strided_slice %133 {offsets = [2, 0], sizes = [1, 256], strides = [1, 1]} : vector<4x256xf32> to vector<1x256xf32>
    %148 = arith.truncf %147 : vector<1x256xf32> to vector<1x256xbf16>
    %c2_122 = arith.constant 2 : index
    %c0_123 = arith.constant 0 : index
    %c0_124 = arith.constant 0 : index
    %149 = vector.load %arg5[%c2_122, %c0_123, %c0_124] : memref<4x256x10xbf16, #tpu.memory_space<vmem>>, vector<1x256x10xbf16>
    %150 = vector.shape_cast %149 : vector<1x256x10xbf16> to vector<256x10xbf16>
    %cst_125 = arith.constant dense<0.000000e+00> : vector<1x10xf32>
    %151 = tpu.matmul %148, %150, %cst_125 {dimension_numbers = #tpu.dot_dimension_numbers<[1], [0], [0], [1], [0, 0, 1, 1], [], []>} : vector<1x256xbf16>, vector<256x10xbf16>, vector<1x10xf32> -> vector<1x10xf32>
    %152 = arith.addf %146, %151 : vector<1x10xf32>
    %153 = vector.extract_strided_slice %133 {offsets = [3, 0], sizes = [1, 256], strides = [1, 1]} : vector<4x256xf32> to vector<1x256xf32>
    %154 = arith.truncf %153 : vector<1x256xf32> to vector<1x256xbf16>
    %c3_126 = arith.constant 3 : index
    %c0_127 = arith.constant 0 : index
    %c0_128 = arith.constant 0 : index
    %155 = vector.load %arg5[%c3_126, %c0_127, %c0_128] : memref<4x256x10xbf16, #tpu.memory_space<vmem>>, vector<1x256x10xbf16>
    %156 = vector.shape_cast %155 : vector<1x256x10xbf16> to vector<256x10xbf16>
    %cst_129 = arith.constant dense<0.000000e+00> : vector<1x10xf32>
    %157 = tpu.matmul %154, %156, %cst_129 {dimension_numbers = #tpu.dot_dimension_numbers<[1], [0], [0], [1], [0, 0, 1, 1], [], []>} : vector<1x256xbf16>, vector<256x10xbf16>, vector<1x10xf32> -> vector<1x10xf32>
    %158 = arith.addf %152, %157 : vector<1x10xf32>
    %cst_130 = arith.constant dense<0xFF800000> : vector<1xf32>
    %159 = vector.multi_reduction <maximumf>, %158, %cst_130 [1] : vector<1x10xf32> to vector<1xf32>
    %160 = vector.shape_cast %159 : vector<1xf32> to vector<1x1xf32>
    %161 = vector.broadcast %160 : vector<1x1xf32> to vector<1x10xf32>
    %162 = arith.subf %158, %161 : vector<1x10xf32>
    %163 = math.exp %162 : vector<1x10xf32>
    %cst_131 = arith.constant dense<0.000000e+00> : vector<1xf32>
    %164 = vector.multi_reduction <add>, %163, %cst_131 [1] : vector<1x10xf32> to vector<1xf32>
    %165 = vector.shape_cast %164 : vector<1xf32> to vector<1x1xf32>
    %166 = vector.broadcast %165 : vector<1x1xf32> to vector<1x10xf32>
    %167 = arith.divf %163, %166 : vector<1x10xf32>
    %c0_132 = arith.constant 0 : index
    %c0_133 = arith.constant 0 : index
    %c0_134 = arith.constant 0 : index
    %168 = vector.load %arg10[%c0_132, %c0_133, %c0_134] : memref<1x1x10xf32, #tpu.memory_space<vmem>>, vector<1x1x10xf32>
    %169 = vector.shape_cast %168 : vector<1x1x10xf32> to vector<1x10xf32>
    %170 = vector.shape_cast %167 : vector<1x10xf32> to vector<1x1x10xf32>
    tpu.vector_store %arg10[%c0_132, %c0_133, %c0_134], %170 {strides = array<i32>} : memref<1x1x10xf32, #tpu.memory_space<vmem>>, vector<1x1x10xf32>,
    return
  }
  func.func @transform_0(%arg0: i32) -> (i32, i32, i32) {
    %c0_i32 = arith.constant 0 : i32
    %c0_i32_0 = arith.constant 0 : i32
    %c0_i32_1 = arith.constant 0 : i32
    return %arg0, %c0_i32, %c0_i32_0 : i32, i32, i32
  }
  func.func @transform_1(%arg0: i32) -> (i32, i32, i32) {
    %c0_i32 = arith.constant 0 : i32
    %c0_i32_0 = arith.constant 0 : i32
    %c0_i32_1 = arith.constant 0 : i32
    %c0_i32_2 = arith.constant 0 : i32
    return %c0_i32, %c0_i32_0, %c0_i32_1 : i32, i32, i32
  }
  func.func @transform_2(%arg0: i32) -> (i32, i32, i32) {
    %c0_i32 = arith.constant 0 : i32
    %c0_i32_0 = arith.constant 0 : i32
    %c0_i32_1 = arith.constant 0 : i32
    %c0_i32_2 = arith.constant 0 : i32
    return %c0_i32, %c0_i32_0, %c0_i32_1 : i32, i32, i32
  }
  func.func @transform_3(%arg0: i32) -> (i32, i32, i32) {
    %c0_i32 = arith.constant 0 : i32
    %c0_i32_0 = arith.constant 0 : i32
    %c0_i32_1 = arith.constant 0 : i32
    %c0_i32_2 = arith.constant 0 : i32
    return %c0_i32, %c0_i32_0, %c0_i32_1 : i32, i32, i32
  }
  func.func @transform_4(%arg0: i32) -> (i32, i32, i32) {
    %c0_i32 = arith.constant 0 : i32
    %c0_i32_0 = arith.constant 0 : i32
    %c0_i32_1 = arith.constant 0 : i32
    %c0_i32_2 = arith.constant 0 : i32
    return %c0_i32, %c0_i32_0, %c0_i32_1 : i32, i32, i32
  }
  func.func @transform_5(%arg0: i32) -> (i32, i32) {
    %c0_i32 = arith.constant 0 : i32
    %c0_i32_0 = arith.constant 0 : i32
    %c0_i32_1 = arith.constant 0 : i32
    return %c0_i32, %c0_i32_0 : i32, i32
  }
  func.func @transform_6(%arg0: i32) -> (i32, i32) {
    %c0_i32 = arith.constant 0 : i32
    %c0_i32_0 = arith.constant 0 : i32
    %c0_i32_1 = arith.constant 0 : i32
    return %c0_i32, %c0_i32_0 : i32, i32
  }
  func.func @transform_7(%arg0: i32) -> (i32, i32) {
    %c0_i32 = arith.constant 0 : i32
    %c0_i32_0 = arith.constant 0 : i32
    %c0_i32_1 = arith.constant 0 : i32
    return %c0_i32, %c0_i32_0 : i32, i32
  }
  func.func @transform_8(%arg0: i32) -> (i32, i32) {
    %c0_i32 = arith.constant 0 : i32
    %c0_i32_0 = arith.constant 0 : i32
    %c0_i32_1 = arith.constant 0 : i32
    return %c0_i32, %c0_i32_0 : i32, i32
  }
  func.func @transform_9(%arg0: i32) -> (i32, i32, i32) {
    %c0_i32 = arith.constant 0 : i32
    %c0_i32_0 = arith.constant 0 : i32
    %c0_i32_1 = arith.constant 0 : i32
    return %arg0, %c0_i32, %c0_i32_0 : i32, i32, i32
  }
}

</mosaic_0001>

<bundles_post_ra>
// kernel: tile.18
= control target key start
LH: loop header
LB: loop body
LE: loop exit
PB: predicated region body
PF: predicated region fallthrough
CT: control target
= control target key end

     0   :  { %s40_s0 = inlined_call_operand.vmem [shape: f32[32], index: 0, kind: input, shape index: {}]   ;;  %s41_s1 = inlined_call_operand.vmem [shape: f32[32,32], index: 1, kind: output, shape index: {}]  }
   0x1   :  { %v4_v0 = vld [vmem:[%s40_s0] ss:$0 sm:$0xff] }
   0x2   :  { %5 = vst [vmem:[%s41_s1] sm:$0xff] %v4_v0  ;;  %12 = vst [vmem:[%s41_s1 + $0x8] sm:$0xff] %v4_v0 }
   0x3   :  { %13 = vst [vmem:[%s41_s1 + $0x10] sm:$0xff] %v4_v0  ;;  %14 = vst [vmem:[%s41_s1 + $0x18] sm:$0xff] %v4_v0 }

// kernel: tile.19
= control target key start
LH: loop header
LB: loop body
LE: loop exit
PB: predicated region body
PF: predicated region fallthrough
CT: control target
= control target key end

     0   :  { %s93_s8 = smov 96   ;;  %vm3_vm0 = vcmask 261120   ;;  %s95_s15 = smov 64   ;;  %vm10_vm1 = vcmask 1048320   ;;  %vm17_vm2 = vcmask 785920   ;;  %vm24_vm3 = vcmask 523520   ;;  %s142_s0 = inlined_call_operand.vmem [shape: f32[32,32], index: 0, kind: input, shape index: {}]   ;;  %s143_s1 = inlined_call_operand.vmem [shape: f32[1,1024], index: 1, kind: output, shape index: {}]  }
   0x1   :  { %v80_v0 = vld [vmem:[%s142_s0 + $0x3] ss:$4 sm:$0xff]   ;;  %v82_v1 = vld [vmem:[%s142_s0 + $0x1] ss:$4 sm:$0xff]   ;;  %v2_v2 = vld [vmem:[%s142_s0] ss:$4 sm:$0xff]  }
   0x2   :  { %8 = vrot.lane.b32.xlu0 %v80_v0, %s93_s8  ;;  %v81_v3 = vld [vmem:[%s142_s0 + $0x2] ss:$4 sm:$0xff]   ;;  %s94_s0 = smov 32   ;;  %4 = vst.msk [vmem:[#allocation0] ss:$8 sm:$0xf] %vm3_vm0, %v2_v2  }
   0x3   :  { %22 = vrot.lane.b32.xlu1 %v82_v1, %s94_s0  ;;  %5 = vst.msk [vmem:[#allocation0] ss:$8 sm:$0xf0] %vm3_vm0, %v2_v2  }
   0x6   :  { %15 = vrot.lane.b32.xlu0 %v81_v3, %s95_s15 }
  0x74   :  { %v9_v4 = vpop.permute.xlu0 %8  }
  0x75   :  { %11 = vst.msk [vmem:[#allocation0] ss:$8 sm:$0xf] %vm10_vm1, %v9_v4   ;;  %12 = vst.msk [vmem:[#allocation0] ss:$8 sm:$0xf0] %vm10_vm1, %v9_v4   ;;  %v23_v5 = vpop.permute.xlu1 %22  }
  0x78   :  { %v16_v6 = vpop.permute.xlu0 %15  }
  0x79   :  { %18 = vst.msk [vmem:[#allocation0] ss:$8 sm:$0xf] %vm17_vm2, %v16_v6   ;;  %19 = vst.msk [vmem:[#allocation0] ss:$8 sm:$0xf0] %vm17_vm2, %v16_v6  }
  0x7a   :  { %25 = vst.msk [vmem:[#allocation0] ss:$8 sm:$0xf] %vm24_vm3, %v23_v5   ;;  %26 = vst.msk [vmem:[#allocation0] ss:$8 sm:$0xf0] %vm24_vm3, %v23_v5  }
  0x81   :  { %v30_v7 = vld [vmem:[#allocation0] sm:$0x1]  ;;  %v34_v8 = vld [vmem:[#allocation0 + $0x8] sm:$0x1]  ;;  %v39_v9 = vld [vmem:[#allocation0 + $0x10] sm:$0x1] }
  0x82   :  { %32 = vst [vmem:[%s143_s1] sm:$0x1] %v30_v7  ;;  %83 = vst [vmem:[%s143_s1 + $0x1] sm:$0x1] %v34_v8  ;;  %v45_v10 = vld [vmem:[#allocation0 + $0x18] sm:$0x1] }
  0x83   :  { %84 = vst [vmem:[%s143_s1 + $0x2] sm:$0x1] %v39_v9  ;;  %v51_v11 = vld [vmem:[#allocation0 + $0x20] sm:$0x1]  ;;  %v57_v12 = vld [vmem:[#allocation0 + $0x28] sm:$0x1] }
  0x84   :  { %85 = vst [vmem:[%s143_s1 + $0x3] sm:$0x1] %v45_v10  ;;  %86 = vst [vmem:[%s143_s1 + $0x4] sm:$0x1] %v51_v11  ;;  %v63_v13 = vld [vmem:[#allocation0 + $0x30] sm:$0x1] }
  0x85   :  { %87 = vst [vmem:[%s143_s1 + $0x5] sm:$0x1] %v57_v12  ;;  %v69_v14 = vld [vmem:[#allocation0 + $0x38] sm:$0x1]  ;;  %88 = vst [vmem:[%s143_s1 + $0x6] sm:$0x1] %v63_v13 }
  0x86   :  { %89 = vst [vmem:[%s143_s1 + $0x7] sm:$0x1] %v69_v14 }

// kernel: tile.23
= control target key start
LH: loop header
LB: loop body
LE: loop exit
PB: predicated region body
PF: predicated region fallthrough
CT: control target
= control target key end

     0   :  { %s28_s0 = inlined_call_operand.vmem [shape: f32[32], index: 0, kind: input, shape index: {}]   ;;  %s29_s1 = inlined_call_operand.vmem [shape: f32[16,32], index: 1, kind: output, shape index: {}]  }
   0x1   :  { %v4_v0 = vld [vmem:[%s28_s0] ss:$0 sm:$0xff] }
   0x2   :  { %5 = vst [vmem:[%s29_s1] sm:$0xff] %v4_v0  ;;  %8 = vst [vmem:[%s29_s1 + $0x8] sm:$0xff] %v4_v0 }

// kernel: tile.24
= control target key start
LH: loop header
LB: loop body
LE: loop exit
PB: predicated region body
PF: predicated region fallthrough
CT: control target
= control target key end

     0   :  { %s57_s8 = smov 96   ;;  %vm3_vm0 = vcmask 261120   ;;  %s59_s15 = smov 64   ;;  %vm9_vm1 = vcmask 1048320   ;;  %vm15_vm2 = vcmask 785920   ;;  %vm21_vm3 = vcmask 523520   ;;  %s94_s0 = inlined_call_operand.vmem [shape: f32[16,32], index: 0, kind: input, shape index: {}]   ;;  %s95_s1 = inlined_call_operand.vmem [shape: f32[1,512], index: 1, kind: output, shape index: {}]  }
   0x1   :  { %v48_v0 = vld [vmem:[%s94_s0 + $0x3] ss:$4 sm:$0xf]   ;;  %v49_v1 = vld [vmem:[%s94_s0 + $0x2] ss:$4 sm:$0xf]  }
   0x2   :  { %7 = vrot.lane.b32.xlu0 %v48_v0, %s57_s8  ;;  %v50_v2 = vld [vmem:[%s94_s0 + $0x1] ss:$4 sm:$0xf]   ;;  %v2_v3 = vld [vmem:[%s94_s0] ss:$4 sm:$0xf]  }
   0x3   :  { %s58_s0 = smov 32   ;;  %4 = vst.msk [vmem:[#allocation0] ss:$8 sm:$0xf] %vm3_vm0, %v2_v3  }
   0x4   :  { %19 = vrot.lane.b32.xlu1 %v50_v2, %s58_s0 }
   0x6   :  { %13 = vrot.lane.b32.xlu0 %v49_v1, %s59_s15 }
  0x74   :  { %v8_v4 = vpop.permute.xlu0 %7  }
  0x75   :  { %10 = vst.msk [vmem:[#allocation0] ss:$8 sm:$0xf] %vm9_vm1, %v8_v4  }
  0x76   :  { %v20_v5 = vpop.permute.xlu1 %19  }
  0x78   :  { %v14_v6 = vpop.permute.xlu0 %13  }
  0x79   :  { %16 = vst.msk [vmem:[#allocation0] ss:$8 sm:$0xf] %vm15_vm2, %v14_v6  }
  0x7a   :  { %22 = vst.msk [vmem:[#allocation0] ss:$8 sm:$0xf] %vm21_vm3, %v20_v5  }
  0x81   :  { %v26_v7 = vld [vmem:[#allocation0] sm:$0x1]  ;;  %v30_v8 = vld [vmem:[#allocation0 + $0x8] sm:$0x1]  ;;  %v35_v9 = vld [vmem:[#allocation0 + $0x10] sm:$0x1] }
  0x82   :  { %28 = vst [vmem:[%s95_s1] sm:$0x1] %v26_v7  ;;  %51 = vst [vmem:[%s95_s1 + $0x1] sm:$0x1] %v30_v8  ;;  %v41_v10 = vld [vmem:[#allocation0 + $0x18] sm:$0x1] }
  0x83   :  { %52 = vst [vmem:[%s95_s1 + $0x2] sm:$0x1] %v35_v9  ;;  %53 = vst [vmem:[%s95_s1 + $0x3] sm:$0x1] %v41_v10 }

// kernel: tile.28
= control target key start
LH: loop header
LB: loop body
LE: loop exit
PB: predicated region body
PF: predicated region fallthrough
CT: control target
= control target key end

     0   :  { %s22_s0 = inlined_call_operand.vmem [shape: f32[64], index: 0, kind: input, shape index: {}]   ;;  %s23_s1 = inlined_call_operand.vmem [shape: f32[8,64], index: 1, kind: output, shape index: {}]  }
   0x1   :  { %v4_v0 = vld [vmem:[%s22_s0] ss:$0 sm:$0xff] }
   0x2   :  { %5 = vst [vmem:[%s23_s1] sm:$0xff] %v4_v0 }

// kernel: tile.29
= control target key start
LH: loop header
LB: loop body
LE: loop exit
PB: predicated region body
PF: predicated region fallthrough
CT: control target
= control target key end

     0   :  { %vm3_vm0 = vcmask 523264   ;;  %s41_s8 = smov 64   ;;  %vm9_vm1 = vcmask 1048064   ;;  %s70_s0 = inlined_call_operand.vmem [shape: f32[8,64], index: 0, kind: input, shape index: {}]   ;;  %s71_s1 = inlined_call_operand.vmem [shape: f32[1,512], index: 1, kind: output, shape index: {}]  }
   0x1   :  { %v36_v0 = vld [vmem:[%s70_s0 + $0x1] ss:$2 sm:$0xf]   ;;  %v2_v1 = vld [vmem:[%s70_s0] ss:$2 sm:$0xf]  }
   0x2   :  { %7 = vrot.lane.b32.xlu0 %v36_v0, %s41_s8  ;;  %4 = vst.msk [vmem:[#allocation0] ss:$8 sm:$0xf] %vm3_vm0, %v2_v1  }
  0x74   :  { %v8_v2 = vpop.permute.xlu0 %7  }
  0x75   :  { %10 = vst.msk [vmem:[#allocation0] ss:$8 sm:$0xf] %vm9_vm1, %v8_v2  }
  0x7c   :  { %v14_v3 = vld [vmem:[#allocation0] sm:$0x1]  ;;  %v18_v4 = vld [vmem:[#allocation0 + $0x8] sm:$0x1]  ;;  %v23_v5 = vld [vmem:[#allocation0 + $0x10] sm:$0x1] }
  0x7d   :  { %16 = vst [vmem:[%s71_s1] sm:$0x1] %v14_v3  ;;  %37 = vst [vmem:[%s71_s1 + $0x1] sm:$0x1] %v18_v4  ;;  %v29_v6 = vld [vmem:[#allocation0 + $0x18] sm:$0x1] }
  0x7e   :  { %38 = vst [vmem:[%s71_s1 + $0x2] sm:$0x1] %v23_v5  ;;  %39 = vst [vmem:[%s71_s1 + $0x3] sm:$0x1] %v29_v6 }

// kernel: model_forward.1
= control target key start
LH: loop header
LB: loop body
LE: loop exit
PB: predicated region body
PF: predicated region fallthrough
CT: control target
= control target key end

     0   :  { %14 = vsyncpa [#allocation6], 0  ;;  %s22048_s0 = inlined_call_operand.vmem [shape: f32[2,32,96], index: 0, kind: input, shape index: {}]   ;;  %s22049_s1 = inlined_call_operand.vmem [shape: bf16[5,96,1024], index: 1, kind: input, shape index: {}]   ;;  %s22050_s2 = inlined_call_operand.vmem [shape: bf16[5,512,512], index: 2, kind: input, shape index: {}]   ;;  %s22051_s3 = inlined_call_operand.vmem [shape: bf16[5,256,512], index: 3, kind: input, shape index: {}]   ;;  %s22052_s4 = inlined_call_operand.vmem [shape: bf16[4,256,10], index: 4, kind: input, shape index: {}]   ;;  %s22053_s5 = inlined_call_operand.vmem [shape: f32[1,1024], index: 5, kind: input, shape index: {}]   ;;  %s22054_s6 = inlined_call_operand.vmem [shape: f32[1,512], index: 6, kind: input, shape index: {}]   ;;  %s22055_s7 = inlined_call_operand.vmem [shape: f32[1,512], index: 7, kind: input, shape index: {}]   ;;  %s22056_s8 = inlined_call_operand.vmem [shape: f32[1,10], index: 8, kind: input, shape index: {}]   ;;  %s22057_s9 = inlined_call_operand.hbm [shape: f32[2,1,10], index: 9, kind: output, shape index: {}]  }
   0x1   :  { %16 = vsyncpa [#allocation6 + $0x1], 0  ;;  %s17218_s30 = smov 0   ;;  %s17220_s10 = smov 0  }
   0x2   :  { %s17222_s11 = smov 0   ;;  %s17224_s12 = smov 0  }
   0x3 LB: > { %s17239_s13 = sadd.s32 4294967295, %s17162_s12   ;;  %s12868_s14 = sadd.s32 4294967294, %s17162_s12   ;;  %s17162_s12 = sphi %s17224_s12, %s22097_s12   ;;  %s17158_s11 = sphi %s17222_s11, %s22096_s11   ;;  %s17154_s10 = sphi %s17220_s10, %s22095_s10   ;;  %s17150_s30 = sphi %s17218_s30, %s22094_s30  }
   0x4   : > { %s17243_s15 = sadd.s32 1, %s17162_s12   ;;  %s223_s16 = sadd.s32 1, %s17158_s11 }
   0x5   : > { %s220_s17 = ssub.s32 %s17162_s12, %s17243_s15  ;;  %p233_p0 = scmp.ne.s32.totalorder %s17158_s11, %s17154_s10 }
   0x6   : > { %p221_p1 = scmp.eq.s32.totalorder %s220_s17, 0  ;;  %p234_p2 = scmp.eq.s32.totalorder %s17239_s13, 1 }
   0x7   : > { %p239_p3 = scmp.ne.s32.totalorder %s17154_s10, %s17150_s30  ;;  %p240_p4 = scmp.eq.s32.totalorder %s12868_s14, 1 }
   0x8   : > { %s17254_s18 = scalar_select %p221_p1, %s17158_s11, %s223_s16  }
   0x9   : > { %p17256_p5 = por %p234_p2, %p233_p0  ;;  %p17260_p6 = por %p240_p4, %p239_p3 }
   0xa   : > { %p12871_p7 = scmp.ge.s32.totalorder %s17162_s12, 1  ;;  %p290_p8 = scmp.lt.s32.totalorder %s17162_s12, 3 }
   0xc   : > { %p291_p9 = pnand %p12871_p7, %p290_p8 }
   0xe   : > { %294 = sbr.rel (%p291_p9) target bundleno = 2610 (0xa32), region = 56 }
  0x15   : > { %v12874_v0 = vld [vmem:[%s22049_s1 + $0x180] sm:$0xff]  ;;  %v12875_v2 = vld [vmem:[%s22049_s1 + $0x188] sm:$0xff]  ;;  %p325_p10 = scmp.lt.s32.totalorder %s17239_s13, 1  ;;  %vm331_vm0 = vcmask 785408   ;;  %v17164_v8 = vmov 0   ;;  %v17165_v15 = vmov 0.0  }
  0x16   : > { %v12878_v1 = vld [vmem:[%s22049_s1 + $0x1a0] sm:$0xff]  ;;  %v12879_v4 = vld [vmem:[%s22049_s1 + $0x1a8] sm:$0xff]  ;;  %734 = vmatprep.mubr.bf16.mxu0 %v17164_v8  ;;  %787 = vmatprep.mubr.bf16.mxu1 %v17164_v8  ;;  %332 = vst.msk [vmem:[#allocation2] sm:$0xff] %vm331_vm0, %v17165_v15  ;;  %333 = vst.msk [vmem:[#allocation2 + $0x8] sm:$0xff] %vm331_vm0, %v17165_v15  ;;  %vm337_vm1 = vcmask 779264   ;;  %vm3625_vm2 = vcmask 1041408  }
  0x17   : > { %v12923_v3 = vcombine.high %v12874_v0, %v12878_v1  ;;  %v12922_v5 = vcombine.low %v12874_v0, %v12878_v1  ;;  %v12882_v6 = vld [vmem:[%s22049_s1 + $0x1c0] sm:$0xff]  ;;  %v12925_v9 = vcombine.high %v12875_v2, %v12879_v4  ;;  %v12924_v10 = vcombine.low %v12875_v2, %v12879_v4  ;;  %v12883_v12 = vld [vmem:[%s22049_s1 + $0x1c8] sm:$0xff]  ;;  %s17299_s27 = scalar_select %p325_p10, %s17239_s13, 1  ;;  %334 = vst.msk [vmem:[#allocation2 + $0x10] sm:$0xff] %vm331_vm0, %v17165_v15  ;;  %v12876_v52 = vld [vmem:[%s22049_s1 + $0x190] sm:$0xff] }
  0x18   : > { %v12886_v7 = vld [vmem:[%s22049_s1 + $0x1e0] sm:$0xff]  ;;  %v12887_v13 = vld [vmem:[%s22049_s1 + $0x1e8] sm:$0xff]  ;;  %335 = vst.msk [vmem:[#allocation2 + $0x18] sm:$0xff] %vm331_vm0, %v17165_v15  ;;  %336 = vst.msk [vmem:[#allocation2 + $0x20] sm:$0xff] %vm331_vm0, %v17165_v15  ;;  %vm4154_vm3 = vcmask 1041409   ;;  %vm4156_vm4 = vcmask 1042434  }
  0x19   : > { %v12931_v11 = vcombine.high %v12882_v6, %v12886_v7  ;;  %v12890_v14 = vld [vmem:[%s22049_s1 + $0x200] sm:$0xff]  ;;  %4074 = vst [vmem:[#allocation3] sm:$0xff] %v17165_v15  ;;  %4075 = vst [vmem:[#allocation3 + $0x8] sm:$0xff] %v17165_v15  ;;  %702 = vmatprep.subr.bf16.mxu0 %v12923_v3  ;;  %v12933_v16 = vcombine.high %v12883_v12, %v12887_v13  ;;  %v12891_v18 = vld [vmem:[%s22049_s1 + $0x208] sm:$0xff]  ;;  %755 = vmatprep.subr.bf16.mxu1 %v12925_v9  ;;  %s15253_s22 = sshll.u32 %s17299_s27, 5  ;;  %vm4158_vm5 = vcmask 1043459  }
  0x1a   : > { %4076 = vst [vmem:[#allocation3 + $0x10] sm:$0xff] %v17165_v15  ;;  %4077 = vst [vmem:[#allocation3 + $0x18] sm:$0xff] %v17165_v15  ;;  %v12894_v17 = vld [vmem:[%s22049_s1 + $0x220] sm:$0xff]  ;;  %v12895_v19 = vld [vmem:[%s22049_s1 + $0x228] sm:$0xff]  ;;  %703 = vmatpush1.bf16.msra.mxu0 %v12922_v5  ;;  %v12930_v20 = vcombine.low %v12882_v6, %v12886_v7  ;;  %756 = vmatpush1.bf16.msra.mxu1 %v12924_v10  ;;  %v12932_v21 = vcombine.low %v12883_v12, %v12887_v13  ;;  %s17342_s14 = scalar_lea.vmem %s22048_s0, %s15253_s22  ;;  %vm4160_vm6 = vcmask 1044484   ;;  %vm4162_vm7 = vcmask 1045509  }
  0x1b   : > { %4086 = vst [vmem:[#allocation3 + $0x60] sm:$0x3] %v17165_v15  ;;  %4087 = vst [vmem:[#allocation3 + $0x68] sm:$0x3] %v17165_v15  ;;  %704 = vmatprep.subr.bf16.mxu0 %v12931_v11  ;;  %v12939_v22 = vcombine.high %v12890_v14, %v12894_v17  ;;  %757 = vmatprep.subr.bf16.mxu1 %v12933_v16  ;;  %v12941_v23 = vcombine.high %v12891_v18, %v12895_v19  ;;  %v12898_v24 = vld [vmem:[%s22049_s1 + $0x240] sm:$0xff]  ;;  %v12899_v26 = vld [vmem:[%s22049_s1 + $0x248] sm:$0xff] }
  0x1c   : > { %4088 = vst [vmem:[#allocation3 + $0x70] sm:$0x3] %v17165_v15  ;;  %4089 = vst [vmem:[#allocation3 + $0x78] sm:$0x3] %v17165_v15  ;;  %v12902_v25 = vld [vmem:[%s22049_s1 + $0x260] sm:$0xff]  ;;  %v12903_v27 = vld [vmem:[%s22049_s1 + $0x268] sm:$0xff]  ;;  %v12938_v28 = vcombine.low %v12890_v14, %v12894_v17  ;;  %v12940_v29 = vcombine.low %v12891_v18, %v12895_v19 }
  0x1d   : > { %9491 = vst [vmem:[#allocation4] sm:$0xff] %v17165_v15  ;;  %9492 = vst [vmem:[#allocation4 + $0x8] sm:$0xff] %v17165_v15  ;;  %v12947_v30 = vcombine.high %v12898_v24, %v12902_v25  ;;  %v339_v31 = vld [vmem:[%s17342_s14] sm:$0xff]  ;;  %v340_v32 = vld [vmem:[%s17342_s14 + $0x8] sm:$0xff]  ;;  %v12949_v33 = vcombine.high %v12899_v26, %v12903_v27  ;;  %v12946_v38 = vcombine.low %v12898_v24, %v12902_v25  ;;  %vm4164_vm8 = vcmask 1046534   ;;  %s15250_s17 = sshll.u32 %s17239_s13, 4 }
  0x1e   : > { %9495 = vst [vmem:[#allocation4 + $0x20] sm:$0x3] %v17165_v15  ;;  %9496 = vst [vmem:[#allocation4 + $0x28] sm:$0x3] %v17165_v15  ;;  %705 = vmatpush1.bf16.msra.mxu0 %v12930_v20  ;;  %758 = vmatpush1.bf16.msra.mxu1 %v12932_v21  ;;  %v12906_v34 = vld [vmem:[%s22049_s1 + $0x280] sm:$0xff]  ;;  %v12907_v36 = vld [vmem:[%s22049_s1 + $0x288] sm:$0xff]  ;;  %v12948_v39 = vcombine.low %v12899_v26, %v12903_v27  ;;  %s22005_s25 = scalar_lea.hbm %s22057_s9, %s15250_s17 }
  0x1f   : > { %706 = vmatprep.subr.bf16.mxu0 %v12939_v22  ;;  %759 = vmatprep.subr.bf16.mxu1 %v12941_v23  ;;  %v12910_v35 = vld [vmem:[%s22049_s1 + $0x2a0] sm:$0xff]  ;;  %343 = vst.msk [vmem:[#allocation2 + $0x8] sm:$0xff] %vm331_vm0, %v339_v31  ;;  %344 = vst.msk [vmem:[#allocation2 + $0x10] sm:$0xff] %vm331_vm0, %v340_v32  ;;  %v12911_v37 = vld [vmem:[%s22049_s1 + $0x2a8] sm:$0xff]  ;;  %vm4166_vm9 = vcmask 1047559   ;;  %vm5419_vm11 = vcmask 1044480  }
  0x20   : > { %v12955_v40 = vcombine.high %v12906_v34, %v12910_v35  ;;  %v12957_v41 = vcombine.high %v12907_v36, %v12911_v37  ;;  %v12914_v42 = vld [vmem:[%s22049_s1 + $0x2c0] sm:$0xff]  ;;  %v12915_v44 = vld [vmem:[%s22049_s1 + $0x2c8] sm:$0xff]  ;;  %v341_v46 = vld [vmem:[%s17342_s14 + $0x10] sm:$0xff]  ;;  %v12954_v48 = vcombine.low %v12906_v34, %v12910_v35  ;;  %v12956_v49 = vcombine.low %v12907_v36, %v12911_v37  ;;  %338 = vst.msk [vmem:[#allocation2 + $0x28] sm:$0x3] %vm337_vm1, %v17165_v15  ;;  %s17167_s13 = smov [#allocation5]  }
  0x21   : > { %v12918_v43 = vld [vmem:[%s22049_s1 + $0x2e0] sm:$0xff]  ;;  %v12919_v45 = vld [vmem:[%s22049_s1 + $0x2e8] sm:$0xff]  ;;  %v342_v47 = vld [vmem:[%s17342_s14 + $0x18] sm:$0xff]  ;;  %345 = vst.msk [vmem:[#allocation2 + $0x18] sm:$0xff] %vm331_vm0, %v341_v46  ;;  %vm4526_vm10 = vsmask.f32 4352 }
  0x22   : > { %707 = vmatpush1.bf16.msra.mxu0 %v12938_v28  ;;  %760 = vmatpush1.bf16.msra.mxu1 %v12940_v29  ;;  %346 = vst.msk [vmem:[#allocation2 + $0x20] sm:$0xff] %vm331_vm0, %v342_v47  ;;  %v12963_v50 = vcombine.high %v12914_v42, %v12918_v43  ;;  %v12965_v51 = vcombine.high %v12915_v44, %v12919_v45  ;;  %v12880_v53 = vld [vmem:[%s22049_s1 + $0x1b0] sm:$0xff]  ;;  %v12877_v54 = vld [vmem:[%s22049_s1 + $0x198] sm:$0xff]  ;;  %v354_v46 = vld [vmem:[%s22049_s1 + $0x8] sm:$0xff]  ;;  %vm7354_vm12 = vsmask.f32 7424 }
  0x23   : > { %708 = vmatprep.subr.bf16.mxu0 %v12947_v30  ;;  %761 = vmatprep.subr.bf16.mxu1 %v12949_v33  ;;  %v12881_v55 = vld [vmem:[%s22049_s1 + $0x1b8] sm:$0xff]  ;;  %v12962_v56 = vcombine.low %v12914_v42, %v12918_v43  ;;  %v12964_v59 = vcombine.low %v12915_v44, %v12919_v45  ;;  %v12927_v60 = vcombine.high %v12876_v52, %v12880_v53  ;;  %v12884_v62 = vld [vmem:[%s22049_s1 + $0x1d0] sm:$0xff]  ;;  %v353_v44 = vld [vmem:[%s22049_s1] sm:$0xff]  ;;  %vm8380_vm13 = vcmask 1046528   ;;  %s323_s14 = sand.u32 1, %s17154_s10   ;;  %s17104_s29 = sshll.u32 %s17167_s13, 4  ;;  %s17105_s29 = int_to_ptr.vmem [resolvable:$false] %s17104_s29 }
  0x24   : > { %v12929_v61 = vcombine.high %v12877_v54, %v12881_v55  ;;  %v12888_v63 = vld [vmem:[%s22049_s1 + $0x1f0] sm:$0xff]  ;;  %v12885_v1 = vld [vmem:[%s22049_s1 + $0x1d8] sm:$0xff]  ;;  %v12926_v3 = vcombine.low %v12876_v52, %v12880_v53  ;;  %v12928_v4 = vcombine.low %v12877_v54, %v12881_v55  ;;  %v357_v45 = vld [vmem:[%s22049_s1 + $0x20] sm:$0xff]  ;;  %vm12787_vm14 = vcmask 73728   ;;  %s324_s21 = scalar_lea.vmem [#allocation5], %s323_s14  ;;  %s12801_s26 = scalar_lea.sflag [#allocation6], %s323_s14 }
  0x25   : > { %v12889_v2 = vld [vmem:[%s22049_s1 + $0x1f8] sm:$0xff]  ;;  %v12935_v5 = vcombine.high %v12884_v62, %v12888_v63  ;;  %v12892_v7 = vld [vmem:[%s22049_s1 + $0x210] sm:$0xff]  ;;  %v12934_v12 = vcombine.low %v12884_v62, %v12888_v63  ;;  %v358_v47 = vld [vmem:[%s22049_s1 + $0x28] sm:$0xff]  ;;  %s12813_s22 = sshll.u32 %s324_s21, 4  ;;  %s17106_s27 = scalar_lea.vmem %s17105_s29, 32  ;;  %s22007_s22 = int_to_ptr.vmem [resolvable:$true] %s12813_s22 }
  0x26   : > { %709 = vmatpush1.bf16.msra.mxu0 %v12946_v38  ;;  %762 = vmatpush1.bf16.msra.mxu1 %v12948_v39  ;;  %v401_v57 = vld [vmem:[#allocation2 + $0x7] sm:$0xff]  ;;  %v402_v58 = vld [vmem:[#allocation2 + $0xf] sm:$0xff]  ;;  %v12937_v6 = vcombine.high %v12885_v1, %v12889_v2  ;;  %v12893_v10 = vld [vmem:[%s22049_s1 + $0x218] sm:$0xff]  ;;  %v12936_v16 = vcombine.low %v12885_v1, %v12889_v2  ;;  %s17100_s28 = scalar_lea.vmem %s22007_s22, 16  ;;  %p17107_p0 = scmp.lt.s32.totalorder %s22007_s22, %s17105_s29 }
  0x27   : > { %710 = vmatprep.subr.bf16.mxu0 %v12955_v40  ;;  %763 = vmatprep.subr.bf16.mxu1 %v12957_v41  ;;  %v17400_v0 = vpack.c.bf16 %v402_v58, %v401_v57  ;;  %v12896_v9 = vld [vmem:[%s22049_s1 + $0x230] sm:$0xff]  ;;  %v12897_v11 = vld [vmem:[%s22049_s1 + $0x238] sm:$0xff]  ;;  %v361_v52 = vld [vmem:[%s22049_s1 + $0x40] sm:$0xff]  ;;  %v12980_v57 = vcombine.low %v354_v46, %v358_v47  ;;  %p17101_p11 = scmp.ne.s32.totalorder %s22007_s22, %s17100_s28  ;;  %p17108_p1 = scmp.lt.s32.totalorder %s17106_s27, %s17100_s28 }
  0x28   : > { %v403_v13 = vld [vmem:[#allocation2 + $0x17] sm:$0xff]  ;;  %v12943_v17 = vcombine.high %v12892_v7, %v12896_v9  ;;  %v12945_v18 = vcombine.high %v12893_v10, %v12897_v11  ;;  %v12942_v24 = vcombine.low %v12892_v7, %v12896_v9  ;;  %v12944_v25 = vcombine.low %v12893_v10, %v12897_v11  ;;  %v365_v53 = vld [vmem:[%s22049_s1 + $0x60] sm:$0xff]  ;;  %v362_v54 = vld [vmem:[%s22049_s1 + $0x48] sm:$0xff] }
  0x29   : > { %v404_v14 = vld [vmem:[#allocation2 + $0x1f] sm:$0xff]  ;;  %v12900_v19 = vld [vmem:[%s22049_s1 + $0x250] sm:$0xff]  ;;  %v366_v55 = vld [vmem:[%s22049_s1 + $0x68] sm:$0xff]  ;;  %v12987_v58 = vcombine.high %v361_v52, %v365_v53  ;;  %v12986_v1 = vcombine.low %v361_v52, %v365_v53  ;;  %p17102_p12 = pnand %p17101_p11, %p17256_p5  ;;  %p17109_p2 = por %p17108_p1, %p17107_p0 }
  0x2a   : > { %711 = vmatpush1.bf16.msra.mxu0 %v12954_v48  ;;  %764 = vmatpush1.bf16.msra.mxu1 %v12956_v49  ;;  %v12904_v20 = vld [vmem:[%s22049_s1 + $0x270] sm:$0xff]  ;;  %v12901_v21 = vld [vmem:[%s22049_s1 + $0x258] sm:$0xff]  ;;  %v17438_v23 = vpack.c.bf16 %v404_v14, %v403_v13  ;;  %v370_v62 = vld [vmem:[%s22049_s1 + $0x88] sm:$0xff]  ;;  %v12988_v2 = vcombine.low %v362_v54, %v366_v55 }
  0x2b   : > { %712 = vmatprep.subr.bf16.mxu0 %v12963_v50  ;;  %765 = vmatprep.subr.bf16.mxu1 %v12965_v51  ;;  %v12905_v22 = vld [vmem:[%s22049_s1 + $0x278] sm:$0xff]  ;;  %v12951_v26 = vcombine.high %v12900_v19, %v12904_v20  ;;  %v12908_v28 = vld [vmem:[%s22049_s1 + $0x290] sm:$0xff]  ;;  %v12950_v32 = vcombine.low %v12900_v19, %v12904_v20  ;;  %v12979_v50 = vcombine.high %v353_v44, %v357_v45  ;;  %v374_v63 = vld [vmem:[%s22049_s1 + $0xa8] sm:$0xff]  ;;  %p17103_p13 = pneg %p17102_p12 }
  0x2c   : > { %v12953_v27 = vcombine.high %v12901_v21, %v12905_v22  ;;  %v12912_v29 = vld [vmem:[%s22049_s1 + $0x2b0] sm:$0xff]  ;;  %v12909_v30 = vld [vmem:[%s22049_s1 + $0x298] sm:$0xff]  ;;  %v12952_v33 = vcombine.low %v12901_v21, %v12905_v22  ;;  %v12981_v51 = vcombine.high %v354_v46, %v358_v47  ;;  %v378_v15 = vld [vmem:[%s22049_s1 + $0xc8] sm:$0xff]  ;;  %v12996_v9 = vcombine.low %v370_v62, %v374_v63 }
  0x2d   : > { %v12913_v31 = vld [vmem:[%s22049_s1 + $0x2b8] sm:$0xff]  ;;  %v12959_v34 = vcombine.high %v12908_v28, %v12912_v29  ;;  %v12916_v36 = vld [vmem:[%s22049_s1 + $0x2d0] sm:$0xff]  ;;  %v12958_v40 = vcombine.low %v12908_v28, %v12912_v29  ;;  %v389_v13 = vld [vmem:[%s22049_s1 + $0x120] sm:$0xff]  ;;  %p17110_p3 = pnand %p17109_p2, %p17103_p13 }
  0x2e   : > { %713 = vmatpush1.bf16.msra.mxu0 %v12962_v56  ;;  %766 = vmatpush1.bf16.msra.mxu1 %v12964_v59  ;;  %v12961_v35 = vcombine.high %v12909_v30, %v12913_v31  ;;  %v12920_v37 = vld [vmem:[%s22049_s1 + $0x2f0] sm:$0xff]  ;;  %v12917_v38 = vld [vmem:[%s22049_s1 + $0x2d8] sm:$0xff]  ;;  %v12960_v41 = vcombine.low %v12909_v30, %v12913_v31  ;;  %v12978_v56 = vcombine.low %v353_v44, %v357_v45  ;;  %v386_v14 = vld [vmem:[%s22049_s1 + $0x108] sm:$0xff] }
  0x2f   : > { %808 = vmatprep.subr.bf16.mxu0 %v12927_v60  ;;  %861 = vmatprep.subr.bf16.mxu1 %v12929_v61  ;;  %v12921_v39 = vld [vmem:[%s22049_s1 + $0x2f8] sm:$0xff]  ;;  %v12967_v42 = vcombine.high %v12916_v36, %v12920_v37  ;;  %v12966_v48 = vcombine.low %v12916_v36, %v12920_v37  ;;  %v12989_v59 = vcombine.high %v362_v54, %v366_v55  ;;  %v369_v60 = vld [vmem:[%s22049_s1 + $0x80] sm:$0xff]  ;;  %v355_v29 = vld [vmem:[%s22049_s1 + $0x10] sm:$0xff] }
  0x30   : > { %v12969_v43 = vcombine.high %v12917_v38, %v12921_v39  ;;  %v12968_v49 = vcombine.low %v12917_v38, %v12921_v39  ;;  %v373_v61 = vld [vmem:[%s22049_s1 + $0xa0] sm:$0xff]  ;;  %v359_v30 = vld [vmem:[%s22049_s1 + $0x30] sm:$0xff]  ;;  %v356_v31 = vld [vmem:[%s22049_s1 + $0x18] sm:$0xff] }
  0x31   : > { %12970 = vmatmul.mubr.msk.bf16.vlgmr.msra.gmra.mrb[0].mxu0 %vm331_vm0, %v17400_v0  ;;  %12972 = vmatmul.mubr.msk.bf16.vlgmr.msra.gmra.mrb[0].mxu1 %vm331_vm0, %v17400_v0  ;;  %v12994_v7 = vcombine.low %v369_v60, %v373_v61  ;;  %v393_v21 = vld [vmem:[%s22049_s1 + $0x140] sm:$0xff]  ;;  %v12983_v37 = vcombine.high %v355_v29, %v359_v30  ;;  %v363_v39 = vld [vmem:[%s22049_s1 + $0x50] sm:$0xff]  ;;  %v12982_v44 = vcombine.low %v355_v29, %v359_v30  ;;  %v13043_v29 = vld [vmem:[%s22049_s1 + $0x348] sm:$0xff] }
  0x32   : > { %809 = vmatpush1.bf16.msra.mxu0 %v12926_v3  ;;  %862 = vmatpush1.bf16.msra.mxu1 %v12928_v4  ;;  %v12995_v3 = vcombine.high %v369_v60, %v373_v61  ;;  %v12997_v4 = vcombine.high %v370_v62, %v374_v63  ;;  %v397_v22 = vld [vmem:[%s22049_s1 + $0x160] sm:$0xff]  ;;  %v371_v45 = vld [vmem:[%s22049_s1 + $0x90] sm:$0xff]  ;;  %v384_v61 = vld [vmem:[%s22049_s1 + $0xf8] sm:$0xff] }
  0x33   : > { %810 = vmatprep.subr.bf16.mxu0 %v12935_v5  ;;  %863 = vmatprep.subr.bf16.mxu1 %v12937_v6  ;;  %v377_v5 = vld [vmem:[%s22049_s1 + $0xc0] sm:$0xff]  ;;  %v349_v52 = vld [vmem:[#allocation2 + $0x16] sm:$0xff] }
  0x34   : > { %744 = vmatprep.mubr.bf16.mxu0 %v17164_v8  ;;  %797 = vmatprep.mubr.bf16.mxu1 %v17164_v8  ;;  %v381_v6 = vld [vmem:[%s22049_s1 + $0xe0] sm:$0xff] }
  0x35   : > { %v13003_v10 = vcombine.high %v377_v5, %v381_v6  ;;  %v350_v53 = vld [vmem:[#allocation2 + $0x1e] sm:$0xff] }
  0x36   : > { %811 = vmatpush1.bf16.msra.mxu0 %v12934_v12  ;;  %864 = vmatpush1.bf16.msra.mxu1 %v12936_v16  ;;  %v385_v12 = vld [vmem:[%s22049_s1 + $0x100] sm:$0xff]  ;;  %v390_v16 = vld [vmem:[%s22049_s1 + $0x128] sm:$0xff]  ;;  %v17611_v62 = vpack.c.bf16 %v350_v53, %v349_v52 }
  0x37   : > { %812 = vmatprep.subr.bf16.mxu0 %v12943_v17  ;;  %865 = vmatprep.subr.bf16.mxu1 %v12945_v18  ;;  %v13002_v17 = vcombine.low %v377_v5, %v381_v6  ;;  %v13011_v19 = vcombine.high %v385_v12, %v389_v13  ;;  %v13013_v20 = vcombine.high %v386_v14, %v390_v16  ;;  %v388_v5 = vld [vmem:[%s22049_s1 + $0x118] sm:$0xff]  ;;  %v13070_v52 = vld [vmem:[%s22049_s1 + $0x420] sm:$0xff]  ;;  %v13067_v53 = vld [vmem:[%s22049_s1 + $0x408] sm:$0xff] }
  0x39   : > { %12971 = vmatmul.mubr.msk.bf16.gmra.mrb[4].mxu0 %vm331_vm0, %v17438_v23  ;;  %12973 = vmatmul.mubr.msk.bf16.gmra.mrb[4].mxu1 %vm331_vm0, %v17438_v23 }
  0x3a   : > { %813 = vmatpush1.bf16.msra.mxu0 %v12942_v24  ;;  %866 = vmatpush1.bf16.msra.mxu1 %v12944_v25  ;;  %v398_v24 = vld [vmem:[%s22049_s1 + $0x168] sm:$0xff]  ;;  %v13010_v25 = vcombine.low %v385_v12, %v389_v13  ;;  %v396_v12 = vld [vmem:[%s22049_s1 + $0x158] sm:$0xff] }
  0x3b   : > { %814 = vmatprep.subr.bf16.mxu0 %v12951_v26  ;;  %867 = vmatprep.subr.bf16.mxu1 %v12953_v27  ;;  %v13012_v26 = vcombine.low %v386_v14, %v390_v16  ;;  %v13019_v27 = vcombine.high %v393_v21, %v397_v22  ;;  %v400_v14 = vld [vmem:[%s22049_s1 + $0x178] sm:$0xff] }
  0x3c   : > { %840 = vmatprep.mubr.bf16.mxu0 %v17164_v8  ;;  %893 = vmatprep.mubr.bf16.mxu1 %v17164_v8 }
  0x3e   : > { %815 = vmatpush1.bf16.msra.mxu0 %v12950_v32  ;;  %868 = vmatpush1.bf16.msra.mxu1 %v12952_v33  ;;  %v360_v32 = vld [vmem:[%s22049_s1 + $0x38] sm:$0xff]  ;;  %v13018_v33 = vcombine.low %v393_v21, %v397_v22  ;;  %v13038_v21 = vld [vmem:[%s22049_s1 + $0x320] sm:$0xff]  ;;  %v13035_v22 = vld [vmem:[%s22049_s1 + $0x308] sm:$0xff] }
  0x3f   : > { %816 = vmatprep.subr.bf16.mxu0 %v12959_v34  ;;  %869 = vmatprep.subr.bf16.mxu1 %v12961_v35  ;;  %v347_v34 = vld [vmem:[#allocation2 + $0x6] sm:$0xff]  ;;  %v348_v35 = vld [vmem:[#allocation2 + $0xe] sm:$0xff]  ;;  %v12985_v38 = vcombine.high %v356_v31, %v360_v32  ;;  %v12984_v46 = vcombine.low %v356_v31, %v360_v32 }
  0x40   : > { %v13047_v31 = vld [vmem:[%s22049_s1 + $0x368] sm:$0xff] }
  0x42   : > { %817 = vmatpush1.bf16.msra.mxu0 %v12958_v40  ;;  %870 = vmatpush1.bf16.msra.mxu1 %v12960_v41  ;;  %v367_v40 = vld [vmem:[%s22049_s1 + $0x70] sm:$0xff]  ;;  %v17573_v41 = vpack.c.bf16 %v348_v35, %v347_v34  ;;  %v13050_v35 = vld [vmem:[%s22049_s1 + $0x380] sm:$0xff] }
  0x43   : > { %818 = vmatprep.subr.bf16.mxu0 %v12967_v42  ;;  %871 = vmatprep.subr.bf16.mxu1 %v12969_v43  ;;  %v364_v42 = vld [vmem:[%s22049_s1 + $0x58] sm:$0xff]  ;;  %v12991_v47 = vcombine.high %v363_v39, %v367_v40  ;;  %v12990_v54 = vcombine.low %v363_v39, %v367_v40  ;;  %v13055_v39 = vld [vmem:[%s22049_s1 + $0x3a8] sm:$0xff] }
  0x44   : > { %v368_v43 = vld [vmem:[%s22049_s1 + $0x78] sm:$0xff] }
  0x45   : > { %v12992_v55 = vcombine.low %v364_v42, %v368_v43 }
  0x46   : > { %819 = vmatpush1.bf16.msra.mxu0 %v12966_v48  ;;  %872 = vmatpush1.bf16.msra.mxu1 %v12968_v49  ;;  %v375_v48 = vld [vmem:[%s22049_s1 + $0xb0] sm:$0xff]  ;;  %v372_v49 = vld [vmem:[%s22049_s1 + $0x98] sm:$0xff] }
  0x47   : > { %1160 = vmatprep.subr.bf16.mxu0 %v12979_v50  ;;  %1213 = vmatprep.subr.bf16.mxu1 %v12981_v51  ;;  %v376_v50 = vld [vmem:[%s22049_s1 + $0xb8] sm:$0xff]  ;;  %v12993_v51 = vcombine.high %v364_v42, %v368_v43  ;;  %v12998_v63 = vcombine.low %v371_v45, %v375_v48  ;;  %v13092_v42 = vcombine.low %v13043_v29, %v13047_v31 }
  0x48   : > { %v13001_v60 = vcombine.high %v372_v49, %v376_v50 }
  0x49   : > { %12974 = vmatmul.mubr.msk.bf16.vlgmr.msra.gmra.mrb[8].mxu0 %vm331_vm0, %v17400_v0  ;;  %12976 = vmatmul.mubr.msk.bf16.vlgmr.msra.gmra.mrb[8].mxu1 %vm331_vm0, %v17400_v0  ;;  %v382_v0 = vld [vmem:[%s22049_s1 + $0xe8] sm:$0xff] }
  0x4a   : > { %1161 = vmatpush1.bf16.msra.mxu0 %v12978_v56  ;;  %1214 = vmatpush1.bf16.msra.mxu1 %v12980_v57  ;;  %v13005_v11 = vcombine.high %v378_v15, %v382_v0  ;;  %v13004_v18 = vcombine.low %v378_v15, %v382_v0  ;;  %v12999_v56 = vcombine.high %v371_v45, %v375_v48  ;;  %v379_v57 = vld [vmem:[%s22049_s1 + $0xd0] sm:$0xff]  ;;  %v392_v15 = vld [vmem:[%s22049_s1 + $0x138] sm:$0xff]  ;;  %v13062_v45 = vld [vmem:[%s22049_s1 + $0x3e0] sm:$0xff] }
  0x4b   : > { %1162 = vmatprep.subr.bf16.mxu0 %v12987_v58  ;;  %1215 = vmatprep.subr.bf16.mxu1 %v12989_v59  ;;  %v383_v58 = vld [vmem:[%s22049_s1 + $0xf0] sm:$0xff]  ;;  %v380_v59 = vld [vmem:[%s22049_s1 + $0xd8] sm:$0xff]  ;;  %v13017_v13 = vcombine.high %v388_v5, %v392_v15 }
  0x4c   : > { %850 = vmatprep.mubr.bf16.mxu0 %v17164_v8  ;;  %903 = vmatprep.mubr.bf16.mxu1 %v17164_v8  ;;  %v13009_v6 = vcombine.high %v380_v59, %v384_v61  ;;  %v13006_v0 = vcombine.low %v379_v57, %v383_v58 }
  0x4e   : > { %1163 = vmatpush1.bf16.msra.mxu0 %v12986_v1  ;;  %1216 = vmatpush1.bf16.msra.mxu1 %v12988_v2  ;;  %v13000_v1 = vcombine.low %v372_v49, %v376_v50  ;;  %v13007_v2 = vcombine.high %v379_v57, %v383_v58 }
  0x4f   : > { %1164 = vmatprep.subr.bf16.mxu0 %v12995_v3  ;;  %1217 = vmatprep.subr.bf16.mxu1 %v12997_v4  ;;  %v387_v3 = vld [vmem:[%s22049_s1 + $0x110] sm:$0xff] }
  0x50   : > { %v391_v4 = vld [vmem:[%s22049_s1 + $0x130] sm:$0xff] }
  0x51   : > { %12975 = vmatmul.mubr.msk.bf16.gmra.mrb[12].mxu0 %vm331_vm0, %v17438_v23  ;;  %12977 = vmatmul.mubr.msk.bf16.gmra.mrb[12].mxu1 %vm331_vm0, %v17438_v23  ;;  %v394_v23 = vld [vmem:[%s22049_s1 + $0x148] sm:$0xff]  ;;  %v13014_v16 = vcombine.low %v387_v3, %v391_v4 }
  0x52   : > { %1165 = vmatpush1.bf16.msra.mxu0 %v12994_v7  ;;  %1218 = vmatpush1.bf16.msra.mxu1 %v12996_v9  ;;  %v13021_v28 = vcombine.high %v394_v23, %v398_v24  ;;  %v13020_v36 = vcombine.low %v394_v23, %v398_v24  ;;  %v13008_v7 = vcombine.low %v380_v59, %v384_v61  ;;  %v13039_v23 = vld [vmem:[%s22049_s1 + $0x328] sm:$0xff]  ;;  %v13074_v59 = vld [vmem:[%s22049_s1 + $0x440] sm:$0xff] }
  0x53   : > { %1166 = vmatprep.subr.bf16.mxu0 %v13003_v10  ;;  %1219 = vmatprep.subr.bf16.mxu1 %v13005_v11  ;;  %v13015_v9 = vcombine.high %v387_v3, %v391_v4  ;;  %v395_v10 = vld [vmem:[%s22049_s1 + $0x150] sm:$0xff]  ;;  %v13085_v30 = vcombine.high %v13035_v22, %v13039_v23  ;;  %v13075_v61 = vld [vmem:[%s22049_s1 + $0x448] sm:$0xff] }
  0x54   : > { %1192 = vmatprep.mubr.bf16.mxu0 %v17164_v8  ;;  %1245 = vmatprep.mubr.bf16.mxu1 %v17164_v8  ;;  %v399_v11 = vld [vmem:[%s22049_s1 + $0x170] sm:$0xff] }
  0x55   : > { %v13022_v24 = vcombine.low %v395_v10, %v399_v11  ;;  %v13040_v3 = vld [vmem:[%s22049_s1 + $0x330] sm:$0xff] }
  0x56   : > { %1167 = vmatpush1.bf16.msra.mxu0 %v13002_v17  ;;  %1220 = vmatpush1.bf16.msra.mxu1 %v13004_v18  ;;  %v13016_v17 = vcombine.low %v388_v5, %v392_v15  ;;  %v13023_v18 = vcombine.high %v395_v10, %v399_v11  ;;  %v13041_v15 = vld [vmem:[%s22049_s1 + $0x338] sm:$0xff]  ;;  %v13044_v11 = vld [vmem:[%s22049_s1 + $0x350] sm:$0xff] }
  0x57   : > { %1168 = vmatprep.subr.bf16.mxu0 %v13011_v19  ;;  %1221 = vmatprep.subr.bf16.mxu1 %v13013_v20  ;;  %v13034_v19 = vld [vmem:[%s22049_s1 + $0x300] sm:$0xff]  ;;  %v13025_v20 = vcombine.high %v396_v12, %v400_v14 }
  0x58   : > { %v13082_v32 = vcombine.low %v13034_v19, %v13038_v21 }
  0x5a   : > { %1169 = vmatpush1.bf16.msra.mxu0 %v13010_v25  ;;  %1222 = vmatpush1.bf16.msra.mxu1 %v13012_v26  ;;  %v13024_v25 = vcombine.low %v396_v12, %v400_v14  ;;  %v13083_v26 = vcombine.high %v13034_v19, %v13038_v21  ;;  %v13048_v12 = vld [vmem:[%s22049_s1 + $0x370] sm:$0xff] }
  0x5b   : > { %1170 = vmatprep.subr.bf16.mxu0 %v13019_v27  ;;  %1223 = vmatprep.subr.bf16.mxu1 %v13021_v28  ;;  %v13042_v27 = vld [vmem:[%s22049_s1 + $0x340] sm:$0xff]  ;;  %v13052_v21 = vld [vmem:[%s22049_s1 + $0x390] sm:$0xff] }
  0x5c   : > { %v13046_v28 = vld [vmem:[%s22049_s1 + $0x360] sm:$0xff] }
  0x5d   : > { %v13091_v34 = vcombine.high %v13042_v27, %v13046_v28  ;;  %v13090_v40 = vcombine.low %v13042_v27, %v13046_v28  ;;  %v1374_v28 = vld [vmem:[#allocation2 + $0x18] sm:$0xff] }
  0x5e   : > { %1171 = vmatpush1.bf16.msra.mxu0 %v13018_v33  ;;  %1224 = vmatpush1.bf16.msra.mxu1 %v13020_v36  ;;  %v13084_v33 = vcombine.low %v13035_v22, %v13039_v23  ;;  %v13093_v36 = vcombine.high %v13043_v29, %v13047_v31  ;;  %v13056_v22 = vld [vmem:[%s22049_s1 + $0x3b0] sm:$0xff]  ;;  %v1375_v29 = vld [vmem:[#allocation2 + $0x20] sm:$0xff] }
  0x5f   : > { %1266 = vmatprep.subr.bf16.mxu0 %v12983_v37  ;;  %1319 = vmatprep.subr.bf16.mxu1 %v12985_v38  ;;  %v13054_v37 = vld [vmem:[%s22049_s1 + $0x3a0] sm:$0xff]  ;;  %v13051_v38 = vld [vmem:[%s22049_s1 + $0x388] sm:$0xff]  ;;  %v13060_v31 = vld [vmem:[%s22049_s1 + $0x3d0] sm:$0xff] }
  0x60   : > { %v13099_v43 = vcombine.high %v13050_v35, %v13054_v37  ;;  %v13098_v48 = vcombine.low %v13050_v35, %v13054_v37  ;;  %v13100_v49 = vcombine.low %v13051_v38, %v13055_v39  ;;  %v13061_v35 = vld [vmem:[%s22049_s1 + $0x3d8] sm:$0xff] }
  0x61   : > { %13026 = vmatmul.mubr.msk.bf16.vlgmr.msra.gmra.mrb[0].mxu0 %vm331_vm0, %v17573_v41  ;;  %13028 = vmatmul.mubr.msk.bf16.vlgmr.msra.gmra.mrb[0].mxu1 %vm331_vm0, %v17573_v41 }
  0x62   : > { %1267 = vmatpush1.bf16.msra.mxu0 %v12982_v44  ;;  %1320 = vmatpush1.bf16.msra.mxu1 %v12984_v46  ;;  %v13058_v44 = vld [vmem:[%s22049_s1 + $0x3c0] sm:$0xff]  ;;  %v13059_v46 = vld [vmem:[%s22049_s1 + $0x3c8] sm:$0xff] }
  0x63   : > { %1268 = vmatprep.subr.bf16.mxu0 %v12991_v47  ;;  %1321 = vmatprep.subr.bf16.mxu1 %v12993_v51  ;;  %v13063_v47 = vld [vmem:[%s22049_s1 + $0x3e8] sm:$0xff]  ;;  %v13107_v50 = vcombine.high %v13058_v44, %v13062_v45  ;;  %v13066_v51 = vld [vmem:[%s22049_s1 + $0x400] sm:$0xff] }
  0x64   : > { %1202 = vmatprep.mubr.bf16.mxu0 %v17164_v8  ;;  %1255 = vmatprep.mubr.bf16.mxu1 %v17164_v8  ;;  %v13108_v57 = vcombine.low %v13059_v46, %v13063_v47  ;;  %v13115_v58 = vcombine.high %v13066_v51, %v13070_v52 }
  0x66   : > { %1269 = vmatpush1.bf16.msra.mxu0 %v12990_v54  ;;  %1322 = vmatpush1.bf16.msra.mxu1 %v12992_v55  ;;  %v13109_v54 = vcombine.high %v13059_v46, %v13063_v47  ;;  %v13071_v55 = vld [vmem:[%s22049_s1 + $0x428] sm:$0xff]  ;;  %v13073_v46 = vld [vmem:[%s22049_s1 + $0x438] sm:$0xff] }
  0x67   : > { %1270 = vmatprep.subr.bf16.mxu0 %v12999_v56  ;;  %1323 = vmatprep.subr.bf16.mxu1 %v13001_v60  ;;  %v13106_v56 = vcombine.low %v13058_v44, %v13062_v45  ;;  %v13078_v60 = vld [vmem:[%s22049_s1 + $0x460] sm:$0xff]  ;;  %v13116_v4 = vcombine.low %v13067_v53, %v13071_v55  ;;  %v13069_v45 = vld [vmem:[%s22049_s1 + $0x418] sm:$0xff] }
  0x68   : > { %v13123_v5 = vcombine.high %v13074_v59, %v13078_v60  ;;  %v13122_v10 = vcombine.low %v13074_v59, %v13078_v60  ;;  %v13139_v60 = vld [vmem:[%s22049_s1 + $0x488] sm:$0xff] }
  0x69   : > { %13027 = vmatmul.mubr.msk.bf16.gmra.mrb[4].mxu0 %vm331_vm0, %v17611_v62  ;;  %13029 = vmatmul.mubr.msk.bf16.gmra.mrb[4].mxu1 %vm331_vm0, %v17611_v62 }
  0x6a   : > { %1271 = vmatpush1.bf16.msra.mxu0 %v12998_v63  ;;  %1324 = vmatpush1.bf16.msra.mxu1 %v13000_v1  ;;  %v13117_v63 = vcombine.high %v13067_v53, %v13071_v55  ;;  %v13114_v1 = vcombine.low %v13066_v51, %v13070_v52  ;;  %v13077_v52 = vld [vmem:[%s22049_s1 + $0x458] sm:$0xff] }
  0x6b   : > { %1272 = vmatprep.subr.bf16.mxu0 %v13007_v2  ;;  %1325 = vmatprep.subr.bf16.mxu1 %v13009_v6  ;;  %v13036_v2 = vld [vmem:[%s22049_s1 + $0x310] sm:$0xff]  ;;  %v13037_v6 = vld [vmem:[%s22049_s1 + $0x318] sm:$0xff] }
  0x6c   : > { %1298 = vmatprep.mubr.bf16.mxu0 %v17164_v8  ;;  %1351 = vmatprep.mubr.bf16.mxu1 %v17164_v8  ;;  %v13087_v14 = vcombine.high %v13036_v2, %v13040_v3  ;;  %v13088_v23 = vcombine.low %v13037_v6, %v13041_v15  ;;  %v13081_v53 = vld [vmem:[%s22049_s1 + $0x478] sm:$0xff] }
  0x6e   : > { %1273 = vmatpush1.bf16.msra.mxu0 %v13006_v0  ;;  %1326 = vmatpush1.bf16.msra.mxu1 %v13008_v7  ;;  %v1372_v7 = vld [vmem:[#allocation2 + $0x8] sm:$0xff] }
  0x6f   : > { %1274 = vmatprep.subr.bf16.mxu0 %v13015_v9  ;;  %1327 = vmatprep.subr.bf16.mxu1 %v13017_v13  ;;  %v1373_v9 = vld [vmem:[#allocation2 + $0x10] sm:$0xff] }
  0x70   : > { %v17751_v19 = vpack.c.bf16 %v1373_v9, %v1372_v7  ;;  %v13154_v7 = vld [vmem:[%s22049_s1 + $0x500] sm:$0xff] }
  0x71   : > { %v13158_v9 = vld [vmem:[%s22049_s1 + $0x520] sm:$0xff] }
  0x72   : > { %1275 = vmatpush1.bf16.msra.mxu0 %v13014_v16  ;;  %1328 = vmatpush1.bf16.msra.mxu1 %v13016_v17  ;;  %v13045_v16 = vld [vmem:[%s22049_s1 + $0x358] sm:$0xff] }
  0x73   : > { %1276 = vmatprep.subr.bf16.mxu0 %v13023_v18  ;;  %1329 = vmatprep.subr.bf16.mxu1 %v13025_v20  ;;  %v13049_v17 = vld [vmem:[%s22049_s1 + $0x378] sm:$0xff]  ;;  %v13089_v18 = vcombine.high %v13037_v6, %v13041_v15  ;;  %v13086_v20 = vcombine.low %v13036_v2, %v13040_v3  ;;  %v13150_v2 = vld [vmem:[%s22049_s1 + $0x4e0] sm:$0xff]  ;;  %v13128_v3 = vcombine.low %v13077_v52, %v13081_v53  ;;  %v13151_v6 = vld [vmem:[%s22049_s1 + $0x4e8] sm:$0xff] }
  0x74   : > { %v13097_v27 = vcombine.high %v13045_v16, %v13049_v17 }
  0x76   : > { %1277 = vmatpush1.bf16.msra.mxu0 %v13022_v24  ;;  %1330 = vmatpush1.bf16.msra.mxu1 %v13024_v25  ;;  %v13095_v24 = vcombine.high %v13044_v11, %v13048_v12  ;;  %v13053_v25 = vld [vmem:[%s22049_s1 + $0x398] sm:$0xff] }
  0x77   : > { %1673 = vmatprep.subr.bf16.mxu0 %v13083_v26  ;;  %1726 = vmatprep.subr.bf16.mxu1 %v13085_v30  ;;  %v13057_v26 = vld [vmem:[%s22049_s1 + $0x3b8] sm:$0xff]  ;;  %v13094_v30 = vcombine.low %v13044_v11, %v13048_v12  ;;  %v13155_v12 = vld [vmem:[%s22049_s1 + $0x508] sm:$0xff] }
  0x78   : > { %v13105_v37 = vcombine.high %v13053_v25, %v13057_v26 }
  0x79   : > { %13030 = vmatmul.mubr.msk.bf16.vlgmr.msra.gmra.mrb[8].mxu0 %vm331_vm0, %v17573_v41  ;;  %13032 = vmatmul.mubr.msk.bf16.vlgmr.msra.gmra.mrb[8].mxu1 %vm331_vm0, %v17573_v41  ;;  %v13101_v41 = vcombine.high %v13051_v38, %v13055_v39  ;;  %v17783_v38 = vpack.c.bf16 %v1375_v29, %v1374_v28  ;;  %v13102_v39 = vcombine.low %v13052_v21, %v13056_v22  ;;  %v13171_v29 = vld [vmem:[%s22049_s1 + $0x588] sm:$0xff] }
  0x7a   : > { %1674 = vmatpush1.bf16.msra.mxu0 %v13082_v32  ;;  %1727 = vmatpush1.bf16.msra.mxu1 %v13084_v33  ;;  %v13064_v32 = vld [vmem:[%s22049_s1 + $0x3f0] sm:$0xff]  ;;  %v13096_v33 = vcombine.low %v13045_v16, %v13049_v17  ;;  %v13162_v17 = vld [vmem:[%s22049_s1 + $0x540] sm:$0xff] }
  0x7b   : > { %1675 = vmatprep.subr.bf16.mxu0 %v13091_v34  ;;  %1728 = vmatprep.subr.bf16.mxu1 %v13093_v36  ;;  %v13103_v34 = vcombine.high %v13052_v21, %v13056_v22  ;;  %v13065_v36 = vld [vmem:[%s22049_s1 + $0x3f8] sm:$0xff]  ;;  %v13111_v44 = vcombine.high %v13060_v31, %v13064_v32  ;;  %v13110_v47 = vcombine.low %v13060_v31, %v13064_v32  ;;  %v13163_v22 = vld [vmem:[%s22049_s1 + $0x548] sm:$0xff] }
  0x7c   : > { %1308 = vmatprep.mubr.bf16.mxu0 %v17164_v8  ;;  %1361 = vmatprep.mubr.bf16.mxu1 %v17164_v8  ;;  %v13203_v21 = vcombine.high %v13154_v7, %v13158_v9 }
  0x7e   : > { %1676 = vmatpush1.bf16.msra.mxu0 %v13090_v40  ;;  %1729 = vmatpush1.bf16.msra.mxu1 %v13092_v42  ;;  %v13068_v40 = vld [vmem:[%s22049_s1 + $0x410] sm:$0xff] }
  0x7f   : > { %1677 = vmatprep.subr.bf16.mxu0 %v13099_v43  ;;  %1730 = vmatprep.subr.bf16.mxu1 %v13101_v41  ;;  %v13072_v42 = vld [vmem:[%s22049_s1 + $0x430] sm:$0xff]  ;;  %v13104_v43 = vcombine.low %v13053_v25, %v13057_v26  ;;  %v13113_v41 = vcombine.high %v13061_v35, %v13065_v36  ;;  %v13170_v25 = vld [vmem:[%s22049_s1 + $0x580] sm:$0xff] }
  0x80   : > { %v13119_v51 = vcombine.high %v13068_v40, %v13072_v42  ;;  %v13118_v55 = vcombine.low %v13068_v40, %v13072_v42  ;;  %v13174_v26 = vld [vmem:[%s22049_s1 + $0x5a0] sm:$0xff]  ;;  %v13140_v42 = vld [vmem:[%s22049_s1 + $0x490] sm:$0xff] }
  0x81   : > { %13031 = vmatmul.mubr.msk.bf16.gmra.mrb[12].mxu0 %vm331_vm0, %v17611_v62  ;;  %13033 = vmatmul.mubr.msk.bf16.gmra.mrb[12].mxu1 %vm331_vm0, %v17611_v62  ;;  %v13079_v62 = vld [vmem:[%s22049_s1 + $0x468] sm:$0xff]  ;;  %v13218_v40 = vcombine.low %v13170_v25, %v13174_v26 }
  0x82   : > { %1678 = vmatpush1.bf16.msra.mxu0 %v13098_v48  ;;  %1731 = vmatpush1.bf16.msra.mxu1 %v13100_v49  ;;  %v13125_v0 = vcombine.high %v13075_v61, %v13079_v62  ;;  %v13124_v13 = vcombine.low %v13075_v61, %v13079_v62  ;;  %v13076_v48 = vld [vmem:[%s22049_s1 + $0x450] sm:$0xff]  ;;  %v13143_v61 = vld [vmem:[%s22049_s1 + $0x4a8] sm:$0xff] }
  0x83   : > { %1679 = vmatprep.subr.bf16.mxu0 %v13107_v50  ;;  %1732 = vmatprep.subr.bf16.mxu1 %v13109_v54  ;;  %v13080_v49 = vld [vmem:[%s22049_s1 + $0x470] sm:$0xff]  ;;  %v13112_v50 = vcombine.low %v13061_v35, %v13065_v36  ;;  %v13121_v54 = vcombine.high %v13069_v45, %v13073_v46  ;;  %v13189_v15 = vcombine.high %v13139_v60, %v13143_v61 }
  0x84   : > { %1705 = vmatprep.mubr.bf16.mxu0 %v17164_v8  ;;  %1758 = vmatprep.mubr.bf16.mxu1 %v17164_v8  ;;  %v13127_v59 = vcombine.high %v13076_v48, %v13080_v49  ;;  %v13126_v62 = vcombine.low %v13076_v48, %v13080_v49  ;;  %v13219_v36 = vcombine.high %v13170_v25, %v13174_v26  ;;  %v1917_v48 = vld [vmem:[#allocation2 + $0x9] sm:$0xff]  ;;  %v1918_v49 = vld [vmem:[#allocation2 + $0x11] sm:$0xff] }
  0x85   : > { %v13184_v25 = vld [vmem:[%s22049_s1 + $0x5f0] sm:$0xff] }
  0x86   : > { %1680 = vmatpush1.bf16.msra.mxu0 %v13106_v56  ;;  %1733 = vmatpush1.bf16.msra.mxu1 %v13108_v57  ;;  %v13138_v56 = vld [vmem:[%s22049_s1 + $0x480] sm:$0xff] }
  0x87   : > { %1681 = vmatprep.subr.bf16.mxu0 %v13115_v58  ;;  %1734 = vmatprep.subr.bf16.mxu1 %v13117_v63  ;;  %v13142_v57 = vld [vmem:[%s22049_s1 + $0x4a0] sm:$0xff]  ;;  %v13120_v58 = vcombine.low %v13069_v45, %v13073_v46  ;;  %v13129_v63 = vcombine.high %v13077_v52, %v13081_v53  ;;  %v13141_v46 = vld [vmem:[%s22049_s1 + $0x498] sm:$0xff]  ;;  %v13152_v52 = vld [vmem:[%s22049_s1 + $0x4f0] sm:$0xff] }
  0x8a   : > { %1682 = vmatpush1.bf16.msra.mxu0 %v13114_v1  ;;  %1735 = vmatpush1.bf16.msra.mxu1 %v13116_v4  ;;  %v13146_v1 = vld [vmem:[%s22049_s1 + $0x4c0] sm:$0xff]  ;;  %v13187_v4 = vcombine.high %v13138_v56, %v13142_v57 }
  0x8b   : > { %1683 = vmatprep.subr.bf16.mxu0 %v13123_v5  ;;  %1736 = vmatprep.subr.bf16.mxu1 %v13125_v0  ;;  %v13147_v5 = vld [vmem:[%s22049_s1 + $0x4c8] sm:$0xff]  ;;  %v13186_v0 = vcombine.low %v13138_v56, %v13142_v57  ;;  %v13195_v11 = vcombine.high %v13146_v1, %v13150_v2  ;;  %v13194_v16 = vcombine.low %v13146_v1, %v13150_v2  ;;  %v13153_v56 = vld [vmem:[%s22049_s1 + $0x4f8] sm:$0xff] }
  0x8c   : > { %v13157_v1 = vld [vmem:[%s22049_s1 + $0x518] sm:$0xff] }
  0x8d   : > { %v13161_v2 = vld [vmem:[%s22049_s1 + $0x538] sm:$0xff] }
  0x8e   : > { %1684 = vmatpush1.bf16.msra.mxu0 %v13122_v10  ;;  %1737 = vmatpush1.bf16.msra.mxu1 %v13124_v13  ;;  %v13188_v10 = vcombine.low %v13139_v60, %v13143_v61  ;;  %v13159_v13 = vld [vmem:[%s22049_s1 + $0x528] sm:$0xff]  ;;  %v13156_v60 = vld [vmem:[%s22049_s1 + $0x510] sm:$0xff] }
  0x8f   : > { %1779 = vmatprep.subr.bf16.mxu0 %v13087_v14  ;;  %1832 = vmatprep.subr.bf16.mxu1 %v13089_v18  ;;  %v13197_v14 = vcombine.high %v13147_v5, %v13151_v6  ;;  %v13166_v18 = vld [vmem:[%s22049_s1 + $0x560] sm:$0xff]  ;;  %v13160_v61 = vld [vmem:[%s22049_s1 + $0x530] sm:$0xff] }
  0x90   : > { %v13211_v28 = vcombine.high %v13162_v17, %v13166_v18  ;;  %v13210_v32 = vcombine.low %v13162_v17, %v13166_v18  ;;  %v13176_v17 = vld [vmem:[%s22049_s1 + $0x5b0] sm:$0xff]  ;;  %v13208_v18 = vcombine.low %v13157_v1, %v13161_v2 }
  0x91   : > { %13130 = vmatmul.mubr.msk.bf16.vlgmr.msra.gmra.mrb[0].mxu0 %vm331_vm0, %v17751_v19  ;;  %13132 = vmatmul.mubr.msk.bf16.vlgmr.msra.gmra.mrb[0].mxu1 %vm331_vm0, %v17751_v19 }
  0x92   : > { %1780 = vmatpush1.bf16.msra.mxu0 %v13086_v20  ;;  %1833 = vmatpush1.bf16.msra.mxu1 %v13088_v23  ;;  %v13196_v20 = vcombine.low %v13147_v5, %v13151_v6  ;;  %v13205_v23 = vcombine.high %v13155_v12, %v13159_v13  ;;  %v1920_v5 = vld [vmem:[#allocation2 + $0x21] sm:$0xff] }
  0x93   : > { %1781 = vmatprep.subr.bf16.mxu0 %v13095_v24  ;;  %1834 = vmatprep.subr.bf16.mxu1 %v13097_v27  ;;  %v13202_v24 = vcombine.low %v13154_v7, %v13158_v9  ;;  %v13204_v27 = vcombine.low %v13155_v12, %v13159_v13  ;;  %v13207_v9 = vcombine.high %v13156_v60, %v13160_v61 }
  0x94   : > { %1715 = vmatprep.mubr.bf16.mxu0 %v17164_v8  ;;  %1768 = vmatprep.mubr.bf16.mxu1 %v17164_v8  ;;  %v13209_v12 = vcombine.high %v13157_v1, %v13161_v2  ;;  %v13274_v1 = vld [vmem:[%s22049_s1 + $0x700] sm:$0xff] }
  0x95   : > { %v13278_v2 = vld [vmem:[%s22049_s1 + $0x720] sm:$0xff] }
  0x96   : > { %1782 = vmatpush1.bf16.msra.mxu0 %v13094_v30  ;;  %1835 = vmatpush1.bf16.msra.mxu1 %v13096_v33  ;;  %v13175_v30 = vld [vmem:[%s22049_s1 + $0x5a8] sm:$0xff]  ;;  %v13178_v33 = vld [vmem:[%s22049_s1 + $0x5c0] sm:$0xff] }
  0x97   : > { %1783 = vmatprep.subr.bf16.mxu0 %v13103_v34  ;;  %1836 = vmatprep.subr.bf16.mxu1 %v13105_v37  ;;  %v13182_v34 = vld [vmem:[%s22049_s1 + $0x5e0] sm:$0xff]  ;;  %v13179_v37 = vld [vmem:[%s22049_s1 + $0x5c8] sm:$0xff] }
  0x98   : > { %v13227_v45 = vcombine.high %v13178_v33, %v13182_v34 }
  0x99   : > { %13131 = vmatmul.mubr.msk.bf16.gmra.mrb[4].mxu0 %vm331_vm0, %v17783_v38  ;;  %13133 = vmatmul.mubr.msk.bf16.gmra.mrb[4].mxu1 %vm331_vm0, %v17783_v38 }
  0x9a   : > { %1784 = vmatpush1.bf16.msra.mxu0 %v13102_v39  ;;  %1837 = vmatpush1.bf16.msra.mxu1 %v13104_v43  ;;  %v13221_v39 = vcombine.high %v13171_v29, %v13175_v30  ;;  %v13144_v43 = vld [vmem:[%s22049_s1 + $0x4b0] sm:$0xff] }
  0x9b   : > { %1785 = vmatprep.subr.bf16.mxu0 %v13111_v44  ;;  %1838 = vmatprep.subr.bf16.mxu1 %v13113_v41  ;;  %v13220_v44 = vcombine.low %v13171_v29, %v13175_v30  ;;  %v13145_v41 = vld [vmem:[%s22049_s1 + $0x4b8] sm:$0xff] }
  0x9c   : > { %1811 = vmatprep.mubr.bf16.mxu0 %v17164_v8  ;;  %1864 = vmatprep.mubr.bf16.mxu1 %v17164_v8  ;;  %v13193_v57 = vcombine.high %v13141_v46, %v13145_v41  ;;  %v13185_v29 = vld [vmem:[%s22049_s1 + $0x5f8] sm:$0xff] }
  0x9e   : > { %1786 = vmatpush1.bf16.msra.mxu0 %v13110_v47  ;;  %1839 = vmatpush1.bf16.msra.mxu1 %v13112_v50  ;;  %v13226_v50 = vcombine.low %v13178_v33, %v13182_v34  ;;  %v13246_v33 = vld [vmem:[%s22049_s1 + $0x620] sm:$0xff] }
  0x9f   : > { %1787 = vmatprep.subr.bf16.mxu0 %v13119_v51  ;;  %1840 = vmatprep.subr.bf16.mxu1 %v13121_v54  ;;  %v13148_v51 = vld [vmem:[%s22049_s1 + $0x4d0] sm:$0xff]  ;;  %v13191_v54 = vcombine.high %v13140_v42, %v13144_v43 }
  0xa0   : > { %v13198_v6 = vcombine.low %v13148_v51, %v13152_v52 }
  0xa2   : > { %1788 = vmatpush1.bf16.msra.mxu0 %v13118_v55  ;;  %1841 = vmatpush1.bf16.msra.mxu1 %v13120_v58  ;;  %v13149_v55 = vld [vmem:[%s22049_s1 + $0x4d8] sm:$0xff]  ;;  %v17923_v58 = vpack.c.bf16 %v1918_v49, %v1917_v48  ;;  %v13258_v48 = vld [vmem:[%s22049_s1 + $0x680] sm:$0xff] }
  0xa3   : > { %1789 = vmatprep.subr.bf16.mxu0 %v13127_v59  ;;  %1842 = vmatprep.subr.bf16.mxu1 %v13129_v63  ;;  %v13190_v59 = vcombine.low %v13140_v42, %v13144_v43  ;;  %v13192_v63 = vcombine.low %v13141_v46, %v13145_v41  ;;  %v13200_v7 = vcombine.low %v13149_v55, %v13153_v56  ;;  %v13254_v42 = vld [vmem:[%s22049_s1 + $0x660] sm:$0xff]  ;;  %v13255_v46 = vld [vmem:[%s22049_s1 + $0x668] sm:$0xff] }
  0xa4   : > { %v13262_v49 = vld [vmem:[%s22049_s1 + $0x6a0] sm:$0xff] }
  0xa6   : > { %1790 = vmatpush1.bf16.msra.mxu0 %v13126_v62  ;;  %1843 = vmatpush1.bf16.msra.mxu1 %v13128_v3  ;;  %v13199_v62 = vcombine.high %v13148_v51, %v13152_v52  ;;  %v13201_v3 = vcombine.high %v13149_v55, %v13153_v56  ;;  %v13259_v52 = vld [vmem:[%s22049_s1 + $0x688] sm:$0xff]  ;;  %v13266_v56 = vld [vmem:[%s22049_s1 + $0x6c0] sm:$0xff] }
  0xa7   : > { %2218 = vmatprep.subr.bf16.mxu0 %v13187_v4  ;;  %2271 = vmatprep.subr.bf16.mxu1 %v13189_v15  ;;  %v1919_v4 = vld [vmem:[#allocation2 + $0x19] sm:$0xff]  ;;  %v13164_v15 = vld [vmem:[%s22049_s1 + $0x550] sm:$0xff] }
  0xa8   : > { %v17955_v13 = vpack.c.bf16 %v1920_v5, %v1919_v4  ;;  %v13275_v5 = vld [vmem:[%s22049_s1 + $0x708] sm:$0xff] }
  0xa9   : > { %13134 = vmatmul.mubr.msk.bf16.vlgmr.msra.gmra.mrb[8].mxu0 %vm331_vm0, %v17751_v19  ;;  %13136 = vmatmul.mubr.msk.bf16.vlgmr.msra.gmra.mrb[8].mxu1 %vm331_vm0, %v17751_v19  ;;  %v13167_v19 = vld [vmem:[%s22049_s1 + $0x568] sm:$0xff] }
  0xaa   : > { %2219 = vmatpush1.bf16.msra.mxu0 %v13186_v0  ;;  %2272 = vmatpush1.bf16.msra.mxu1 %v13188_v10  ;;  %v13213_v31 = vcombine.high %v13163_v22, %v13167_v19  ;;  %v13212_v35 = vcombine.low %v13163_v22, %v13167_v19  ;;  %v13168_v0 = vld [vmem:[%s22049_s1 + $0x570] sm:$0xff]  ;;  %v13165_v10 = vld [vmem:[%s22049_s1 + $0x558] sm:$0xff] }
  0xab   : > { %2220 = vmatprep.subr.bf16.mxu0 %v13195_v11  ;;  %2273 = vmatprep.subr.bf16.mxu1 %v13197_v14  ;;  %v13169_v11 = vld [vmem:[%s22049_s1 + $0x578] sm:$0xff]  ;;  %v13206_v14 = vcombine.low %v13156_v60, %v13160_v61  ;;  %v13307_v60 = vcombine.high %v13258_v48, %v13262_v49  ;;  %v13267_v61 = vld [vmem:[%s22049_s1 + $0x6c8] sm:$0xff] }
  0xac   : > { %1821 = vmatprep.mubr.bf16.mxu0 %v17164_v8  ;;  %1874 = vmatprep.mubr.bf16.mxu1 %v17164_v8  ;;  %v13177_v22 = vld [vmem:[%s22049_s1 + $0x5b8] sm:$0xff]  ;;  %v13217_v19 = vcombine.high %v13165_v10, %v13169_v11  ;;  %v13216_v26 = vcombine.low %v13165_v10, %v13169_v11  ;;  %v13323_v11 = vcombine.high %v13274_v1, %v13278_v2 }
  0xae   : > { %2221 = vmatpush1.bf16.msra.mxu0 %v13194_v16  ;;  %2274 = vmatpush1.bf16.msra.mxu1 %v13196_v20  ;;  %v13172_v16 = vld [vmem:[%s22049_s1 + $0x590] sm:$0xff]  ;;  %v13215_v20 = vcombine.high %v13164_v15, %v13168_v0 }
  0xaf   : > { %2222 = vmatprep.subr.bf16.mxu0 %v13203_v21  ;;  %2275 = vmatprep.subr.bf16.mxu1 %v13205_v23  ;;  %v13173_v21 = vld [vmem:[%s22049_s1 + $0x598] sm:$0xff]  ;;  %v13214_v23 = vcombine.low %v13164_v15, %v13168_v0 }
  0xb0   : > { %v13225_v30 = vcombine.high %v13173_v21, %v13177_v22  ;;  %v13224_v34 = vcombine.low %v13173_v21, %v13177_v22  ;;  %v13245_v22 = vld [vmem:[%s22049_s1 + $0x618] sm:$0xff] }
  0xb1   : > { %13135 = vmatmul.mubr.msk.bf16.gmra.mrb[12].mxu0 %vm331_vm0, %v17783_v38  ;;  %13137 = vmatmul.mubr.msk.bf16.gmra.mrb[12].mxu1 %vm331_vm0, %v17783_v38  ;;  %v13183_v38 = vld [vmem:[%s22049_s1 + $0x5e8] sm:$0xff] }
  0xb2   : > { %2223 = vmatpush1.bf16.msra.mxu0 %v13202_v24  ;;  %2276 = vmatpush1.bf16.msra.mxu1 %v13204_v27  ;;  %v13229_v47 = vcombine.high %v13179_v37, %v13183_v38  ;;  %v13228_v53 = vcombine.low %v13179_v37, %v13183_v38  ;;  %v13180_v24 = vld [vmem:[%s22049_s1 + $0x5d0] sm:$0xff]  ;;  %v13223_v27 = vcombine.high %v13172_v16, %v13176_v17  ;;  %v13247_v37 = vld [vmem:[%s22049_s1 + $0x628] sm:$0xff] }
  0xb3   : > { %2224 = vmatprep.subr.bf16.mxu0 %v13211_v28  ;;  %2277 = vmatprep.subr.bf16.mxu1 %v13213_v31  ;;  %v13181_v28 = vld [vmem:[%s22049_s1 + $0x5d8] sm:$0xff]  ;;  %v13222_v31 = vcombine.low %v13172_v16, %v13176_v17  ;;  %v13322_v16 = vcombine.low %v13274_v1, %v13278_v2  ;;  %v13244_v17 = vld [vmem:[%s22049_s1 + $0x610] sm:$0xff] }
  0xb4   : > { %2250 = vmatprep.mubr.bf16.mxu0 %v17164_v8  ;;  %2303 = vmatprep.mubr.bf16.mxu1 %v17164_v8  ;;  %v13233_v38 = vcombine.high %v13181_v28, %v13185_v29  ;;  %v13232_v43 = vcombine.low %v13181_v28, %v13185_v29  ;;  %v13256_v28 = vld [vmem:[%s22049_s1 + $0x670] sm:$0xff] }
  0xb5   : > { %v13288_v1 = vld [vmem:[%s22049_s1 + $0x770] sm:$0xff] }
  0xb6   : > { %2225 = vmatpush1.bf16.msra.mxu0 %v13210_v32  ;;  %2278 = vmatpush1.bf16.msra.mxu1 %v13212_v35  ;;  %v13242_v32 = vld [vmem:[%s22049_s1 + $0x600] sm:$0xff]  ;;  %v13231_v35 = vcombine.high %v13180_v24, %v13184_v25 }
  0xb7   : > { %2226 = vmatprep.subr.bf16.mxu0 %v13219_v36  ;;  %2279 = vmatprep.subr.bf16.mxu1 %v13221_v39  ;;  %v13243_v36 = vld [vmem:[%s22049_s1 + $0x608] sm:$0xff]  ;;  %v13230_v39 = vcombine.low %v13180_v24, %v13184_v25  ;;  %v2463_v25 = vld [vmem:[#allocation2 + $0x12] sm:$0xff] }
  0xb8   : > { %v13293_v41 = vcombine.high %v13243_v36, %v13247_v37  ;;  %v2462_v24 = vld [vmem:[#allocation2 + $0xa] sm:$0xff] }
  0xba   : > { %2227 = vmatpush1.bf16.msra.mxu0 %v13218_v40  ;;  %2280 = vmatpush1.bf16.msra.mxu1 %v13220_v44  ;;  %v13250_v40 = vld [vmem:[%s22049_s1 + $0x640] sm:$0xff]  ;;  %v13291_v44 = vcombine.high %v13242_v32, %v13246_v33 }
  0xbb   : > { %2228 = vmatprep.subr.bf16.mxu0 %v13227_v45  ;;  %2281 = vmatprep.subr.bf16.mxu1 %v13229_v47  ;;  %v13251_v45 = vld [vmem:[%s22049_s1 + $0x648] sm:$0xff]  ;;  %v13290_v47 = vcombine.low %v13242_v32, %v13246_v33  ;;  %v13299_v51 = vcombine.high %v13250_v40, %v13254_v42  ;;  %v13298_v55 = vcombine.low %v13250_v40, %v13254_v42  ;;  %v13257_v32 = vld [vmem:[%s22049_s1 + $0x678] sm:$0xff] }
  0xbc   : > { %v13261_v40 = vld [vmem:[%s22049_s1 + $0x698] sm:$0xff] }
  0xbd   : > { %v13265_v42 = vld [vmem:[%s22049_s1 + $0x6b8] sm:$0xff] }
  0xbe   : > { %2229 = vmatpush1.bf16.msra.mxu0 %v13226_v50  ;;  %2282 = vmatpush1.bf16.msra.mxu1 %v13228_v53  ;;  %v13292_v50 = vcombine.low %v13243_v36, %v13247_v37  ;;  %v13263_v53 = vld [vmem:[%s22049_s1 + $0x6a8] sm:$0xff]  ;;  %v13260_v36 = vld [vmem:[%s22049_s1 + $0x690] sm:$0xff] }
  0xbf   : > { %2324 = vmatprep.subr.bf16.mxu0 %v13191_v54  ;;  %2377 = vmatprep.subr.bf16.mxu1 %v13193_v57  ;;  %v13301_v54 = vcombine.high %v13251_v45, %v13255_v46  ;;  %v13270_v57 = vld [vmem:[%s22049_s1 + $0x6e0] sm:$0xff]  ;;  %v13264_v37 = vld [vmem:[%s22049_s1 + $0x6b0] sm:$0xff] }
  0xc0   : > { %v13315_v4 = vcombine.high %v13266_v56, %v13270_v57  ;;  %v13314_v0 = vcombine.low %v13266_v56, %v13270_v57  ;;  %v13280_v56 = vld [vmem:[%s22049_s1 + $0x730] sm:$0xff]  ;;  %v13312_v57 = vcombine.low %v13261_v40, %v13265_v42 }
  0xc1   : > { %13234 = vmatmul.mubr.msk.bf16.vlgmr.msra.gmra.mrb[0].mxu0 %vm331_vm0, %v17923_v58  ;;  %13236 = vmatmul.mubr.msk.bf16.vlgmr.msra.gmra.mrb[0].mxu1 %vm331_vm0, %v17923_v58 }
  0xc2   : > { %2325 = vmatpush1.bf16.msra.mxu0 %v13190_v59  ;;  %2378 = vmatpush1.bf16.msra.mxu1 %v13192_v63  ;;  %v13300_v59 = vcombine.low %v13251_v45, %v13255_v46  ;;  %v13309_v63 = vcombine.high %v13259_v52, %v13263_v53  ;;  %v2465_v45 = vld [vmem:[#allocation2 + $0x22] sm:$0xff] }
  0xc3   : > { %2326 = vmatprep.subr.bf16.mxu0 %v13199_v62  ;;  %2379 = vmatprep.subr.bf16.mxu1 %v13201_v3  ;;  %v13306_v62 = vcombine.low %v13258_v48, %v13262_v49  ;;  %v13308_v3 = vcombine.low %v13259_v52, %v13263_v53  ;;  %v13311_v49 = vcombine.high %v13260_v36, %v13264_v37 }
  0xc4   : > { %2260 = vmatprep.mubr.bf16.mxu0 %v17164_v8  ;;  %2313 = vmatprep.mubr.bf16.mxu1 %v17164_v8  ;;  %v13313_v52 = vcombine.high %v13261_v40, %v13265_v42 }
  0xc6   : > { %2327 = vmatpush1.bf16.msra.mxu0 %v13198_v6  ;;  %2380 = vmatpush1.bf16.msra.mxu1 %v13200_v7  ;;  %v13279_v6 = vld [vmem:[%s22049_s1 + $0x728] sm:$0xff]  ;;  %v13282_v7 = vld [vmem:[%s22049_s1 + $0x740] sm:$0xff] }
  0xc7   : > { %2328 = vmatprep.subr.bf16.mxu0 %v13207_v9  ;;  %2381 = vmatprep.subr.bf16.mxu1 %v13209_v12  ;;  %v13286_v9 = vld [vmem:[%s22049_s1 + $0x760] sm:$0xff]  ;;  %v13283_v12 = vld [vmem:[%s22049_s1 + $0x748] sm:$0xff] }
  0xc8   : > { %v13331_v21 = vcombine.high %v13282_v7, %v13286_v9 }
  0xc9   : > { %13235 = vmatmul.mubr.msk.bf16.gmra.mrb[4].mxu0 %vm331_vm0, %v17955_v13  ;;  %13237 = vmatmul.mubr.msk.bf16.gmra.mrb[4].mxu1 %vm331_vm0, %v17955_v13 }
  0xca   : > { %2329 = vmatpush1.bf16.msra.mxu0 %v13206_v14  ;;  %2382 = vmatpush1.bf16.msra.mxu1 %v13208_v18  ;;  %v13325_v14 = vcombine.high %v13275_v5, %v13279_v6  ;;  %v13248_v18 = vld [vmem:[%s22049_s1 + $0x630] sm:$0xff] }
  0xcb   : > { %2330 = vmatprep.subr.bf16.mxu0 %v13215_v20  ;;  %2383 = vmatprep.subr.bf16.mxu1 %v13217_v19  ;;  %v13324_v20 = vcombine.low %v13275_v5, %v13279_v6  ;;  %v13249_v19 = vld [vmem:[%s22049_s1 + $0x638] sm:$0xff] }
  0xcc   : > { %2356 = vmatprep.mubr.bf16.mxu0 %v17164_v8  ;;  %2409 = vmatprep.mubr.bf16.mxu1 %v17164_v8  ;;  %v13297_v33 = vcombine.high %v13245_v22, %v13249_v19  ;;  %v13289_v5 = vld [vmem:[%s22049_s1 + $0x778] sm:$0xff] }
  0xce   : > { %2331 = vmatpush1.bf16.msra.mxu0 %v13214_v23  ;;  %2384 = vmatpush1.bf16.msra.mxu1 %v13216_v26  ;;  %v13330_v26 = vcombine.low %v13282_v7, %v13286_v9 }
  0xcf   : > { %2332 = vmatprep.subr.bf16.mxu0 %v13223_v27  ;;  %2385 = vmatprep.subr.bf16.mxu1 %v13225_v30  ;;  %v13252_v27 = vld [vmem:[%s22049_s1 + $0x650] sm:$0xff]  ;;  %v13295_v30 = vcombine.high %v13244_v17, %v13248_v18 }
  0xd0   : > { %v13302_v46 = vcombine.low %v13252_v27, %v13256_v28 }
  0xd2   : > { %2333 = vmatpush1.bf16.msra.mxu0 %v13222_v31  ;;  %2386 = vmatpush1.bf16.msra.mxu1 %v13224_v34  ;;  %v13253_v31 = vld [vmem:[%s22049_s1 + $0x658] sm:$0xff]  ;;  %v18095_v34 = vpack.c.bf16 %v2463_v25, %v2462_v24  ;;  %v3009_v24 = vlaneseq }
  0xd3   : > { %2334 = vmatprep.subr.bf16.mxu0 %v13231_v35  ;;  %2387 = vmatprep.subr.bf16.mxu1 %v13233_v38  ;;  %v13294_v35 = vcombine.low %v13244_v17, %v13248_v18  ;;  %v13296_v38 = vcombine.low %v13245_v22, %v13249_v19  ;;  %v13304_v48 = vcombine.low %v13253_v31, %v13257_v32  ;;  %v15595_v17 = vld [vmem:[%s22050_s2 + $0x42c] ss:$16 sps:$4 sm:$0xff]   ;;  %v15590_v18 = vld [vmem:[%s22050_s2 + $0x420] ss:$16 sps:$4 sm:$0xff]  }
  0xd4   : > { %v15601_v22 = vld [vmem:[%s22050_s2 + $0x44c] ss:$16 sps:$4 sm:$0xff]   ;;  %v15596_v19 = vld [vmem:[%s22050_s2 + $0x440] ss:$16 sps:$4 sm:$0xff]   ;;  %v18199_v25 = vshrl.u32 %v3009_v24, 7 }
  0xd6   : > { %2335 = vmatpush1.bf16.msra.mxu0 %v13230_v39  ;;  %2388 = vmatpush1.bf16.msra.mxu1 %v13232_v43  ;;  %v13303_v39 = vcombine.high %v13252_v27, %v13256_v28  ;;  %v13305_v43 = vcombine.high %v13253_v31, %v13257_v32  ;;  %v18205_v27 = vsub.s32 2, %v18199_v25  ;;  %v18208_v28 = vsub.s32 1, %v18199_v25 }
  0xd7   : > { %2763 = vmatprep.subr.bf16.mxu0 %v13291_v44  ;;  %2816 = vmatprep.subr.bf16.mxu1 %v13293_v41  ;;  %v2464_v44 = vld [vmem:[#allocation2 + $0x1a] sm:$0xff]  ;;  %v13268_v41 = vld [vmem:[%s22049_s1 + $0x6d0] sm:$0xff]  ;;  %v18215_v32 = vsub.s32 3, %v18199_v25 }
  0xd8   : > { %v2467_v53 = vpack.c.bf16 %v2465_v45, %v2464_v44  ;;  %22072 = vst [vmem:[#allocation9_spill] sm:$0xff] %v18205_v27  ;;  %22073 = vst [vmem:[#allocation10_spill] sm:$0xff] %v18208_v28  ;;  %v3027_v45 = vsub.s32 4, %v18199_v25 }
  0xd9   : > { %13238 = vmatmul.mubr.msk.bf16.vlgmr.msra.gmra.mrb[8].mxu0 %vm331_vm0, %v17923_v58  ;;  %13240 = vmatmul.mubr.msk.bf16.vlgmr.msra.gmra.mrb[8].mxu1 %vm331_vm0, %v17923_v58  ;;  %v13271_v58 = vld [vmem:[%s22049_s1 + $0x6e8] sm:$0xff]  ;;  %22074 = vst [vmem:[#allocation11_spill] sm:$0xff] %v18215_v32 }
  0xda   : > { %2764 = vmatpush1.bf16.msra.mxu0 %v13290_v47  ;;  %2817 = vmatpush1.bf16.msra.mxu1 %v13292_v50  ;;  %v13317_v15 = vcombine.high %v13267_v61, %v13271_v58  ;;  %v13316_v10 = vcombine.low %v13267_v61, %v13271_v58  ;;  %v13272_v47 = vld [vmem:[%s22049_s1 + $0x6f0] sm:$0xff]  ;;  %v13269_v50 = vld [vmem:[%s22049_s1 + $0x6d8] sm:$0xff] }
  0xdb   : > { %2765 = vmatprep.subr.bf16.mxu0 %v13299_v51  ;;  %2818 = vmatprep.subr.bf16.mxu1 %v13301_v54  ;;  %v13273_v51 = vld [vmem:[%s22049_s1 + $0x6f8] sm:$0xff]  ;;  %v13310_v54 = vcombine.low %v13260_v36, %v13264_v37 }
  0xdc   : > { %2366 = vmatprep.mubr.bf16.mxu0 %v17164_v8  ;;  %2419 = vmatprep.mubr.bf16.mxu1 %v17164_v8  ;;  %v13281_v61 = vld [vmem:[%s22049_s1 + $0x738] sm:$0xff]  ;;  %v13321_v58 = vcombine.high %v13269_v50, %v13273_v51  ;;  %v13320_v2 = vcombine.low %v13269_v50, %v13273_v51 }
  0xde   : > { %2766 = vmatpush1.bf16.msra.mxu0 %v13298_v55  ;;  %2819 = vmatpush1.bf16.msra.mxu1 %v13300_v59  ;;  %v13276_v55 = vld [vmem:[%s22049_s1 + $0x710] sm:$0xff]  ;;  %v13319_v59 = vcombine.high %v13268_v41, %v13272_v47 }
  0xdf   : > { %2767 = vmatprep.subr.bf16.mxu0 %v13307_v60  ;;  %2820 = vmatprep.subr.bf16.mxu1 %v13309_v63  ;;  %v13277_v60 = vld [vmem:[%s22049_s1 + $0x718] sm:$0xff]  ;;  %v13318_v63 = vcombine.low %v13268_v41, %v13272_v47  ;;  %v3031_v41 = vsub.s32 5, %v18199_v25  ;;  %v3039_v47 = vsub.s32 7, %v18199_v25 }
  0xe0   : > { %v13329_v6 = vcombine.high %v13277_v60, %v13281_v61 }
  0xe1   : > { %13239 = vmatmul.mubr.msk.bf16.gmra.mrb[12].mxu0 %vm331_vm0, %v17955_v13  ;;  %13241 = vmatmul.mubr.msk.bf16.gmra.mrb[12].mxu1 %vm331_vm0, %v17955_v13  ;;  %v13287_v13 = vld [vmem:[%s22049_s1 + $0x768] sm:$0xff] }
  0xe2   : > { %2768 = vmatpush1.bf16.msra.mxu0 %v13306_v62  ;;  %2821 = vmatpush1.bf16.msra.mxu1 %v13308_v3  ;;  %v13333_v23 = vcombine.high %v13283_v12, %v13287_v13  ;;  %v13332_v29 = vcombine.low %v13283_v12, %v13287_v13  ;;  %v13284_v62 = vld [vmem:[%s22049_s1 + $0x750] sm:$0xff]  ;;  %v13327_v3 = vcombine.high %v13276_v55, %v13280_v56 }
  0xe3   : > { %2769 = vmatprep.subr.bf16.mxu0 %v13315_v4  ;;  %2822 = vmatprep.subr.bf16.mxu1 %v13317_v15  ;;  %v13285_v4 = vld [vmem:[%s22049_s1 + $0x758] sm:$0xff]  ;;  %v13326_v15 = vcombine.low %v13276_v55, %v13280_v56  ;;  %v13335_v7 = vcombine.high %v13284_v62, %v13288_v1  ;;  %v15584_v12 = vld [vmem:[%s22050_s2 + $0x400] ss:$16 sps:$4 sm:$0xff]   ;;  %v15586_v13 = vld [vmem:[%s22050_s2 + $0x404] ss:$16 sps:$4 sm:$0xff]  }
  0xe4   : > { %2795 = vmatprep.mubr.bf16.mxu0 %v17164_v8  ;;  %2848 = vmatprep.mubr.bf16.mxu1 %v17164_v8  ;;  %v13337_v9 = vcombine.high %v13285_v4, %v13289_v5 }
  0xe6   : > { %2770 = vmatpush1.bf16.msra.mxu0 %v13314_v0  ;;  %2823 = vmatpush1.bf16.msra.mxu1 %v13316_v10  ;;  %v13328_v0 = vcombine.low %v13277_v60, %v13281_v61  ;;  %v13334_v10 = vcombine.low %v13284_v62, %v13288_v1 }
  0xe7   : > { %2771 = vmatprep.subr.bf16.mxu0 %v13323_v11  ;;  %2824 = vmatprep.subr.bf16.mxu1 %v13325_v14  ;;  %v13336_v11 = vcombine.low %v13285_v4, %v13289_v5  ;;  %v15587_v14 = vld [vmem:[%s22050_s2 + $0x408] ss:$16 sps:$4 sm:$0xff]  }
  0xea   : > { %2772 = vmatpush1.bf16.msra.mxu0 %v13322_v16  ;;  %2825 = vmatpush1.bf16.msra.mxu1 %v13324_v20  ;;  %v15592_v16 = vld [vmem:[%s22050_s2 + $0x424] ss:$16 sps:$4 sm:$0xff]   ;;  %v15593_v20 = vld [vmem:[%s22050_s2 + $0x428] ss:$16 sps:$4 sm:$0xff]  }
  0xeb   : > { %2773 = vmatprep.subr.bf16.mxu0 %v13331_v21  ;;  %2826 = vmatprep.subr.bf16.mxu1 %v13333_v23  ;;  %v15598_v21 = vld [vmem:[%s22050_s2 + $0x444] ss:$16 sps:$4 sm:$0xff]   ;;  %v15599_v23 = vld [vmem:[%s22050_s2 + $0x448] ss:$16 sps:$4 sm:$0xff]  }
  0xee   : > { %2774 = vmatpush1.bf16.msra.mxu0 %v13330_v26  ;;  %2827 = vmatpush1.bf16.msra.mxu1 %v13332_v29  ;;  %v18202_v26 = vsub.s32 0, %v18199_v25  ;;  %v3007_v29 = vld [vmem:[%s22053_s5] sm:$0xff] }
  0xef   : > { %2869 = vmatprep.subr.bf16.mxu0 %v13295_v30  ;;  %2922 = vmatprep.subr.bf16.mxu1 %v13297_v33  ;;  %v3020_v37 = vrot.slane %v3007_v29, %v18205_v27  ;;  %v18273_v24 = vrot.slane %v3007_v29, %v3039_v47 }
  0xf0   : > { %22071 = vst [vmem:[#allocation8_spill] sm:$0xff] %v18202_v26  ;;  %v3012_v31 = vrot.slane %v3007_v29, %v18202_v26 }
  0xf1   : > { %13338 = vmatmul.mubr.msk.bf16.vlgmr.msra.gmra.mrb[0].mxu0 %vm331_vm0, %v18095_v34  ;;  %13340 = vmatmul.mubr.msk.bf16.vlgmr.msra.gmra.mrb[0].mxu1 %vm331_vm0, %v18095_v34 }
  0xf2   : > { %2870 = vmatpush1.bf16.msra.mxu0 %v13294_v35  ;;  %2923 = vmatpush1.bf16.msra.mxu1 %v13296_v38  ;;  %v3016_v38 = vrot.slane %v3007_v29, %v18208_v28 }
  0xf3   : > { %2871 = vmatprep.subr.bf16.mxu0 %v13303_v39  ;;  %2924 = vmatprep.subr.bf16.mxu1 %v13305_v43  ;;  %v3024_v43 = vrot.slane %v3007_v29, %v18215_v32 }
  0xf4   : > { %2805 = vmatprep.mubr.bf16.mxu0 %v17164_v8  ;;  %2858 = vmatprep.mubr.bf16.mxu1 %v17164_v8 }
  0xf6   : > { %2872 = vmatpush1.bf16.msra.mxu0 %v13302_v46  ;;  %2925 = vmatpush1.bf16.msra.mxu1 %v13304_v48  ;;  %v3035_v46 = vsub.s32 6, %v18199_v25 }
  0xf7   : > { %2873 = vmatprep.subr.bf16.mxu0 %v13311_v49  ;;  %2926 = vmatprep.subr.bf16.mxu1 %v13313_v52 }
  0xf9   : > { %13339 = vmatmul.mubr.msk.bf16.gmra.mrb[4].mxu0 %vm331_vm0, %v2467_v53  ;;  %13341 = vmatmul.mubr.msk.bf16.gmra.mrb[4].mxu1 %vm331_vm0, %v2467_v53 }
  0xfa   : > { %2874 = vmatpush1.bf16.msra.mxu0 %v13310_v54  ;;  %2927 = vmatpush1.bf16.msra.mxu1 %v13312_v57 }
  0xfb   : > { %2875 = vmatprep.subr.bf16.mxu0 %v13319_v59  ;;  %2928 = vmatprep.subr.bf16.mxu1 %v13321_v58 }
  0xfc   : > { %2901 = vmatprep.mubr.bf16.mxu0 %v17164_v8  ;;  %2954 = vmatprep.mubr.bf16.mxu1 %v17164_v8 }
  0xfe   : > { %2876 = vmatpush1.bf16.msra.mxu0 %v13318_v63  ;;  %2929 = vmatpush1.bf16.msra.mxu1 %v13320_v2 }
  0xff   : > { %2877 = vmatprep.subr.bf16.mxu0 %v13327_v3  ;;  %2930 = vmatprep.subr.bf16.mxu1 %v13329_v6 }
 0x102   : > { %2878 = vmatpush1.bf16.msra.mxu0 %v13326_v15  ;;  %2931 = vmatpush1.bf16.msra.mxu1 %v13328_v0 }
 0x103   : > { %2879 = vmatprep.subr.bf16.mxu0 %v13335_v7  ;;  %2932 = vmatprep.subr.bf16.mxu1 %v13337_v9 }
 0x106   : > { %2880 = vmatpush1.bf16.msra.mxu0 %v13334_v10  ;;  %2933 = vmatpush1.bf16.msra.mxu1 %v13336_v11 }
 0x107   : > { %5239 = vmatprep.subr.bf16.mxu0 %v15586_v13 }
 0x109   : > { %13342 = vmatmul.mubr.msk.bf16.vlgmr.msra.gmra.mrb[8].mxu0 %vm331_vm0, %v18095_v34  ;;  %13344 = vmatmul.mubr.msk.bf16.vlgmr.msra.gmra.mrb[8].mxu1 %vm331_vm0, %v18095_v34 }
 0x10a   : > { %2911 = vmatprep.mubr.bf16.mxu0 %v17164_v8  ;;  %2964 = vmatprep.mubr.bf16.mxu1 %v17164_v8  ;;  %v15589_v8 = vld [vmem:[%s22050_s2 + $0x40c] ss:$16 sps:$4 sm:$0xff]  }
 0x10b   : > { %5325 = vmatprep.subr.bf16.mxu1 %v15589_v8  ;;  %5240 = vmatpush1.bf16.msra.mxu0 %v15584_v12 }
 0x10c   : > { %5326 = vmatpush1.bf16.msra.mxu1 %v15587_v14  ;;  %5241 = vmatprep.subr.bf16.mxu0 %v15592_v16 }
 0x10d   : > { %5327 = vmatprep.subr.bf16.mxu1 %v15595_v17 }
 0x10f   : > { %5242 = vmatpush1.bf16.msra.mxu0 %v15590_v18  ;;  %v17166_v18 = vmov 1983009808  }
 0x110   : > { %5328 = vmatpush1.bf16.msra.mxu1 %v15593_v20  ;;  %5243 = vmatprep.subr.bf16.mxu0 %v15598_v21  ;;  %v3150_v20 = vunpack.c.l.s4 %v17166_v18  ;;  %v18267_v21 = vrot.slane %v3007_v29, %v3027_v45 }
 0x111   : > { %13343 = vmatmul.mubr.msk.bf16.gmra.mrb[12].mxu0 %vm331_vm0, %v2467_v53  ;;  %13345 = vmatmul.mubr.msk.bf16.gmra.mrb[12].mxu1 %vm331_vm0, %v2467_v53 }
 0x112   : > { %5329 = vmatprep.subr.bf16.mxu1 %v15601_v22  ;;  %v18269_v22 = vrot.slane %v3007_v29, %v3035_v46 }
 0x113   : > { %5244 = vmatpush1.bf16.msra.mxu0 %v15596_v19  ;;  %v18271_v19 = vrot.slane %v3007_v29, %v3031_v41 }
 0x114   : > { %5330 = vmatpush1.bf16.msra.mxu1 %v15599_v23  ;;  %v3151_v23 = vunpack.c.0.s8 %v3150_v20 }
 0x1c4   : > { %v2797_v30 = vpop.f32.mrb[0].mxu0  ;;  %v2850_v33 = vpop.f32.mrb[0].mxu1 }
 0x1c5   : > { %v2799_v34 = vpop.f32.mrb[1].mxu0  ;;  %v2852_v35 = vpop.f32.mrb[1].mxu1  ;;  %v18219_v42 = vadd.f32 %v3012_v31, %v2797_v30  ;;  %v18226_v48 = vadd.f32 %v3020_v37, %v2850_v33 }
 0x1c6   : > { %v2801_v36 = vpop.f32.mrb[2].mxu0  ;;  %v2854_v39 = vpop.f32.mrb[2].mxu1  ;;  %v18228_v49 = vadd.f32 %v3016_v38, %v2799_v34  ;;  %v18231_v51 = vadd.f32 %v3024_v43, %v2852_v35 }
 0x1c7   : > { %v2803_v40 = vpop.f32.mrb[3].mxu0  ;;  %v2856_v44 = vpop.f32.mrb[3].mxu1  ;;  %v3081_v50 = vmax.f32 %v18219_v42, 0.0  ;;  %v18233_v52 = vadd.f32 %v3012_v31, %v2801_v36  ;;  %v18235_v54 = vadd.f32 %v3020_v37, %v2854_v39  ;;  %v3083_v1 = vmax.f32 %v18226_v48, 0.0 }
 0x1c8   : > { %v18237_v55 = vadd.f32 %v3016_v38, %v2803_v40  ;;  %v18241_v60 = vadd.f32 %v3024_v43, %v2856_v44  ;;  %v3082_v2 = vmax.f32 %v18228_v49, 0.0  ;;  %v3084_v15 = vmax.f32 %v18231_v51, 0.0 }
 0x1c9   : > { %v3089_v0 = vmax.f32 %v18233_v52, 0.0  ;;  %v3091_v11 = vmax.f32 %v18235_v54, 0.0 }
 0x1ca   : > { %v3090_v12 = vmax.f32 %v18237_v55, 0.0  ;;  %v3092_v14 = vmax.f32 %v18241_v60, 0.0 }
 0x1cc   : > { %v2807_v53 = vpop.f32.mrb[4].mxu0  ;;  %v2860_v57 = vpop.f32.mrb[4].mxu1 }
 0x1cd   : > { %v18239_v56 = vadd.f32 %v3012_v31, %v2807_v53  ;;  %v2809_v59 = vpop.f32.mrb[5].mxu0  ;;  %v18243_v61 = vadd.f32 %v3020_v37, %v2860_v57  ;;  %v2862_v63 = vpop.f32.mrb[5].mxu1 }
 0x1ce   : > { %v18245_v58 = vadd.f32 %v3016_v38, %v2809_v59  ;;  %v2811_v62 = vpop.f32.mrb[6].mxu0  ;;  %v18249_v3 = vadd.f32 %v3024_v43, %v2862_v63  ;;  %v2864_v5 = vpop.f32.mrb[6].mxu1 }
 0x1cf   : > { %v18251_v4 = vadd.f32 %v3012_v31, %v2811_v62  ;;  %v2813_v6 = vpop.f32.mrb[7].mxu0  ;;  %v18255_v7 = vadd.f32 %v3020_v37, %v2864_v5  ;;  %v2866_v10 = vpop.f32.mrb[7].mxu1 }
 0x1d0   : > { %v18257_v9 = vadd.f32 %v3016_v38, %v2813_v6  ;;  %v18261_v13 = vadd.f32 %v3024_v43, %v2866_v10  ;;  %v18280_v38 = vsub.s32 %v3151_v23, %v18199_v25 }
 0x1d1   : > { %22075 = vst [vmem:[#allocation12_spill] sm:$0xff] %v18255_v7 }
 0x1d2   : > { %22076 = vst [vmem:[#allocation13_spill] sm:$0xff] %v18280_v38 }
 0x1dc   : > { %v2903_v31 = vpop.f32.mrb[8].mxu0  ;;  %v2956_v34 = vpop.f32.mrb[8].mxu1 }
 0x1dd   : > { %v3053_v33 = vadd.f32 %v18267_v21, %v2903_v31  ;;  %v2905_v35 = vpop.f32.mrb[9].mxu0  ;;  %v3055_v36 = vadd.f32 %v18269_v22, %v2956_v34  ;;  %v2958_v39 = vpop.f32.mrb[9].mxu1 }
 0x1de   : > { %v3054_v37 = vadd.f32 %v18271_v19, %v2905_v35  ;;  %v2907_v40 = vpop.f32.mrb[10].mxu0  ;;  %v3056_v43 = vadd.f32 %v18273_v24, %v2958_v39  ;;  %v2960_v45 = vpop.f32.mrb[10].mxu1 }
 0x1df   : > { %v3085_v29 = vmax.f32 %v3053_v33, 0.0  ;;  %v3061_v44 = vadd.f32 %v18267_v21, %v2907_v40  ;;  %v2909_v46 = vpop.f32.mrb[11].mxu0  ;;  %v3087_v41 = vmax.f32 %v3055_v36, 0.0  ;;  %v3063_v48 = vadd.f32 %v18269_v22, %v2960_v45  ;;  %v2962_v51 = vpop.f32.mrb[11].mxu1 }
 0x1e0   : > { %v3086_v47 = vmax.f32 %v3054_v37, 0.0  ;;  %v3062_v49 = vadd.f32 %v18271_v19, %v2909_v46  ;;  %v3088_v52 = vmax.f32 %v3056_v43, 0.0  ;;  %v3064_v54 = vadd.f32 %v18273_v24, %v2962_v51 }
 0x1e1   : > { %v3113_v25 = vmax.f32 %v3081_v50, %v3085_v29  ;;  %v3093_v53 = vmax.f32 %v3061_v44, 0.0  ;;  %v3115_v55 = vmax.f32 %v3083_v1, %v3087_v41  ;;  %v3095_v59 = vmax.f32 %v3063_v48, 0.0 }
 0x1e2   : > { %v3114_v57 = vmax.f32 %v3082_v2, %v3086_v47  ;;  %v3094_v60 = vmax.f32 %v3062_v49, 0.0  ;;  %v3116_v62 = vmax.f32 %v3084_v15, %v3088_v52  ;;  %v3096_v6 = vmax.f32 %v3064_v54, 0.0 }
 0x1e3   : > { %v3117_v5 = vmax.f32 %v3089_v0, %v3093_v53  ;;  %v18289_v20 = vmax.f32 %v3091_v11, %v3095_v59 }
 0x1e4   : > { %v3145_v10 = vcombine.low %v3113_v25, %v3114_v57  ;;  %v3146_v18 = vcombine.high %v3113_v25, %v3114_v57  ;;  %v3118_v23 = vmax.f32 %v3090_v12, %v3094_v60  ;;  %v2913_v50 = vpop.f32.mrb[12].mxu0  ;;  %v3147_v31 = vcombine.low %v3115_v55, %v3116_v62  ;;  %v2966_v2 = vpop.f32.mrb[12].mxu1 }
 0x1e5   : > { %v3148_v33 = vcombine.high %v3115_v55, %v3116_v62  ;;  %v18291_v34 = vmax.f32 %v3092_v14, %v3096_v6  ;;  %v18294_v1 = vadd.f32 %v18267_v21, %v2913_v50  ;;  %v18296_v35 = vpop.f32.mrb[13].mxu0  ;;  %v18300_v11 = vpop.f32.mrb[13].mxu1  ;;  %v18322_v47 = vadd.f32 %v18269_v22, %v2966_v2  ;;  %v15604_v50 = vld [vmem:[%s22050_s2 + $0x464] ss:$16 sps:$4 sm:$0xff]  }
 0x1e6   : > { %v3155_v15 = vrot.slane %v3145_v10, %v18280_v38  ;;  %v3162_v0 = vrot.slane %v3146_v18, %v18280_v38  ;;  %v3181_v36 = vcombine.low %v3117_v5, %v3118_v23  ;;  %v3182_v37 = vcombine.high %v3117_v5, %v3118_v23  ;;  %v18302_v12 = vpop.f32.mrb[14].mxu0  ;;  %v18310_v43 = vpop.f32.mrb[14].mxu1  ;;  %5245 = vmatprep.subr.bf16.mxu0 %v15604_v50  ;;  %v15610_v50 = vld [vmem:[%s22050_s2 + $0x484] ss:$16 sps:$4 sm:$0xff]  }
 0x1e7   : > { %v3169_v39 = vrot.slane %v3147_v31, %v18280_v38  ;;  %v3176_v14 = vrot.slane %v3148_v33, %v18280_v38  ;;  %v18312_v44 = vpop.f32.mrb[15].mxu0  ;;  %v18324_v48 = vpop.f32.mrb[15].mxu1  ;;  %v15607_v31 = vld [vmem:[%s22050_s2 + $0x46c] ss:$16 sps:$4 sm:$0xff]  }
 0x1e8   : > { %v18315_v45 = vrot.slane %v3181_v36, %v18280_v38  ;;  %v18318_v46 = vrot.slane %v3182_v37, %v18280_v38  ;;  %v15602_v36 = vld [vmem:[%s22050_s2 + $0x460] ss:$16 sps:$4 sm:$0xff]   ;;  %v15605_v37 = vld [vmem:[%s22050_s2 + $0x468] ss:$16 sps:$4 sm:$0xff]   ;;  %5331 = vmatprep.subr.bf16.mxu1 %v15607_v31 }
 0x1e9   : > { %v3177_v49 = vcombine.low %v3155_v15, %v3169_v39  ;;  %v3178_v51 = vcombine.high %v3155_v15, %v3169_v39  ;;  %v3179_v25 = vcombine.low %v3162_v0, %v3176_v14  ;;  %v3180_v52 = vcombine.high %v3162_v0, %v3176_v14  ;;  %5246 = vmatpush1.bf16.msra.mxu0 %v15602_v36 }
 0x1ea   : > { %v13346_v53 = vcombine.low %v3169_v39, %v3169_v39  ;;  %v13347_v54 = vcombine.high %v3169_v39, %v3169_v39  ;;  %v13348_v55 = vcombine.low %v3176_v14, %v3176_v14  ;;  %v13349_v57 = vcombine.high %v3176_v14, %v3176_v14  ;;  %5332 = vmatpush1.bf16.msra.mxu1 %v15605_v37  ;;  %v15611_v37 = vld [vmem:[%s22050_s2 + $0x488] ss:$16 sps:$4 sm:$0xff]  }
 0x1eb   : > { %v3296_v59 = vrot.slane %v3177_v49, %v18280_v38  ;;  %v3313_v60 = vrot.slane %v3178_v51, %v18280_v38  ;;  %v18329_v62 = vrot.slane %v3179_v25, %v18280_v38  ;;  %v18332_v5 = vrot.slane %v3180_v52, %v18280_v38  ;;  %5247 = vmatprep.subr.bf16.mxu0 %v15610_v50 }
 0x1ec   : > { %v3303_v6 = vrot.slane %v13346_v53, %v18280_v38  ;;  %v3320_v10 = vrot.slane %v13347_v54, %v18280_v38  ;;  %v18337_v18 = vrot.slane %v13348_v55, %v18280_v38  ;;  %v18340_v23 = vrot.slane %v13349_v57, %v18280_v38 }
 0x1ed   : > { %v3304_v33 = vcombine.high %v3296_v59, %v3296_v59  ;;  %v3321_v2 = vcombine.high %v3313_v60, %v3313_v60  ;;  %v3338_v15 = vcombine.high %v18329_v62, %v18329_v62  ;;  %v3355_v0 = vcombine.high %v18332_v5, %v18332_v5 }
 0x1ee   : > { %v3305_v39 = vcombine.high %v3303_v6, %v3303_v6  ;;  %v3322_v14 = vcombine.high %v3320_v10, %v3320_v10  ;;  %v3339_v49 = vcombine.high %v18337_v18, %v18337_v18  ;;  %v3626_v25 = vsel %vm3625_vm2, %v3296_v59, -inf }
 0x1ef   : > { %v3633_v52 = vsel %vm3625_vm2, %v3304_v33, -inf  ;;  %v3640_v53 = vsel %vm3625_vm2, %v3303_v6, -inf  ;;  %v3654_v54 = vsel %vm3625_vm2, %v3313_v60, -inf  ;;  %v3627_v55 = vrot.slane %v3626_v25, 4  ;;  %v15608_v60 = vld [vmem:[%s22050_s2 + $0x480] ss:$16 sps:$4 sm:$0xff]  }
 0x1f0   : > { %v3634_v57 = vrot.slane %v3633_v52, 4  ;;  %v3641_v63 = vrot.slane %v3640_v53, 4  ;;  %v3647_v42 = vsel %vm3625_vm2, %v3305_v39, -inf  ;;  %v3655_v59 = vrot.slane %v3654_v54, 4  ;;  %v15613_v39 = vld [vmem:[%s22050_s2 + $0x48c] ss:$16 sps:$4 sm:$0xff]   ;;  %5248 = vmatpush1.bf16.msra.mxu0 %v15608_v60 }
 0x1f1   : > { %v3648_v30 = vrot.slane %v3647_v42, 4  ;;  %v3661_v33 = vsel %vm3625_vm2, %v3321_v2, -inf  ;;  %v3668_v6 = vsel %vm3625_vm2, %v3320_v10, -inf  ;;  %v3628_v31 = vmax.f32 %v3626_v25, %v3627_v55  ;;  %5333 = vmatprep.subr.bf16.mxu1 %v15613_v39 }
 0x1f2   : > { %v3635_v36 = vmax.f32 %v3633_v52, %v3634_v57  ;;  %v3642_v17 = vmax.f32 %v3640_v53, %v3641_v63  ;;  %v3662_v16 = vrot.slane %v3661_v33, 4  ;;  %v3656_v8 = vmax.f32 %v3654_v54, %v3655_v59  ;;  %v15616_v53 = vld [vmem:[%s22050_s2 + $0x4a4] ss:$16 sps:$4 sm:$0xff]   ;;  %5334 = vmatpush1.bf16.msra.mxu1 %v15611_v37 }
 0x1f3   : > { %v3649_v2 = vmax.f32 %v3647_v42, %v3648_v30  ;;  %v3669_v10 = vrot.slane %v3668_v6, 4  ;;  %v3675_v41 = vsel %vm3625_vm2, %v3322_v14, -inf  ;;  %v3629_v29 = vrot.slane %v3628_v31, 2  ;;  %v15614_v30 = vld [vmem:[%s22050_s2 + $0x4a0] ss:$16 sps:$4 sm:$0xff]   ;;  %5249 = vmatprep.subr.bf16.mxu0 %v15616_v53 }
 0x1f4   : > { %v3636_v25 = vrot.slane %v3635_v36, 2  ;;  %v3643_v52 = vrot.slane %v3642_v17, 2  ;;  %v3663_v63 = vmax.f32 %v3661_v33, %v3662_v16  ;;  %v3657_v57 = vrot.slane %v3656_v8, 2  ;;  %v15617_v16 = vld [vmem:[%s22050_s2 + $0x4a8] ss:$16 sps:$4 sm:$0xff]   ;;  %5250 = vmatpush1.bf16.msra.mxu0 %v15614_v30 }
 0x1f5   : > { %v3650_v55 = vrot.slane %v3649_v2, 2  ;;  %v3670_v50 = vmax.f32 %v3668_v6, %v3669_v10  ;;  %v3676_v40 = vrot.slane %v3675_v41, 4  ;;  %v3630_v42 = vmax.f32 %v3628_v31, %v3629_v29  ;;  %v15619_v33 = vld [vmem:[%s22050_s2 + $0x4ac] ss:$16 sps:$4 sm:$0xff]  }
 0x1f6   : > { %v3637_v14 = vmax.f32 %v3635_v36, %v3636_v25  ;;  %v3644_v54 = vmax.f32 %v3642_v17, %v3643_v52  ;;  %v3664_v59 = vrot.slane %v3663_v63, 2  ;;  %v3658_v60 = vmax.f32 %v3656_v8, %v3657_v57  ;;  %5335 = vmatprep.subr.bf16.mxu1 %v15619_v33  ;;  %v15622_v17 = vld [vmem:[%s22050_s2 + $0x4c4] ss:$16 sps:$4 sm:$0xff]   ;;  %v15620_v8 = vld [vmem:[%s22050_s2 + $0x4c0] ss:$16 sps:$4 sm:$0xff]  }
 0x1f7   : > { %v3651_v6 = vmax.f32 %v3649_v2, %v3650_v55  ;;  %v3671_v37 = vrot.slane %v3670_v50, 2  ;;  %v3677_v39 = vmax.f32 %v3675_v41, %v3676_v40  ;;  %v3631_v10 = vrot.slane %v3630_v42, 1  ;;  %5336 = vmatpush1.bf16.msra.mxu1 %v15617_v16  ;;  %5251 = vmatprep.subr.bf16.mxu0 %v15622_v17  ;;  %v15623_v55 = vld [vmem:[%s22050_s2 + $0x4c8] ss:$16 sps:$4 sm:$0xff]   ;;  %v15625_v57 = vld [vmem:[%s22050_s2 + $0x4cc] ss:$16 sps:$4 sm:$0xff]  }
 0x1f8   : > { %v3638_v51 = vrot.slane %v3637_v14, 1  ;;  %v3645_v29 = vrot.slane %v3644_v54, 1  ;;  %v3665_v31 = vmax.f32 %v3663_v63, %v3664_v59  ;;  %v3659_v25 = vrot.slane %v3658_v60, 1  ;;  %5252 = vmatpush1.bf16.msra.mxu0 %v15620_v8  ;;  %5337 = vmatprep.subr.bf16.mxu1 %v15625_v57  ;;  %v15628_v33 = vld [vmem:[%s22050_s2 + $0x4e4] ss:$16 sps:$4 sm:$0xff]  }
 0x1f9   : > { %v3652_v36 = vrot.slane %v3651_v6, 1  ;;  %v3672_v52 = vmax.f32 %v3670_v50, %v3671_v37  ;;  %v3678_v53 = vrot.slane %v3677_v39, 2  ;;  %v18400_v40 = vmax.f32 %v3630_v42, %v3631_v10  ;;  %5253 = vmatprep.subr.bf16.mxu0 %v15628_v33  ;;  %v15629_v17 = vld [vmem:[%s22050_s2 + $0x4e8] ss:$16 sps:$4 sm:$0xff]  }
 0x1fa   : > { %v18402_v41 = vmax.f32 %v3637_v14, %v3638_v51  ;;  %v18404_v2 = vmax.f32 %v3644_v54, %v3645_v29  ;;  %v3666_v63 = vrot.slane %v3665_v31, 1  ;;  %v18414_v30 = vmax.f32 %v3658_v60, %v3659_v25 }
 0x1fb   : > { %v18412_v50 = vmax.f32 %v3651_v6, %v3652_v36  ;;  %v3673_v42 = vrot.slane %v3672_v52, 1  ;;  %v3679_v59 = vmax.f32 %v3677_v39, %v3678_v53  ;;  %v3682_v14 = vsel %vm3625_vm2, %v18329_v62, -inf  ;;  %5338 = vmatpush1.bf16.msra.mxu1 %v15623_v55  ;;  %v15626_v62 = vld [vmem:[%s22050_s2 + $0x4e0] ss:$16 sps:$4 sm:$0xff]  }
 0x1fc   : > { %v18416_v51 = vmax.f32 %v3665_v31, %v3666_v63  ;;  %v3689_v54 = vsel %vm3625_vm2, %v3338_v15, -inf  ;;  %v3696_v16 = vsel %vm3625_vm2, %v18337_v18, -inf  ;;  %v3683_v37 = vrot.slane %v3682_v14, 4  ;;  %5254 = vmatpush1.bf16.msra.mxu0 %v15626_v62  ;;  %v15634_v63 = vld [vmem:[%s22050_s2 + $0x504] ss:$16 sps:$4 sm:$0xff]  }
 0x1fd   : > { %v18429_v6 = vmax.f32 %v3672_v52, %v3673_v42  ;;  %v3680_v60 = vrot.slane %v3679_v59, 1  ;;  %v3690_v39 = vrot.slane %v3689_v54, 4  ;;  %v3697_v10 = vrot.slane %v3696_v16, 4  ;;  %5255 = vmatprep.subr.bf16.mxu0 %v15634_v63  ;;  %v15637_v62 = vld [vmem:[%s22050_s2 + $0x50c] ss:$16 sps:$4 sm:$0xff]  }
 0x1fe   : > { %v3703_v15 = vsel %vm3625_vm2, %v3339_v49, -inf  ;;  %v3710_v29 = vsel %vm3625_vm2, %v18332_v5, -inf  ;;  %v3717_v31 = vsel %vm3625_vm2, %v3355_v0, -inf  ;;  %v3684_v25 = vmax.f32 %v3682_v14, %v3683_v37  ;;  %v15631_v49 = vld [vmem:[%s22050_s2 + $0x4ec] ss:$16 sps:$4 sm:$0xff]  }
 0x1ff   : > { %v18447_v36 = vmax.f32 %v3679_v59, %v3680_v60  ;;  %v3691_v18 = vmax.f32 %v3689_v54, %v3690_v39  ;;  %v3704_v52 = vrot.slane %v3703_v15, 4  ;;  %v3698_v5 = vmax.f32 %v3696_v16, %v3697_v10  ;;  %5339 = vmatprep.subr.bf16.mxu1 %v15631_v49  ;;  %v15632_v14 = vld [vmem:[%s22050_s2 + $0x500] ss:$16 sps:$4 sm:$0xff]   ;;  %v15635_v39 = vld [vmem:[%s22050_s2 + $0x508] ss:$16 sps:$4 sm:$0xff]  }
 0x200   : > { %v3711_v53 = vrot.slane %v3710_v29, 4  ;;  %v3718_v0 = vrot.slane %v3717_v31, 4  ;;  %v3724_v8 = vsel %vm3625_vm2, %v18340_v23, -inf  ;;  %v3685_v55 = vrot.slane %v3684_v25, 2  ;;  %5340 = vmatpush1.bf16.msra.mxu1 %v15629_v17  ;;  %5256 = vmatpush1.bf16.msra.mxu0 %v15632_v14  ;;  %v15640_v17 = vld [vmem:[%s22050_s2 + $0x524] ss:$16 sps:$4 sm:$0xff]  }
 0x201   : > { %v3692_v57 = vrot.slane %v3691_v18, 2  ;;  %v3705_v42 = vmax.f32 %v3703_v15, %v3704_v52  ;;  %v3725_v59 = vrot.slane %v3724_v8, 4  ;;  %v3699_v54 = vrot.slane %v3698_v5, 2  ;;  %5341 = vmatprep.subr.bf16.mxu1 %v15637_v62  ;;  %5257 = vmatprep.subr.bf16.mxu0 %v15640_v17  ;;  %v15647_v17 = vld [vmem:[%s22050_s2 + $0x548] ss:$16 sps:$4 sm:$0xff]  }
 0x202   : > { %v3712_v16 = vmax.f32 %v3710_v29, %v3711_v53  ;;  %v3719_v33 = vmax.f32 %v3717_v31, %v3718_v0  ;;  %v22077_v60 = vcombine.high %v18340_v23, %v18340_v23  ;;  %v3686_v10 = vmax.f32 %v3684_v25, %v3685_v55  ;;  %v15638_v25 = vld [vmem:[%s22050_s2 + $0x520] ss:$16 sps:$4 sm:$0xff]  }
 0x203   : > { %v3693_v15 = vmax.f32 %v3691_v18, %v3692_v57  ;;  %v3706_v52 = vrot.slane %v3705_v42, 2  ;;  %v3726_v29 = vmax.f32 %v3724_v8, %v3725_v59  ;;  %v3700_v31 = vmax.f32 %v3698_v5, %v3699_v54  ;;  %v15641_v57 = vld [vmem:[%s22050_s2 + $0x528] ss:$16 sps:$4 sm:$0xff]   ;;  %v15643_v59 = vld [vmem:[%s22050_s2 + $0x52c] ss:$16 sps:$4 sm:$0xff]  }
 0x204   : > { %v3731_v37 = vsel %vm3625_vm2, %v22077_v60, -inf  ;;  %v3713_v49 = vrot.slane %v3712_v16, 2  ;;  %v3720_v23 = vrot.slane %v3719_v33, 2  ;;  %v3687_v0 = vrot.slane %v3686_v10, 1  ;;  %5342 = vmatpush1.bf16.msra.mxu1 %v15635_v39  ;;  %5258 = vmatpush1.bf16.msra.mxu0 %v15638_v25 }
 0x205   : > { %v3732_v53 = vrot.slane %v3731_v37, 4  ;;  %v3694_v63 = vrot.slane %v3693_v15, 1  ;;  %v3707_v60 = vmax.f32 %v3705_v42, %v3706_v52  ;;  %v3727_v32 = vrot.slane %v3726_v29, 2  ;;  %5343 = vmatprep.subr.bf16.mxu1 %v15643_v59 }
 0x206   : > { %v3701_v18 = vrot.slane %v3700_v31, 1  ;;  %v3714_v8 = vmax.f32 %v3712_v16, %v3713_v49  ;;  %v3721_v55 = vmax.f32 %v3719_v33, %v3720_v23  ;;  %v3688_v42 = vmax.f32 %v3686_v10, %v3687_v0  ;;  %v15644_v10 = vld [vmem:[%s22050_s2 + $0x540] ss:$16 sps:$4 sm:$0xff]  }
 0x207   : > { %v3733_v5 = vmax.f32 %v3731_v37, %v3732_v53  ;;  %v3695_v14 = vmax.f32 %v3693_v15, %v3694_v63  ;;  %v3708_v54 = vrot.slane %v3707_v60, 1  ;;  %v3728_v62 = vmax.f32 %v3726_v29, %v3727_v32  ;;  %v15646_v37 = vld [vmem:[%s22050_s2 + $0x544] ss:$16 sps:$4 sm:$0xff]  }
 0x208   : > { %v3702_v52 = vmax.f32 %v3700_v31, %v3701_v18  ;;  %v3715_v28 = vrot.slane %v3714_v8, 1  ;;  %v3722_v16 = vrot.slane %v3721_v55, 1  ;;  %v4155_v23 = vsel %vm4154_vm3, %v18414_v30, %v18400_v40  ;;  %5344 = vmatpush1.bf16.msra.mxu1 %v15641_v57  ;;  %v15649_v40 = vld [vmem:[%s22050_s2 + $0x54c] ss:$16 sps:$4 sm:$0xff]   ;;  %5259 = vmatprep.subr.bf16.mxu0 %v15646_v37  ;;  %v15650_v57 = vld [vmem:[%s22050_s2 + $0x560] ss:$16 sps:$4 sm:$0xff]  }
 0x209   : > { %v3734_v33 = vrot.slane %v3733_v5, 2  ;;  %v3709_v39 = vmax.f32 %v3707_v60, %v3708_v54  ;;  %v3729_v49 = vrot.slane %v3728_v62, 1  ;;  %v4168_v32 = vsel %vm4154_vm3, %v18416_v51, %v18402_v41  ;;  %5345 = vmatprep.subr.bf16.mxu1 %v15649_v40  ;;  %5260 = vmatpush1.bf16.msra.mxu0 %v15644_v10 }
 0x20a   : > { %v3716_v15 = vmax.f32 %v3714_v8, %v3715_v28  ;;  %v3723_v29 = vmax.f32 %v3721_v55, %v3722_v16  ;;  %v4157_v53 = vsel %vm4156_vm4, %v3688_v42, %v4155_v23  ;;  %v4169_v41 = vsel %vm4156_vm4, %v3695_v14, %v4168_v32 }
 0x20b   : > { %v3735_v31 = vmax.f32 %v3733_v5, %v3734_v33  ;;  %v3730_v30 = vmax.f32 %v3728_v62, %v3729_v49  ;;  %v4175_v28 = vsel %vm4154_vm3, %v18429_v6, %v18404_v2  ;;  %v4182_v51 = vsel %vm4154_vm3, %v18447_v36, %v18412_v50  ;;  %v15652_v2 = vld [vmem:[%s22050_s2 + $0x564] ss:$16 sps:$4 sm:$0xff]   ;;  %v15655_v50 = vld [vmem:[%s22050_s2 + $0x56c] ss:$16 sps:$4 sm:$0xff]  }
 0x20c   : > { %v18509_v63 = vsel %vm4158_vm5, %v3716_v15, %v4157_v53  ;;  %v18512_v60 = vsel %vm4158_vm5, %v3723_v29, %v4169_v41  ;;  %v4176_v25 = vsel %vm4156_vm4, %v3702_v52, %v4175_v28  ;;  %v4183_v36 = vsel %vm4156_vm4, %v3709_v39, %v4182_v51  ;;  %5346 = vmatpush1.bf16.msra.mxu1 %v15647_v17  ;;  %v15664_v29 = vld [vmem:[%s22050_s2 + $0x5a4] ss:$16 sps:$4 sm:$0xff]  }
 0x20d   : > { %v3736_v0 = vrot.slane %v3735_v31, 1  ;;  %v18522_v6 = vsel %vm4158_vm5, %v3730_v30, %v4176_v25  ;;  %v22078_v18 = vcombine.low %v18289_v20, %v18291_v34  ;;  %v22079_v55 = vcombine.high %v18289_v20, %v18291_v34  ;;  %5261 = vmatprep.subr.bf16.mxu0 %v15652_v2  ;;  %v15653_v20 = vld [vmem:[%s22050_s2 + $0x568] ss:$16 sps:$4 sm:$0xff]   ;;  %v15658_v34 = vld [vmem:[%s22050_s2 + $0x584] ss:$16 sps:$4 sm:$0xff]   ;;  %5347 = vmatprep.subr.bf16.mxu1 %v15655_v50 }
 0x20e   : > { %v22080_v42 = vmax.f32 %v18294_v1, 0.0  ;;  %v22081_v14 = vmax.f32 %v18239_v56, 0.0  ;;  %v18545_v52 = vadd.f32 %v18271_v19, %v18296_v35  ;;  %v15661_v35 = vld [vmem:[%s22050_s2 + $0x58c] ss:$16 sps:$4 sm:$0xff]   ;;  %5262 = vmatpush1.bf16.msra.mxu0 %v15650_v57  ;;  %v15659_v30 = vld [vmem:[%s22050_s2 + $0x588] ss:$16 sps:$4 sm:$0xff]  }
 0x20f   : > { %v3205_v8 = vrot.slane %v22078_v18, %v18280_v38  ;;  %v3212_v5 = vrot.slane %v22079_v55, %v18280_v38  ;;  %v3737_v59 = vmax.f32 %v3735_v31, %v3736_v0  ;;  %5263 = vmatprep.subr.bf16.mxu0 %v15658_v34  ;;  %v15667_v25 = vld [vmem:[%s22050_s2 + $0x5ac] ss:$16 sps:$4 sm:$0xff]  }
 0x210   : > { %v18540_v54 = vmax.f32 %v22081_v14, %v22080_v42  ;;  %5348 = vmatpush1.bf16.msra.mxu1 %v15653_v20  ;;  %v15670_v42 = vld [vmem:[%s22050_s2 + $0x5c4] ss:$16 sps:$4 sm:$0xff]  }
 0x211   : > { %v3213_v56 = vcombine.low %v18315_v45, %v3205_v8  ;;  %v3214_v1 = vcombine.high %v18315_v45, %v3205_v8  ;;  %v3215_v16 = vcombine.low %v18318_v46, %v3212_v5  ;;  %v3216_v33 = vcombine.high %v18318_v46, %v3212_v5  ;;  %v15656_v45 = vld [vmem:[%s22050_s2 + $0x580] ss:$16 sps:$4 sm:$0xff]   ;;  %5349 = vmatprep.subr.bf16.mxu1 %v15661_v35 }
 0x212   : > { %v18561_v37 = vsel %vm4158_vm5, %v3737_v59, %v4183_v36  ;;  %v13350_v39 = vcombine.low %v3205_v8, %v3205_v8  ;;  %v13351_v49 = vcombine.high %v3205_v8, %v3205_v8  ;;  %v13352_v23 = vcombine.low %v3212_v5, %v3212_v5  ;;  %5264 = vmatpush1.bf16.msra.mxu0 %v15656_v45  ;;  %v15662_v8 = vld [vmem:[%s22050_s2 + $0x5a0] ss:$16 sps:$4 sm:$0xff]  }
 0x213   : > { %v3364_v32 = vrot.slane %v3213_v56, %v18280_v38  ;;  %v3381_v46 = vrot.slane %v3214_v1, %v18280_v38  ;;  %v18569_v10 = vrot.slane %v3215_v16, %v18280_v38  ;;  %v13353_v15 = vcombine.high %v3212_v5, %v3212_v5  ;;  %5265 = vmatprep.subr.bf16.mxu0 %v15664_v29  ;;  %v15665_v1 = vld [vmem:[%s22050_s2 + $0x5a8] ss:$16 sps:$4 sm:$0xff]   ;;  %v15668_v29 = vld [vmem:[%s22050_s2 + $0x5c0] ss:$16 sps:$4 sm:$0xff]  }
 0x214   : > { %v3371_v31 = vrot.slane %v13350_v39, %v18280_v38  ;;  %v3388_v53 = vrot.slane %v13351_v49, %v18280_v38  ;;  %v18577_v17 = vrot.slane %v13352_v23, %v18280_v38  ;;  %v18580_v40 = vrot.slane %v3216_v33, %v18280_v38  ;;  %5350 = vmatpush1.bf16.msra.mxu1 %v15659_v30  ;;  %v15673_v49 = vld [vmem:[%s22050_s2 + $0x5cc] ss:$16 sps:$4 sm:$0xff]  }
 0x215   : > { %v3372_v41 = vcombine.high %v3364_v32, %v3364_v32  ;;  %v3389_v28 = vcombine.high %v3381_v46, %v3381_v46  ;;  %v3406_v51 = vcombine.high %v18569_v10, %v18569_v10  ;;  %v18588_v0 = vrot.slane %v13353_v15, %v18280_v38  ;;  %5351 = vmatprep.subr.bf16.mxu1 %v15667_v25 }
 0x216   : > { %v3373_v2 = vcombine.high %v3371_v31, %v3371_v31  ;;  %v3390_v50 = vcombine.high %v3388_v53, %v3388_v53  ;;  %v3407_v36 = vcombine.high %v18577_v17, %v18577_v17  ;;  %v3423_v18 = vcombine.high %v18580_v40, %v18580_v40  ;;  %5266 = vmatpush1.bf16.msra.mxu0 %v15662_v8  ;;  %v15671_v8 = vld [vmem:[%s22050_s2 + $0x5c8] ss:$16 sps:$4 sm:$0xff]  }
 0x217   : > { %v3424_v55 = vcombine.high %v18588_v0, %v18588_v0  ;;  %v3738_v5 = vsel %vm3625_vm2, %v3364_v32, -inf  ;;  %v3745_v57 = vsel %vm3625_vm2, %v3372_v41, -inf  ;;  %v3752_v59 = vsel %vm3625_vm2, %v3371_v31, -inf  ;;  %5267 = vmatprep.subr.bf16.mxu0 %v15670_v42 }
 0x218   : > { %v3739_v14 = vrot.slane %v3738_v5, 4  ;;  %v3746_v20 = vrot.slane %v3745_v57, 4  ;;  %v3753_v34 = vrot.slane %v3752_v59, 4  ;;  %v3759_v56 = vsel %vm3625_vm2, %v3373_v2, -inf  ;;  %5352 = vmatpush1.bf16.msra.mxu1 %v15665_v1  ;;  %v15674_v1 = vld [vmem:[%s22050_s2 + $0x5e0] ss:$16 sps:$4 sm:$0xff]  }
 0x219   : > { %v3760_v16 = vrot.slane %v3759_v56, 4  ;;  %v3766_v33 = vsel %vm3625_vm2, %v3381_v46, -inf  ;;  %v3773_v35 = vsel %vm3625_vm2, %v3389_v28, -inf  ;;  %v3780_v39 = vsel %vm3625_vm2, %v3388_v53, -inf  ;;  %v15676_v53 = vld [vmem:[%s22050_s2 + $0x5e4] ss:$16 sps:$4 sm:$0xff]   ;;  %5353 = vmatprep.subr.bf16.mxu1 %v15673_v49 }
 0x21a   : > { %v3740_v23 = vmax.f32 %v3738_v5, %v3739_v14  ;;  %v3747_v45 = vmax.f32 %v3745_v57, %v3746_v20  ;;  %v3754_v32 = vmax.f32 %v3752_v59, %v3753_v34  ;;  %v3767_v15 = vrot.slane %v3766_v33, 4  ;;  %5268 = vmatpush1.bf16.msra.mxu0 %v15668_v29 }
 0x21b   : > { %v3761_v31 = vmax.f32 %v3759_v56, %v3760_v16  ;;  %v3774_v46 = vrot.slane %v3773_v35, 4  ;;  %v3781_v30 = vrot.slane %v3780_v39, 4  ;;  %v3787_v41 = vsel %vm3625_vm2, %v3390_v50, -inf  ;;  %v15679_v50 = vld [vmem:[%s22050_s2 + $0x5ec] ss:$16 sps:$4 sm:$0xff]   ;;  %5269 = vmatprep.subr.bf16.mxu0 %v15676_v53 }
 0x21c   : > { %v3741_v28 = vrot.slane %v3740_v23, 2  ;;  %v3748_v25 = vrot.slane %v3747_v45, 2  ;;  %v3755_v2 = vrot.slane %v3754_v32, 2  ;;  %v3768_v5 = vmax.f32 %v3766_v33, %v3767_v15  ;;  %5354 = vmatpush1.bf16.msra.mxu1 %v15671_v8 }
 0x21d   : > { %v3762_v57 = vrot.slane %v3761_v31, 2  ;;  %v3775_v59 = vmax.f32 %v3773_v35, %v3774_v46  ;;  %v3782_v14 = vmax.f32 %v3780_v39, %v3781_v30  ;;  %v3788_v20 = vrot.slane %v3787_v41, 4  ;;  %v15682_v39 = vld [vmem:[%s22050_s2 + $0x604] ss:$16 sps:$4 sm:$0xff]   ;;  %5355 = vmatprep.subr.bf16.mxu1 %v15679_v50 }
 0x21e   : > { %v3742_v42 = vmax.f32 %v3740_v23, %v3741_v28  ;;  %v3749_v34 = vmax.f32 %v3747_v45, %v3748_v25  ;;  %v3756_v56 = vmax.f32 %v3754_v32, %v3755_v2  ;;  %v3769_v16 = vrot.slane %v3768_v5, 2  ;;  %v15677_v32 = vld [vmem:[%s22050_s2 + $0x5e8] ss:$16 sps:$4 sm:$0xff]   ;;  %5270 = vmatpush1.bf16.msra.mxu0 %v15674_v1 }
 0x21f   : > { %v3763_v33 = vmax.f32 %v3761_v31, %v3762_v57  ;;  %v3776_v15 = vrot.slane %v3775_v59, 2  ;;  %v3783_v62 = vrot.slane %v3782_v14, 2  ;;  %v3789_v35 = vmax.f32 %v3787_v41, %v3788_v20  ;;  %v15685_v41 = vld [vmem:[%s22050_s2 + $0x60c] ss:$16 sps:$4 sm:$0xff]   ;;  %5282 = vmatprep.subr.bf16.mxu0 %v15682_v39 }
 0x220   : > { %v3743_v49 = vrot.slane %v3742_v42, 1  ;;  %v3750_v46 = vrot.slane %v3749_v34, 1  ;;  %v3757_v23 = vrot.slane %v3756_v56, 1  ;;  %v3770_v45 = vmax.f32 %v3768_v5, %v3769_v16  ;;  %5356 = vmatpush1.bf16.msra.mxu1 %v15677_v32 }
 0x221   : > { %v3764_v29 = vrot.slane %v3763_v33, 1  ;;  %v3777_v30 = vmax.f32 %v3775_v59, %v3776_v15  ;;  %v3784_v31 = vmax.f32 %v3782_v14, %v3783_v62  ;;  %v3790_v28 = vrot.slane %v3789_v35, 2  ;;  %5368 = vmatprep.subr.bf16.mxu1 %v15685_v41 }
 0x222   : > { %v18643_v53 = vmax.f32 %v3742_v42, %v3743_v49  ;;  %v18645_v25 = vmax.f32 %v3749_v34, %v3750_v46  ;;  %v18647_v2 = vmax.f32 %v3756_v56, %v3757_v23  ;;  %v3771_v5 = vrot.slane %v3770_v45, 1 }
 0x223   : > { %v18649_v8 = vmax.f32 %v3763_v33, %v3764_v29  ;;  %v3778_v57 = vrot.slane %v3777_v30, 1  ;;  %v3785_v20 = vrot.slane %v3784_v31, 1  ;;  %v3791_v59 = vmax.f32 %v3789_v35, %v3790_v28 }
 0x224   : > { %v18651_v62 = vmax.f32 %v3770_v45, %v3771_v5  ;;  %v3794_v14 = vsel %vm3625_vm2, %v18569_v10, -inf  ;;  %v3801_v50 = vsel %vm3625_vm2, %v3406_v51, -inf  ;;  %v3808_v42 = vsel %vm3625_vm2, %v18577_v17, -inf }
 0x225   : > { %v18661_v34 = vmax.f32 %v3777_v30, %v3778_v57  ;;  %v18663_v56 = vmax.f32 %v3784_v31, %v3785_v20  ;;  %v3792_v16 = vrot.slane %v3791_v59, 1  ;;  %v3795_v1 = vrot.slane %v3794_v14, 4 }
 0x226   : > { %v3802_v33 = vrot.slane %v3801_v50, 4  ;;  %v3809_v15 = vrot.slane %v3808_v42, 4  ;;  %v3815_v10 = vsel %vm3625_vm2, %v3407_v36, -inf  ;;  %v3822_v51 = vsel %vm3625_vm2, %v18580_v40, -inf }
 0x227   : > { %v18671_v35 = vmax.f32 %v3791_v59, %v3792_v16  ;;  %v3796_v39 = vmax.f32 %v3794_v14, %v3795_v1  ;;  %v3816_v49 = vrot.slane %v3815_v10, 4  ;;  %v3823_v46 = vrot.slane %v3822_v51, 4 }
 0x228   : > { %v3803_v23 = vmax.f32 %v3801_v50, %v3802_v33  ;;  %v3810_v45 = vmax.f32 %v3808_v42, %v3809_v15  ;;  %v3829_v32 = vsel %vm3625_vm2, %v3423_v18, -inf  ;;  %v3836_v17 = vsel %vm3625_vm2, %v18588_v0, -inf }
 0x229   : > { %v3797_v36 = vrot.slane %v3796_v39, 2  ;;  %v3817_v29 = vmax.f32 %v3815_v10, %v3816_v49  ;;  %v3824_v30 = vmax.f32 %v3822_v51, %v3823_v46  ;;  %v3830_v31 = vrot.slane %v3829_v32, 4 }
 0x22a   : > { %v3804_v28 = vrot.slane %v3803_v23, 2  ;;  %v3811_v41 = vrot.slane %v3810_v45, 2  ;;  %v3837_v5 = vrot.slane %v3836_v17, 4  ;;  %v3843_v57 = vsel %vm3625_vm2, %v3424_v55, -inf }
 0x22b   : > { %v3798_v40 = vmax.f32 %v3796_v39, %v3797_v36  ;;  %v3818_v20 = vrot.slane %v3817_v29, 2  ;;  %v3825_v18 = vrot.slane %v3824_v30, 2  ;;  %v3831_v59 = vmax.f32 %v3829_v32, %v3830_v31 }
 0x22c   : > { %v3805_v14 = vmax.f32 %v3803_v23, %v3804_v28  ;;  %v3812_v50 = vmax.f32 %v3810_v45, %v3811_v41  ;;  %v3838_v42 = vmax.f32 %v3836_v17, %v3837_v5  ;;  %v3844_v16 = vrot.slane %v3843_v57, 4 }
 0x22d   : > { %v3799_v1 = vrot.slane %v3798_v40, 1  ;;  %v3819_v33 = vmax.f32 %v3817_v29, %v3818_v20  ;;  %v3826_v15 = vmax.f32 %v3824_v30, %v3825_v18  ;;  %v3832_v10 = vrot.slane %v3831_v59, 2 }
 0x22e   : > { %v3806_v51 = vrot.slane %v3805_v14, 1  ;;  %v3813_v49 = vrot.slane %v3812_v50, 1  ;;  %v3839_v46 = vrot.slane %v3838_v42, 2  ;;  %v3845_v27 = vmax.f32 %v3843_v57, %v3844_v16 }
 0x22f   : > { %v3800_v26 = vmax.f32 %v3798_v40, %v3799_v1  ;;  %v3820_v0 = vrot.slane %v3819_v33, 1  ;;  %v3827_v7 = vrot.slane %v3826_v15, 1  ;;  %v3833_v55 = vmax.f32 %v3831_v59, %v3832_v10  ;;  %v22087_v10 = vld [vmem:[#allocation13_spill] sm:$0xff] }
 0x230   : > { %v3807_v39 = vmax.f32 %v3805_v14, %v3806_v51  ;;  %v3814_v36 = vmax.f32 %v3812_v50, %v3813_v49  ;;  %v3840_v38 = vmax.f32 %v3838_v42, %v3839_v46  ;;  %v3846_v32 = vrot.slane %v3845_v27, 2  ;;  %v22088_v49 = vld [vmem:[#allocation12_spill] sm:$0xff] }
 0x231   : > { %v3821_v23 = vmax.f32 %v3819_v33, %v3820_v0  ;;  %v3828_v45 = vmax.f32 %v3826_v15, %v3827_v7  ;;  %v3834_v17 = vrot.slane %v3833_v55, 1  ;;  %v4161_v29 = vsel %vm4160_vm6, %v18643_v53, %v18509_v63 }
 0x232   : > { %v3841_v30 = vrot.slane %v3840_v38, 1  ;;  %v3847_v31 = vmax.f32 %v3845_v27, %v3846_v32  ;;  %v4163_v28 = vsel %vm4162_vm7, %v18651_v62, %v4161_v29  ;;  %v4171_v41 = vsel %vm4160_vm6, %v18645_v25, %v18512_v60 }
 0x233   : > { %v3835_v5 = vmax.f32 %v3833_v55, %v3834_v17  ;;  %v4165_v57 = vsel %vm4164_vm8, %v3800_v26, %v4163_v28  ;;  %v4172_v7 = vsel %vm4162_vm7, %v18661_v34, %v4171_v41  ;;  %v4178_v40 = vsel %vm4160_vm6, %v18647_v2, %v18522_v6 }
 0x234   : > { %v3842_v63 = vmax.f32 %v3840_v38, %v3841_v30  ;;  %v3848_v53 = vrot.slane %v3847_v31, 1  ;;  %v4167_v27 = vsel %vm4166_vm9, %v3828_v45, %v4165_v57  ;;  %v4173_v62 = vsel %vm4164_vm8, %v3807_v39, %v4172_v7 }
 0x235   : > { %v4174_v20 = vsel %vm4166_vm9, %v3835_v5, %v4173_v62  ;;  %v4179_v60 = vsel %vm4162_vm7, %v18663_v56, %v4178_v40  ;;  %v4185_v26 = vsel %vm4160_vm6, %v18649_v8, %v18561_v37  ;;  %4225 = vst [vmem:[#allocation3 + $0x20] sm:$0xff] %v4167_v27  ;;  %v22082_v25 = vmax.f32 %v18322_v47, 0.0 }
 0x236   : > { %v22083_v6 = vmax.f32 %v18243_v61, 0.0  ;;  %v3849_v2 = vmax.f32 %v3847_v31, %v3848_v53  ;;  %v4180_v34 = vsel %vm4164_vm8, %v3814_v36, %v4179_v60  ;;  %v4186_v18 = vsel %vm4162_vm7, %v18671_v35, %v4185_v26  ;;  %4226 = vst [vmem:[#allocation3 + $0x28] sm:$0xff] %v4174_v20 }
 0x237   : > { %v3102_v59 = vmax.f32 %v18545_v52, 0.0  ;;  %v4181_v56 = vsel %vm4166_vm9, %v3842_v63, %v4180_v34  ;;  %v4187_v14 = vsel %vm4164_vm8, %v3821_v23, %v4186_v18  ;;  %v3072_v37 = vadd.f32 %v18273_v24, %v18300_v11 }
 0x238   : > { %v3123_v38 = vmax.f32 %v22083_v6, %v22082_v25  ;;  %v3077_v61 = vadd.f32 %v18267_v21, %v18302_v12  ;;  %v4188_v47 = vsel %vm4166_vm9, %v3849_v2, %v4187_v14  ;;  %4227 = vst [vmem:[#allocation3 + $0x30] sm:$0xff] %v4181_v56  ;;  %v22084_v8 = vmax.f32 %v18245_v58, 0.0 }
 0x239   : > { %v3079_v35 = vadd.f32 %v18269_v22, %v18310_v43  ;;  %v3078_v52 = vadd.f32 %v18271_v19, %v18312_v44  ;;  %v3106_v42 = vmax.f32 %v18257_v9, 0.0  ;;  %4228 = vst [vmem:[#allocation3 + $0x38] sm:$0xff] %v4188_v47  ;;  %v3104_v16 = vmax.f32 %v3072_v37, 0.0 }
 0x23a   : > { %v3122_v50 = vmax.f32 %v22084_v8, %v3102_v59  ;;  %v3109_v11 = vmax.f32 %v3077_v61, 0.0  ;;  %v3080_v21 = vadd.f32 %v18273_v24, %v18324_v48  ;;  %v3108_v15 = vmax.f32 %v18261_v13, 0.0 }
 0x23b   : > { %v3111_v58 = vmax.f32 %v3079_v35, 0.0  ;;  %v3110_v33 = vmax.f32 %v3078_v52, 0.0  ;;  %v22085_v22 = vmax.f32 %v18249_v3, 0.0  ;;  %v22086_v19 = vmax.f32 %v18251_v4, 0.0 }
 0x23c   : > { %v3217_v12 = vcombine.low %v18540_v54, %v3122_v50  ;;  %v3218_v1 = vcombine.high %v18540_v54, %v3122_v50  ;;  %v3112_v44 = vmax.f32 %v3080_v21, 0.0  ;;  %v22089_v46 = vmax.f32 %v22088_v49, 0.0 }
 0x23d   : > { %v3124_v43 = vmax.f32 %v22085_v22, %v3104_v16  ;;  %v3125_v9 = vmax.f32 %v22086_v19, %v3109_v11  ;;  %v3126_v48 = vmax.f32 %v3106_v42, %v3110_v33 }
 0x23e   : > { %v3227_v51 = vrot.slane %v3217_v12, %v22087_v10  ;;  %v18739_v24 = vmax.f32 %v22089_v46, %v3111_v58  ;;  %v3234_v54 = vrot.slane %v3218_v1, %v22087_v10  ;;  %v18742_v39 = vmax.f32 %v3108_v15, %v3112_v44 }
 0x23f   : > { %v3219_v0 = vcombine.low %v3123_v38, %v3124_v43  ;;  %v3220_v55 = vcombine.high %v3123_v38, %v3124_v43  ;;  %v3253_v13 = vcombine.low %v3125_v9, %v3126_v48  ;;  %v3254_v3 = vcombine.high %v3125_v9, %v3126_v48 }
 0x240   : > { %v3255_v32 = vcombine.low %v18739_v24, %v18742_v39  ;;  %v3256_v23 = vcombine.high %v18739_v24, %v18742_v39 }
 0x241   : > { %v3241_v36 = vrot.slane %v3219_v0, %v22087_v10  ;;  %v3248_v4 = vrot.slane %v3220_v55, %v22087_v10  ;;  %v18751_v45 = vrot.slane %v3253_v13, %v22087_v10  ;;  %v18754_v17 = vrot.slane %v3254_v3, %v22087_v10 }
 0x243   : > { %v3249_v29 = vcombine.low %v3227_v51, %v3241_v36  ;;  %v3250_v30 = vcombine.high %v3227_v51, %v3241_v36  ;;  %v3251_v31 = vcombine.low %v3234_v54, %v3248_v4  ;;  %v3252_v28 = vcombine.high %v3234_v54, %v3248_v4 }
 0x244   : > { %v13354_v41 = vcombine.low %v3241_v36, %v3241_v36  ;;  %v13355_v5 = vcombine.high %v3241_v36, %v3241_v36  ;;  %v13356_v57 = vcombine.low %v3248_v4, %v3248_v4  ;;  %v13357_v7 = vcombine.high %v3248_v4, %v3248_v4 }
 0x245   : > { %v3432_v40 = vrot.slane %v3249_v29, %v22087_v10  ;;  %v3449_v63 = vrot.slane %v3250_v30, %v22087_v10  ;;  %v18759_v53 = vrot.slane %v3251_v31, %v22087_v10  ;;  %v18762_v27 = vrot.slane %v3252_v28, %v22087_v10 }
 0x246   : > { %v3439_v62 = vrot.slane %v13354_v41, %v22087_v10  ;;  %v3456_v20 = vrot.slane %v13355_v5, %v22087_v10  ;;  %v18767_v60 = vrot.slane %v13356_v57, %v22087_v10  ;;  %v18770_v26 = vrot.slane %v13357_v7, %v22087_v10 }
 0x247   : > { %v3440_v25 = vcombine.high %v3432_v40, %v3432_v40  ;;  %v3457_v6 = vcombine.high %v3449_v63, %v3449_v63  ;;  %v3474_v38 = vcombine.high %v18759_v53, %v18759_v53  ;;  %v3491_v2 = vcombine.high %v18762_v27, %v18762_v27 }
 0x248   : > { %v3441_v34 = vcombine.high %v3439_v62, %v3439_v62  ;;  %v3458_v18 = vcombine.high %v3456_v20, %v3456_v20  ;;  %v3475_v59 = vcombine.high %v18767_v60, %v18767_v60  ;;  %v3492_v56 = vcombine.high %v18770_v26, %v18770_v26 }
 0x249   : > { %v3850_v14 = vsel %vm3625_vm2, %v3432_v40, -inf  ;;  %v3857_v37 = vsel %vm3625_vm2, %v3440_v25, -inf  ;;  %v3864_v61 = vsel %vm3625_vm2, %v3439_v62, -inf  ;;  %v3878_v47 = vsel %vm3625_vm2, %v3449_v63, -inf }
 0x24a   : > { %v3851_v8 = vrot.slane %v3850_v14, 4  ;;  %v3858_v50 = vrot.slane %v3857_v37, 4  ;;  %v3865_v35 = vrot.slane %v3864_v61, 4  ;;  %v3871_v52 = vsel %vm3625_vm2, %v3441_v34, -inf }
 0x24b   : > { %v3872_v42 = vrot.slane %v3871_v52, 4  ;;  %v3879_v16 = vrot.slane %v3878_v47, 4  ;;  %v3885_v11 = vsel %vm3625_vm2, %v3457_v6, -inf  ;;  %v3892_v21 = vsel %vm3625_vm2, %v3456_v20, -inf }
 0x24c   : > { %v3852_v12 = vmax.f32 %v3850_v14, %v3851_v8  ;;  %v3859_v1 = vmax.f32 %v3857_v37, %v3858_v50  ;;  %v3866_v58 = vmax.f32 %v3864_v61, %v3865_v35  ;;  %v3886_v33 = vrot.slane %v3885_v11, 4 }
 0x24d   : > { %v3873_v15 = vmax.f32 %v3871_v52, %v3872_v42  ;;  %v3880_v22 = vmax.f32 %v3878_v47, %v3879_v16  ;;  %v3893_v43 = vrot.slane %v3892_v21, 4  ;;  %v3899_v19 = vsel %vm3625_vm2, %v3458_v18, -inf }
 0x24e   : > { %v3853_v9 = vrot.slane %v3852_v12, 2  ;;  %v3860_v44 = vrot.slane %v3859_v1, 2  ;;  %v3867_v51 = vrot.slane %v3866_v58, 2  ;;  %v3887_v49 = vmax.f32 %v3885_v11, %v3886_v33 }
 0x24f   : > { %v3874_v46 = vrot.slane %v3873_v15, 2  ;;  %v3881_v48 = vrot.slane %v3880_v22, 2  ;;  %v3894_v54 = vmax.f32 %v3892_v21, %v3893_v43  ;;  %v3900_v0 = vrot.slane %v3899_v19, 4 }
 0x250   : > { %v3854_v55 = vmax.f32 %v3852_v12, %v3853_v9  ;;  %v3861_v13 = vmax.f32 %v3859_v1, %v3860_v44  ;;  %v3868_v3 = vmax.f32 %v3866_v58, %v3867_v51  ;;  %v3888_v36 = vrot.slane %v3887_v49, 2 }
 0x251   : > { %v3875_v4 = vmax.f32 %v3873_v15, %v3874_v46  ;;  %v3882_v29 = vmax.f32 %v3880_v22, %v3881_v48  ;;  %v3895_v30 = vrot.slane %v3894_v54, 2  ;;  %v3901_v31 = vmax.f32 %v3899_v19, %v3900_v0 }
 0x252   : > { %v3855_v28 = vrot.slane %v3854_v55, 1  ;;  %v3862_v41 = vrot.slane %v3861_v13, 1  ;;  %v3869_v5 = vrot.slane %v3868_v3, 1  ;;  %v3889_v57 = vmax.f32 %v3887_v49, %v3888_v36 }
 0x253   : > { %v3876_v7 = vrot.slane %v3875_v4, 1  ;;  %v3883_v40 = vrot.slane %v3882_v29, 1  ;;  %v3896_v63 = vmax.f32 %v3894_v54, %v3895_v30  ;;  %v3902_v62 = vrot.slane %v3901_v31, 2 }
 0x254   : > { %v18788_v20 = vmax.f32 %v3854_v55, %v3855_v28  ;;  %v18790_v25 = vmax.f32 %v3861_v13, %v3862_v41  ;;  %v18792_v6 = vmax.f32 %v3868_v3, %v3869_v5  ;;  %v3890_v34 = vrot.slane %v3889_v57, 1 }
 0x255   : > { %v18794_v18 = vmax.f32 %v3875_v4, %v3876_v7  ;;  %v3884_v14 = vmax.f32 %v3882_v29, %v3883_v40  ;;  %v3897_v37 = vrot.slane %v3896_v63, 1  ;;  %v3903_v61 = vmax.f32 %v3901_v31, %v3902_v62 }
 0x256   : > { %v3891_v47 = vmax.f32 %v3889_v57, %v3890_v34  ;;  %v3906_v8 = vsel %vm3625_vm2, %v18759_v53, -inf  ;;  %v3913_v50 = vsel %vm3625_vm2, %v3474_v38, -inf  ;;  %v3920_v35 = vsel %vm3625_vm2, %v18767_v60, -inf }
 0x257   : > { %v3898_v52 = vmax.f32 %v3896_v63, %v3897_v37  ;;  %v3904_v42 = vrot.slane %v3903_v61, 1  ;;  %v3907_v16 = vrot.slane %v3906_v8, 4  ;;  %v3914_v11 = vrot.slane %v3913_v50, 4 }
 0x258   : > { %v3921_v21 = vrot.slane %v3920_v35, 4  ;;  %v3927_v12 = vsel %vm3625_vm2, %v3475_v59, -inf  ;;  %v3934_v1 = vsel %vm3625_vm2, %v18762_v27, -inf  ;;  %v3941_v53 = vsel %vm3625_vm2, %v3491_v2, -inf }
 0x259   : > { %v3905_v38 = vmax.f32 %v3903_v61, %v3904_v42  ;;  %v3908_v58 = vmax.f32 %v3906_v8, %v3907_v16  ;;  %v3915_v33 = vmax.f32 %v3913_v50, %v3914_v11  ;;  %v3928_v15 = vrot.slane %v3927_v12, 4 }
 0x25a   : > { %v3922_v22 = vmax.f32 %v3920_v35, %v3921_v21  ;;  %v3935_v43 = vrot.slane %v3934_v1, 4  ;;  %v3942_v19 = vrot.slane %v3941_v53, 4  ;;  %v3948_v60 = vsel %vm3625_vm2, %v18770_v26, -inf }
 0x25b   : > { %v3909_v9 = vrot.slane %v3908_v58, 2  ;;  %v3916_v59 = vrot.slane %v3915_v33, 2  ;;  %v3929_v44 = vmax.f32 %v3927_v12, %v3928_v15  ;;  %v3949_v51 = vrot.slane %v3948_v60, 4 }
 0x25c   : > { %v3923_v49 = vrot.slane %v3922_v22, 2  ;;  %v3936_v46 = vmax.f32 %v3934_v1, %v3935_v43  ;;  %v3943_v48 = vmax.f32 %v3941_v53, %v3942_v19  ;;  %v3955_v27 = vsel %vm3625_vm2, %v3492_v56, -inf }
 0x25d   : > { %v3910_v2 = vmax.f32 %v3908_v58, %v3909_v9  ;;  %v3917_v54 = vmax.f32 %v3915_v33, %v3916_v59  ;;  %v3930_v0 = vrot.slane %v3929_v44, 2  ;;  %v3950_v55 = vmax.f32 %v3948_v60, %v3949_v51 }
 0x25e   : > { %v3924_v13 = vmax.f32 %v3922_v22, %v3923_v49  ;;  %v3937_v3 = vrot.slane %v3936_v46, 2  ;;  %v3944_v36 = vrot.slane %v3943_v48, 2  ;;  %v3956_v4 = vrot.slane %v3955_v27, 4 }
 0x25f   : > { %v3911_v29 = vrot.slane %v3910_v2, 1  ;;  %v3918_v30 = vrot.slane %v3917_v54, 1  ;;  %v3931_v31 = vmax.f32 %v3929_v44, %v3930_v0  ;;  %v3951_v28 = vrot.slane %v3950_v55, 2 }
 0x260   : > { %v3925_v41 = vrot.slane %v3924_v13, 1  ;;  %v3938_v5 = vmax.f32 %v3936_v46, %v3937_v3  ;;  %v3945_v57 = vmax.f32 %v3943_v48, %v3944_v36  ;;  %v3957_v7 = vmax.f32 %v3955_v27, %v3956_v4 }
 0x261   : > { %v3912_v40 = vmax.f32 %v3910_v2, %v3911_v29  ;;  %v3919_v26 = vmax.f32 %v3917_v54, %v3918_v30  ;;  %v3932_v63 = vrot.slane %v3931_v31, 1  ;;  %v3952_v56 = vmax.f32 %v3950_v55, %v3951_v28 }
 0x262   : > { %v3926_v62 = vmax.f32 %v3924_v13, %v3925_v41  ;;  %v3939_v34 = vrot.slane %v3938_v5, 1  ;;  %v3946_v37 = vrot.slane %v3945_v57, 1  ;;  %v3958_v61 = vrot.slane %v3957_v7, 2 }
 0x263   : > { %v3933_v8 = vmax.f32 %v3931_v31, %v3932_v63  ;;  %v3953_v50 = vrot.slane %v3952_v56, 1  ;;  %v4189_v35 = vsel %vm4154_vm3, %v3884_v14, %v18788_v20  ;;  %v4196_v42 = vsel %vm4154_vm3, %v3891_v47, %v18790_v25 }
 0x264   : > { %v3940_v16 = vmax.f32 %v3938_v5, %v3939_v34  ;;  %v3947_v11 = vmax.f32 %v3945_v57, %v3946_v37  ;;  %v3959_v21 = vmax.f32 %v3957_v7, %v3958_v61  ;;  %v4190_v12 = vsel %vm4156_vm4, %v3912_v40, %v4189_v35 }
 0x265   : > { %v3954_v1 = vmax.f32 %v3952_v56, %v3953_v50  ;;  %v4197_v53 = vsel %vm4156_vm4, %v3919_v26, %v4196_v42  ;;  %v4203_v58 = vsel %vm4154_vm3, %v3898_v52, %v18792_v6  ;;  %v4210_v33 = vsel %vm4154_vm3, %v3905_v38, %v18794_v18 }
 0x266   : > { %v3960_v15 = vrot.slane %v3959_v21, 1  ;;  %v18828_v20 = vsel %vm4158_vm5, %v3940_v16, %v4190_v12  ;;  %v18831_v25 = vsel %vm4158_vm5, %v3947_v11, %v4197_v53  ;;  %v4204_v14 = vsel %vm4156_vm4, %v3926_v62, %v4203_v58 }
 0x267   : > { %v18835_v47 = vsel %vm4158_vm5, %v3954_v1, %v4204_v14  ;;  %v4211_v22 = vsel %vm4156_vm4, %v3933_v8, %v4210_v33  ;;  %v3277_v6 = vrot.slane %v3255_v32, %v22087_v10  ;;  %v3284_v18 = vrot.slane %v3256_v23, %v22087_v10 }
 0x268   : > { %v3961_v52 = vmax.f32 %v3959_v21, %v3960_v15 }
 0x269   : > { %v3285_v38 = vcombine.low %v18751_v45, %v3277_v6  ;;  %v3286_v43 = vcombine.high %v18751_v45, %v3277_v6  ;;  %v3287_v19 = vcombine.low %v18754_v17, %v3284_v18  ;;  %v3288_v60 = vcombine.high %v18754_v17, %v3284_v18 }
 0x26a   : > { %v18851_v9 = vsel %vm4158_vm5, %v3961_v52, %v4211_v22  ;;  %v13358_v59 = vcombine.low %v3277_v6, %v3277_v6  ;;  %v13359_v44 = vcombine.high %v3277_v6, %v3277_v6  ;;  %v13360_v32 = vcombine.low %v3284_v18, %v3284_v18 }
 0x26b   : > { %v3500_v51 = vrot.slane %v3285_v38, %v22087_v10  ;;  %v3517_v24 = vrot.slane %v3286_v43, %v22087_v10  ;;  %v18856_v39 = vrot.slane %v3287_v19, %v22087_v10  ;;  %v13361_v23 = vcombine.high %v3284_v18, %v3284_v18 }
 0x26c   : > { %v3507_v45 = vrot.slane %v13358_v59, %v22087_v10  ;;  %v3524_v49 = vrot.slane %v13359_v44, %v22087_v10  ;;  %v18861_v17 = vrot.slane %v13360_v32, %v22087_v10  ;;  %v18864_v46 = vrot.slane %v3288_v60, %v22087_v10 }
 0x26d   : > { %v3508_v48 = vcombine.high %v3500_v51, %v3500_v51  ;;  %v3525_v27 = vcombine.high %v3517_v24, %v3517_v24  ;;  %v3542_v2 = vcombine.high %v18856_v39, %v18856_v39  ;;  %v18871_v13 = vrot.slane %v13361_v23, %v22087_v10 }
 0x26e   : > { %v3509_v54 = vcombine.high %v3507_v45, %v3507_v45  ;;  %v3526_v0 = vcombine.high %v3524_v49, %v3524_v49  ;;  %v3543_v55 = vcombine.high %v18861_v17, %v18861_v17  ;;  %v3559_v3 = vcombine.high %v18864_v46, %v18864_v46 }
 0x26f   : > { %v3962_v36 = vsel %vm3625_vm2, %v3500_v51, -inf  ;;  %v3969_v4 = vsel %vm3625_vm2, %v3508_v48, -inf  ;;  %v3976_v29 = vsel %vm3625_vm2, %v3507_v45, -inf  ;;  %v3990_v57 = vsel %vm3625_vm2, %v3517_v24, -inf }
 0x270   : > { %v3963_v30 = vrot.slane %v3962_v36, 4  ;;  %v3970_v31 = vrot.slane %v3969_v4, 4  ;;  %v3977_v28 = vrot.slane %v3976_v29, 4  ;;  %v3983_v41 = vsel %vm3625_vm2, %v3509_v54, -inf }
 0x271   : > { %v3984_v5 = vrot.slane %v3983_v41, 4  ;;  %v3997_v7 = vsel %vm3625_vm2, %v3525_v27, -inf  ;;  %v4004_v40 = vsel %vm3625_vm2, %v3524_v49, -inf  ;;  %v3991_v62 = vrot.slane %v3990_v57, 4 }
 0x272   : > { %v3964_v26 = vmax.f32 %v3962_v36, %v3963_v30  ;;  %v3971_v63 = vmax.f32 %v3969_v4, %v3970_v31  ;;  %v3978_v56 = vmax.f32 %v3976_v29, %v3977_v28  ;;  %v3998_v37 = vrot.slane %v3997_v7, 4 }
 0x273   : > { %v3985_v34 = vmax.f32 %v3983_v41, %v3984_v5  ;;  %v4005_v61 = vrot.slane %v4004_v40, 4  ;;  %v4011_v8 = vsel %vm3625_vm2, %v3526_v0, -inf  ;;  %v3992_v16 = vmax.f32 %v3990_v57, %v3991_v62 }
 0x274   : > { %v3965_v50 = vrot.slane %v3964_v26, 2  ;;  %v3972_v35 = vrot.slane %v3971_v63, 2  ;;  %v3979_v42 = vrot.slane %v3978_v56, 2  ;;  %v3999_v21 = vmax.f32 %v3997_v7, %v3998_v37 }
 0x275   : > { %v3986_v11 = vrot.slane %v3985_v34, 2  ;;  %v4006_v12 = vmax.f32 %v4004_v40, %v4005_v61  ;;  %v4012_v1 = vrot.slane %v4011_v8, 4  ;;  %v3993_v15 = vrot.slane %v3992_v16, 2 }
 0x276   : > { %v3966_v53 = vmax.f32 %v3964_v26, %v3965_v50  ;;  %v3973_v58 = vmax.f32 %v3971_v63, %v3972_v35  ;;  %v3980_v33 = vmax.f32 %v3978_v56, %v3979_v42  ;;  %v4000_v22 = vrot.slane %v3999_v21, 2 }
 0x277   : > { %v3987_v14 = vmax.f32 %v3985_v34, %v3986_v11  ;;  %v4007_v6 = vrot.slane %v4006_v12, 2  ;;  %v4013_v18 = vmax.f32 %v4011_v8, %v4012_v1  ;;  %v3994_v19 = vmax.f32 %v3992_v16, %v3993_v15 }
 0x278   : > { %v3967_v52 = vrot.slane %v3966_v53, 1  ;;  %v3974_v38 = vrot.slane %v3973_v58, 1  ;;  %v3981_v43 = vrot.slane %v3980_v33, 1  ;;  %v4001_v59 = vmax.f32 %v3999_v21, %v4000_v22 }
 0x279   : > { %v3988_v60 = vrot.slane %v3987_v14, 1  ;;  %v4008_v44 = vmax.f32 %v4006_v12, %v4007_v6  ;;  %v4014_v32 = vrot.slane %v4013_v18, 2  ;;  %v3560_v51 = vcombine.high %v18871_v13, %v18871_v13 }
 0x27a   : > { %v18885_v24 = vmax.f32 %v3966_v53, %v3967_v52  ;;  %v18887_v23 = vmax.f32 %v3973_v58, %v3974_v38  ;;  %v3995_v45 = vrot.slane %v3994_v19, 1  ;;  %v18889_v49 = vmax.f32 %v3980_v33, %v3981_v43 }
 0x27b   : > { %v4002_v48 = vrot.slane %v4001_v59, 1  ;;  %v4009_v27 = vrot.slane %v4008_v44, 1  ;;  %v4015_v54 = vmax.f32 %v4013_v18, %v4014_v32  ;;  %v18891_v0 = vmax.f32 %v3987_v14, %v3988_v60 }
 0x27c   : > { %v4018_v36 = vsel %vm3625_vm2, %v18856_v39, -inf  ;;  %v4025_v4 = vsel %vm3625_vm2, %v3542_v2, -inf  ;;  %v4032_v29 = vsel %vm3625_vm2, %v18861_v17, -inf  ;;  %v3996_v30 = vmax.f32 %v3994_v19, %v3995_v45 }
 0x27d   : > { %v4003_v31 = vmax.f32 %v4001_v59, %v4002_v48  ;;  %v18898_v28 = vmax.f32 %v4008_v44, %v4009_v27  ;;  %v4019_v41 = vrot.slane %v4018_v36, 4  ;;  %v4026_v5 = vrot.slane %v4025_v4, 4 }
 0x27e   : > { %v4033_v57 = vrot.slane %v4032_v29, 4  ;;  %v4039_v7 = vsel %vm3625_vm2, %v3543_v55, -inf  ;;  %v4046_v39 = vsel %vm3625_vm2, %v18864_v46, -inf  ;;  %v4016_v40 = vrot.slane %v4015_v54, 1 }
 0x27f   : > { %v4020_v2 = vmax.f32 %v4018_v36, %v4019_v41  ;;  %v4040_v26 = vrot.slane %v4039_v7, 4  ;;  %v4047_v63 = vrot.slane %v4046_v39, 4  ;;  %v4027_v56 = vmax.f32 %v4025_v4, %v4026_v5 }
 0x280   : > { %v4034_v62 = vmax.f32 %v4032_v29, %v4033_v57  ;;  %v4053_v34 = vsel %vm3625_vm2, %v3559_v3, -inf  ;;  %v4060_v37 = vsel %vm3625_vm2, %v18871_v13, -inf  ;;  %v4067_v16 = vsel %vm3625_vm2, %v3560_v51, -inf }
 0x281   : > { %v4021_v17 = vrot.slane %v4020_v2, 2  ;;  %v4041_v61 = vmax.f32 %v4039_v7, %v4040_v26  ;;  %v4048_v55 = vmax.f32 %v4046_v39, %v4047_v63  ;;  %v4054_v8 = vrot.slane %v4053_v34, 4  ;;  %v4382_v26 = vld [vmem:[#allocation3 + $0x8] sm:$0x80] }
 0x282   : > { %v4028_v50 = vrot.slane %v4027_v56, 2  ;;  %v4035_v35 = vrot.slane %v4034_v62, 2  ;;  %v4061_v42 = vrot.slane %v4060_v37, 4  ;;  %v4068_v3 = vrot.slane %v4067_v16, 4 }
 0x283   : > { %v4022_v11 = vmax.f32 %v4020_v2, %v4021_v17  ;;  %v4042_v21 = vrot.slane %v4041_v61, 2  ;;  %v4049_v12 = vrot.slane %v4048_v55, 2  ;;  %v4055_v1 = vmax.f32 %v4053_v34, %v4054_v8 }
 0x284   : > { %v4029_v53 = vmax.f32 %v4027_v56, %v4028_v50  ;;  %v4036_v46 = vmax.f32 %v4034_v62, %v4035_v35  ;;  %v4062_v58 = vmax.f32 %v4060_v37, %v4061_v42  ;;  %v4069_v52 = vmax.f32 %v4067_v16, %v4068_v3 }
 0x285   : > { %v4023_v33 = vrot.slane %v4022_v11, 1  ;;  %v4043_v15 = vmax.f32 %v4041_v61, %v4042_v21  ;;  %v4050_v13 = vmax.f32 %v4048_v55, %v4049_v12  ;;  %v4056_v14 = vrot.slane %v4055_v1, 2  ;;  %v18942_v61 = vld [vmem:[#allocation3 + $0x38] sm:$0xff] }
 0x286   : > { %v4030_v22 = vrot.slane %v4029_v53, 1  ;;  %v4037_v6 = vrot.slane %v4036_v46, 1  ;;  %v4063_v18 = vrot.slane %v4062_v58, 2  ;;  %v4017_v38 = vmax.f32 %v4015_v54, %v4016_v40  ;;  %v4384_v55 = vld [vmem:[#allocation3 + $0x18] sm:$0x80] }
 0x287   : > { %v4024_v43 = vmax.f32 %v4022_v11, %v4023_v33  ;;  %v4051_v19 = vrot.slane %v4050_v13, 1  ;;  %v4057_v60 = vmax.f32 %v4055_v1, %v4056_v14  ;;  %v4044_v44 = vrot.slane %v4043_v15, 1 }
 0x288   : > { %v4031_v59 = vmax.f32 %v4029_v53, %v4030_v22  ;;  %v4064_v32 = vmax.f32 %v4062_v58, %v4063_v18  ;;  %v4070_v51 = vrot.slane %v4069_v52, 2  ;;  %v4038_v45 = vmax.f32 %v4036_v46, %v4037_v6 }
 0x289   : > { %v4052_v48 = vmax.f32 %v4050_v13, %v4051_v19  ;;  %v4058_v27 = vrot.slane %v4057_v60, 1  ;;  %v4192_v36 = vsel %vm4160_vm6, %v18885_v24, %v18828_v20  ;;  %v4199_v54 = vsel %vm4160_vm6, %v18887_v23, %v18831_v25 }
 0x28a   : > { %v4065_v4 = vrot.slane %v4064_v32, 1  ;;  %v4071_v29 = vmax.f32 %v4069_v52, %v4070_v51  ;;  %v4193_v41 = vsel %vm4162_vm7, %v3996_v30, %v4192_v36  ;;  %v4200_v7 = vsel %vm4162_vm7, %v4003_v31, %v4199_v54  ;;  %v18927_v30 = vld [vmem:[#allocation3 + $0x28] sm:$0xff] }
 0x28b   : > { %v4059_v5 = vmax.f32 %v4057_v60, %v4058_v27  ;;  %v4194_v57 = vsel %vm4164_vm8, %v4024_v43, %v4193_v41  ;;  %v4206_v39 = vsel %vm4160_vm6, %v18889_v49, %v18835_v47  ;;  %v4045_v40 = vmax.f32 %v4043_v15, %v4044_v44  ;;  %v18935_v47 = vld [vmem:[#allocation3 + $0x20] sm:$0xff]  ;;  %v4236_v15 = vld [vmem:[#allocation3 + $0x18] sm:$0xc0]  ;;  %v18947_v60 = vld [vmem:[#allocation3 + $0x30] sm:$0xff] }
 0x28c   : > { %v4072_v2 = vrot.slane %v4071_v29, 1  ;;  %v4195_v20 = vsel %vm4166_vm9, %v4052_v48, %v4194_v57  ;;  %v4201_v24 = vsel %vm4164_vm8, %v4031_v59, %v4200_v7  ;;  %v4066_v63 = vmax.f32 %v4064_v32, %v4065_v4  ;;  %v4381_v49 = vld [vmem:[#allocation3] sm:$0x80]  ;;  %v4235_v59 = vld [vmem:[#allocation3 + $0x10] sm:$0xc0] }
 0x28d   : > { %v4202_v25 = vsel %vm4166_vm9, %v4059_v5, %v4201_v24  ;;  %v4207_v23 = vsel %vm4162_vm7, %v18898_v28, %v4206_v39  ;;  %v4213_v31 = vsel %vm4160_vm6, %v18891_v0, %v18851_v9  ;;  %4229 = vst [vmem:[#allocation3 + $0x40] sm:$0xff] %v4195_v20  ;;  %v4390_v28 = vpack.c.bf16 %v18927_v30, %v4382_v26  ;;  %v15680_v7 = vld [vmem:[%s22050_s2 + $0x600] ss:$16 sps:$4 sm:$0xff]   ;;  %v15683_v39 = vld [vmem:[%s22050_s2 + $0x608] ss:$16 sps:$4 sm:$0xff]  }
 0x28e   : > { %v4073_v56 = vmax.f32 %v4071_v29, %v4072_v2  ;;  %v4208_v62 = vsel %vm4164_vm8, %v4038_v45, %v4207_v23  ;;  %v4214_v34 = vsel %vm4162_vm7, %v4017_v38, %v4213_v31  ;;  %4230 = vst [vmem:[#allocation3 + $0x48] sm:$0xff] %v4202_v25  ;;  %v4389_v0 = vpack.c.bf16 %v18935_v47, %v4381_v49  ;;  %v7216_v23 = vld [vmem:[#allocation3 + $0x78] sm:$0x1] }
 0x28f   : > { %v4209_v37 = vsel %vm4166_vm9, %v4066_v63, %v4208_v62  ;;  %v4215_v17 = vsel %vm4164_vm8, %v4045_v40, %v4214_v34  ;;  %v4392_v8 = vpack.c.bf16 %v18942_v61, %v4384_v55  ;;  %v4545_v50 = vshrl.u32 %v4390_v28, 16  ;;  %v15691_v62 = vld [vmem:[%s22050_s2 + $0x62c] ss:$16 sps:$4 sm:$0xff]  }
 0x290   : > { %v4216_v9 = vsel %vm4166_vm9, %v4073_v56, %v4215_v17  ;;  %4231 = vst [vmem:[#allocation3 + $0x50] sm:$0xff] %v4209_v37  ;;  %v4548_v35 = vshll.u32 %v4390_v28, 16  ;;  %v4528_v16 = vshrl.u32 %v4389_v0, 16  ;;  %v4531_v12 = vshll.u32 %v4389_v0, 16  ;;  %v15688_v56 = vld [vmem:[%s22050_s2 + $0x624] ss:$16 sps:$4 sm:$0xff]  }
 0x291   : > { %4232 = vst [vmem:[#allocation3 + $0x58] sm:$0xff] %v4216_v9  ;;  %v4579_v53 = vshrl.u32 %v4392_v8, 16  ;;  %v4582_v46 = vshll.u32 %v4392_v8, 16  ;;  %v4547_v58 = vrot.slane %v4545_v50, 3  ;;  %v4248_v29 = vpack.c.bf16 %v18942_v61, %v4236_v15  ;;  %v15686_v17 = vld [vmem:[%s22050_s2 + $0x620] ss:$16 sps:$4 sm:$0xff]  }
 0x292   : > { %v4550_v13 = vrot.slane %v4548_v35, 4  ;;  %v4530_v6 = vrot.slane %v4528_v16, 3  ;;  %v4533_v52 = vrot.slane %v4531_v12, 4  ;;  %v4247_v57 = vpack.c.bf16 %v18947_v60, %v4235_v59  ;;  %v15689_v0 = vld [vmem:[%s22050_s2 + $0x628] ss:$16 sps:$4 sm:$0xff]  }
 0x293   : > { %v4581_v51 = vrot.slane %v4579_v53, 3  ;;  %v4584_v45 = vrot.slane %v4582_v46, 4  ;;  %v5429_v34 = vrot.slane %v4248_v29, 3  ;;  %v7224_v35 = vpack.c.bf16 %v7216_v23, %v7216_v23  ;;  %v15694_v16 = vld [vmem:[%s22050_s2 + $0x644] ss:$16 sps:$4 sm:$0xff]  }
 0x294   : > { %v4385_v42 = vld [vmem:[#allocation3 + $0x40] sm:$0x7f]  ;;  %v4551_v41 = vor.u32 %v4550_v13, %v4547_v58  ;;  %v4534_v40 = vor.u32 %v4533_v52, %v4530_v6  ;;  %v5426_v28 = vrot.slane %v4247_v57, 3  ;;  %v7208_v12 = vld [vmem:[#allocation3 + $0x38] sm:$0xfe] }
 0x295   : > { %v4386_v11 = vld [vmem:[#allocation3 + $0x48] sm:$0x7f]  ;;  %v4393_v21 = vpack.c.bf16 %v4385_v42, %v4385_v42  ;;  %v4585_v63 = vor.u32 %v4584_v45, %v4581_v51  ;;  %v7215_v42 = vld [vmem:[#allocation3 + $0x70] sm:$0x1]  ;;  %v7207_v53 = vld [vmem:[#allocation3 + $0x30] sm:$0xfe] }
 0x296   : > { %v4394_v1 = vpack.c.bf16 %v4386_v11, %v4386_v11  ;;  %v15697_v11 = vld [vmem:[%s22050_s2 + $0x64c] ss:$16 sps:$4 sm:$0xff]   ;;  %v7223_v58 = vpack.c.bf16 %v7215_v42, %v7215_v42  ;;  %v7399_v13 = vshll.u32 %v7224_v35, 16  ;;  %v8233_v29 = vld [vmem:[#allocation3 + $0x70] sm:$0x3] }
 0x297   : > { %v4536_v3 = vshrl.u32 %v4393_v21, 16  ;;  %v4539_v33 = vshll.u32 %v4393_v21, 16  ;;  %v4243_v5 = vld [vmem:[#allocation3 + $0x50] sm:$0x3f]  ;;  %v8230_v45 = vld [vmem:[#allocation3 + $0x38] sm:$0xfc] }
 0x298   : > { %v4553_v14 = vshrl.u32 %v4394_v1, 16  ;;  %v4556_v22 = vshll.u32 %v4394_v1, 16  ;;  %v4388_v18 = vld [vmem:[#allocation3 + $0x58] sm:$0x7f]  ;;  %v4251_v25 = vpack.c.bf16 %v4243_v5, %v4243_v5  ;;  %v6250_v50 = vld [vmem:[#allocation3 + $0x50] sm:$0xff]  ;;  %v7401_v52 = vrot.slane %v7399_v13, 1 }
 0x299   : > { %v4538_v38 = vrot.slane %v4536_v3, 3  ;;  %v4541_v43 = vrot.slane %v4539_v33, 4  ;;  %v4396_v19 = vpack.c.bf16 %v4388_v18, %v4388_v18  ;;  %v4244_v48 = vld [vmem:[#allocation3 + $0x58] sm:$0x3f]  ;;  %v7219_v46 = vpack.c.bf16 %v6250_v50, %v7207_v53  ;;  %v15692_v3 = vld [vmem:[%s22050_s2 + $0x640] ss:$16 sps:$4 sm:$0xff]  }
 0x29a   : > { %v4555_v44 = vrot.slane %v4553_v14, 3  ;;  %v4558_v32 = vrot.slane %v4556_v22, 4  ;;  %v4252_v24 = vpack.c.bf16 %v4244_v48, %v4244_v48  ;;  %v5427_v61 = vrot.slane %v4251_v25, 3  ;;  %v6251_v55 = vld [vmem:[#allocation3 + $0x58] sm:$0xff]  ;;  %v15700_v14 = vld [vmem:[%s22050_s2 + $0x664] ss:$16 sps:$4 sm:$0xff]  }
 0x29b   : > { %v4542_v27 = vor.u32 %v4541_v43, %v4538_v38  ;;  %v4587_v36 = vshrl.u32 %v4396_v19, 16  ;;  %v4590_v4 = vshll.u32 %v4396_v19, 16  ;;  %v7220_v1 = vpack.c.bf16 %v6251_v55, %v7208_v12  ;;  %v15695_v33 = vld [vmem:[%s22050_s2 + $0x648] ss:$16 sps:$4 sm:$0xff]   ;;  %v15703_v22 = vld [vmem:[%s22050_s2 + $0x66c] ss:$16 sps:$4 sm:$0xff]  }
 0x29c   : > { %v4559_v54 = vor.u32 %v4558_v32, %v4555_v44  ;;  %v5430_v37 = vrot.slane %v4252_v24, 3  ;;  %v18982_v21 = vsel %vm5419_vm11, %v5426_v28, %v5427_v61  ;;  %v8234_v38 = vld [vmem:[#allocation3 + $0x78] sm:$0x3]  ;;  %v15698_v43 = vld [vmem:[%s22050_s2 + $0x660] ss:$16 sps:$4 sm:$0xff]   ;;  %v7382_v59 = vshll.u32 %v7219_v46, 16 }
 0x29d   : > { %v4589_v2 = vrot.slane %v4587_v36, 3  ;;  %v4592_v20 = vrot.slane %v4590_v4, 4  ;;  %v4543_v31 = vsel %vm4526_vm10, %v4534_v40, %v4542_v27  ;;  %v7394_v15 = vshll.u32 %v7220_v1, 16  ;;  %v15701_v19 = vld [vmem:[%s22050_s2 + $0x668] ss:$16 sps:$4 sm:$0xff]  }
 0x29e   : > { %v4560_v26 = vsel %vm4526_vm10, %v4551_v41, %v4559_v54  ;;  %v18973_v8 = vsel %vm5419_vm11, %v5429_v34, %v5430_v37  ;;  %v7392_v6 = vshrl.u32 %v7220_v1, 16  ;;  %v7387_v44 = vshll.u32 %v7223_v58, 16  ;;  %v15706_v32 = vld [vmem:[%s22050_s2 + $0x684] ss:$16 sps:$4 sm:$0xff]   ;;  %v15709_v27 = vld [vmem:[%s22050_s2 + $0x68c] ss:$16 sps:$4 sm:$0xff]  }
 0x29f   : > { %5271 = vmatprep.mubr.bf16.mxu0 %v4560_v26  ;;  %5357 = vmatprep.mubr.bf16.mxu1 %v4560_v26  ;;  %v4593_v49 = vor.u32 %v4592_v20, %v4589_v2  ;;  %v7396_v18 = vrot.slane %v7394_v15, 1  ;;  %v8229_v48 = vld [vmem:[#allocation3 + $0x30] sm:$0xfc]  ;;  %v8238_v36 = vpack.c.bf16 %v6251_v55, %v8230_v45  ;;  %v8242_v4 = vpack.c.bf16 %v8234_v38, %v8234_v38  ;;  %v15707_v2 = vld [vmem:[%s22050_s2 + $0x688] ss:$16 sps:$4 sm:$0xff]  }
 0x2a0   : > { %5272 = vmatmul.mubr.bf16.vlgmr.msra.gmra.mrb[16].mxu0 %v4543_v31  ;;  %5358 = vmatmul.mubr.bf16.vlgmr.msra.gmra.mrb[16].mxu1 %v4543_v31  ;;  %v8237_v41 = vpack.c.bf16 %v6250_v50, %v8229_v48  ;;  %v7380_v5 = vshrl.u32 %v7219_v46, 16  ;;  %v7384_v57 = vrot.slane %v7382_v59, 1  ;;  %v15704_v40 = vld [vmem:[%s22050_s2 + $0x680] ss:$16 sps:$4 sm:$0xff]   ;;  %v8241_v26 = vpack.c.bf16 %v8233_v29, %v8233_v29  ;;  %v15712_v25 = vld [vmem:[%s22050_s2 + $0x6a4] ss:$16 sps:$4 sm:$0xff]  }
 0x2a1   : > { %5283 = vmatpush1.bf16.msra.mxu0 %v15680_v7  ;;  %5369 = vmatpush1.bf16.msra.mxu1 %v15683_v39  ;;  %v4594_v9 = vsel %vm4526_vm10, %v4585_v63, %v4593_v49  ;;  %v7397_v51 = vor.u32 %v7396_v18, %v7392_v6  ;;  %v7389_v7 = vrot.slane %v7387_v44, 1  ;;  %v8390_v39 = vrot.slane %v8238_v36, 1  ;;  %v15715_v23 = vld [vmem:[%s22050_s2 + $0x6ac] ss:$16 sps:$4 sm:$0xff]   ;;  %v15713_v34 = vld [vmem:[%s22050_s2 + $0x6a8] ss:$16 sps:$4 sm:$0xff]  }
 0x2a2   : > { %5314 = vmatprep.mubr.bf16.mxu0 %v4594_v9  ;;  %5400 = vmatprep.mubr.bf16.mxu1 %v4594_v9  ;;  %v7385_v20 = vor.u32 %v7384_v57, %v7380_v5  ;;  %v8391_v24 = vrot.slane %v8242_v4, 1  ;;  %v8387_v63 = vrot.slane %v8237_v41, 1  ;;  %v15721_v28 = vld [vmem:[%s22050_s2 + $0x6cc] ss:$16 sps:$4 sm:$0xff]   ;;  %v15716_v61 = vld [vmem:[%s22050_s2 + $0x6c0] ss:$16 sps:$4 sm:$0xff]  }
 0x2a3   : > { %5284 = vmatprep.subr.bf16.mxu0 %v15688_v56  ;;  %5370 = vmatprep.subr.bf16.mxu1 %v15691_v62  ;;  %v19009_v54 = vsel %vm7354_vm12, %v7397_v51, %v7401_v52  ;;  %v8388_v56 = vrot.slane %v8241_v26, 1  ;;  %v15710_v62 = vld [vmem:[%s22050_s2 + $0x6a0] ss:$16 sps:$4 sm:$0xff]   ;;  %v15719_v55 = vld [vmem:[%s22050_s2 + $0x6c8] ss:$16 sps:$4 sm:$0xff]  }
 0x2a4   : > { %v19024_v31 = vsel %vm7354_vm12, %v7385_v20, %v7389_v7  ;;  %v19027_v49 = vsel %vm8380_vm13, %v8390_v39, %v8391_v24  ;;  %v15724_v9 = vld [vmem:[%s22050_s2 + $0x6e4] ss:$16 sps:$4 sm:$0xff]   ;;  %v15722_v50 = vld [vmem:[%s22050_s2 + $0x6e0] ss:$16 sps:$4 sm:$0xff]   ;;  %v15725_v35 = vld [vmem:[%s22050_s2 + $0x6e8] ss:$16 sps:$4 sm:$0xff]  }
 0x2a5   : > { %5285 = vmatpush1.bf16.msra.mxu0 %v15686_v17  ;;  %5371 = vmatpush1.bf16.msra.mxu1 %v15689_v0  ;;  %v19036_v37 = vsel %vm8380_vm13, %v8387_v63, %v8388_v56  ;;  %v15718_v17 = vld [vmem:[%s22050_s2 + $0x6c4] ss:$16 sps:$4 sm:$0xff]   ;;  %v15727_v0 = vld [vmem:[%s22050_s2 + $0x6ec] ss:$16 sps:$4 sm:$0xff]   ;;  %v15731_v12 = vld [vmem:[%s22050_s2 + $0x708] ss:$16 sps:$4 sm:$0xff]  }
 0x2a6   : > { %5286 = vmatprep.subr.bf16.mxu0 %v15694_v16  ;;  %5372 = vmatprep.subr.bf16.mxu1 %v15697_v11  ;;  %v15730_v42 = vld [vmem:[%s22050_s2 + $0x704] ss:$16 sps:$4 sm:$0xff]   ;;  %v15733_v16 = vld [vmem:[%s22050_s2 + $0x70c] ss:$16 sps:$4 sm:$0xff]   ;;  %v15728_v11 = vld [vmem:[%s22050_s2 + $0x700] ss:$16 sps:$4 sm:$0xff]  }
 0x2a7   : > { %v15736_v1 = vld [vmem:[%s22050_s2 + $0x724] ss:$16 sps:$4 sm:$0xff]   ;;  %v15739_v53 = vld [vmem:[%s22050_s2 + $0x72c] ss:$16 sps:$4 sm:$0xff]   ;;  %v15734_v46 = vld [vmem:[%s22050_s2 + $0x720] ss:$16 sps:$4 sm:$0xff]  }
 0x2a8   : > { %v15737_v58 = vld [vmem:[%s22050_s2 + $0x728] ss:$16 sps:$4 sm:$0xff]   ;;  %v15740_v15 = vld [vmem:[%s22050_s2 + $0x740] ss:$16 sps:$4 sm:$0xff]   ;;  %v15754_v52 = vld [vmem:[%s22050_s2 + $0x784] ss:$16 sps:$4 sm:$0xff]  }
 0x2a9   : > { %5287 = vmatpush1.bf16.msra.mxu0 %v15692_v3  ;;  %5373 = vmatpush1.bf16.msra.mxu1 %v15695_v33  ;;  %v15742_v3 = vld [vmem:[%s22050_s2 + $0x744] ss:$16 sps:$4 sm:$0xff]   ;;  %v15745_v33 = vld [vmem:[%s22050_s2 + $0x74c] ss:$16 sps:$4 sm:$0xff]   ;;  %v15743_v13 = vld [vmem:[%s22050_s2 + $0x748] ss:$16 sps:$4 sm:$0xff]  }
 0x2aa   : > { %5288 = vmatprep.subr.bf16.mxu0 %v15700_v14  ;;  %5374 = vmatprep.subr.bf16.mxu1 %v15703_v22  ;;  %v15748_v14 = vld [vmem:[%s22050_s2 + $0x764] ss:$16 sps:$4 sm:$0xff]   ;;  %v15751_v22 = vld [vmem:[%s22050_s2 + $0x76c] ss:$16 sps:$4 sm:$0xff]   ;;  %v15746_v6 = vld [vmem:[%s22050_s2 + $0x760] ss:$16 sps:$4 sm:$0xff]  }
 0x2ab   : > { %v15749_v18 = vld [vmem:[%s22050_s2 + $0x768] ss:$16 sps:$4 sm:$0xff]   ;;  %v15757_v38 = vld [vmem:[%s22050_s2 + $0x78c] ss:$16 sps:$4 sm:$0xff]   ;;  %v15760_v44 = vld [vmem:[%s22050_s2 + $0x7a4] ss:$16 sps:$4 sm:$0xff]  }
 0x2ac   : > { %v15755_v59 = vld [vmem:[%s22050_s2 + $0x788] ss:$16 sps:$4 sm:$0xff]   ;;  %v4383_v51 = vld [vmem:[#allocation3 + $0x10] sm:$0x80]  ;;  %v15758_v48 = vld [vmem:[%s22050_s2 + $0x7a0] ss:$16 sps:$4 sm:$0xff]  }
 0x2ad   : > { %5289 = vmatpush1.bf16.msra.mxu0 %v15698_v43  ;;  %5375 = vmatpush1.bf16.msra.mxu1 %v15701_v19  ;;  %v4387_v43 = vld [vmem:[#allocation3 + $0x50] sm:$0x7f]  ;;  %v4391_v36 = vpack.c.bf16 %v18947_v60, %v4383_v51  ;;  %v15769_v29 = vld [vmem:[%s22050_s2 + $0x7cc] ss:$16 sps:$4 sm:$0xff]   ;;  %v15767_v60 = vld [vmem:[%s22050_s2 + $0x7c8] ss:$16 sps:$4 sm:$0xff]  }
 0x2ae   : > { %5290 = vmatprep.subr.bf16.mxu0 %v15706_v32  ;;  %5376 = vmatprep.subr.bf16.mxu1 %v15709_v27  ;;  %v15752_v19 = vld [vmem:[%s22050_s2 + $0x780] ss:$16 sps:$4 sm:$0xff]   ;;  %v15763_v32 = vld [vmem:[%s22050_s2 + $0x7ac] ss:$16 sps:$4 sm:$0xff]   ;;  %v4395_v45 = vpack.c.bf16 %v4387_v43, %v4387_v43  ;;  %v15761_v27 = vld [vmem:[%s22050_s2 + $0x7a8] ss:$16 sps:$4 sm:$0xff]  }
 0x2af   : > { %v15766_v4 = vld [vmem:[%s22050_s2 + $0x7c4] ss:$16 sps:$4 sm:$0xff]   ;;  %v15764_v57 = vld [vmem:[%s22050_s2 + $0x7c0] ss:$16 sps:$4 sm:$0xff]   ;;  %v4562_v7 = vshrl.u32 %v4391_v36, 16  ;;  %v4565_v39 = vshll.u32 %v4391_v36, 16 }
 0x2b0   : > { %v4570_v41 = vshrl.u32 %v4395_v45, 16  ;;  %v4573_v5 = vshll.u32 %v4395_v45, 16  ;;  %v15775_v20 = vld [vmem:[%s22050_s2 + $0x7ec] ss:$16 sps:$4 sm:$0xff]   ;;  %v15773_v56 = vld [vmem:[%s22050_s2 + $0x7e8] ss:$16 sps:$4 sm:$0xff]  }
 0x2b1   : > { %5291 = vmatpush1.bf16.msra.mxu0 %v15704_v40  ;;  %5377 = vmatpush1.bf16.msra.mxu1 %v15707_v2  ;;  %v4242_v40 = vld [vmem:[#allocation3 + $0x48] sm:$0x3f]  ;;  %v15772_v2 = vld [vmem:[%s22050_s2 + $0x7e4] ss:$16 sps:$4 sm:$0xff]   ;;  %v4234_v63 = vld [vmem:[#allocation3 + $0x8] sm:$0xc0] }
 0x2b2   : > { %5292 = vmatprep.subr.bf16.mxu0 %v15712_v25  ;;  %5378 = vmatprep.subr.bf16.mxu1 %v15715_v23  ;;  %v4572_v24 = vrot.slane %v4570_v41, 3  ;;  %v4575_v26 = vrot.slane %v4573_v5, 4  ;;  %v4250_v25 = vpack.c.bf16 %v4242_v40, %v4242_v40  ;;  %v15770_v23 = vld [vmem:[%s22050_s2 + $0x7e0] ss:$16 sps:$4 sm:$0xff]   ;;  %v15808_v43 = vld [vmem:[%s22050_s2 + $0xa4] ss:$16 sps:$4 sm:$0xff]  }
 0x2b3   : > { %v15817_v51 = vld [vmem:[%s22050_s2 + $0xcc] ss:$16 sps:$4 sm:$0xff]   ;;  %v15812_v45 = vld [vmem:[%s22050_s2 + $0xc0] ss:$16 sps:$4 sm:$0xff]   ;;  %v15826_v41 = vld [vmem:[%s22050_s2 + $0x104] ss:$16 sps:$4 sm:$0xff]  }
 0x2b4   : > { %v15823_v36 = vld [vmem:[%s22050_s2 + $0xec] ss:$16 sps:$4 sm:$0xff]   ;;  %v15830_v40 = vld [vmem:[%s22050_s2 + $0x120] ss:$16 sps:$4 sm:$0xff]  }
 0x2b5   : > { %5293 = vmatpush1.bf16.msra.mxu0 %v15710_v62  ;;  %5379 = vmatpush1.bf16.msra.mxu1 %v15713_v34  ;;  %v4564_v62 = vrot.slane %v4562_v7, 3  ;;  %v4567_v34 = vrot.slane %v4565_v39, 4  ;;  %v15829_v5 = vld [vmem:[%s22050_s2 + $0x10c] ss:$16 sps:$4 sm:$0xff]   ;;  %v15832_v7 = vld [vmem:[%s22050_s2 + $0x124] ss:$16 sps:$4 sm:$0xff]  }
 0x2b6   : > { %5294 = vmatprep.subr.bf16.mxu0 %v15718_v17  ;;  %5380 = vmatprep.subr.bf16.mxu1 %v15721_v28  ;;  %v15778_v17 = vld [vmem:[%s22050_s2 + $0x4] ss:$16 sps:$4 sm:$0xff]   ;;  %v15781_v28 = vld [vmem:[%s22050_s2 + $0xc] ss:$16 sps:$4 sm:$0xff]  }
 0x2b7   : > { %v15835_v39 = vld [vmem:[%s22050_s2 + $0x12c] ss:$16 sps:$4 sm:$0xff]  }
 0x2b9   : > { %5295 = vmatpush1.bf16.msra.mxu0 %v15716_v61  ;;  %5381 = vmatpush1.bf16.msra.mxu1 %v15719_v55  ;;  %v4246_v61 = vpack.c.bf16 %v18927_v30, %v4234_v63  ;;  %v4576_v55 = vor.u32 %v4575_v26, %v4572_v24  ;;  %v15784_v30 = vld [vmem:[%s22050_s2 + $0x24] ss:$16 sps:$4 sm:$0xff]   ;;  %v15841_v24 = vld [vmem:[%s22050_s2 + $0x14c] ss:$16 sps:$4 sm:$0xff]   ;;  %v15836_v26 = vld [vmem:[%s22050_s2 + $0x140] ss:$16 sps:$4 sm:$0xff]  }
 0x2ba   : > { %5296 = vmatprep.subr.bf16.mxu0 %v15724_v9  ;;  %5382 = vmatprep.subr.bf16.mxu1 %v15727_v0  ;;  %v5424_v9 = vrot.slane %v4250_v25, 3  ;;  %v4568_v0 = vor.u32 %v4567_v34, %v4564_v62  ;;  %v15839_v63 = vld [vmem:[%s22050_s2 + $0x148] ss:$16 sps:$4 sm:$0xff]   ;;  %v15844_v25 = vld [vmem:[%s22050_s2 + $0x164] ss:$16 sps:$4 sm:$0xff]  }
 0x2bb   : > { %v15845_v62 = vld [vmem:[%s22050_s2 + $0x168] ss:$16 sps:$4 sm:$0xff]   ;;  %v15850_v34 = vld [vmem:[%s22050_s2 + $0x184] ss:$16 sps:$4 sm:$0xff]  }
 0x2bd   : > { %5297 = vmatpush1.bf16.msra.mxu0 %v15722_v50  ;;  %5383 = vmatpush1.bf16.msra.mxu1 %v15725_v35  ;;  %v15776_v50 = vld [vmem:[%s22050_s2] ss:$16 sps:$4 sm:$0xff]   ;;  %v15779_v35 = vld [vmem:[%s22050_s2 + $0x8] ss:$16 sps:$4 sm:$0xff]  }
 0x2be   : > { %5298 = vmatprep.subr.bf16.mxu0 %v15730_v42  ;;  %5384 = vmatprep.subr.bf16.mxu1 %v15733_v16  ;;  %v5423_v42 = vrot.slane %v4246_v61, 3  ;;  %v4577_v16 = vsel %vm4526_vm10, %v4568_v0, %v4576_v55  ;;  %v15851_v61 = vld [vmem:[%s22050_s2 + $0x188] ss:$16 sps:$4 sm:$0xff]   ;;  %v15856_v55 = vld [vmem:[%s22050_s2 + $0x1a4] ss:$16 sps:$4 sm:$0xff]  }
 0x2bf   : > { %v15854_v0 = vld [vmem:[%s22050_s2 + $0x1a0] ss:$16 sps:$4 sm:$0xff]  }
 0x2c1   : > { %5299 = vmatpush1.bf16.msra.mxu0 %v15728_v11  ;;  %5385 = vmatpush1.bf16.msra.mxu1 %v15731_v12  ;;  %v15787_v11 = vld [vmem:[%s22050_s2 + $0x2c] ss:$16 sps:$4 sm:$0xff]   ;;  %v5425_v12 = vsel %vm5419_vm11, %v5423_v42, %v5424_v9 }
 0x2c2   : > { %5300 = vmatprep.subr.bf16.mxu0 %v15736_v1  ;;  %5386 = vmatprep.subr.bf16.mxu1 %v15739_v53  ;;  %v15782_v1 = vld [vmem:[%s22050_s2 + $0x20] ss:$16 sps:$4 sm:$0xff]   ;;  %v15785_v53 = vld [vmem:[%s22050_s2 + $0x28] ss:$16 sps:$4 sm:$0xff]   ;;  %v15859_v9 = vld [vmem:[%s22050_s2 + $0x1ac] ss:$16 sps:$4 sm:$0xff]  }
 0x2c3   : > { %v15865_v42 = vld [vmem:[%s22050_s2 + $0x1cc] ss:$16 sps:$4 sm:$0xff]  }
 0x2c5   : > { %5301 = vmatpush1.bf16.msra.mxu0 %v15734_v46  ;;  %5387 = vmatpush1.bf16.msra.mxu1 %v15737_v58  ;;  %v15790_v46 = vld [vmem:[%s22050_s2 + $0x44] ss:$16 sps:$4 sm:$0xff]   ;;  %v15793_v58 = vld [vmem:[%s22050_s2 + $0x4c] ss:$16 sps:$4 sm:$0xff]  }
 0x2c6   : > { %5302 = vmatprep.subr.bf16.mxu0 %v15742_v3  ;;  %5388 = vmatprep.subr.bf16.mxu1 %v15745_v33  ;;  %v15788_v3 = vld [vmem:[%s22050_s2 + $0x40] ss:$16 sps:$4 sm:$0xff]   ;;  %v15791_v33 = vld [vmem:[%s22050_s2 + $0x48] ss:$16 sps:$4 sm:$0xff]  }
 0x2c9   : > { %5303 = vmatpush1.bf16.msra.mxu0 %v15740_v15  ;;  %5389 = vmatpush1.bf16.msra.mxu1 %v15743_v13  ;;  %v15796_v15 = vld [vmem:[%s22050_s2 + $0x64] ss:$16 sps:$4 sm:$0xff]   ;;  %v15799_v13 = vld [vmem:[%s22050_s2 + $0x6c] ss:$16 sps:$4 sm:$0xff]  }
 0x2ca   : > { %5304 = vmatprep.subr.bf16.mxu0 %v15748_v14  ;;  %5390 = vmatprep.subr.bf16.mxu1 %v15751_v22  ;;  %v15794_v14 = vld [vmem:[%s22050_s2 + $0x60] ss:$16 sps:$4 sm:$0xff]   ;;  %v15797_v22 = vld [vmem:[%s22050_s2 + $0x68] ss:$16 sps:$4 sm:$0xff]  }
 0x2cd   : > { %5305 = vmatpush1.bf16.msra.mxu0 %v15746_v6  ;;  %5391 = vmatpush1.bf16.msra.mxu1 %v15749_v18  ;;  %v15802_v6 = vld [vmem:[%s22050_s2 + $0x84] ss:$16 sps:$4 sm:$0xff]   ;;  %v15805_v18 = vld [vmem:[%s22050_s2 + $0x8c] ss:$16 sps:$4 sm:$0xff]  }
 0x2ce   : > { %5306 = vmatprep.subr.bf16.mxu0 %v15754_v52  ;;  %5392 = vmatprep.subr.bf16.mxu1 %v15757_v38  ;;  %v15800_v52 = vld [vmem:[%s22050_s2 + $0x80] ss:$16 sps:$4 sm:$0xff]   ;;  %v15803_v38 = vld [vmem:[%s22050_s2 + $0x88] ss:$16 sps:$4 sm:$0xff]  }
 0x2d1   : > { %5307 = vmatpush1.bf16.msra.mxu0 %v15752_v19  ;;  %5393 = vmatpush1.bf16.msra.mxu1 %v15755_v59  ;;  %v15811_v19 = vld [vmem:[%s22050_s2 + $0xac] ss:$16 sps:$4 sm:$0xff]   ;;  %v15806_v59 = vld [vmem:[%s22050_s2 + $0xa0] ss:$16 sps:$4 sm:$0xff]  }
 0x2d2   : > { %5308 = vmatprep.subr.bf16.mxu0 %v15760_v44  ;;  %5394 = vmatprep.subr.bf16.mxu1 %v15763_v32  ;;  %v15809_v44 = vld [vmem:[%s22050_s2 + $0xa8] ss:$16 sps:$4 sm:$0xff]   ;;  %v15814_v32 = vld [vmem:[%s22050_s2 + $0xc4] ss:$16 sps:$4 sm:$0xff]  }
 0x2d5   : > { %5309 = vmatpush1.bf16.msra.mxu0 %v15758_v48  ;;  %5395 = vmatpush1.bf16.msra.mxu1 %v15761_v27  ;;  %v15815_v48 = vld [vmem:[%s22050_s2 + $0xc8] ss:$16 sps:$4 sm:$0xff]   ;;  %v15820_v27 = vld [vmem:[%s22050_s2 + $0xe4] ss:$16 sps:$4 sm:$0xff]  }
 0x2d6   : > { %5310 = vmatprep.subr.bf16.mxu0 %v15766_v4  ;;  %5396 = vmatprep.subr.bf16.mxu1 %v15769_v29  ;;  %v15818_v4 = vld [vmem:[%s22050_s2 + $0xe0] ss:$16 sps:$4 sm:$0xff]   ;;  %v15821_v29 = vld [vmem:[%s22050_s2 + $0xe8] ss:$16 sps:$4 sm:$0xff]  }
 0x2d9   : > { %5311 = vmatpush1.bf16.msra.mxu0 %v15764_v57  ;;  %5397 = vmatpush1.bf16.msra.mxu1 %v15767_v60  ;;  %v15824_v57 = vld [vmem:[%s22050_s2 + $0x100] ss:$16 sps:$4 sm:$0xff]   ;;  %v15827_v60 = vld [vmem:[%s22050_s2 + $0x108] ss:$16 sps:$4 sm:$0xff]  }
 0x2da   : > { %5312 = vmatprep.subr.bf16.mxu0 %v15772_v2  ;;  %5398 = vmatprep.subr.bf16.mxu1 %v15775_v20  ;;  %v15833_v2 = vld [vmem:[%s22050_s2 + $0x128] ss:$16 sps:$4 sm:$0xff]   ;;  %v15838_v20 = vld [vmem:[%s22050_s2 + $0x144] ss:$16 sps:$4 sm:$0xff]  }
 0x2dd   : > { %5313 = vmatpush1.bf16.msra.mxu0 %v15770_v23  ;;  %5399 = vmatpush1.bf16.msra.mxu1 %v15773_v56  ;;  %v15847_v23 = vld [vmem:[%s22050_s2 + $0x16c] ss:$16 sps:$4 sm:$0xff]   ;;  %v15842_v56 = vld [vmem:[%s22050_s2 + $0x160] ss:$16 sps:$4 sm:$0xff]  }
 0x2de   : > { %6076 = vmatprep.subr.bf16.mxu0 %v15778_v17  ;;  %6162 = vmatprep.subr.bf16.mxu1 %v15781_v28  ;;  %v15853_v17 = vld [vmem:[%s22050_s2 + $0x18c] ss:$16 sps:$4 sm:$0xff]   ;;  %v15848_v28 = vld [vmem:[%s22050_s2 + $0x180] ss:$16 sps:$4 sm:$0xff]  }
 0x2e0   : > { %5315 = vmatmul.mubr.bf16.vlgmr.msra.gmra.mrb[16].mxu0 %v4577_v16  ;;  %5401 = vmatmul.mubr.bf16.vlgmr.msra.gmra.mrb[16].mxu1 %v4577_v16  ;;  %v4241_v16 = vld [vmem:[#allocation3 + $0x40] sm:$0x3f] }
 0x2e1   : > { %6077 = vmatpush1.bf16.msra.mxu0 %v15776_v50  ;;  %6108 = vmatprep.mubr.bf16.mxu0 %v5425_v12  ;;  %v15857_v50 = vld [vmem:[%s22050_s2 + $0x1a8] ss:$16 sps:$4 sm:$0xff]  }
 0x2e2   : > { %6163 = vmatpush1.bf16.msra.mxu1 %v15779_v35  ;;  %6194 = vmatprep.mubr.bf16.mxu1 %v5425_v12  ;;  %v15862_v35 = vld [vmem:[%s22050_s2 + $0x1c4] ss:$16 sps:$4 sm:$0xff]  }
 0x2e3   : > { %6078 = vmatprep.subr.bf16.mxu0 %v15784_v30  ;;  %6164 = vmatprep.subr.bf16.mxu1 %v15787_v11  ;;  %v15860_v30 = vld [vmem:[%s22050_s2 + $0x1c0] ss:$16 sps:$4 sm:$0xff]   ;;  %v15863_v11 = vld [vmem:[%s22050_s2 + $0x1c8] ss:$16 sps:$4 sm:$0xff]   ;;  %v15868_v12 = vld [vmem:[%s22050_s2 + $0x1e4] ss:$16 sps:$4 sm:$0xff]  }
 0x2e5   : > { %6079 = vmatpush1.bf16.msra.mxu0 %v15782_v1  ;;  %v4233_v1 = vld [vmem:[#allocation3] sm:$0xc0] }
 0x2e6   : > { %6165 = vmatpush1.bf16.msra.mxu1 %v15785_v53  ;;  %6080 = vmatprep.subr.bf16.mxu0 %v15790_v46  ;;  %v15871_v53 = vld [vmem:[%s22050_s2 + $0x1ec] ss:$16 sps:$4 sm:$0xff]   ;;  %v4249_v46 = vpack.c.bf16 %v4241_v16, %v4241_v16 }
 0x2e7   : > { %6166 = vmatprep.subr.bf16.mxu1 %v15793_v58  ;;  %v15866_v58 = vld [vmem:[%s22050_s2 + $0x1e0] ss:$16 sps:$4 sm:$0xff]   ;;  %v15943_v16 = vld [vmem:[%s22050_s2 + $0x36c] ss:$16 sps:$4 sm:$0xff]  }
 0x2e9   : > { %6081 = vmatpush1.bf16.msra.mxu0 %v15788_v3  ;;  %v4245_v3 = vpack.c.bf16 %v18935_v47, %v4233_v1  ;;  %v15872_v47 = vld [vmem:[%s22050_s2 + $0x200] ss:$16 sps:$4 sm:$0xff]   ;;  %v15949_v1 = vld [vmem:[%s22050_s2 + $0x38c] ss:$16 sps:$4 sm:$0xff]  }
 0x2ea   : > { %6167 = vmatpush1.bf16.msra.mxu1 %v15791_v33  ;;  %6082 = vmatprep.subr.bf16.mxu0 %v15796_v15  ;;  %v15869_v33 = vld [vmem:[%s22050_s2 + $0x1e8] ss:$16 sps:$4 sm:$0xff]   ;;  %v15874_v15 = vld [vmem:[%s22050_s2 + $0x204] ss:$16 sps:$4 sm:$0xff]  }
 0x2eb   : > { %6168 = vmatprep.subr.bf16.mxu1 %v15799_v13  ;;  %v5421_v13 = vrot.slane %v4249_v46, 3  ;;  %v15947_v46 = vld [vmem:[%s22050_s2 + $0x388] ss:$16 sps:$4 sm:$0xff]  }
 0x2ed   : > { %6083 = vmatpush1.bf16.msra.mxu0 %v15794_v14  ;;  %v15877_v14 = vld [vmem:[%s22050_s2 + $0x20c] ss:$16 sps:$4 sm:$0xff]  }
 0x2ee   : > { %6169 = vmatpush1.bf16.msra.mxu1 %v15797_v22  ;;  %6084 = vmatprep.subr.bf16.mxu0 %v15802_v6  ;;  %v5420_v22 = vrot.slane %v4245_v3, 3  ;;  %v15875_v6 = vld [vmem:[%s22050_s2 + $0x208] ss:$16 sps:$4 sm:$0xff]   ;;  %v15955_v3 = vld [vmem:[%s22050_s2 + $0x3ac] ss:$16 sps:$4 sm:$0xff]  }
 0x2ef   : > { %6170 = vmatprep.subr.bf16.mxu1 %v15805_v18 }
 0x2f0   : > { %v5422_v18 = vsel %vm5419_vm11, %v5420_v22, %v5421_v13  ;;  %v15958_v13 = vld [vmem:[%s22050_s2 + $0x3c4] ss:$16 sps:$4 sm:$0xff]   ;;  %v15956_v22 = vld [vmem:[%s22050_s2 + $0x3c0] ss:$16 sps:$4 sm:$0xff]  }
 0x2f1   : > { %6085 = vmatpush1.bf16.msra.mxu0 %v15800_v52  ;;  %v15880_v52 = vld [vmem:[%s22050_s2 + $0x224] ss:$16 sps:$4 sm:$0xff]  }
 0x2f2   : > { %6171 = vmatpush1.bf16.msra.mxu1 %v15803_v38  ;;  %6086 = vmatprep.subr.bf16.mxu0 %v15808_v43  ;;  %v15883_v38 = vld [vmem:[%s22050_s2 + $0x22c] ss:$16 sps:$4 sm:$0xff]   ;;  %v15878_v43 = vld [vmem:[%s22050_s2 + $0x220] ss:$16 sps:$4 sm:$0xff]  }
 0x2f3   : > { %6172 = vmatprep.subr.bf16.mxu1 %v15811_v19  ;;  %v15881_v19 = vld [vmem:[%s22050_s2 + $0x228] ss:$16 sps:$4 sm:$0xff]  }
 0x2f5   : > { %6087 = vmatpush1.bf16.msra.mxu0 %v15806_v59  ;;  %v15886_v59 = vld [vmem:[%s22050_s2 + $0x244] ss:$16 sps:$4 sm:$0xff]  }
 0x2f6   : > { %6173 = vmatpush1.bf16.msra.mxu1 %v15809_v44  ;;  %6088 = vmatprep.subr.bf16.mxu0 %v15814_v32  ;;  %v15889_v44 = vld [vmem:[%s22050_s2 + $0x24c] ss:$16 sps:$4 sm:$0xff]   ;;  %v15884_v32 = vld [vmem:[%s22050_s2 + $0x240] ss:$16 sps:$4 sm:$0xff]  }
 0x2f7   : > { %6174 = vmatprep.subr.bf16.mxu1 %v15817_v51  ;;  %v15887_v51 = vld [vmem:[%s22050_s2 + $0x248] ss:$16 sps:$4 sm:$0xff]  }
 0x2f9   : > { %6089 = vmatpush1.bf16.msra.mxu0 %v15812_v45  ;;  %v15895_v45 = vld [vmem:[%s22050_s2 + $0x26c] ss:$16 sps:$4 sm:$0xff]  }
 0x2fa   : > { %6175 = vmatpush1.bf16.msra.mxu1 %v15815_v48  ;;  %6090 = vmatprep.subr.bf16.mxu0 %v15820_v27  ;;  %v15890_v48 = vld [vmem:[%s22050_s2 + $0x260] ss:$16 sps:$4 sm:$0xff]   ;;  %v15893_v27 = vld [vmem:[%s22050_s2 + $0x268] ss:$16 sps:$4 sm:$0xff]  }
 0x2fb   : > { %6176 = vmatprep.subr.bf16.mxu1 %v15823_v36  ;;  %v15898_v36 = vld [vmem:[%s22050_s2 + $0x284] ss:$16 sps:$4 sm:$0xff]  }
 0x2fd   : > { %6091 = vmatpush1.bf16.msra.mxu0 %v15818_v4  ;;  %v15901_v4 = vld [vmem:[%s22050_s2 + $0x28c] ss:$16 sps:$4 sm:$0xff]  }
 0x2fe   : > { %6177 = vmatpush1.bf16.msra.mxu1 %v15821_v29  ;;  %6092 = vmatprep.subr.bf16.mxu0 %v15826_v41  ;;  %v15896_v29 = vld [vmem:[%s22050_s2 + $0x280] ss:$16 sps:$4 sm:$0xff]   ;;  %v15899_v41 = vld [vmem:[%s22050_s2 + $0x288] ss:$16 sps:$4 sm:$0xff]  }
 0x2ff   : > { %6178 = vmatprep.subr.bf16.mxu1 %v15829_v5  ;;  %v15904_v5 = vld [vmem:[%s22050_s2 + $0x2a4] ss:$16 sps:$4 sm:$0xff]  }
 0x301   : > { %6093 = vmatpush1.bf16.msra.mxu0 %v15824_v57  ;;  %v15907_v57 = vld [vmem:[%s22050_s2 + $0x2ac] ss:$16 sps:$4 sm:$0xff]  }
 0x302   : > { %6179 = vmatpush1.bf16.msra.mxu1 %v15827_v60  ;;  %6094 = vmatprep.subr.bf16.mxu0 %v15832_v7  ;;  %v15902_v60 = vld [vmem:[%s22050_s2 + $0x2a0] ss:$16 sps:$4 sm:$0xff]   ;;  %v15905_v7 = vld [vmem:[%s22050_s2 + $0x2a8] ss:$16 sps:$4 sm:$0xff]  }
 0x303   : > { %6180 = vmatprep.subr.bf16.mxu1 %v15835_v39  ;;  %v15910_v39 = vld [vmem:[%s22050_s2 + $0x2c4] ss:$16 sps:$4 sm:$0xff]  }
 0x305   : > { %6095 = vmatpush1.bf16.msra.mxu0 %v15830_v40  ;;  %v15913_v40 = vld [vmem:[%s22050_s2 + $0x2cc] ss:$16 sps:$4 sm:$0xff]  }
 0x306   : > { %6181 = vmatpush1.bf16.msra.mxu1 %v15833_v2  ;;  %6096 = vmatprep.subr.bf16.mxu0 %v15838_v20  ;;  %v15908_v2 = vld [vmem:[%s22050_s2 + $0x2c0] ss:$16 sps:$4 sm:$0xff]   ;;  %v15911_v20 = vld [vmem:[%s22050_s2 + $0x2c8] ss:$16 sps:$4 sm:$0xff]  }
 0x307   : > { %6182 = vmatprep.subr.bf16.mxu1 %v15841_v24  ;;  %v15916_v24 = vld [vmem:[%s22050_s2 + $0x2e4] ss:$16 sps:$4 sm:$0xff]  }
 0x309   : > { %6097 = vmatpush1.bf16.msra.mxu0 %v15836_v26  ;;  %v15919_v26 = vld [vmem:[%s22050_s2 + $0x2ec] ss:$16 sps:$4 sm:$0xff]  }
 0x30a   : > { %6183 = vmatpush1.bf16.msra.mxu1 %v15839_v63  ;;  %6098 = vmatprep.subr.bf16.mxu0 %v15844_v25  ;;  %v15914_v63 = vld [vmem:[%s22050_s2 + $0x2e0] ss:$16 sps:$4 sm:$0xff]   ;;  %v15917_v25 = vld [vmem:[%s22050_s2 + $0x2e8] ss:$16 sps:$4 sm:$0xff]  }
 0x30b   : > { %6184 = vmatprep.subr.bf16.mxu1 %v15847_v23  ;;  %v15922_v23 = vld [vmem:[%s22050_s2 + $0x304] ss:$16 sps:$4 sm:$0xff]  }
 0x30d   : > { %6099 = vmatpush1.bf16.msra.mxu0 %v15842_v56  ;;  %v15925_v56 = vld [vmem:[%s22050_s2 + $0x30c] ss:$16 sps:$4 sm:$0xff]  }
 0x30e   : > { %6185 = vmatpush1.bf16.msra.mxu1 %v15845_v62  ;;  %6100 = vmatprep.subr.bf16.mxu0 %v15850_v34  ;;  %v15920_v62 = vld [vmem:[%s22050_s2 + $0x300] ss:$16 sps:$4 sm:$0xff]   ;;  %v15923_v34 = vld [vmem:[%s22050_s2 + $0x308] ss:$16 sps:$4 sm:$0xff]  }
 0x30f   : > { %6186 = vmatprep.subr.bf16.mxu1 %v15853_v17  ;;  %v15928_v17 = vld [vmem:[%s22050_s2 + $0x324] ss:$16 sps:$4 sm:$0xff]  }
 0x311   : > { %6101 = vmatpush1.bf16.msra.mxu0 %v15848_v28  ;;  %v15931_v28 = vld [vmem:[%s22050_s2 + $0x32c] ss:$16 sps:$4 sm:$0xff]  }
 0x312   : > { %6187 = vmatpush1.bf16.msra.mxu1 %v15851_v61  ;;  %6102 = vmatprep.subr.bf16.mxu0 %v15856_v55  ;;  %v15926_v61 = vld [vmem:[%s22050_s2 + $0x320] ss:$16 sps:$4 sm:$0xff]   ;;  %v15929_v55 = vld [vmem:[%s22050_s2 + $0x328] ss:$16 sps:$4 sm:$0xff]  }
 0x313   : > { %6188 = vmatprep.subr.bf16.mxu1 %v15859_v9  ;;  %v15934_v9 = vld [vmem:[%s22050_s2 + $0x344] ss:$16 sps:$4 sm:$0xff]  }
 0x315   : > { %6103 = vmatpush1.bf16.msra.mxu0 %v15854_v0  ;;  %v15937_v0 = vld [vmem:[%s22050_s2 + $0x34c] ss:$16 sps:$4 sm:$0xff]  }
 0x316   : > { %6189 = vmatpush1.bf16.msra.mxu1 %v15857_v50  ;;  %6104 = vmatprep.subr.bf16.mxu0 %v15862_v35  ;;  %v15932_v50 = vld [vmem:[%s22050_s2 + $0x340] ss:$16 sps:$4 sm:$0xff]   ;;  %v15935_v35 = vld [vmem:[%s22050_s2 + $0x348] ss:$16 sps:$4 sm:$0xff]  }
 0x317   : > { %6190 = vmatprep.subr.bf16.mxu1 %v15865_v42  ;;  %v15940_v42 = vld [vmem:[%s22050_s2 + $0x364] ss:$16 sps:$4 sm:$0xff]  }
 0x319   : > { %6105 = vmatpush1.bf16.msra.mxu0 %v15860_v30  ;;  %v15938_v30 = vld [vmem:[%s22050_s2 + $0x360] ss:$16 sps:$4 sm:$0xff]  }
 0x31a   : > { %6191 = vmatpush1.bf16.msra.mxu1 %v15863_v11  ;;  %6106 = vmatprep.subr.bf16.mxu0 %v15868_v12  ;;  %v15941_v11 = vld [vmem:[%s22050_s2 + $0x368] ss:$16 sps:$4 sm:$0xff]   ;;  %v15946_v12 = vld [vmem:[%s22050_s2 + $0x384] ss:$16 sps:$4 sm:$0xff]  }
 0x31b   : > { %6192 = vmatprep.subr.bf16.mxu1 %v15871_v53  ;;  %v15944_v53 = vld [vmem:[%s22050_s2 + $0x380] ss:$16 sps:$4 sm:$0xff]  }
 0x31d   : > { %6107 = vmatpush1.bf16.msra.mxu0 %v15866_v58  ;;  %v15952_v58 = vld [vmem:[%s22050_s2 + $0x3a4] ss:$16 sps:$4 sm:$0xff]  }
 0x31e   : > { %6193 = vmatpush1.bf16.msra.mxu1 %v15869_v33  ;;  %6119 = vmatprep.subr.bf16.mxu0 %v15874_v15  ;;  %v15950_v33 = vld [vmem:[%s22050_s2 + $0x3a0] ss:$16 sps:$4 sm:$0xff]   ;;  %v15953_v15 = vld [vmem:[%s22050_s2 + $0x3a8] ss:$16 sps:$4 sm:$0xff]  }
 0x31f   : > { %6205 = vmatprep.subr.bf16.mxu1 %v15877_v14  ;;  %v15961_v14 = vld [vmem:[%s22050_s2 + $0x3cc] ss:$16 sps:$4 sm:$0xff]  }
 0x320   : > { %6109 = vmatmul.mubr.bf16.vlgmr.msra.gmra.mrb[16].mxu0 %v5422_v18 }
 0x321   : > { %6195 = vmatmul.mubr.bf16.vlgmr.msra.gmra.mrb[16].mxu1 %v5422_v18  ;;  %6120 = vmatpush1.bf16.msra.mxu0 %v15872_v47  ;;  %v15959_v47 = vld [vmem:[%s22050_s2 + $0x3c8] ss:$16 sps:$4 sm:$0xff]   ;;  %v15967_v18 = vld [vmem:[%s22050_s2 + $0x3ec] ss:$16 sps:$4 sm:$0xff]  }
 0x322   : > { %6151 = vmatprep.mubr.bf16.mxu0 %v18973_v8  ;;  %6206 = vmatpush1.bf16.msra.mxu1 %v15875_v6  ;;  %v15964_v6 = vld [vmem:[%s22050_s2 + $0x3e4] ss:$16 sps:$4 sm:$0xff]  }
 0x323   : > { %6237 = vmatprep.mubr.bf16.mxu1 %v18973_v8  ;;  %6121 = vmatprep.subr.bf16.mxu0 %v15880_v52  ;;  %v15892_v8 = vld [vmem:[%s22050_s2 + $0x264] ss:$16 sps:$4 sm:$0xff]   ;;  %v15962_v52 = vld [vmem:[%s22050_s2 + $0x3e0] ss:$16 sps:$4 sm:$0xff]  }
 0x324   : > { %6207 = vmatprep.subr.bf16.mxu1 %v15883_v38  ;;  %v15965_v38 = vld [vmem:[%s22050_s2 + $0x3e8] ss:$16 sps:$4 sm:$0xff]  }
 0x325   : > { %6122 = vmatpush1.bf16.msra.mxu0 %v15878_v43  ;;  %v15970_v43 = vld [vmem:[%s22050_s2 + $0x804] ss:$16 sps:$4 sm:$0xff]  }
 0x326   : > { %6208 = vmatpush1.bf16.msra.mxu1 %v15881_v19  ;;  %6123 = vmatprep.subr.bf16.mxu0 %v15886_v59  ;;  %v15973_v19 = vld [vmem:[%s22050_s2 + $0x80c] ss:$16 sps:$4 sm:$0xff]   ;;  %v15968_v59 = vld [vmem:[%s22050_s2 + $0x800] ss:$16 sps:$4 sm:$0xff]  }
 0x327   : > { %6209 = vmatprep.subr.bf16.mxu1 %v15889_v44  ;;  %v19559_v44 = vld [vmem:[#allocation3 + $0x48] sm:$0xff] }
 0x329   : > { %6124 = vmatpush1.bf16.msra.mxu0 %v15884_v32  ;;  %v15971_v32 = vld [vmem:[%s22050_s2 + $0x808] ss:$16 sps:$4 sm:$0xff]  }
 0x32a   : > { %6210 = vmatpush1.bf16.msra.mxu1 %v15887_v51  ;;  %6125 = vmatprep.subr.bf16.mxu0 %v15892_v8  ;;  %v15976_v51 = vld [vmem:[%s22050_s2 + $0x824] ss:$16 sps:$4 sm:$0xff]   ;;  %v17092_v8 = vld [vmem:[#allocation3 + $0x28] sm:$0xff] }
 0x32b   : > { %6211 = vmatprep.subr.bf16.mxu1 %v15895_v45  ;;  %v6253_v45 = vpack.c.bf16 %v19559_v44, %v17092_v8  ;;  %v16063_v8 = vld [vmem:[%s22050_s2 + $0x9ec] ss:$16 sps:$4 sm:$0xff]  }
 0x32d   : > { %6126 = vmatpush1.bf16.msra.mxu0 %v15890_v48  ;;  %v15979_v48 = vld [vmem:[%s22050_s2 + $0x82c] ss:$16 sps:$4 sm:$0xff]  }
 0x32e   : > { %6212 = vmatpush1.bf16.msra.mxu1 %v15893_v27  ;;  %6127 = vmatprep.subr.bf16.mxu0 %v15898_v36  ;;  %v15974_v27 = vld [vmem:[%s22050_s2 + $0x820] ss:$16 sps:$4 sm:$0xff]   ;;  %v15977_v36 = vld [vmem:[%s22050_s2 + $0x828] ss:$16 sps:$4 sm:$0xff]  }
 0x32f   : > { %6213 = vmatprep.subr.bf16.mxu1 %v15901_v4  ;;  %v15982_v4 = vld [vmem:[%s22050_s2 + $0x844] ss:$16 sps:$4 sm:$0xff]  }
 0x331   : > { %6128 = vmatpush1.bf16.msra.mxu0 %v15896_v29  ;;  %v15980_v29 = vld [vmem:[%s22050_s2 + $0x840] ss:$16 sps:$4 sm:$0xff]  }
 0x332   : > { %6214 = vmatpush1.bf16.msra.mxu1 %v15899_v41  ;;  %6129 = vmatprep.subr.bf16.mxu0 %v15904_v5  ;;  %v15983_v41 = vld [vmem:[%s22050_s2 + $0x848] ss:$16 sps:$4 sm:$0xff]   ;;  %v15988_v5 = vld [vmem:[%s22050_s2 + $0x864] ss:$16 sps:$4 sm:$0xff]  }
 0x333   : > { %6215 = vmatprep.subr.bf16.mxu1 %v15907_v57  ;;  %v15991_v57 = vld [vmem:[%s22050_s2 + $0x86c] ss:$16 sps:$4 sm:$0xff]  }
 0x335   : > { %6130 = vmatpush1.bf16.msra.mxu0 %v15902_v60  ;;  %v15986_v60 = vld [vmem:[%s22050_s2 + $0x860] ss:$16 sps:$4 sm:$0xff]  }
 0x336   : > { %6216 = vmatpush1.bf16.msra.mxu1 %v15905_v7  ;;  %6131 = vmatprep.subr.bf16.mxu0 %v15910_v39  ;;  %v15989_v7 = vld [vmem:[%s22050_s2 + $0x868] ss:$16 sps:$4 sm:$0xff]   ;;  %v15994_v39 = vld [vmem:[%s22050_s2 + $0x884] ss:$16 sps:$4 sm:$0xff]  }
 0x337   : > { %6217 = vmatprep.subr.bf16.mxu1 %v15913_v40  ;;  %v15997_v40 = vld [vmem:[%s22050_s2 + $0x88c] ss:$16 sps:$4 sm:$0xff]  }
 0x339   : > { %6132 = vmatpush1.bf16.msra.mxu0 %v15908_v2  ;;  %v15992_v2 = vld [vmem:[%s22050_s2 + $0x880] ss:$16 sps:$4 sm:$0xff]  }
 0x33a   : > { %6218 = vmatpush1.bf16.msra.mxu1 %v15911_v20  ;;  %6133 = vmatprep.subr.bf16.mxu0 %v15916_v24  ;;  %v15995_v20 = vld [vmem:[%s22050_s2 + $0x888] ss:$16 sps:$4 sm:$0xff]   ;;  %v16000_v24 = vld [vmem:[%s22050_s2 + $0x8a4] ss:$16 sps:$4 sm:$0xff]  }
 0x33b   : > { %6219 = vmatprep.subr.bf16.mxu1 %v15919_v26  ;;  %v16003_v26 = vld [vmem:[%s22050_s2 + $0x8ac] ss:$16 sps:$4 sm:$0xff]  }
 0x33d   : > { %6134 = vmatpush1.bf16.msra.mxu0 %v15914_v63  ;;  %v15998_v63 = vld [vmem:[%s22050_s2 + $0x8a0] ss:$16 sps:$4 sm:$0xff]  }
 0x33e   : > { %6220 = vmatpush1.bf16.msra.mxu1 %v15917_v25  ;;  %6135 = vmatprep.subr.bf16.mxu0 %v15922_v23  ;;  %v16001_v25 = vld [vmem:[%s22050_s2 + $0x8a8] ss:$16 sps:$4 sm:$0xff]   ;;  %v16006_v23 = vld [vmem:[%s22050_s2 + $0x8c4] ss:$16 sps:$4 sm:$0xff]  }
 0x33f   : > { %6221 = vmatprep.subr.bf16.mxu1 %v15925_v56  ;;  %v16009_v56 = vld [vmem:[%s22050_s2 + $0x8cc] ss:$16 sps:$4 sm:$0xff]  }
 0x341   : > { %6136 = vmatpush1.bf16.msra.mxu0 %v15920_v62  ;;  %v16004_v62 = vld [vmem:[%s22050_s2 + $0x8c0] ss:$16 sps:$4 sm:$0xff]  }
 0x342   : > { %6222 = vmatpush1.bf16.msra.mxu1 %v15923_v34  ;;  %6137 = vmatprep.subr.bf16.mxu0 %v15928_v17  ;;  %v16007_v34 = vld [vmem:[%s22050_s2 + $0x8c8] ss:$16 sps:$4 sm:$0xff]   ;;  %v16012_v17 = vld [vmem:[%s22050_s2 + $0x8e4] ss:$16 sps:$4 sm:$0xff]  }
 0x343   : > { %6223 = vmatprep.subr.bf16.mxu1 %v15931_v28  ;;  %v16015_v28 = vld [vmem:[%s22050_s2 + $0x8ec] ss:$16 sps:$4 sm:$0xff]  }
 0x345   : > { %6138 = vmatpush1.bf16.msra.mxu0 %v15926_v61  ;;  %v16010_v61 = vld [vmem:[%s22050_s2 + $0x8e0] ss:$16 sps:$4 sm:$0xff]  }
 0x346   : > { %6224 = vmatpush1.bf16.msra.mxu1 %v15929_v55  ;;  %6139 = vmatprep.subr.bf16.mxu0 %v15934_v9  ;;  %v16013_v55 = vld [vmem:[%s22050_s2 + $0x8e8] ss:$16 sps:$4 sm:$0xff]   ;;  %v16018_v9 = vld [vmem:[%s22050_s2 + $0x904] ss:$16 sps:$4 sm:$0xff]  }
 0x347   : > { %6225 = vmatprep.subr.bf16.mxu1 %v15937_v0  ;;  %v16021_v0 = vld [vmem:[%s22050_s2 + $0x90c] ss:$16 sps:$4 sm:$0xff]  }
 0x349   : > { %6140 = vmatpush1.bf16.msra.mxu0 %v15932_v50  ;;  %v16016_v50 = vld [vmem:[%s22050_s2 + $0x900] ss:$16 sps:$4 sm:$0xff]  }
 0x34a   : > { %6226 = vmatpush1.bf16.msra.mxu1 %v15935_v35  ;;  %6141 = vmatprep.subr.bf16.mxu0 %v15940_v42  ;;  %v16019_v35 = vld [vmem:[%s22050_s2 + $0x908] ss:$16 sps:$4 sm:$0xff]   ;;  %v16024_v42 = vld [vmem:[%s22050_s2 + $0x924] ss:$16 sps:$4 sm:$0xff]  }
 0x34b   : > { %6227 = vmatprep.subr.bf16.mxu1 %v15943_v16  ;;  %v16027_v16 = vld [vmem:[%s22050_s2 + $0x92c] ss:$16 sps:$4 sm:$0xff]  }
 0x34d   : > { %6142 = vmatpush1.bf16.msra.mxu0 %v15938_v30  ;;  %v16022_v30 = vld [vmem:[%s22050_s2 + $0x920] ss:$16 sps:$4 sm:$0xff]  }
 0x34e   : > { %6228 = vmatpush1.bf16.msra.mxu1 %v15941_v11  ;;  %6143 = vmatprep.subr.bf16.mxu0 %v15946_v12  ;;  %v16025_v11 = vld [vmem:[%s22050_s2 + $0x928] ss:$16 sps:$4 sm:$0xff]   ;;  %v16030_v12 = vld [vmem:[%s22050_s2 + $0x944] ss:$16 sps:$4 sm:$0xff]  }
 0x34f   : > { %6229 = vmatprep.subr.bf16.mxu1 %v15949_v1  ;;  %v16033_v1 = vld [vmem:[%s22050_s2 + $0x94c] ss:$16 sps:$4 sm:$0xff]  }
 0x351   : > { %6144 = vmatpush1.bf16.msra.mxu0 %v15944_v53  ;;  %v16028_v53 = vld [vmem:[%s22050_s2 + $0x940] ss:$16 sps:$4 sm:$0xff]  }
 0x352   : > { %6230 = vmatpush1.bf16.msra.mxu1 %v15947_v46  ;;  %6145 = vmatprep.subr.bf16.mxu0 %v15952_v58  ;;  %v16031_v46 = vld [vmem:[%s22050_s2 + $0x948] ss:$16 sps:$4 sm:$0xff]   ;;  %v16036_v58 = vld [vmem:[%s22050_s2 + $0x964] ss:$16 sps:$4 sm:$0xff]  }
 0x353   : > { %6231 = vmatprep.subr.bf16.mxu1 %v15955_v3  ;;  %v16039_v3 = vld [vmem:[%s22050_s2 + $0x96c] ss:$16 sps:$4 sm:$0xff]  }
 0x355   : > { %6146 = vmatpush1.bf16.msra.mxu0 %v15950_v33  ;;  %v16034_v33 = vld [vmem:[%s22050_s2 + $0x960] ss:$16 sps:$4 sm:$0xff]  }
 0x356   : > { %6232 = vmatpush1.bf16.msra.mxu1 %v15953_v15  ;;  %6147 = vmatprep.subr.bf16.mxu0 %v15958_v13  ;;  %v16037_v15 = vld [vmem:[%s22050_s2 + $0x968] ss:$16 sps:$4 sm:$0xff]   ;;  %v16042_v13 = vld [vmem:[%s22050_s2 + $0x984] ss:$16 sps:$4 sm:$0xff]  }
 0x357   : > { %6233 = vmatprep.subr.bf16.mxu1 %v15961_v14  ;;  %v16045_v14 = vld [vmem:[%s22050_s2 + $0x98c] ss:$16 sps:$4 sm:$0xff]  }
 0x359   : > { %6148 = vmatpush1.bf16.msra.mxu0 %v15956_v22  ;;  %v16040_v22 = vld [vmem:[%s22050_s2 + $0x980] ss:$16 sps:$4 sm:$0xff]  }
 0x35a   : > { %6234 = vmatpush1.bf16.msra.mxu1 %v15959_v47  ;;  %6149 = vmatprep.subr.bf16.mxu0 %v15964_v6  ;;  %v16043_v47 = vld [vmem:[%s22050_s2 + $0x988] ss:$16 sps:$4 sm:$0xff]   ;;  %v16048_v6 = vld [vmem:[%s22050_s2 + $0x9a4] ss:$16 sps:$4 sm:$0xff]  }
 0x35b   : > { %6235 = vmatprep.subr.bf16.mxu1 %v15967_v18  ;;  %v16051_v18 = vld [vmem:[%s22050_s2 + $0x9ac] ss:$16 sps:$4 sm:$0xff]  }
 0x35d   : > { %6150 = vmatpush1.bf16.msra.mxu0 %v15962_v52  ;;  %v16046_v52 = vld [vmem:[%s22050_s2 + $0x9a0] ss:$16 sps:$4 sm:$0xff]  }
 0x35e   : > { %6236 = vmatpush1.bf16.msra.mxu1 %v15965_v38  ;;  %7025 = vmatprep.subr.bf16.mxu0 %v15970_v43  ;;  %v16049_v38 = vld [vmem:[%s22050_s2 + $0x9a8] ss:$16 sps:$4 sm:$0xff]   ;;  %v16054_v43 = vld [vmem:[%s22050_s2 + $0x9c4] ss:$16 sps:$4 sm:$0xff]  }
 0x35f   : > { %7111 = vmatprep.subr.bf16.mxu1 %v15973_v19  ;;  %v16057_v19 = vld [vmem:[%s22050_s2 + $0x9cc] ss:$16 sps:$4 sm:$0xff]  }
 0x360   : > { %6152 = vmatmul.mubr.bf16.vlgmr.msra.gmra.mrb[16].mxu0 %v18982_v21 }
 0x361   : > { %6238 = vmatmul.mubr.bf16.vlgmr.msra.gmra.mrb[16].mxu1 %v18982_v21  ;;  %7026 = vmatpush1.bf16.msra.mxu0 %v15968_v59  ;;  %v15985_v21 = vld [vmem:[%s22050_s2 + $0x84c] ss:$16 sps:$4 sm:$0xff]   ;;  %v16052_v59 = vld [vmem:[%s22050_s2 + $0x9c0] ss:$16 sps:$4 sm:$0xff]  }
 0x362   : > { %7057 = vmatprep.mubr.bf16.mxu0 %v6253_v45  ;;  %7112 = vmatpush1.bf16.msra.mxu1 %v15971_v32  ;;  %v16055_v32 = vld [vmem:[%s22050_s2 + $0x9c8] ss:$16 sps:$4 sm:$0xff]  }
 0x363   : > { %7143 = vmatprep.mubr.bf16.mxu1 %v6253_v45  ;;  %7027 = vmatprep.subr.bf16.mxu0 %v15976_v51  ;;  %v16060_v51 = vld [vmem:[%s22050_s2 + $0x9e4] ss:$16 sps:$4 sm:$0xff]   ;;  %v16058_v45 = vld [vmem:[%s22050_s2 + $0x9e0] ss:$16 sps:$4 sm:$0xff]  }
 0x364   : > { %7113 = vmatprep.subr.bf16.mxu1 %v15979_v48  ;;  %v16061_v48 = vld [vmem:[%s22050_s2 + $0x9e8] ss:$16 sps:$4 sm:$0xff]  }
 0x365   : > { %7028 = vmatpush1.bf16.msra.mxu0 %v15974_v27  ;;  %v16066_v27 = vld [vmem:[%s22050_s2 + $0xa04] ss:$16 sps:$4 sm:$0xff]  }
 0x366   : > { %7114 = vmatpush1.bf16.msra.mxu1 %v15977_v36  ;;  %7029 = vmatprep.subr.bf16.mxu0 %v15982_v4  ;;  %v19750_v36 = vld [vmem:[#allocation3 + $0x40] sm:$0xff]  ;;  %v16069_v4 = vld [vmem:[%s22050_s2 + $0xa0c] ss:$16 sps:$4 sm:$0xff]  }
 0x367   : > { %7115 = vmatprep.subr.bf16.mxu1 %v15985_v21  ;;  %v16064_v21 = vld [vmem:[%s22050_s2 + $0xa00] ss:$16 sps:$4 sm:$0xff]  }
 0x369   : > { %7030 = vmatpush1.bf16.msra.mxu0 %v15980_v29  ;;  %v17093_v29 = vld [vmem:[#allocation3 + $0x20] sm:$0xff] }
 0x36a   : > { %7116 = vmatpush1.bf16.msra.mxu1 %v15983_v41  ;;  %7031 = vmatprep.subr.bf16.mxu0 %v15988_v5  ;;  %v6252_v41 = vpack.c.bf16 %v19750_v36, %v17093_v29  ;;  %v16067_v5 = vld [vmem:[%s22050_s2 + $0xa08] ss:$16 sps:$4 sm:$0xff]   ;;  %v16142_v29 = vld [vmem:[%s22050_s2 + $0xba0] ss:$16 sps:$4 sm:$0xff]  }
 0x36b   : > { %7117 = vmatprep.subr.bf16.mxu1 %v15991_v57  ;;  %v16072_v57 = vld [vmem:[%s22050_s2 + $0xa24] ss:$16 sps:$4 sm:$0xff]  }
 0x36d   : > { %7032 = vmatpush1.bf16.msra.mxu0 %v15986_v60  ;;  %v17094_v60 = vld [vmem:[#allocation3 + $0x38] sm:$0xff] }
 0x36e   : > { %7118 = vmatpush1.bf16.msra.mxu1 %v15989_v7  ;;  %7033 = vmatprep.subr.bf16.mxu0 %v15994_v39  ;;  %v17095_v7 = vld [vmem:[#allocation3 + $0x58] sm:$0xff] }
 0x36f   : > { %7119 = vmatprep.subr.bf16.mxu1 %v15997_v40  ;;  %v6255_v39 = vpack.c.bf16 %v17095_v7, %v17094_v60  ;;  %v16075_v40 = vld [vmem:[%s22050_s2 + $0xa2c] ss:$16 sps:$4 sm:$0xff]   ;;  %v7214_v60 = vld [vmem:[#allocation3 + $0x68] sm:$0x1] }
 0x370   : > { %v16153_v7 = vld [vmem:[%s22050_s2 + $0xbcc] ss:$16 sps:$4 sm:$0xff]  }
 0x371   : > { %7034 = vmatpush1.bf16.msra.mxu0 %v15992_v2  ;;  %v16070_v2 = vld [vmem:[%s22050_s2 + $0xa20] ss:$16 sps:$4 sm:$0xff]  }
 0x372   : > { %7120 = vmatpush1.bf16.msra.mxu1 %v15995_v20  ;;  %7035 = vmatprep.subr.bf16.mxu0 %v16000_v24  ;;  %v16073_v20 = vld [vmem:[%s22050_s2 + $0xa28] ss:$16 sps:$4 sm:$0xff]   ;;  %v16078_v24 = vld [vmem:[%s22050_s2 + $0xa44] ss:$16 sps:$4 sm:$0xff]  }
 0x373   : > { %7121 = vmatprep.subr.bf16.mxu1 %v16003_v26  ;;  %v16081_v26 = vld [vmem:[%s22050_s2 + $0xa4c] ss:$16 sps:$4 sm:$0xff]  }
 0x375   : > { %7036 = vmatpush1.bf16.msra.mxu0 %v15998_v63  ;;  %v16076_v63 = vld [vmem:[%s22050_s2 + $0xa40] ss:$16 sps:$4 sm:$0xff]  }
 0x376   : > { %7122 = vmatpush1.bf16.msra.mxu1 %v16001_v25  ;;  %7037 = vmatprep.subr.bf16.mxu0 %v16006_v23  ;;  %v16079_v25 = vld [vmem:[%s22050_s2 + $0xa48] ss:$16 sps:$4 sm:$0xff]   ;;  %v16084_v23 = vld [vmem:[%s22050_s2 + $0xa64] ss:$16 sps:$4 sm:$0xff]  }
 0x377   : > { %7123 = vmatprep.subr.bf16.mxu1 %v16009_v56  ;;  %v16087_v56 = vld [vmem:[%s22050_s2 + $0xa6c] ss:$16 sps:$4 sm:$0xff]  }
 0x379   : > { %7038 = vmatpush1.bf16.msra.mxu0 %v16004_v62  ;;  %v16082_v62 = vld [vmem:[%s22050_s2 + $0xa60] ss:$16 sps:$4 sm:$0xff]  }
 0x37a   : > { %7124 = vmatpush1.bf16.msra.mxu1 %v16007_v34  ;;  %7039 = vmatprep.subr.bf16.mxu0 %v16012_v17  ;;  %v16085_v34 = vld [vmem:[%s22050_s2 + $0xa68] ss:$16 sps:$4 sm:$0xff]   ;;  %v16090_v17 = vld [vmem:[%s22050_s2 + $0xa84] ss:$16 sps:$4 sm:$0xff]  }
 0x37b   : > { %7125 = vmatprep.subr.bf16.mxu1 %v16015_v28  ;;  %v16093_v28 = vld [vmem:[%s22050_s2 + $0xa8c] ss:$16 sps:$4 sm:$0xff]  }
 0x37d   : > { %7040 = vmatpush1.bf16.msra.mxu0 %v16010_v61  ;;  %v16088_v61 = vld [vmem:[%s22050_s2 + $0xa80] ss:$16 sps:$4 sm:$0xff]  }
 0x37e   : > { %7126 = vmatpush1.bf16.msra.mxu1 %v16013_v55  ;;  %7041 = vmatprep.subr.bf16.mxu0 %v16018_v9  ;;  %v16091_v55 = vld [vmem:[%s22050_s2 + $0xa88] ss:$16 sps:$4 sm:$0xff]   ;;  %v16096_v9 = vld [vmem:[%s22050_s2 + $0xaa4] ss:$16 sps:$4 sm:$0xff]  }
 0x37f   : > { %7127 = vmatprep.subr.bf16.mxu1 %v16021_v0  ;;  %v16099_v0 = vld [vmem:[%s22050_s2 + $0xaac] ss:$16 sps:$4 sm:$0xff]  }
 0x381   : > { %7042 = vmatpush1.bf16.msra.mxu0 %v16016_v50  ;;  %v16094_v50 = vld [vmem:[%s22050_s2 + $0xaa0] ss:$16 sps:$4 sm:$0xff]  }
 0x382   : > { %7128 = vmatpush1.bf16.msra.mxu1 %v16019_v35  ;;  %7043 = vmatprep.subr.bf16.mxu0 %v16024_v42  ;;  %v16097_v35 = vld [vmem:[%s22050_s2 + $0xaa8] ss:$16 sps:$4 sm:$0xff]   ;;  %v16102_v42 = vld [vmem:[%s22050_s2 + $0xac4] ss:$16 sps:$4 sm:$0xff]  }
 0x383   : > { %7129 = vmatprep.subr.bf16.mxu1 %v16027_v16  ;;  %v16105_v16 = vld [vmem:[%s22050_s2 + $0xacc] ss:$16 sps:$4 sm:$0xff]  }
 0x385   : > { %7044 = vmatpush1.bf16.msra.mxu0 %v16022_v30  ;;  %v16100_v30 = vld [vmem:[%s22050_s2 + $0xac0] ss:$16 sps:$4 sm:$0xff]  }
 0x386   : > { %7130 = vmatpush1.bf16.msra.mxu1 %v16025_v11  ;;  %7045 = vmatprep.subr.bf16.mxu0 %v16030_v12  ;;  %v16103_v11 = vld [vmem:[%s22050_s2 + $0xac8] ss:$16 sps:$4 sm:$0xff]   ;;  %v16108_v12 = vld [vmem:[%s22050_s2 + $0xae4] ss:$16 sps:$4 sm:$0xff]  }
 0x387   : > { %7131 = vmatprep.subr.bf16.mxu1 %v16033_v1  ;;  %v16111_v1 = vld [vmem:[%s22050_s2 + $0xaec] ss:$16 sps:$4 sm:$0xff]  }
 0x389   : > { %7046 = vmatpush1.bf16.msra.mxu0 %v16028_v53  ;;  %v16106_v53 = vld [vmem:[%s22050_s2 + $0xae0] ss:$16 sps:$4 sm:$0xff]  }
 0x38a   : > { %7132 = vmatpush1.bf16.msra.mxu1 %v16031_v46  ;;  %7047 = vmatprep.subr.bf16.mxu0 %v16036_v58  ;;  %v16109_v46 = vld [vmem:[%s22050_s2 + $0xae8] ss:$16 sps:$4 sm:$0xff]   ;;  %v16114_v58 = vld [vmem:[%s22050_s2 + $0xb04] ss:$16 sps:$4 sm:$0xff]  }
 0x38b   : > { %7133 = vmatprep.subr.bf16.mxu1 %v16039_v3  ;;  %v16117_v3 = vld [vmem:[%s22050_s2 + $0xb0c] ss:$16 sps:$4 sm:$0xff]  }
 0x38d   : > { %7048 = vmatpush1.bf16.msra.mxu0 %v16034_v33  ;;  %v16112_v33 = vld [vmem:[%s22050_s2 + $0xb00] ss:$16 sps:$4 sm:$0xff]  }
 0x38e   : > { %7134 = vmatpush1.bf16.msra.mxu1 %v16037_v15  ;;  %7049 = vmatprep.subr.bf16.mxu0 %v16042_v13  ;;  %v16115_v15 = vld [vmem:[%s22050_s2 + $0xb08] ss:$16 sps:$4 sm:$0xff]   ;;  %v16120_v13 = vld [vmem:[%s22050_s2 + $0xb24] ss:$16 sps:$4 sm:$0xff]  }
 0x38f   : > { %7135 = vmatprep.subr.bf16.mxu1 %v16045_v14  ;;  %v16123_v14 = vld [vmem:[%s22050_s2 + $0xb2c] ss:$16 sps:$4 sm:$0xff]  }
 0x391   : > { %7050 = vmatpush1.bf16.msra.mxu0 %v16040_v22  ;;  %v16118_v22 = vld [vmem:[%s22050_s2 + $0xb20] ss:$16 sps:$4 sm:$0xff]  }
 0x392   : > { %7136 = vmatpush1.bf16.msra.mxu1 %v16043_v47  ;;  %7051 = vmatprep.subr.bf16.mxu0 %v16048_v6  ;;  %v16121_v47 = vld [vmem:[%s22050_s2 + $0xb28] ss:$16 sps:$4 sm:$0xff]   ;;  %v16126_v6 = vld [vmem:[%s22050_s2 + $0xb44] ss:$16 sps:$4 sm:$0xff]  }
 0x393   : > { %7137 = vmatprep.subr.bf16.mxu1 %v16051_v18  ;;  %v16129_v18 = vld [vmem:[%s22050_s2 + $0xb4c] ss:$16 sps:$4 sm:$0xff]  }
 0x395   : > { %7052 = vmatpush1.bf16.msra.mxu0 %v16046_v52  ;;  %v16124_v52 = vld [vmem:[%s22050_s2 + $0xb40] ss:$16 sps:$4 sm:$0xff]  }
 0x396   : > { %7138 = vmatpush1.bf16.msra.mxu1 %v16049_v38  ;;  %7053 = vmatprep.subr.bf16.mxu0 %v16054_v43  ;;  %v16127_v38 = vld [vmem:[%s22050_s2 + $0xb48] ss:$16 sps:$4 sm:$0xff]   ;;  %v16132_v43 = vld [vmem:[%s22050_s2 + $0xb64] ss:$16 sps:$4 sm:$0xff]  }
 0x397   : > { %7139 = vmatprep.subr.bf16.mxu1 %v16057_v19  ;;  %v16135_v19 = vld [vmem:[%s22050_s2 + $0xb6c] ss:$16 sps:$4 sm:$0xff]  }
 0x399   : > { %7054 = vmatpush1.bf16.msra.mxu0 %v16052_v59  ;;  %v16130_v59 = vld [vmem:[%s22050_s2 + $0xb60] ss:$16 sps:$4 sm:$0xff]  }
 0x39a   : > { %7140 = vmatpush1.bf16.msra.mxu1 %v16055_v32  ;;  %7055 = vmatprep.subr.bf16.mxu0 %v16060_v51  ;;  %v16133_v32 = vld [vmem:[%s22050_s2 + $0xb68] ss:$16 sps:$4 sm:$0xff]   ;;  %v16138_v51 = vld [vmem:[%s22050_s2 + $0xb84] ss:$16 sps:$4 sm:$0xff]  }
 0x39b   : > { %7141 = vmatprep.subr.bf16.mxu1 %v16063_v8  ;;  %v16141_v8 = vld [vmem:[%s22050_s2 + $0xb8c] ss:$16 sps:$4 sm:$0xff]  }
 0x39d   : > { %7056 = vmatpush1.bf16.msra.mxu0 %v16058_v45  ;;  %v16136_v45 = vld [vmem:[%s22050_s2 + $0xb80] ss:$16 sps:$4 sm:$0xff]  }
 0x39e   : > { %7142 = vmatpush1.bf16.msra.mxu1 %v16061_v48  ;;  %7068 = vmatprep.subr.bf16.mxu0 %v16066_v27  ;;  %v16139_v48 = vld [vmem:[%s22050_s2 + $0xb88] ss:$16 sps:$4 sm:$0xff]   ;;  %v16144_v27 = vld [vmem:[%s22050_s2 + $0xba4] ss:$16 sps:$4 sm:$0xff]  }
 0x39f   : > { %7154 = vmatprep.subr.bf16.mxu1 %v16069_v4  ;;  %v16147_v4 = vld [vmem:[%s22050_s2 + $0xbac] ss:$16 sps:$4 sm:$0xff]  }
 0x3a0   : > { %7058 = vmatmul.mubr.bf16.vlgmr.msra.gmra.mrb[16].mxu0 %v6252_v41 }
 0x3a1   : > { %7144 = vmatmul.mubr.bf16.vlgmr.msra.gmra.mrb[16].mxu1 %v6252_v41  ;;  %7069 = vmatpush1.bf16.msra.mxu0 %v16064_v21  ;;  %v7206_v21 = vld [vmem:[#allocation3 + $0x28] sm:$0xfe] }
 0x3a2   : > { %7100 = vmatprep.mubr.bf16.mxu0 %v6255_v39  ;;  %7155 = vmatpush1.bf16.msra.mxu1 %v16067_v5  ;;  %v7218_v41 = vpack.c.bf16 %v19559_v44, %v7206_v21  ;;  %v16145_v5 = vld [vmem:[%s22050_s2 + $0xba8] ss:$16 sps:$4 sm:$0xff]   ;;  %v16148_v44 = vld [vmem:[%s22050_s2 + $0xbc0] ss:$16 sps:$4 sm:$0xff]  }
 0x3a3   : > { %7186 = vmatprep.mubr.bf16.mxu1 %v6255_v39  ;;  %7070 = vmatprep.subr.bf16.mxu0 %v16072_v57  ;;  %v16150_v57 = vld [vmem:[%s22050_s2 + $0xbc4] ss:$16 sps:$4 sm:$0xff]   ;;  %v7222_v39 = vpack.c.bf16 %v7214_v60, %v7214_v60  ;;  %v16208_v21 = vld [vmem:[%s22050_s2 + $0xd00] ss:$16 sps:$4 sm:$0xff]   ;;  %v16217_v60 = vld [vmem:[%s22050_s2 + $0xd28] ss:$16 sps:$4 sm:$0xff]  }
 0x3a4   : > { %7156 = vmatprep.subr.bf16.mxu1 %v16075_v40  ;;  %v7370_v40 = vshll.u32 %v7218_v41, 16 }
 0x3a5   : > { %7071 = vmatpush1.bf16.msra.mxu0 %v16070_v2  ;;  %v16151_v2 = vld [vmem:[%s22050_s2 + $0xbc8] ss:$16 sps:$4 sm:$0xff]  }
 0x3a6   : > { %7157 = vmatpush1.bf16.msra.mxu1 %v16073_v20  ;;  %7072 = vmatprep.subr.bf16.mxu0 %v16078_v24  ;;  %v16156_v20 = vld [vmem:[%s22050_s2 + $0xbe4] ss:$16 sps:$4 sm:$0xff]   ;;  %v16159_v24 = vld [vmem:[%s22050_s2 + $0xbec] ss:$16 sps:$4 sm:$0xff]  }
 0x3a7   : > { %7158 = vmatprep.subr.bf16.mxu1 %v16081_v26  ;;  %v16154_v26 = vld [vmem:[%s22050_s2 + $0xbe0] ss:$16 sps:$4 sm:$0xff]  }
 0x3a9   : > { %7073 = vmatpush1.bf16.msra.mxu0 %v16076_v63  ;;  %v7372_v63 = vrot.slane %v7370_v40, 1  ;;  %v16223_v40 = vld [vmem:[%s22050_s2 + $0xd48] ss:$16 sps:$4 sm:$0xff]  }
 0x3aa   : > { %7159 = vmatpush1.bf16.msra.mxu1 %v16079_v25  ;;  %7074 = vmatprep.subr.bf16.mxu0 %v16084_v23  ;;  %v7375_v25 = vshll.u32 %v7222_v39, 16  ;;  %v16157_v23 = vld [vmem:[%s22050_s2 + $0xbe8] ss:$16 sps:$4 sm:$0xff]   ;;  %v16220_v39 = vld [vmem:[%s22050_s2 + $0xd40] ss:$16 sps:$4 sm:$0xff]  }
 0x3ab   : > { %7160 = vmatprep.subr.bf16.mxu1 %v16087_v56  ;;  %v16162_v56 = vld [vmem:[%s22050_s2 + $0xc04] ss:$16 sps:$4 sm:$0xff]  }
 0x3ad   : > { %7075 = vmatpush1.bf16.msra.mxu0 %v16082_v62  ;;  %v16165_v62 = vld [vmem:[%s22050_s2 + $0xc0c] ss:$16 sps:$4 sm:$0xff]  }
 0x3ae   : > { %7161 = vmatpush1.bf16.msra.mxu1 %v16085_v34  ;;  %7076 = vmatprep.subr.bf16.mxu0 %v16090_v17  ;;  %v7368_v34 = vshrl.u32 %v7218_v41, 16  ;;  %v16160_v17 = vld [vmem:[%s22050_s2 + $0xc00] ss:$16 sps:$4 sm:$0xff]   ;;  %v16216_v41 = vld [vmem:[%s22050_s2 + $0xd24] ss:$16 sps:$4 sm:$0xff]  }
 0x3af   : > { %7162 = vmatprep.subr.bf16.mxu1 %v16093_v28 }
 0x3b0   : > { %v7373_v28 = vor.u32 %v7372_v63, %v7368_v34  ;;  %v16234_v63 = vld [vmem:[%s22050_s2 + $0xd84] ss:$16 sps:$4 sm:$0xff]  }
 0x3b1   : > { %7077 = vmatpush1.bf16.msra.mxu0 %v16088_v61  ;;  %v7377_v61 = vrot.slane %v7375_v25, 1  ;;  %v16237_v25 = vld [vmem:[%s22050_s2 + $0xd8c] ss:$16 sps:$4 sm:$0xff]   ;;  %v7205_v34 = vld [vmem:[#allocation3 + $0x20] sm:$0xfe] }
 0x3b2   : > { %7163 = vmatpush1.bf16.msra.mxu1 %v16091_v55  ;;  %7078 = vmatprep.subr.bf16.mxu0 %v16096_v9  ;;  %v17096_v55 = vld [vmem:[#allocation3 + $0x30] sm:$0xff] }
 0x3b3   : > { %7164 = vmatprep.subr.bf16.mxu1 %v16099_v0  ;;  %v17097_v9 = vld [vmem:[#allocation3 + $0x50] sm:$0xff] }
 0x3b4   : > { %v6254_v0 = vpack.c.bf16 %v17097_v9, %v17096_v55  ;;  %v16238_v55 = vld [vmem:[%s22050_s2 + $0xda0] ss:$16 sps:$4 sm:$0xff]   ;;  %v16241_v9 = vld [vmem:[%s22050_s2 + $0xda8] ss:$16 sps:$4 sm:$0xff]  }
 0x3b5   : > { %7079 = vmatpush1.bf16.msra.mxu0 %v16094_v50  ;;  %v16163_v50 = vld [vmem:[%s22050_s2 + $0xc08] ss:$16 sps:$4 sm:$0xff]  }
 0x3b6   : > { %7165 = vmatpush1.bf16.msra.mxu1 %v16097_v35  ;;  %7080 = vmatprep.subr.bf16.mxu0 %v16102_v42  ;;  %v16168_v35 = vld [vmem:[%s22050_s2 + $0xc24] ss:$16 sps:$4 sm:$0xff]   ;;  %v16171_v42 = vld [vmem:[%s22050_s2 + $0xc2c] ss:$16 sps:$4 sm:$0xff]  }
 0x3b7   : > { %7166 = vmatprep.subr.bf16.mxu1 %v16105_v16  ;;  %v7378_v16 = vsel %vm7354_vm12, %v7373_v28, %v7377_v61  ;;  %v7217_v28 = vpack.c.bf16 %v19750_v36, %v7205_v34  ;;  %v7213_v61 = vld [vmem:[#allocation3 + $0x60] sm:$0x1]  ;;  %v16249_v36 = vld [vmem:[%s22050_s2 + $0xdcc] ss:$16 sps:$4 sm:$0xff]  }
 0x3b8   : > { %v16310_v34 = vld [vmem:[%s22050_s2 + $0xf20] ss:$16 sps:$4 sm:$0xff]  }
 0x3b9   : > { %7081 = vmatpush1.bf16.msra.mxu0 %v16100_v30  ;;  %v16166_v30 = vld [vmem:[%s22050_s2 + $0xc20] ss:$16 sps:$4 sm:$0xff]  }
 0x3ba   : > { %7167 = vmatpush1.bf16.msra.mxu1 %v16103_v11  ;;  %7082 = vmatprep.subr.bf16.mxu0 %v16108_v12  ;;  %v16169_v11 = vld [vmem:[%s22050_s2 + $0xc28] ss:$16 sps:$4 sm:$0xff]   ;;  %v16174_v12 = vld [vmem:[%s22050_s2 + $0xc44] ss:$16 sps:$4 sm:$0xff]  }
 0x3bb   : > { %7168 = vmatprep.subr.bf16.mxu1 %v16111_v1  ;;  %v16177_v1 = vld [vmem:[%s22050_s2 + $0xc4c] ss:$16 sps:$4 sm:$0xff]  }
 0x3bd   : > { %7083 = vmatpush1.bf16.msra.mxu0 %v16106_v53  ;;  %v16172_v53 = vld [vmem:[%s22050_s2 + $0xc40] ss:$16 sps:$4 sm:$0xff]  }
 0x3be   : > { %7169 = vmatpush1.bf16.msra.mxu1 %v16109_v46  ;;  %7084 = vmatprep.subr.bf16.mxu0 %v16114_v58  ;;  %v16175_v46 = vld [vmem:[%s22050_s2 + $0xc48] ss:$16 sps:$4 sm:$0xff]   ;;  %v16180_v58 = vld [vmem:[%s22050_s2 + $0xc64] ss:$16 sps:$4 sm:$0xff]  }
 0x3bf   : > { %7170 = vmatprep.subr.bf16.mxu1 %v16117_v3  ;;  %v16183_v3 = vld [vmem:[%s22050_s2 + $0xc6c] ss:$16 sps:$4 sm:$0xff]  }
 0x3c1   : > { %7085 = vmatpush1.bf16.msra.mxu0 %v16112_v33  ;;  %v16178_v33 = vld [vmem:[%s22050_s2 + $0xc60] ss:$16 sps:$4 sm:$0xff]  }
 0x3c2   : > { %7171 = vmatpush1.bf16.msra.mxu1 %v16115_v15  ;;  %7086 = vmatprep.subr.bf16.mxu0 %v16120_v13  ;;  %v16181_v15 = vld [vmem:[%s22050_s2 + $0xc68] ss:$16 sps:$4 sm:$0xff]   ;;  %v16186_v13 = vld [vmem:[%s22050_s2 + $0xc84] ss:$16 sps:$4 sm:$0xff]  }
 0x3c3   : > { %7172 = vmatprep.subr.bf16.mxu1 %v16123_v14  ;;  %v16189_v14 = vld [vmem:[%s22050_s2 + $0xc8c] ss:$16 sps:$4 sm:$0xff]  }
 0x3c5   : > { %7087 = vmatpush1.bf16.msra.mxu0 %v16118_v22  ;;  %v16184_v22 = vld [vmem:[%s22050_s2 + $0xc80] ss:$16 sps:$4 sm:$0xff]  }
 0x3c6   : > { %7173 = vmatpush1.bf16.msra.mxu1 %v16121_v47  ;;  %7088 = vmatprep.subr.bf16.mxu0 %v16126_v6  ;;  %v16187_v47 = vld [vmem:[%s22050_s2 + $0xc88] ss:$16 sps:$4 sm:$0xff]   ;;  %v16192_v6 = vld [vmem:[%s22050_s2 + $0xca4] ss:$16 sps:$4 sm:$0xff]  }
 0x3c7   : > { %7174 = vmatprep.subr.bf16.mxu1 %v16129_v18  ;;  %v16195_v18 = vld [vmem:[%s22050_s2 + $0xcac] ss:$16 sps:$4 sm:$0xff]  }
 0x3c9   : > { %7089 = vmatpush1.bf16.msra.mxu0 %v16124_v52  ;;  %v16190_v52 = vld [vmem:[%s22050_s2 + $0xca0] ss:$16 sps:$4 sm:$0xff]  }
 0x3ca   : > { %7175 = vmatpush1.bf16.msra.mxu1 %v16127_v38  ;;  %7090 = vmatprep.subr.bf16.mxu0 %v16132_v43  ;;  %v16193_v38 = vld [vmem:[%s22050_s2 + $0xca8] ss:$16 sps:$4 sm:$0xff]   ;;  %v16198_v43 = vld [vmem:[%s22050_s2 + $0xcc4] ss:$16 sps:$4 sm:$0xff]  }
 0x3cb   : > { %7176 = vmatprep.subr.bf16.mxu1 %v16135_v19  ;;  %v16201_v19 = vld [vmem:[%s22050_s2 + $0xccc] ss:$16 sps:$4 sm:$0xff]  }
 0x3cd   : > { %7091 = vmatpush1.bf16.msra.mxu0 %v16130_v59  ;;  %v16196_v59 = vld [vmem:[%s22050_s2 + $0xcc0] ss:$16 sps:$4 sm:$0xff]  }
 0x3ce   : > { %7177 = vmatpush1.bf16.msra.mxu1 %v16133_v32  ;;  %7092 = vmatprep.subr.bf16.mxu0 %v16138_v51  ;;  %v16199_v32 = vld [vmem:[%s22050_s2 + $0xcc8] ss:$16 sps:$4 sm:$0xff]   ;;  %v16204_v51 = vld [vmem:[%s22050_s2 + $0xce4] ss:$16 sps:$4 sm:$0xff]  }
 0x3cf   : > { %7178 = vmatprep.subr.bf16.mxu1 %v16141_v8  ;;  %v16207_v8 = vld [vmem:[%s22050_s2 + $0xcec] ss:$16 sps:$4 sm:$0xff]  }
 0x3d1   : > { %7093 = vmatpush1.bf16.msra.mxu0 %v16136_v45  ;;  %v16202_v45 = vld [vmem:[%s22050_s2 + $0xce0] ss:$16 sps:$4 sm:$0xff]  }
 0x3d2   : > { %7179 = vmatpush1.bf16.msra.mxu1 %v16139_v48  ;;  %7094 = vmatprep.subr.bf16.mxu0 %v16144_v27  ;;  %v16205_v48 = vld [vmem:[%s22050_s2 + $0xce8] ss:$16 sps:$4 sm:$0xff]   ;;  %v16210_v27 = vld [vmem:[%s22050_s2 + $0xd04] ss:$16 sps:$4 sm:$0xff]  }
 0x3d3   : > { %7180 = vmatprep.subr.bf16.mxu1 %v16147_v4  ;;  %v16213_v4 = vld [vmem:[%s22050_s2 + $0xd0c] ss:$16 sps:$4 sm:$0xff]  }
 0x3d5   : > { %7095 = vmatpush1.bf16.msra.mxu0 %v16142_v29  ;;  %v16211_v29 = vld [vmem:[%s22050_s2 + $0xd08] ss:$16 sps:$4 sm:$0xff]  }
 0x3d6   : > { %7181 = vmatpush1.bf16.msra.mxu1 %v16145_v5  ;;  %7096 = vmatprep.subr.bf16.mxu0 %v16150_v57  ;;  %v16219_v5 = vld [vmem:[%s22050_s2 + $0xd2c] ss:$16 sps:$4 sm:$0xff]   ;;  %v16214_v57 = vld [vmem:[%s22050_s2 + $0xd20] ss:$16 sps:$4 sm:$0xff]  }
 0x3d7   : > { %7182 = vmatprep.subr.bf16.mxu1 %v16153_v7  ;;  %v16222_v7 = vld [vmem:[%s22050_s2 + $0xd44] ss:$16 sps:$4 sm:$0xff]  }
 0x3d9   : > { %7097 = vmatpush1.bf16.msra.mxu0 %v16148_v44  ;;  %v16225_v44 = vld [vmem:[%s22050_s2 + $0xd4c] ss:$16 sps:$4 sm:$0xff]  }
 0x3da   : > { %7183 = vmatpush1.bf16.msra.mxu1 %v16151_v2  ;;  %7098 = vmatprep.subr.bf16.mxu0 %v16156_v20  ;;  %v16228_v2 = vld [vmem:[%s22050_s2 + $0xd64] ss:$16 sps:$4 sm:$0xff]   ;;  %v16231_v20 = vld [vmem:[%s22050_s2 + $0xd6c] ss:$16 sps:$4 sm:$0xff]  }
 0x3db   : > { %7184 = vmatprep.subr.bf16.mxu1 %v16159_v24  ;;  %v16226_v24 = vld [vmem:[%s22050_s2 + $0xd60] ss:$16 sps:$4 sm:$0xff]  }
 0x3dd   : > { %7099 = vmatpush1.bf16.msra.mxu0 %v16154_v26  ;;  %v16229_v26 = vld [vmem:[%s22050_s2 + $0xd68] ss:$16 sps:$4 sm:$0xff]  }
 0x3de   : > { %7185 = vmatpush1.bf16.msra.mxu1 %v16157_v23  ;;  %8047 = vmatprep.subr.bf16.mxu0 %v16162_v56  ;;  %v16232_v23 = vld [vmem:[%s22050_s2 + $0xd80] ss:$16 sps:$4 sm:$0xff]   ;;  %v16235_v56 = vld [vmem:[%s22050_s2 + $0xd88] ss:$16 sps:$4 sm:$0xff]  }
 0x3df   : > { %8133 = vmatprep.subr.bf16.mxu1 %v16165_v62  ;;  %v16240_v62 = vld [vmem:[%s22050_s2 + $0xda4] ss:$16 sps:$4 sm:$0xff]  }
 0x3e0   : > { %7101 = vmatmul.mubr.bf16.vlgmr.msra.gmra.mrb[16].mxu0 %v6254_v0 }
 0x3e1   : > { %7187 = vmatmul.mubr.bf16.vlgmr.msra.gmra.mrb[16].mxu1 %v6254_v0  ;;  %8048 = vmatpush1.bf16.msra.mxu0 %v16160_v17  ;;  %v16243_v17 = vld [vmem:[%s22050_s2 + $0xdac] ss:$16 sps:$4 sm:$0xff]   ;;  %v16246_v0 = vld [vmem:[%s22050_s2 + $0xdc4] ss:$16 sps:$4 sm:$0xff]  }
 0x3e2   : > { %8079 = vmatprep.mubr.bf16.mxu0 %v7378_v16  ;;  %8134 = vmatpush1.bf16.msra.mxu1 %v16163_v50  ;;  %v7221_v50 = vpack.c.bf16 %v7213_v61, %v7213_v61  ;;  %v16321_v61 = vld [vmem:[%s22050_s2 + $0xf4c] ss:$16 sps:$4 sm:$0xff]  }
 0x3e3   : > { %8165 = vmatprep.mubr.bf16.mxu1 %v7378_v16  ;;  %8049 = vmatprep.subr.bf16.mxu0 %v16168_v35  ;;  %v7358_v35 = vshll.u32 %v7217_v28, 16  ;;  %v16247_v16 = vld [vmem:[%s22050_s2 + $0xdc8] ss:$16 sps:$4 sm:$0xff]  }
 0x3e4   : > { %8135 = vmatprep.subr.bf16.mxu1 %v16171_v42  ;;  %v16244_v42 = vld [vmem:[%s22050_s2 + $0xdc0] ss:$16 sps:$4 sm:$0xff]  }
 0x3e5   : > { %8050 = vmatpush1.bf16.msra.mxu0 %v16166_v30  ;;  %v16252_v30 = vld [vmem:[%s22050_s2 + $0xde4] ss:$16 sps:$4 sm:$0xff]  }
 0x3e6   : > { %8136 = vmatpush1.bf16.msra.mxu1 %v16169_v11  ;;  %8051 = vmatprep.subr.bf16.mxu0 %v16174_v12  ;;  %v16255_v11 = vld [vmem:[%s22050_s2 + $0xdec] ss:$16 sps:$4 sm:$0xff]   ;;  %v7360_v12 = vrot.slane %v7358_v35, 1  ;;  %v16325_v35 = vld [vmem:[%s22050_s2 + $0xf68] ss:$16 sps:$4 sm:$0xff]  }
 0x3e7   : > { %8137 = vmatprep.subr.bf16.mxu1 %v16177_v1  ;;  %v7363_v1 = vshll.u32 %v7221_v50, 16  ;;  %v16322_v50 = vld [vmem:[%s22050_s2 + $0xf60] ss:$16 sps:$4 sm:$0xff]  }
 0x3e9   : > { %8052 = vmatpush1.bf16.msra.mxu0 %v16172_v53  ;;  %v16250_v53 = vld [vmem:[%s22050_s2 + $0xde0] ss:$16 sps:$4 sm:$0xff]  }
 0x3ea   : > { %8138 = vmatpush1.bf16.msra.mxu1 %v16175_v46  ;;  %8053 = vmatprep.subr.bf16.mxu0 %v16180_v58  ;;  %v7356_v46 = vshrl.u32 %v7217_v28, 16  ;;  %v16253_v58 = vld [vmem:[%s22050_s2 + $0xde8] ss:$16 sps:$4 sm:$0xff]   ;;  %v16318_v28 = vld [vmem:[%s22050_s2 + $0xf44] ss:$16 sps:$4 sm:$0xff]  }
 0x3eb   : > { %8139 = vmatprep.subr.bf16.mxu1 %v16183_v3  ;;  %v16258_v3 = vld [vmem:[%s22050_s2 + $0xe04] ss:$16 sps:$4 sm:$0xff]  }
 0x3ed   : > { %8054 = vmatpush1.bf16.msra.mxu0 %v16178_v33  ;;  %v7361_v33 = vor.u32 %v7360_v12, %v7356_v46  ;;  %v16336_v12 = vld [vmem:[%s22050_s2 + $0xfa4] ss:$16 sps:$4 sm:$0xff]   ;;  %v16337_v46 = vld [vmem:[%s22050_s2 + $0xfa8] ss:$16 sps:$4 sm:$0xff]  }
 0x3ee   : > { %8140 = vmatpush1.bf16.msra.mxu1 %v16181_v15  ;;  %8055 = vmatprep.subr.bf16.mxu0 %v16186_v13  ;;  %v7365_v15 = vrot.slane %v7363_v1, 1  ;;  %v16261_v13 = vld [vmem:[%s22050_s2 + $0xe0c] ss:$16 sps:$4 sm:$0xff]  }
 0x3ef   : > { %8141 = vmatprep.subr.bf16.mxu1 %v16189_v14  ;;  %v16256_v14 = vld [vmem:[%s22050_s2 + $0xe00] ss:$16 sps:$4 sm:$0xff]   ;;  %v16339_v1 = vld [vmem:[%s22050_s2 + $0xfac] ss:$16 sps:$4 sm:$0xff]  }
 0x3f1   : > { %8056 = vmatpush1.bf16.msra.mxu0 %v16184_v22  ;;  %v16259_v22 = vld [vmem:[%s22050_s2 + $0xe08] ss:$16 sps:$4 sm:$0xff]  }
 0x3f2   : > { %8142 = vmatpush1.bf16.msra.mxu1 %v16187_v47  ;;  %8057 = vmatprep.subr.bf16.mxu0 %v16192_v6  ;;  %v7366_v47 = vsel %vm7354_vm12, %v7361_v33, %v7365_v15  ;;  %v16264_v6 = vld [vmem:[%s22050_s2 + $0xe24] ss:$16 sps:$4 sm:$0xff]   ;;  %v16340_v33 = vld [vmem:[%s22050_s2 + $0xfc0] ss:$16 sps:$4 sm:$0xff]   ;;  %v16343_v15 = vld [vmem:[%s22050_s2 + $0xfc8] ss:$16 sps:$4 sm:$0xff]  }
 0x3f3   : > { %8143 = vmatprep.subr.bf16.mxu1 %v16195_v18  ;;  %v16267_v18 = vld [vmem:[%s22050_s2 + $0xe2c] ss:$16 sps:$4 sm:$0xff]  }
 0x3f5   : > { %8058 = vmatpush1.bf16.msra.mxu0 %v16190_v52  ;;  %v16262_v52 = vld [vmem:[%s22050_s2 + $0xe20] ss:$16 sps:$4 sm:$0xff]  }
 0x3f6   : > { %8144 = vmatpush1.bf16.msra.mxu1 %v16193_v38  ;;  %8059 = vmatprep.subr.bf16.mxu0 %v16198_v43  ;;  %v16265_v38 = vld [vmem:[%s22050_s2 + $0xe28] ss:$16 sps:$4 sm:$0xff]   ;;  %v16270_v43 = vld [vmem:[%s22050_s2 + $0xe44] ss:$16 sps:$4 sm:$0xff]  }
 0x3f7   : > { %8145 = vmatprep.subr.bf16.mxu1 %v16201_v19  ;;  %v16273_v19 = vld [vmem:[%s22050_s2 + $0xe4c] ss:$16 sps:$4 sm:$0xff]  }
 0x3f9   : > { %8060 = vmatpush1.bf16.msra.mxu0 %v16196_v59  ;;  %v16268_v59 = vld [vmem:[%s22050_s2 + $0xe40] ss:$16 sps:$4 sm:$0xff]  }
 0x3fa   : > { %8146 = vmatpush1.bf16.msra.mxu1 %v16199_v32  ;;  %8061 = vmatprep.subr.bf16.mxu0 %v16204_v51  ;;  %v16271_v32 = vld [vmem:[%s22050_s2 + $0xe48] ss:$16 sps:$4 sm:$0xff]   ;;  %v16279_v51 = vld [vmem:[%s22050_s2 + $0xe6c] ss:$16 sps:$4 sm:$0xff]  }
 0x3fb   : > { %8147 = vmatprep.subr.bf16.mxu1 %v16207_v8  ;;  %v16274_v8 = vld [vmem:[%s22050_s2 + $0xe60] ss:$16 sps:$4 sm:$0xff]  }
 0x3fd   : > { %8062 = vmatpush1.bf16.msra.mxu0 %v16202_v45  ;;  %v16277_v45 = vld [vmem:[%s22050_s2 + $0xe68] ss:$16 sps:$4 sm:$0xff]  }
 0x3fe   : > { %8148 = vmatpush1.bf16.msra.mxu1 %v16205_v48  ;;  %8063 = vmatprep.subr.bf16.mxu0 %v16210_v27  ;;  %v16282_v48 = vld [vmem:[%s22050_s2 + $0xe84] ss:$16 sps:$4 sm:$0xff]   ;;  %v16285_v27 = vld [vmem:[%s22050_s2 + $0xe8c] ss:$16 sps:$4 sm:$0xff]  }
 0x3ff   : > { %8149 = vmatprep.subr.bf16.mxu1 %v16213_v4  ;;  %v16280_v4 = vld [vmem:[%s22050_s2 + $0xe80] ss:$16 sps:$4 sm:$0xff]  }
 0x401   : > { %8064 = vmatpush1.bf16.msra.mxu0 %v16208_v21  ;;  %v16283_v21 = vld [vmem:[%s22050_s2 + $0xe88] ss:$16 sps:$4 sm:$0xff]  }
 0x402   : > { %8150 = vmatpush1.bf16.msra.mxu1 %v16211_v29  ;;  %8065 = vmatprep.subr.bf16.mxu0 %v16216_v41  ;;  %v16288_v29 = vld [vmem:[%s22050_s2 + $0xea4] ss:$16 sps:$4 sm:$0xff]   ;;  %v16291_v41 = vld [vmem:[%s22050_s2 + $0xeac] ss:$16 sps:$4 sm:$0xff]  }
 0x403   : > { %8151 = vmatprep.subr.bf16.mxu1 %v16219_v5  ;;  %v16286_v5 = vld [vmem:[%s22050_s2 + $0xea0] ss:$16 sps:$4 sm:$0xff]  }
 0x405   : > { %8066 = vmatpush1.bf16.msra.mxu0 %v16214_v57  ;;  %v16289_v57 = vld [vmem:[%s22050_s2 + $0xea8] ss:$16 sps:$4 sm:$0xff]  }
 0x406   : > { %8152 = vmatpush1.bf16.msra.mxu1 %v16217_v60  ;;  %8067 = vmatprep.subr.bf16.mxu0 %v16222_v7  ;;  %v16294_v60 = vld [vmem:[%s22050_s2 + $0xec4] ss:$16 sps:$4 sm:$0xff]   ;;  %v16297_v7 = vld [vmem:[%s22050_s2 + $0xecc] ss:$16 sps:$4 sm:$0xff]  }
 0x407   : > { %8153 = vmatprep.subr.bf16.mxu1 %v16225_v44  ;;  %v16292_v44 = vld [vmem:[%s22050_s2 + $0xec0] ss:$16 sps:$4 sm:$0xff]  }
 0x409   : > { %8068 = vmatpush1.bf16.msra.mxu0 %v16220_v39  ;;  %v16295_v39 = vld [vmem:[%s22050_s2 + $0xec8] ss:$16 sps:$4 sm:$0xff]  }
 0x40a   : > { %8154 = vmatpush1.bf16.msra.mxu1 %v16223_v40  ;;  %8069 = vmatprep.subr.bf16.mxu0 %v16228_v2  ;;  %v16300_v40 = vld [vmem:[%s22050_s2 + $0xee4] ss:$16 sps:$4 sm:$0xff]   ;;  %v16303_v2 = vld [vmem:[%s22050_s2 + $0xeec] ss:$16 sps:$4 sm:$0xff]  }
 0x40b   : > { %8155 = vmatprep.subr.bf16.mxu1 %v16231_v20  ;;  %v16298_v20 = vld [vmem:[%s22050_s2 + $0xee0] ss:$16 sps:$4 sm:$0xff]  }
 0x40d   : > { %8070 = vmatpush1.bf16.msra.mxu0 %v16226_v24  ;;  %v16301_v24 = vld [vmem:[%s22050_s2 + $0xee8] ss:$16 sps:$4 sm:$0xff]  }
 0x40e   : > { %8156 = vmatpush1.bf16.msra.mxu1 %v16229_v26  ;;  %8071 = vmatprep.subr.bf16.mxu0 %v16234_v63  ;;  %v16306_v26 = vld [vmem:[%s22050_s2 + $0xf04] ss:$16 sps:$4 sm:$0xff]   ;;  %v16309_v63 = vld [vmem:[%s22050_s2 + $0xf0c] ss:$16 sps:$4 sm:$0xff]  }
 0x40f   : > { %8157 = vmatprep.subr.bf16.mxu1 %v16237_v25  ;;  %v16304_v25 = vld [vmem:[%s22050_s2 + $0xf00] ss:$16 sps:$4 sm:$0xff]  }
 0x411   : > { %8072 = vmatpush1.bf16.msra.mxu0 %v16232_v23  ;;  %v16307_v23 = vld [vmem:[%s22050_s2 + $0xf08] ss:$16 sps:$4 sm:$0xff]  }
 0x412   : > { %8158 = vmatpush1.bf16.msra.mxu1 %v16235_v56  ;;  %8073 = vmatprep.subr.bf16.mxu0 %v16240_v62  ;;  %v16312_v56 = vld [vmem:[%s22050_s2 + $0xf24] ss:$16 sps:$4 sm:$0xff]   ;;  %v16315_v62 = vld [vmem:[%s22050_s2 + $0xf2c] ss:$16 sps:$4 sm:$0xff]  }
 0x413   : > { %8159 = vmatprep.subr.bf16.mxu1 %v16243_v17  ;;  %v16313_v17 = vld [vmem:[%s22050_s2 + $0xf28] ss:$16 sps:$4 sm:$0xff]  }
 0x415   : > { %8074 = vmatpush1.bf16.msra.mxu0 %v16238_v55  ;;  %v16316_v55 = vld [vmem:[%s22050_s2 + $0xf40] ss:$16 sps:$4 sm:$0xff]  }
 0x416   : > { %8160 = vmatpush1.bf16.msra.mxu1 %v16241_v9  ;;  %8075 = vmatprep.subr.bf16.mxu0 %v16246_v0  ;;  %v16319_v9 = vld [vmem:[%s22050_s2 + $0xf48] ss:$16 sps:$4 sm:$0xff]   ;;  %v16324_v0 = vld [vmem:[%s22050_s2 + $0xf64] ss:$16 sps:$4 sm:$0xff]  }
 0x417   : > { %8161 = vmatprep.subr.bf16.mxu1 %v16249_v36  ;;  %v16327_v36 = vld [vmem:[%s22050_s2 + $0xf6c] ss:$16 sps:$4 sm:$0xff]  }
 0x419   : > { %8076 = vmatpush1.bf16.msra.mxu0 %v16244_v42  ;;  %v16330_v42 = vld [vmem:[%s22050_s2 + $0xf84] ss:$16 sps:$4 sm:$0xff]  }
 0x41a   : > { %8162 = vmatpush1.bf16.msra.mxu1 %v16247_v16  ;;  %8077 = vmatprep.subr.bf16.mxu0 %v16252_v30  ;;  %v16333_v16 = vld [vmem:[%s22050_s2 + $0xf8c] ss:$16 sps:$4 sm:$0xff]   ;;  %v16328_v30 = vld [vmem:[%s22050_s2 + $0xf80] ss:$16 sps:$4 sm:$0xff]  }
 0x41b   : > { %8163 = vmatprep.subr.bf16.mxu1 %v16255_v11  ;;  %v16331_v11 = vld [vmem:[%s22050_s2 + $0xf88] ss:$16 sps:$4 sm:$0xff]  }
 0x41d   : > { %8078 = vmatpush1.bf16.msra.mxu0 %v16250_v53  ;;  %v16334_v53 = vld [vmem:[%s22050_s2 + $0xfa0] ss:$16 sps:$4 sm:$0xff]  }
 0x41e   : > { %8164 = vmatpush1.bf16.msra.mxu1 %v16253_v58  ;;  %8090 = vmatprep.subr.bf16.mxu0 %v16258_v3  ;;  %v16342_v58 = vld [vmem:[%s22050_s2 + $0xfc4] ss:$16 sps:$4 sm:$0xff]   ;;  %v16345_v3 = vld [vmem:[%s22050_s2 + $0xfcc] ss:$16 sps:$4 sm:$0xff]  }
 0x41f   : > { %8176 = vmatprep.subr.bf16.mxu1 %v16261_v13  ;;  %v16348_v13 = vld [vmem:[%s22050_s2 + $0xfe4] ss:$16 sps:$4 sm:$0xff]  }
 0x420   : > { %8080 = vmatmul.mubr.bf16.vlgmr.msra.gmra.mrb[16].mxu0 %v7366_v47 }
 0x421   : > { %8166 = vmatmul.mubr.bf16.vlgmr.msra.gmra.mrb[16].mxu1 %v7366_v47  ;;  %8091 = vmatpush1.bf16.msra.mxu0 %v16256_v14  ;;  %v8232_v14 = vld [vmem:[#allocation3 + $0x68] sm:$0x3]  ;;  %v8228_v47 = vld [vmem:[#allocation3 + $0x28] sm:$0xfc] }
 0x422   : > { %8122 = vmatprep.mubr.bf16.mxu0 %v19009_v54  ;;  %8177 = vmatpush1.bf16.msra.mxu1 %v16259_v22  ;;  %v16351_v22 = vld [vmem:[%s22050_s2 + $0xfec] ss:$16 sps:$4 sm:$0xff]  }
 0x423   : > { %8208 = vmatprep.mubr.bf16.mxu1 %v19009_v54  ;;  %8092 = vmatprep.subr.bf16.mxu0 %v16264_v6  ;;  %v16276_v54 = vld [vmem:[%s22050_s2 + $0xe64] ss:$16 sps:$4 sm:$0xff]   ;;  %v16346_v6 = vld [vmem:[%s22050_s2 + $0xfe0] ss:$16 sps:$4 sm:$0xff]  }
 0x424   : > { %8178 = vmatprep.subr.bf16.mxu1 %v16267_v18  ;;  %v17098_v18 = vld [vmem:[#allocation3 + $0x48] sm:$0xff] }
 0x425   : > { %8093 = vmatpush1.bf16.msra.mxu0 %v16262_v52  ;;  %v8236_v52 = vpack.c.bf16 %v17098_v18, %v8228_v47  ;;  %v16432_v47 = vld [vmem:[%s22050_s2 + $0x11a4] ss:$16 sps:$4 sm:$0xff]   ;;  %v16430_v18 = vld [vmem:[%s22050_s2 + $0x11a0] ss:$16 sps:$4 sm:$0xff]  }
 0x426   : > { %8179 = vmatpush1.bf16.msra.mxu1 %v16265_v38  ;;  %8094 = vmatprep.subr.bf16.mxu0 %v16270_v43  ;;  %v8240_v38 = vpack.c.bf16 %v8232_v14, %v8232_v14  ;;  %v16349_v43 = vld [vmem:[%s22050_s2 + $0xfe8] ss:$16 sps:$4 sm:$0xff]   ;;  %v16424_v14 = vld [vmem:[%s22050_s2 + $0x1180] ss:$16 sps:$4 sm:$0xff]  }
 0x427   : > { %8180 = vmatprep.subr.bf16.mxu1 %v16273_v19  ;;  %v16354_v19 = vld [vmem:[%s22050_s2 + $0x1004] ss:$16 sps:$4 sm:$0xff]  }
 0x429   : > { %8095 = vmatpush1.bf16.msra.mxu0 %v16268_v59  ;;  %v16357_v59 = vld [vmem:[%s22050_s2 + $0x100c] ss:$16 sps:$4 sm:$0xff]  }
 0x42a   : > { %8181 = vmatpush1.bf16.msra.mxu1 %v16271_v32  ;;  %8096 = vmatprep.subr.bf16.mxu0 %v16276_v54  ;;  %v16352_v32 = vld [vmem:[%s22050_s2 + $0x1000] ss:$16 sps:$4 sm:$0xff]   ;;  %v8384_v54 = vrot.slane %v8236_v52, 1  ;;  %v16433_v52 = vld [vmem:[%s22050_s2 + $0x11a8] ss:$16 sps:$4 sm:$0xff]  }
 0x42b   : > { %8182 = vmatprep.subr.bf16.mxu1 %v16279_v51  ;;  %v8385_v51 = vrot.slane %v8240_v38, 1  ;;  %v16438_v38 = vld [vmem:[%s22050_s2 + $0x11c4] ss:$16 sps:$4 sm:$0xff]  }
 0x42d   : > { %8097 = vmatpush1.bf16.msra.mxu0 %v16274_v8  ;;  %v16355_v8 = vld [vmem:[%s22050_s2 + $0x1008] ss:$16 sps:$4 sm:$0xff]  }
 0x42e   : > { %8183 = vmatpush1.bf16.msra.mxu1 %v16277_v45  ;;  %8098 = vmatprep.subr.bf16.mxu0 %v16282_v48  ;;  %v16360_v45 = vld [vmem:[%s22050_s2 + $0x1024] ss:$16 sps:$4 sm:$0xff]   ;;  %v16363_v48 = vld [vmem:[%s22050_s2 + $0x102c] ss:$16 sps:$4 sm:$0xff]  }
 0x42f   : > { %8184 = vmatprep.subr.bf16.mxu1 %v16285_v27  ;;  %v8386_v27 = vsel %vm8380_vm13, %v8384_v54, %v8385_v51  ;;  %v16444_v54 = vld [vmem:[%s22050_s2 + $0x11e4] ss:$16 sps:$4 sm:$0xff]  }
 0x430   : > { %v8227_v51 = vld [vmem:[#allocation3 + $0x20] sm:$0xfc] }
 0x431   : > { %8099 = vmatpush1.bf16.msra.mxu0 %v16280_v4  ;;  %v16358_v4 = vld [vmem:[%s22050_s2 + $0x1020] ss:$16 sps:$4 sm:$0xff]  }
 0x432   : > { %8185 = vmatpush1.bf16.msra.mxu1 %v16283_v21  ;;  %8100 = vmatprep.subr.bf16.mxu0 %v16288_v29  ;;  %v16361_v21 = vld [vmem:[%s22050_s2 + $0x1028] ss:$16 sps:$4 sm:$0xff]   ;;  %v16366_v29 = vld [vmem:[%s22050_s2 + $0x1044] ss:$16 sps:$4 sm:$0xff]  }
 0x433   : > { %8186 = vmatprep.subr.bf16.mxu1 %v16291_v41  ;;  %v16364_v41 = vld [vmem:[%s22050_s2 + $0x1040] ss:$16 sps:$4 sm:$0xff]  }
 0x435   : > { %8101 = vmatpush1.bf16.msra.mxu0 %v16286_v5  ;;  %v16367_v5 = vld [vmem:[%s22050_s2 + $0x1048] ss:$16 sps:$4 sm:$0xff]  }
 0x436   : > { %8187 = vmatpush1.bf16.msra.mxu1 %v16289_v57  ;;  %8102 = vmatprep.subr.bf16.mxu0 %v16294_v60  ;;  %v16372_v57 = vld [vmem:[%s22050_s2 + $0x1064] ss:$16 sps:$4 sm:$0xff]   ;;  %v16375_v60 = vld [vmem:[%s22050_s2 + $0x106c] ss:$16 sps:$4 sm:$0xff]  }
 0x437   : > { %8188 = vmatprep.subr.bf16.mxu1 %v16297_v7  ;;  %v16370_v7 = vld [vmem:[%s22050_s2 + $0x1060] ss:$16 sps:$4 sm:$0xff]  }
 0x439   : > { %8103 = vmatpush1.bf16.msra.mxu0 %v16292_v44  ;;  %v16373_v44 = vld [vmem:[%s22050_s2 + $0x1068] ss:$16 sps:$4 sm:$0xff]  }
 0x43a   : > { %8189 = vmatpush1.bf16.msra.mxu1 %v16295_v39  ;;  %8104 = vmatprep.subr.bf16.mxu0 %v16300_v40  ;;  %v16378_v39 = vld [vmem:[%s22050_s2 + $0x1084] ss:$16 sps:$4 sm:$0xff]   ;;  %v16381_v40 = vld [vmem:[%s22050_s2 + $0x108c] ss:$16 sps:$4 sm:$0xff]  }
 0x43b   : > { %8190 = vmatprep.subr.bf16.mxu1 %v16303_v2  ;;  %v16376_v2 = vld [vmem:[%s22050_s2 + $0x1080] ss:$16 sps:$4 sm:$0xff]  }
 0x43d   : > { %8105 = vmatpush1.bf16.msra.mxu0 %v16298_v20  ;;  %v16379_v20 = vld [vmem:[%s22050_s2 + $0x1088] ss:$16 sps:$4 sm:$0xff]  }
 0x43e   : > { %8191 = vmatpush1.bf16.msra.mxu1 %v16301_v24  ;;  %8106 = vmatprep.subr.bf16.mxu0 %v16306_v26  ;;  %v16384_v24 = vld [vmem:[%s22050_s2 + $0x10a4] ss:$16 sps:$4 sm:$0xff]   ;;  %v16387_v26 = vld [vmem:[%s22050_s2 + $0x10ac] ss:$16 sps:$4 sm:$0xff]  }
 0x43f   : > { %8192 = vmatprep.subr.bf16.mxu1 %v16309_v63  ;;  %v16382_v63 = vld [vmem:[%s22050_s2 + $0x10a0] ss:$16 sps:$4 sm:$0xff]  }
 0x441   : > { %8107 = vmatpush1.bf16.msra.mxu0 %v16304_v25  ;;  %v16385_v25 = vld [vmem:[%s22050_s2 + $0x10a8] ss:$16 sps:$4 sm:$0xff]  }
 0x442   : > { %8193 = vmatpush1.bf16.msra.mxu1 %v16307_v23  ;;  %8108 = vmatprep.subr.bf16.mxu0 %v16312_v56  ;;  %v16390_v23 = vld [vmem:[%s22050_s2 + $0x10c4] ss:$16 sps:$4 sm:$0xff]   ;;  %v16393_v56 = vld [vmem:[%s22050_s2 + $0x10cc] ss:$16 sps:$4 sm:$0xff]  }
 0x443   : > { %8194 = vmatprep.subr.bf16.mxu1 %v16315_v62  ;;  %v16388_v62 = vld [vmem:[%s22050_s2 + $0x10c0] ss:$16 sps:$4 sm:$0xff]  }
 0x445   : > { %8109 = vmatpush1.bf16.msra.mxu0 %v16310_v34  ;;  %v16391_v34 = vld [vmem:[%s22050_s2 + $0x10c8] ss:$16 sps:$4 sm:$0xff]  }
 0x446   : > { %8195 = vmatpush1.bf16.msra.mxu1 %v16313_v17  ;;  %8110 = vmatprep.subr.bf16.mxu0 %v16318_v28  ;;  %v16396_v17 = vld [vmem:[%s22050_s2 + $0x10e4] ss:$16 sps:$4 sm:$0xff]   ;;  %v16399_v28 = vld [vmem:[%s22050_s2 + $0x10ec] ss:$16 sps:$4 sm:$0xff]  }
 0x447   : > { %8196 = vmatprep.subr.bf16.mxu1 %v16321_v61  ;;  %v16394_v61 = vld [vmem:[%s22050_s2 + $0x10e0] ss:$16 sps:$4 sm:$0xff]  }
 0x449   : > { %8111 = vmatpush1.bf16.msra.mxu0 %v16316_v55  ;;  %v16397_v55 = vld [vmem:[%s22050_s2 + $0x10e8] ss:$16 sps:$4 sm:$0xff]  }
 0x44a   : > { %8197 = vmatpush1.bf16.msra.mxu1 %v16319_v9  ;;  %8112 = vmatprep.subr.bf16.mxu0 %v16324_v0  ;;  %v16402_v9 = vld [vmem:[%s22050_s2 + $0x1104] ss:$16 sps:$4 sm:$0xff]   ;;  %v16405_v0 = vld [vmem:[%s22050_s2 + $0x110c] ss:$16 sps:$4 sm:$0xff]  }
 0x44b   : > { %8198 = vmatprep.subr.bf16.mxu1 %v16327_v36  ;;  %v16400_v36 = vld [vmem:[%s22050_s2 + $0x1100] ss:$16 sps:$4 sm:$0xff]  }
 0x44d   : > { %8113 = vmatpush1.bf16.msra.mxu0 %v16322_v50  ;;  %v16403_v50 = vld [vmem:[%s22050_s2 + $0x1108] ss:$16 sps:$4 sm:$0xff]  }
 0x44e   : > { %8199 = vmatpush1.bf16.msra.mxu1 %v16325_v35  ;;  %8114 = vmatprep.subr.bf16.mxu0 %v16330_v42  ;;  %v16408_v35 = vld [vmem:[%s22050_s2 + $0x1124] ss:$16 sps:$4 sm:$0xff]   ;;  %v16411_v42 = vld [vmem:[%s22050_s2 + $0x112c] ss:$16 sps:$4 sm:$0xff]  }
 0x44f   : > { %8200 = vmatprep.subr.bf16.mxu1 %v16333_v16  ;;  %v16406_v16 = vld [vmem:[%s22050_s2 + $0x1120] ss:$16 sps:$4 sm:$0xff]  }
 0x451   : > { %8115 = vmatpush1.bf16.msra.mxu0 %v16328_v30  ;;  %v16409_v30 = vld [vmem:[%s22050_s2 + $0x1128] ss:$16 sps:$4 sm:$0xff]  }
 0x452   : > { %8201 = vmatpush1.bf16.msra.mxu1 %v16331_v11  ;;  %8116 = vmatprep.subr.bf16.mxu0 %v16336_v12  ;;  %v16414_v11 = vld [vmem:[%s22050_s2 + $0x1144] ss:$16 sps:$4 sm:$0xff]   ;;  %v16417_v12 = vld [vmem:[%s22050_s2 + $0x114c] ss:$16 sps:$4 sm:$0xff]  }
 0x453   : > { %8202 = vmatprep.subr.bf16.mxu1 %v16339_v1  ;;  %v16412_v1 = vld [vmem:[%s22050_s2 + $0x1140] ss:$16 sps:$4 sm:$0xff]  }
 0x455   : > { %8117 = vmatpush1.bf16.msra.mxu0 %v16334_v53  ;;  %v16415_v53 = vld [vmem:[%s22050_s2 + $0x1148] ss:$16 sps:$4 sm:$0xff]  }
 0x456   : > { %8203 = vmatpush1.bf16.msra.mxu1 %v16337_v46  ;;  %8118 = vmatprep.subr.bf16.mxu0 %v16342_v58  ;;  %v16420_v46 = vld [vmem:[%s22050_s2 + $0x1164] ss:$16 sps:$4 sm:$0xff]   ;;  %v16423_v58 = vld [vmem:[%s22050_s2 + $0x116c] ss:$16 sps:$4 sm:$0xff]  }
 0x457   : > { %8204 = vmatprep.subr.bf16.mxu1 %v16345_v3  ;;  %v16418_v3 = vld [vmem:[%s22050_s2 + $0x1160] ss:$16 sps:$4 sm:$0xff]  }
 0x459   : > { %8119 = vmatpush1.bf16.msra.mxu0 %v16340_v33  ;;  %v16421_v33 = vld [vmem:[%s22050_s2 + $0x1168] ss:$16 sps:$4 sm:$0xff]  }
 0x45a   : > { %8205 = vmatpush1.bf16.msra.mxu1 %v16343_v15  ;;  %8120 = vmatprep.subr.bf16.mxu0 %v16348_v13  ;;  %v16426_v15 = vld [vmem:[%s22050_s2 + $0x1184] ss:$16 sps:$4 sm:$0xff]   ;;  %v16429_v13 = vld [vmem:[%s22050_s2 + $0x118c] ss:$16 sps:$4 sm:$0xff]  }
 0x45b   : > { %8206 = vmatprep.subr.bf16.mxu1 %v16351_v22  ;;  %v16427_v22 = vld [vmem:[%s22050_s2 + $0x1188] ss:$16 sps:$4 sm:$0xff]  }
 0x45d   : > { %8121 = vmatpush1.bf16.msra.mxu0 %v16346_v6  ;;  %v16435_v6 = vld [vmem:[%s22050_s2 + $0x11ac] ss:$16 sps:$4 sm:$0xff]  }
 0x45e   : > { %8207 = vmatpush1.bf16.msra.mxu1 %v16349_v43  ;;  %9037 = vmatprep.subr.bf16.mxu0 %v16354_v19  ;;  %v16441_v43 = vld [vmem:[%s22050_s2 + $0x11cc] ss:$16 sps:$4 sm:$0xff]   ;;  %v8231_v19 = vld [vmem:[#allocation3 + $0x60] sm:$0x3] }
 0x45f   : > { %9123 = vmatprep.subr.bf16.mxu1 %v16357_v59  ;;  %v16436_v59 = vld [vmem:[%s22050_s2 + $0x11c0] ss:$16 sps:$4 sm:$0xff]  }
 0x460   : > { %8123 = vmatmul.mubr.bf16.vlgmr.msra.gmra.mrb[16].mxu0 %v19024_v31 }
 0x461   : > { %8209 = vmatmul.mubr.bf16.vlgmr.msra.gmra.mrb[16].mxu1 %v19024_v31  ;;  %9038 = vmatpush1.bf16.msra.mxu0 %v16352_v32  ;;  %v16369_v31 = vld [vmem:[%s22050_s2 + $0x104c] ss:$16 sps:$4 sm:$0xff]   ;;  %v16439_v32 = vld [vmem:[%s22050_s2 + $0x11c8] ss:$16 sps:$4 sm:$0xff]  }
 0x462   : > { %9069 = vmatprep.mubr.bf16.mxu0 %v8386_v27  ;;  %9124 = vmatpush1.bf16.msra.mxu1 %v16355_v8  ;;  %v16447_v8 = vld [vmem:[%s22050_s2 + $0x11ec] ss:$16 sps:$4 sm:$0xff]  }
 0x463   : > { %9155 = vmatprep.mubr.bf16.mxu1 %v8386_v27  ;;  %9039 = vmatprep.subr.bf16.mxu0 %v16360_v45  ;;  %v17099_v45 = vld [vmem:[#allocation3 + $0x40] sm:$0xff]  ;;  %v8239_v27 = vpack.c.bf16 %v8231_v19, %v8231_v19 }
 0x464   : > { %9125 = vmatprep.subr.bf16.mxu1 %v16363_v48  ;;  %v8235_v48 = vpack.c.bf16 %v17099_v45, %v8227_v51  ;;  %v16522_v19 = vld [vmem:[%s22050_s2 + $0x1384] ss:$16 sps:$4 sm:$0xff]   ;;  %v16526_v45 = vld [vmem:[%s22050_s2 + $0x13a0] ss:$16 sps:$4 sm:$0xff]  }
 0x465   : > { %9040 = vmatpush1.bf16.msra.mxu0 %v16358_v4  ;;  %v16442_v4 = vld [vmem:[%s22050_s2 + $0x11e0] ss:$16 sps:$4 sm:$0xff]   ;;  %v16528_v51 = vld [vmem:[%s22050_s2 + $0x13a4] ss:$16 sps:$4 sm:$0xff]  }
 0x466   : > { %9126 = vmatpush1.bf16.msra.mxu1 %v16361_v21  ;;  %9041 = vmatprep.subr.bf16.mxu0 %v16366_v29  ;;  %v16445_v21 = vld [vmem:[%s22050_s2 + $0x11e8] ss:$16 sps:$4 sm:$0xff]   ;;  %v16450_v29 = vld [vmem:[%s22050_s2 + $0x1204] ss:$16 sps:$4 sm:$0xff]  }
 0x467   : > { %9127 = vmatprep.subr.bf16.mxu1 %v16369_v31  ;;  %v8381_v31 = vrot.slane %v8235_v48, 1  ;;  %v16529_v48 = vld [vmem:[%s22050_s2 + $0x13a8] ss:$16 sps:$4 sm:$0xff]  }
 0x469   : > { %9042 = vmatpush1.bf16.msra.mxu0 %v16364_v41  ;;  %v8382_v41 = vrot.slane %v8239_v27, 1  ;;  %v16534_v27 = vld [vmem:[%s22050_s2 + $0x13c4] ss:$16 sps:$4 sm:$0xff]  }
 0x46a   : > { %9128 = vmatpush1.bf16.msra.mxu1 %v16367_v5  ;;  %9043 = vmatprep.subr.bf16.mxu0 %v16372_v57  ;;  %v16453_v5 = vld [vmem:[%s22050_s2 + $0x120c] ss:$16 sps:$4 sm:$0xff]   ;;  %v16448_v57 = vld [vmem:[%s22050_s2 + $0x1200] ss:$16 sps:$4 sm:$0xff]  }
 0x46b   : > { %9129 = vmatprep.subr.bf16.mxu1 %v16375_v60  ;;  %v16451_v60 = vld [vmem:[%s22050_s2 + $0x1208] ss:$16 sps:$4 sm:$0xff]  }
 0x46d   : > { %9044 = vmatpush1.bf16.msra.mxu0 %v16370_v7  ;;  %v8383_v7 = vsel %vm8380_vm13, %v8381_v31, %v8382_v41  ;;  %v16540_v31 = vld [vmem:[%s22050_s2 + $0x13e4] ss:$16 sps:$4 sm:$0xff]   ;;  %v16543_v41 = vld [vmem:[%s22050_s2 + $0x13ec] ss:$16 sps:$4 sm:$0xff]  }
 0x46e   : > { %9130 = vmatpush1.bf16.msra.mxu1 %v16373_v44  ;;  %9045 = vmatprep.subr.bf16.mxu0 %v16378_v39  ;;  %v16456_v44 = vld [vmem:[%s22050_s2 + $0x1224] ss:$16 sps:$4 sm:$0xff]   ;;  %v16459_v39 = vld [vmem:[%s22050_s2 + $0x122c] ss:$16 sps:$4 sm:$0xff]  }
 0x46f   : > { %9131 = vmatprep.subr.bf16.mxu1 %v16381_v40  ;;  %v16454_v40 = vld [vmem:[%s22050_s2 + $0x1220] ss:$16 sps:$4 sm:$0xff]  }
 0x471   : > { %9046 = vmatpush1.bf16.msra.mxu0 %v16376_v2  ;;  %v16457_v2 = vld [vmem:[%s22050_s2 + $0x1228] ss:$16 sps:$4 sm:$0xff]  }
 0x472   : > { %9132 = vmatpush1.bf16.msra.mxu1 %v16379_v20  ;;  %9047 = vmatprep.subr.bf16.mxu0 %v16384_v24  ;;  %v16462_v20 = vld [vmem:[%s22050_s2 + $0x1244] ss:$16 sps:$4 sm:$0xff]   ;;  %v16465_v24 = vld [vmem:[%s22050_s2 + $0x124c] ss:$16 sps:$4 sm:$0xff]  }
 0x473   : > { %9133 = vmatprep.subr.bf16.mxu1 %v16387_v26  ;;  %v16460_v26 = vld [vmem:[%s22050_s2 + $0x1240] ss:$16 sps:$4 sm:$0xff]  }
 0x475   : > { %9048 = vmatpush1.bf16.msra.mxu0 %v16382_v63  ;;  %v16463_v63 = vld [vmem:[%s22050_s2 + $0x1248] ss:$16 sps:$4 sm:$0xff]  }
 0x476   : > { %9134 = vmatpush1.bf16.msra.mxu1 %v16385_v25  ;;  %9049 = vmatprep.subr.bf16.mxu0 %v16390_v23  ;;  %v16471_v25 = vld [vmem:[%s22050_s2 + $0x126c] ss:$16 sps:$4 sm:$0xff]   ;;  %v16466_v23 = vld [vmem:[%s22050_s2 + $0x1260] ss:$16 sps:$4 sm:$0xff]  }
 0x477   : > { %9135 = vmatprep.subr.bf16.mxu1 %v16393_v56  ;;  %v16469_v56 = vld [vmem:[%s22050_s2 + $0x1268] ss:$16 sps:$4 sm:$0xff]  }
 0x479   : > { %9050 = vmatpush1.bf16.msra.mxu0 %v16388_v62  ;;  %v16474_v62 = vld [vmem:[%s22050_s2 + $0x1284] ss:$16 sps:$4 sm:$0xff]  }
 0x47a   : > { %9136 = vmatpush1.bf16.msra.mxu1 %v16391_v34  ;;  %9051 = vmatprep.subr.bf16.mxu0 %v16396_v17  ;;  %v16477_v34 = vld [vmem:[%s22050_s2 + $0x128c] ss:$16 sps:$4 sm:$0xff]   ;;  %v16472_v17 = vld [vmem:[%s22050_s2 + $0x1280] ss:$16 sps:$4 sm:$0xff]  }
 0x47b   : > { %9137 = vmatprep.subr.bf16.mxu1 %v16399_v28  ;;  %v16475_v28 = vld [vmem:[%s22050_s2 + $0x1288] ss:$16 sps:$4 sm:$0xff]  }
 0x47d   : > { %9052 = vmatpush1.bf16.msra.mxu0 %v16394_v61  ;;  %v16480_v61 = vld [vmem:[%s22050_s2 + $0x12a4] ss:$16 sps:$4 sm:$0xff]  }
 0x47e   : > { %9138 = vmatpush1.bf16.msra.mxu1 %v16397_v55  ;;  %9053 = vmatprep.subr.bf16.mxu0 %v16402_v9  ;;  %v16483_v55 = vld [vmem:[%s22050_s2 + $0x12ac] ss:$16 sps:$4 sm:$0xff]   ;;  %v16478_v9 = vld [vmem:[%s22050_s2 + $0x12a0] ss:$16 sps:$4 sm:$0xff]  }
 0x47f   : > { %9139 = vmatprep.subr.bf16.mxu1 %v16405_v0  ;;  %v16481_v0 = vld [vmem:[%s22050_s2 + $0x12a8] ss:$16 sps:$4 sm:$0xff]  }
 0x481   : > { %9054 = vmatpush1.bf16.msra.mxu0 %v16400_v36  ;;  %v16486_v36 = vld [vmem:[%s22050_s2 + $0x12c4] ss:$16 sps:$4 sm:$0xff]  }
 0x482   : > { %9140 = vmatpush1.bf16.msra.mxu1 %v16403_v50  ;;  %9055 = vmatprep.subr.bf16.mxu0 %v16408_v35  ;;  %v16489_v50 = vld [vmem:[%s22050_s2 + $0x12cc] ss:$16 sps:$4 sm:$0xff]   ;;  %v16484_v35 = vld [vmem:[%s22050_s2 + $0x12c0] ss:$16 sps:$4 sm:$0xff]  }
 0x483   : > { %9141 = vmatprep.subr.bf16.mxu1 %v16411_v42  ;;  %v16487_v42 = vld [vmem:[%s22050_s2 + $0x12c8] ss:$16 sps:$4 sm:$0xff]  }
 0x485   : > { %9056 = vmatpush1.bf16.msra.mxu0 %v16406_v16  ;;  %v16492_v16 = vld [vmem:[%s22050_s2 + $0x12e4] ss:$16 sps:$4 sm:$0xff]  }
 0x486   : > { %9142 = vmatpush1.bf16.msra.mxu1 %v16409_v30  ;;  %9057 = vmatprep.subr.bf16.mxu0 %v16414_v11  ;;  %v16495_v30 = vld [vmem:[%s22050_s2 + $0x12ec] ss:$16 sps:$4 sm:$0xff]   ;;  %v16490_v11 = vld [vmem:[%s22050_s2 + $0x12e0] ss:$16 sps:$4 sm:$0xff]  }
 0x487   : > { %9143 = vmatprep.subr.bf16.mxu1 %v16417_v12  ;;  %v16493_v12 = vld [vmem:[%s22050_s2 + $0x12e8] ss:$16 sps:$4 sm:$0xff]  }
 0x489   : > { %9058 = vmatpush1.bf16.msra.mxu0 %v16412_v1  ;;  %v16498_v1 = vld [vmem:[%s22050_s2 + $0x1304] ss:$16 sps:$4 sm:$0xff]  }
 0x48a   : > { %9144 = vmatpush1.bf16.msra.mxu1 %v16415_v53  ;;  %9059 = vmatprep.subr.bf16.mxu0 %v16420_v46  ;;  %v16501_v53 = vld [vmem:[%s22050_s2 + $0x130c] ss:$16 sps:$4 sm:$0xff]   ;;  %v16496_v46 = vld [vmem:[%s22050_s2 + $0x1300] ss:$16 sps:$4 sm:$0xff]  }
 0x48b   : > { %9145 = vmatprep.subr.bf16.mxu1 %v16423_v58  ;;  %v16499_v58 = vld [vmem:[%s22050_s2 + $0x1308] ss:$16 sps:$4 sm:$0xff]  }
 0x48d   : > { %9060 = vmatpush1.bf16.msra.mxu0 %v16418_v3  ;;  %v16504_v3 = vld [vmem:[%s22050_s2 + $0x1324] ss:$16 sps:$4 sm:$0xff]  }
 0x48e   : > { %9146 = vmatpush1.bf16.msra.mxu1 %v16421_v33  ;;  %9061 = vmatprep.subr.bf16.mxu0 %v16426_v15  ;;  %v16507_v33 = vld [vmem:[%s22050_s2 + $0x132c] ss:$16 sps:$4 sm:$0xff]   ;;  %v16502_v15 = vld [vmem:[%s22050_s2 + $0x1320] ss:$16 sps:$4 sm:$0xff]  }
 0x48f   : > { %9147 = vmatprep.subr.bf16.mxu1 %v16429_v13  ;;  %v16505_v13 = vld [vmem:[%s22050_s2 + $0x1328] ss:$16 sps:$4 sm:$0xff]  }
 0x491   : > { %9062 = vmatpush1.bf16.msra.mxu0 %v16424_v14  ;;  %v16510_v14 = vld [vmem:[%s22050_s2 + $0x1344] ss:$16 sps:$4 sm:$0xff]  }
 0x492   : > { %9148 = vmatpush1.bf16.msra.mxu1 %v16427_v22  ;;  %9063 = vmatprep.subr.bf16.mxu0 %v16432_v47  ;;  %v16513_v22 = vld [vmem:[%s22050_s2 + $0x134c] ss:$16 sps:$4 sm:$0xff]   ;;  %v16508_v47 = vld [vmem:[%s22050_s2 + $0x1340] ss:$16 sps:$4 sm:$0xff]  }
 0x493   : > { %9149 = vmatprep.subr.bf16.mxu1 %v16435_v6  ;;  %v16511_v6 = vld [vmem:[%s22050_s2 + $0x1348] ss:$16 sps:$4 sm:$0xff]  }
 0x495   : > { %9064 = vmatpush1.bf16.msra.mxu0 %v16430_v18  ;;  %v16516_v18 = vld [vmem:[%s22050_s2 + $0x1364] ss:$16 sps:$4 sm:$0xff]  }
 0x496   : > { %9150 = vmatpush1.bf16.msra.mxu1 %v16433_v52  ;;  %9065 = vmatprep.subr.bf16.mxu0 %v16438_v38  ;;  %v16519_v52 = vld [vmem:[%s22050_s2 + $0x136c] ss:$16 sps:$4 sm:$0xff]   ;;  %v16514_v38 = vld [vmem:[%s22050_s2 + $0x1360] ss:$16 sps:$4 sm:$0xff]  }
 0x497   : > { %9151 = vmatprep.subr.bf16.mxu1 %v16441_v43  ;;  %v16517_v43 = vld [vmem:[%s22050_s2 + $0x1368] ss:$16 sps:$4 sm:$0xff]  }
 0x499   : > { %9066 = vmatpush1.bf16.msra.mxu0 %v16436_v59  ;;  %v16525_v59 = vld [vmem:[%s22050_s2 + $0x138c] ss:$16 sps:$4 sm:$0xff]  }
 0x49a   : > { %9152 = vmatpush1.bf16.msra.mxu1 %v16439_v32  ;;  %9067 = vmatprep.subr.bf16.mxu0 %v16444_v54  ;;  %v16520_v32 = vld [vmem:[%s22050_s2 + $0x1380] ss:$16 sps:$4 sm:$0xff]   ;;  %v16523_v54 = vld [vmem:[%s22050_s2 + $0x1388] ss:$16 sps:$4 sm:$0xff]  }
 0x49b   : > { %9153 = vmatprep.subr.bf16.mxu1 %v16447_v8  ;;  %v16531_v8 = vld [vmem:[%s22050_s2 + $0x13ac] ss:$16 sps:$4 sm:$0xff]  }
 0x49d   : > { %9068 = vmatpush1.bf16.msra.mxu0 %v16442_v4  ;;  %v16537_v4 = vld [vmem:[%s22050_s2 + $0x13cc] ss:$16 sps:$4 sm:$0xff]  }
 0x49e   : > { %9154 = vmatpush1.bf16.msra.mxu1 %v16445_v21  ;;  %9080 = vmatprep.subr.bf16.mxu0 %v16450_v29  ;;  %v16532_v21 = vld [vmem:[%s22050_s2 + $0x13c0] ss:$16 sps:$4 sm:$0xff]   ;;  %v16535_v29 = vld [vmem:[%s22050_s2 + $0x13c8] ss:$16 sps:$4 sm:$0xff]  }
 0x49f   : > { %9166 = vmatprep.subr.bf16.mxu1 %v16453_v5  ;;  %v16538_v5 = vld [vmem:[%s22050_s2 + $0x13e0] ss:$16 sps:$4 sm:$0xff]  }
 0x4a0   : > { %9070 = vmatmul.mubr.bf16.vlgmr.msra.gmra.mrb[16].mxu0 %v8383_v7 }
 0x4a1   : > { %9156 = vmatmul.mubr.bf16.vlgmr.msra.gmra.mrb[16].mxu1 %v8383_v7  ;;  %9081 = vmatpush1.bf16.msra.mxu0 %v16448_v57  ;;  %v16541_v57 = vld [vmem:[%s22050_s2 + $0x13e8] ss:$16 sps:$4 sm:$0xff]   ;;  %v16549_v7 = vld [vmem:[%s22051_s3 + $0x20c] ss:$16 sps:$4 sm:$0xff]  }
 0x4a2   : > { %9112 = vmatprep.mubr.bf16.mxu0 %v19027_v49  ;;  %9167 = vmatpush1.bf16.msra.mxu1 %v16451_v60  ;;  %v16546_v60 = vld [vmem:[%s22051_s3 + $0x204] ss:$16 sps:$4 sm:$0xff]  }
 0x4a3   : > { %9198 = vmatprep.mubr.bf16.mxu1 %v19027_v49  ;;  %9082 = vmatprep.subr.bf16.mxu0 %v16456_v44  ;;  %v16468_v49 = vld [vmem:[%s22050_s2 + $0x1264] ss:$16 sps:$4 sm:$0xff]   ;;  %v16544_v44 = vld [vmem:[%s22051_s3 + $0x200] ss:$16 sps:$4 sm:$0xff]  }
 0x4a4   : > { %9168 = vmatprep.subr.bf16.mxu1 %v16459_v39  ;;  %v16547_v39 = vld [vmem:[%s22051_s3 + $0x208] ss:$16 sps:$4 sm:$0xff]  }
 0x4a5   : > { %9083 = vmatpush1.bf16.msra.mxu0 %v16454_v40  ;;  %v16552_v40 = vld [vmem:[%s22051_s3 + $0x224] ss:$16 sps:$4 sm:$0xff]  }
 0x4a6   : > { %9169 = vmatpush1.bf16.msra.mxu1 %v16457_v2  ;;  %9084 = vmatprep.subr.bf16.mxu0 %v16462_v20  ;;  %v16555_v2 = vld [vmem:[%s22051_s3 + $0x22c] ss:$16 sps:$4 sm:$0xff]   ;;  %v16550_v20 = vld [vmem:[%s22051_s3 + $0x220] ss:$16 sps:$4 sm:$0xff]  }
 0x4a7   : > { %9170 = vmatprep.subr.bf16.mxu1 %v16465_v24  ;;  %v16553_v24 = vld [vmem:[%s22051_s3 + $0x228] ss:$16 sps:$4 sm:$0xff]  }
 0x4a9   : > { %9085 = vmatpush1.bf16.msra.mxu0 %v16460_v26  ;;  %v16558_v26 = vld [vmem:[%s22051_s3 + $0x244] ss:$16 sps:$4 sm:$0xff]  }
 0x4aa   : > { %9171 = vmatpush1.bf16.msra.mxu1 %v16463_v63  ;;  %9086 = vmatprep.subr.bf16.mxu0 %v16468_v49  ;;  %v16556_v63 = vld [vmem:[%s22051_s3 + $0x240] ss:$16 sps:$4 sm:$0xff]   ;;  %v16559_v49 = vld [vmem:[%s22051_s3 + $0x248] ss:$16 sps:$4 sm:$0xff]  }
 0x4ab   : > { %9172 = vmatprep.subr.bf16.mxu1 %v16471_v25  ;;  %v16564_v25 = vld [vmem:[%s22051_s3 + $0x264] ss:$16 sps:$4 sm:$0xff]  }
 0x4ad   : > { %9087 = vmatpush1.bf16.msra.mxu0 %v16466_v23  ;;  %v16567_v23 = vld [vmem:[%s22051_s3 + $0x26c] ss:$16 sps:$4 sm:$0xff]  }
 0x4ae   : > { %9173 = vmatpush1.bf16.msra.mxu1 %v16469_v56  ;;  %9088 = vmatprep.subr.bf16.mxu0 %v16474_v62  ;;  %v16562_v56 = vld [vmem:[%s22051_s3 + $0x260] ss:$16 sps:$4 sm:$0xff]   ;;  %v16565_v62 = vld [vmem:[%s22051_s3 + $0x268] ss:$16 sps:$4 sm:$0xff]  }
 0x4af   : > { %9174 = vmatprep.subr.bf16.mxu1 %v16477_v34  ;;  %v16570_v34 = vld [vmem:[%s22051_s3 + $0x284] ss:$16 sps:$4 sm:$0xff]  }
 0x4b1   : > { %9089 = vmatpush1.bf16.msra.mxu0 %v16472_v17  ;;  %v16573_v17 = vld [vmem:[%s22051_s3 + $0x28c] ss:$16 sps:$4 sm:$0xff]  }
 0x4b2   : > { %9175 = vmatpush1.bf16.msra.mxu1 %v16475_v28  ;;  %9090 = vmatprep.subr.bf16.mxu0 %v16480_v61  ;;  %v16568_v28 = vld [vmem:[%s22051_s3 + $0x280] ss:$16 sps:$4 sm:$0xff]   ;;  %v16571_v61 = vld [vmem:[%s22051_s3 + $0x288] ss:$16 sps:$4 sm:$0xff]  }
 0x4b3   : > { %9176 = vmatprep.subr.bf16.mxu1 %v16483_v55  ;;  %v16576_v55 = vld [vmem:[%s22051_s3 + $0x2a4] ss:$16 sps:$4 sm:$0xff]  }
 0x4b5   : > { %9091 = vmatpush1.bf16.msra.mxu0 %v16478_v9  ;;  %v16579_v9 = vld [vmem:[%s22051_s3 + $0x2ac] ss:$16 sps:$4 sm:$0xff]  }
 0x4b6   : > { %9177 = vmatpush1.bf16.msra.mxu1 %v16481_v0  ;;  %9092 = vmatprep.subr.bf16.mxu0 %v16486_v36  ;;  %v16574_v0 = vld [vmem:[%s22051_s3 + $0x2a0] ss:$16 sps:$4 sm:$0xff]   ;;  %v16577_v36 = vld [vmem:[%s22051_s3 + $0x2a8] ss:$16 sps:$4 sm:$0xff]  }
 0x4b7   : > { %9178 = vmatprep.subr.bf16.mxu1 %v16489_v50  ;;  %v16582_v50 = vld [vmem:[%s22051_s3 + $0x2c4] ss:$16 sps:$4 sm:$0xff]  }
 0x4b9   : > { %9093 = vmatpush1.bf16.msra.mxu0 %v16484_v35  ;;  %v16585_v35 = vld [vmem:[%s22051_s3 + $0x2cc] ss:$16 sps:$4 sm:$0xff]  }
 0x4ba   : > { %9179 = vmatpush1.bf16.msra.mxu1 %v16487_v42  ;;  %9094 = vmatprep.subr.bf16.mxu0 %v16492_v16  ;;  %v16580_v42 = vld [vmem:[%s22051_s3 + $0x2c0] ss:$16 sps:$4 sm:$0xff]   ;;  %v16583_v16 = vld [vmem:[%s22051_s3 + $0x2c8] ss:$16 sps:$4 sm:$0xff]  }
 0x4bb   : > { %9180 = vmatprep.subr.bf16.mxu1 %v16495_v30  ;;  %v16588_v30 = vld [vmem:[%s22051_s3 + $0x2e4] ss:$16 sps:$4 sm:$0xff]  }
 0x4bd   : > { %9095 = vmatpush1.bf16.msra.mxu0 %v16490_v11  ;;  %v16591_v11 = vld [vmem:[%s22051_s3 + $0x2ec] ss:$16 sps:$4 sm:$0xff]  }
 0x4be   : > { %9181 = vmatpush1.bf16.msra.mxu1 %v16493_v12  ;;  %9096 = vmatprep.subr.bf16.mxu0 %v16498_v1  ;;  %v16586_v12 = vld [vmem:[%s22051_s3 + $0x2e0] ss:$16 sps:$4 sm:$0xff]   ;;  %v16589_v1 = vld [vmem:[%s22051_s3 + $0x2e8] ss:$16 sps:$4 sm:$0xff]  }
 0x4bf   : > { %9182 = vmatprep.subr.bf16.mxu1 %v16501_v53  ;;  %v16594_v53 = vld [vmem:[%s22051_s3 + $0x304] ss:$16 sps:$4 sm:$0xff]  }
 0x4c1   : > { %9097 = vmatpush1.bf16.msra.mxu0 %v16496_v46  ;;  %v16597_v46 = vld [vmem:[%s22051_s3 + $0x30c] ss:$16 sps:$4 sm:$0xff]  }
 0x4c2   : > { %9183 = vmatpush1.bf16.msra.mxu1 %v16499_v58  ;;  %9098 = vmatprep.subr.bf16.mxu0 %v16504_v3  ;;  %v16592_v58 = vld [vmem:[%s22051_s3 + $0x300] ss:$16 sps:$4 sm:$0xff]   ;;  %v16595_v3 = vld [vmem:[%s22051_s3 + $0x308] ss:$16 sps:$4 sm:$0xff]  }
 0x4c3   : > { %9184 = vmatprep.subr.bf16.mxu1 %v16507_v33  ;;  %v16600_v33 = vld [vmem:[%s22051_s3 + $0x324] ss:$16 sps:$4 sm:$0xff]  }
 0x4c5   : > { %9099 = vmatpush1.bf16.msra.mxu0 %v16502_v15  ;;  %v16603_v15 = vld [vmem:[%s22051_s3 + $0x32c] ss:$16 sps:$4 sm:$0xff]  }
 0x4c6   : > { %9185 = vmatpush1.bf16.msra.mxu1 %v16505_v13  ;;  %9100 = vmatprep.subr.bf16.mxu0 %v16510_v14  ;;  %v16598_v13 = vld [vmem:[%s22051_s3 + $0x320] ss:$16 sps:$4 sm:$0xff]   ;;  %v16601_v14 = vld [vmem:[%s22051_s3 + $0x328] ss:$16 sps:$4 sm:$0xff]  }
 0x4c7   : > { %9186 = vmatprep.subr.bf16.mxu1 %v16513_v22  ;;  %v16606_v22 = vld [vmem:[%s22051_s3 + $0x344] ss:$16 sps:$4 sm:$0xff]  }
 0x4c9   : > { %9101 = vmatpush1.bf16.msra.mxu0 %v16508_v47  ;;  %v16609_v47 = vld [vmem:[%s22051_s3 + $0x34c] ss:$16 sps:$4 sm:$0xff]  }
 0x4ca   : > { %9187 = vmatpush1.bf16.msra.mxu1 %v16511_v6  ;;  %9102 = vmatprep.subr.bf16.mxu0 %v16516_v18  ;;  %v16604_v6 = vld [vmem:[%s22051_s3 + $0x340] ss:$16 sps:$4 sm:$0xff]   ;;  %v16607_v18 = vld [vmem:[%s22051_s3 + $0x348] ss:$16 sps:$4 sm:$0xff]  }
 0x4cb   : > { %9188 = vmatprep.subr.bf16.mxu1 %v16519_v52  ;;  %v16612_v52 = vld [vmem:[%s22051_s3 + $0x364] ss:$16 sps:$4 sm:$0xff]  }
 0x4cd   : > { %9103 = vmatpush1.bf16.msra.mxu0 %v16514_v38  ;;  %v16615_v38 = vld [vmem:[%s22051_s3 + $0x36c] ss:$16 sps:$4 sm:$0xff]  }
 0x4ce   : > { %9189 = vmatpush1.bf16.msra.mxu1 %v16517_v43  ;;  %9104 = vmatprep.subr.bf16.mxu0 %v16522_v19  ;;  %v16610_v43 = vld [vmem:[%s22051_s3 + $0x360] ss:$16 sps:$4 sm:$0xff]   ;;  %v16613_v19 = vld [vmem:[%s22051_s3 + $0x368] ss:$16 sps:$4 sm:$0xff]  }
 0x4cf   : > { %9190 = vmatprep.subr.bf16.mxu1 %v16525_v59  ;;  %v16618_v59 = vld [vmem:[%s22051_s3 + $0x384] ss:$16 sps:$4 sm:$0xff]  }
 0x4d1   : > { %9105 = vmatpush1.bf16.msra.mxu0 %v16520_v32  ;;  %v16621_v32 = vld [vmem:[%s22051_s3 + $0x38c] ss:$16 sps:$4 sm:$0xff]  }
 0x4d2   : > { %9191 = vmatpush1.bf16.msra.mxu1 %v16523_v54  ;;  %9106 = vmatprep.subr.bf16.mxu0 %v16528_v51  ;;  %v16616_v54 = vld [vmem:[%s22051_s3 + $0x380] ss:$16 sps:$4 sm:$0xff]   ;;  %v16619_v51 = vld [vmem:[%s22051_s3 + $0x388] ss:$16 sps:$4 sm:$0xff]  }
 0x4d3   : > { %9192 = vmatprep.subr.bf16.mxu1 %v16531_v8  ;;  %v16624_v8 = vld [vmem:[%s22051_s3 + $0x3a4] ss:$16 sps:$4 sm:$0xff]  }
 0x4d5   : > { %9107 = vmatpush1.bf16.msra.mxu0 %v16526_v45  ;;  %v16627_v45 = vld [vmem:[%s22051_s3 + $0x3ac] ss:$16 sps:$4 sm:$0xff]  }
 0x4d6   : > { %9193 = vmatpush1.bf16.msra.mxu1 %v16529_v48  ;;  %9108 = vmatprep.subr.bf16.mxu0 %v16534_v27  ;;  %v16622_v48 = vld [vmem:[%s22051_s3 + $0x3a0] ss:$16 sps:$4 sm:$0xff]   ;;  %v16625_v27 = vld [vmem:[%s22051_s3 + $0x3a8] ss:$16 sps:$4 sm:$0xff]  }
 0x4d7   : > { %9194 = vmatprep.subr.bf16.mxu1 %v16537_v4  ;;  %v16630_v4 = vld [vmem:[%s22051_s3 + $0x3c4] ss:$16 sps:$4 sm:$0xff]  }
 0x4d9   : > { %9109 = vmatpush1.bf16.msra.mxu0 %v16532_v21  ;;  %v16633_v21 = vld [vmem:[%s22051_s3 + $0x3cc] ss:$16 sps:$4 sm:$0xff]  }
 0x4da   : > { %9195 = vmatpush1.bf16.msra.mxu1 %v16535_v29  ;;  %9110 = vmatprep.subr.bf16.mxu0 %v16540_v31  ;;  %v16628_v29 = vld [vmem:[%s22051_s3 + $0x3c0] ss:$16 sps:$4 sm:$0xff]   ;;  %v16631_v31 = vld [vmem:[%s22051_s3 + $0x3c8] ss:$16 sps:$4 sm:$0xff]  }
 0x4db   : > { %9196 = vmatprep.subr.bf16.mxu1 %v16543_v41  ;;  %v16636_v41 = vld [vmem:[%s22051_s3 + $0x3e4] ss:$16 sps:$4 sm:$0xff]  }
 0x4dd   : > { %9111 = vmatpush1.bf16.msra.mxu0 %v16538_v5  ;;  %v16639_v5 = vld [vmem:[%s22051_s3 + $0x3ec] ss:$16 sps:$4 sm:$0xff]  }
 0x4de   : > { %9197 = vmatpush1.bf16.msra.mxu1 %v16541_v57  ;;  %10010 = vmatprep.subr.bf16.mxu0 %v16546_v60  ;;  %v16634_v57 = vld [vmem:[%s22051_s3 + $0x3e0] ss:$16 sps:$4 sm:$0xff]   ;;  %v16637_v60 = vld [vmem:[%s22051_s3 + $0x3e8] ss:$16 sps:$4 sm:$0xff]  }
 0x4df   : > { %10051 = vmatprep.subr.bf16.mxu1 %v16549_v7  ;;  %v16642_v7 = vld [vmem:[%s22051_s3 + $0x4] ss:$16 sps:$4 sm:$0xff]  }
 0x4e0   : > { %9113 = vmatmul.mubr.bf16.vlgmr.msra.gmra.mrb[16].mxu0 %v19036_v37 }
 0x4e1   : > { %9199 = vmatmul.mubr.bf16.vlgmr.msra.gmra.mrb[16].mxu1 %v19036_v37  ;;  %10011 = vmatpush1.bf16.msra.mxu0 %v16544_v44  ;;  %v16561_v37 = vld [vmem:[%s22051_s3 + $0x24c] ss:$16 sps:$4 sm:$0xff]  }
 0x4e2   : > { %10052 = vmatpush1.bf16.msra.mxu1 %v16547_v39  ;;  %10012 = vmatprep.subr.bf16.mxu0 %v16552_v40  ;;  %v16645_v44 = vld [vmem:[%s22051_s3 + $0xc] ss:$16 sps:$4 sm:$0xff]   ;;  %v9217_v39 = vld [vmem:[%s22054_s6] sm:$0xf] }
 0x4e3   : > { %10053 = vmatprep.subr.bf16.mxu1 %v16555_v2  ;;  %v22090_v40 = vld [vmem:[#allocation8_spill] sm:$0xff] }
 0x4e4   : > { %v9222_v2 = vrot.slane %v9217_v39, %v22090_v40 }
 0x4e5   : > { %10013 = vmatpush1.bf16.msra.mxu0 %v16550_v20  ;;  %v22091_v20 = vld [vmem:[#allocation9_spill] sm:$0xff] }
 0x4e6   : > { %10054 = vmatpush1.bf16.msra.mxu1 %v16553_v24  ;;  %10014 = vmatprep.subr.bf16.mxu0 %v16558_v26  ;;  %v9230_v24 = vrot.slane %v9217_v39, %v22091_v20  ;;  %v22092_v26 = vld [vmem:[#allocation10_spill] sm:$0xff] }
 0x4e7   : > { %10055 = vmatprep.subr.bf16.mxu1 %v16561_v37  ;;  %v9226_v37 = vrot.slane %v9217_v39, %v22092_v26 }
 0x4e9   : > { %10015 = vmatpush1.bf16.msra.mxu0 %v16556_v63  ;;  %v22093_v63 = vld [vmem:[#allocation11_spill] sm:$0xff] }
 0x4ea   : > { %10056 = vmatpush1.bf16.msra.mxu1 %v16559_v49  ;;  %10016 = vmatprep.subr.bf16.mxu0 %v16564_v25  ;;  %v9234_v49 = vrot.slane %v9217_v39, %v22093_v63 }
 0x4eb   : > { %10057 = vmatprep.subr.bf16.mxu1 %v16567_v23 }
 0x4ed   : > { %10017 = vmatpush1.bf16.msra.mxu0 %v16562_v56 }
 0x4ee   : > { %10058 = vmatpush1.bf16.msra.mxu1 %v16565_v62  ;;  %10018 = vmatprep.subr.bf16.mxu0 %v16570_v34 }
 0x4ef   : > { %10059 = vmatprep.subr.bf16.mxu1 %v16573_v17 }
 0x4f1   : > { %10019 = vmatpush1.bf16.msra.mxu0 %v16568_v28 }
 0x4f2   : > { %10060 = vmatpush1.bf16.msra.mxu1 %v16571_v61  ;;  %10020 = vmatprep.subr.bf16.mxu0 %v16576_v55 }
 0x4f3   : > { %10061 = vmatprep.subr.bf16.mxu1 %v16579_v9 }
 0x4f5   : > { %10021 = vmatpush1.bf16.msra.mxu0 %v16574_v0 }
 0x4f6   : > { %10062 = vmatpush1.bf16.msra.mxu1 %v16577_v36  ;;  %10022 = vmatprep.subr.bf16.mxu0 %v16582_v50 }
 0x4f7   : > { %10063 = vmatprep.subr.bf16.mxu1 %v16585_v35 }
 0x4f9   : > { %10023 = vmatpush1.bf16.msra.mxu0 %v16580_v42 }
 0x4fa   : > { %10064 = vmatpush1.bf16.msra.mxu1 %v16583_v16  ;;  %10024 = vmatprep.subr.bf16.mxu0 %v16588_v30 }
 0x4fb   : > { %10065 = vmatprep.subr.bf16.mxu1 %v16591_v11 }
 0x4fd   : > { %10025 = vmatpush1.bf16.msra.mxu0 %v16586_v12 }
 0x4fe   : > { %10066 = vmatpush1.bf16.msra.mxu1 %v16589_v1  ;;  %10026 = vmatprep.subr.bf16.mxu0 %v16594_v53 }
 0x4ff   : > { %10067 = vmatprep.subr.bf16.mxu1 %v16597_v46 }
 0x501   : > { %10027 = vmatpush1.bf16.msra.mxu0 %v16592_v58 }
 0x502   : > { %10068 = vmatpush1.bf16.msra.mxu1 %v16595_v3  ;;  %10028 = vmatprep.subr.bf16.mxu0 %v16600_v33 }
 0x503   : > { %10069 = vmatprep.subr.bf16.mxu1 %v16603_v15 }
 0x505   : > { %10029 = vmatpush1.bf16.msra.mxu0 %v16598_v13 }
 0x506   : > { %10070 = vmatpush1.bf16.msra.mxu1 %v16601_v14  ;;  %10030 = vmatprep.subr.bf16.mxu0 %v16606_v22 }
 0x507   : > { %10071 = vmatprep.subr.bf16.mxu1 %v16609_v47 }
 0x509   : > { %10031 = vmatpush1.bf16.msra.mxu0 %v16604_v6 }
 0x50a   : > { %10072 = vmatpush1.bf16.msra.mxu1 %v16607_v18  ;;  %10032 = vmatprep.subr.bf16.mxu0 %v16612_v52 }
 0x50b   : > { %10073 = vmatprep.subr.bf16.mxu1 %v16615_v38 }
 0x50d   : > { %10033 = vmatpush1.bf16.msra.mxu0 %v16610_v43 }
 0x50e   : > { %10074 = vmatpush1.bf16.msra.mxu1 %v16613_v19  ;;  %10034 = vmatprep.subr.bf16.mxu0 %v16618_v59 }
 0x50f   : > { %10075 = vmatprep.subr.bf16.mxu1 %v16621_v32 }
 0x511   : > { %10035 = vmatpush1.bf16.msra.mxu0 %v16616_v54 }
 0x512   : > { %10076 = vmatpush1.bf16.msra.mxu1 %v16619_v51  ;;  %10036 = vmatprep.subr.bf16.mxu0 %v16624_v8 }
 0x513   : > { %10077 = vmatprep.subr.bf16.mxu1 %v16627_v45 }
 0x515   : > { %10037 = vmatpush1.bf16.msra.mxu0 %v16622_v48 }
 0x516   : > { %10078 = vmatpush1.bf16.msra.mxu1 %v16625_v27  ;;  %10038 = vmatprep.subr.bf16.mxu0 %v16630_v4 }
 0x517   : > { %10079 = vmatprep.subr.bf16.mxu1 %v16633_v21 }
 0x519   : > { %10039 = vmatpush1.bf16.msra.mxu0 %v16628_v29 }
 0x51a   : > { %10080 = vmatpush1.bf16.msra.mxu1 %v16631_v31  ;;  %10040 = vmatprep.subr.bf16.mxu0 %v16636_v41 }
 0x51b   : > { %10081 = vmatprep.subr.bf16.mxu1 %v16639_v5 }
 0x51d   : > { %10041 = vmatpush1.bf16.msra.mxu0 %v16634_v57 }
 0x51e   : > { %10082 = vmatpush1.bf16.msra.mxu1 %v16637_v60  ;;  %10418 = vmatprep.subr.bf16.mxu0 %v16642_v7 }
 0x51f   : > { %10459 = vmatprep.subr.bf16.mxu1 %v16645_v44 }
 0x5b3   : > { %v9114_v25 = vpop.f32.mrb[16].mxu0 }
 0x5b4   : > { %v9239_v23 = vadd.f32 %v9222_v2, %v9114_v25  ;;  %v9200_v56 = vpop.f32.mrb[16].mxu1  ;;  %v9116_v62 = vpop.f32.mrb[17].mxu0 }
 0x5b5   : > { %v9241_v34 = vadd.f32 %v9230_v24, %v9200_v56  ;;  %v9240_v17 = vadd.f32 %v9226_v37, %v9116_v62  ;;  %v9202_v28 = vpop.f32.mrb[17].mxu1  ;;  %v9118_v61 = vpop.f32.mrb[18].mxu0 }
 0x5b6   : > { %v9247_v55 = vmax.f32 %v9239_v23, 0.0  ;;  %v9242_v9 = vadd.f32 %v9234_v49, %v9202_v28  ;;  %v9243_v0 = vadd.f32 %v9222_v2, %v9118_v61  ;;  %v9204_v36 = vpop.f32.mrb[18].mxu1  ;;  %v9120_v50 = vpop.f32.mrb[19].mxu0 }
 0x5b7   : > { %v9249_v35 = vmax.f32 %v9241_v34, 0.0  ;;  %v9248_v42 = vmax.f32 %v9240_v17, 0.0  ;;  %v9245_v16 = vadd.f32 %v9230_v24, %v9204_v36  ;;  %v9244_v30 = vadd.f32 %v9226_v37, %v9120_v50  ;;  %v9206_v11 = vpop.f32.mrb[19].mxu1 }
 0x5b8   : > { %v9250_v12 = vmax.f32 %v9242_v9, 0.0  ;;  %v9251_v1 = vmax.f32 %v9243_v0, 0.0  ;;  %v9246_v53 = vadd.f32 %v9234_v49, %v9206_v11 }
 0x5b9   : > { %v9255_v46 = vmax.f32 %v9247_v55, %v9249_v35  ;;  %v9253_v58 = vmax.f32 %v9245_v16, 0.0  ;;  %v9252_v3 = vmax.f32 %v9244_v30, 0.0 }
 0x5ba   : > { %v9256_v33 = vmax.f32 %v9248_v42, %v9250_v12  ;;  %v9254_v15 = vmax.f32 %v9246_v53, 0.0 }
 0x5bb   : > { %v9257_v13 = vmax.f32 %v9251_v1, %v9253_v58 }
 0x5bc   : > { %v9263_v14 = vcombine.low %v9255_v46, %v9256_v33  ;;  %v9264_v22 = vcombine.high %v9255_v46, %v9256_v33  ;;  %v9258_v47 = vmax.f32 %v9252_v3, %v9254_v15 }
 0x5be   : > { %v9271_v6 = vrot.slane %v9263_v14, %v22087_v10  ;;  %v9278_v18 = vrot.slane %v9264_v22, %v22087_v10  ;;  %v9281_v52 = vcombine.low %v9257_v13, %v9258_v47  ;;  %v9282_v38 = vcombine.high %v9257_v13, %v9258_v47 }
 0x5c0   : > { %v9279_v43 = vcombine.high %v9271_v6, %v9271_v6  ;;  %v9280_v19 = vcombine.high %v9278_v18, %v9278_v18  ;;  %v9305_v59 = vrot.slane %v9271_v6, %v22087_v10  ;;  %v9321_v32 = vrot.slane %v9278_v18, %v22087_v10 }
 0x5c1   : > { %v20934_v54 = vrot.slane %v9281_v52, %v22087_v10  ;;  %v20937_v51 = vrot.slane %v9282_v38, %v22087_v10 }
 0x5c2   : > { %v9306_v8 = vcombine.high %v9305_v59, %v9305_v59  ;;  %v9313_v45 = vrot.slane %v9279_v43, %v22087_v10  ;;  %v9322_v48 = vcombine.high %v9321_v32, %v9321_v32  ;;  %v9329_v27 = vrot.slane %v9280_v19, %v22087_v10 }
 0x5c3   : > { %v9379_v4 = vsel %vm3625_vm2, %v9305_v59, -inf  ;;  %v9407_v21 = vsel %vm3625_vm2, %v9321_v32, -inf  ;;  %v9297_v29 = vcombine.high %v20934_v54, %v20934_v54  ;;  %v9298_v31 = vcombine.high %v20937_v51, %v20937_v51 }
 0x5c4   : > { %v9314_v41 = vcombine.high %v9313_v45, %v9313_v45  ;;  %v9330_v5 = vcombine.high %v9329_v27, %v9329_v27  ;;  %v9380_v57 = vrot.slane %v9379_v4, 4  ;;  %v9386_v60 = vsel %vm3625_vm2, %v9306_v8, -inf }
 0x5c5   : > { %v9387_v7 = vrot.slane %v9386_v60, 4  ;;  %v9393_v44 = vsel %vm3625_vm2, %v9313_v45, -inf  ;;  %v9408_v39 = vrot.slane %v9407_v21, 4  ;;  %v9414_v2 = vsel %vm3625_vm2, %v9322_v48, -inf }
 0x5c6   : > { %v9381_v24 = vmax.f32 %v9379_v4, %v9380_v57  ;;  %v9394_v37 = vrot.slane %v9393_v44, 4  ;;  %v9400_v49 = vsel %vm3625_vm2, %v9314_v41, -inf  ;;  %v9415_v25 = vrot.slane %v9414_v2, 4 }
 0x5c7   : > { %v9388_v23 = vmax.f32 %v9386_v60, %v9387_v7  ;;  %v9401_v56 = vrot.slane %v9400_v49, 4  ;;  %v9409_v62 = vmax.f32 %v9407_v21, %v9408_v39  ;;  %v9421_v34 = vsel %vm3625_vm2, %v9329_v27, -inf }
 0x5c8   : > { %v9382_v17 = vrot.slane %v9381_v24, 2  ;;  %v9395_v28 = vmax.f32 %v9393_v44, %v9394_v37  ;;  %v9416_v61 = vmax.f32 %v9414_v2, %v9415_v25  ;;  %v9422_v55 = vrot.slane %v9421_v34, 4 }
 0x5c9   : > { %v9389_v9 = vrot.slane %v9388_v23, 2  ;;  %v9402_v0 = vmax.f32 %v9400_v49, %v9401_v56  ;;  %v9410_v36 = vrot.slane %v9409_v62, 2  ;;  %v9428_v50 = vsel %vm3625_vm2, %v9330_v5, -inf }
 0x5ca   : > { %v9383_v35 = vmax.f32 %v9381_v24, %v9382_v17  ;;  %v9396_v42 = vrot.slane %v9395_v28, 2  ;;  %v9417_v16 = vrot.slane %v9416_v61, 2  ;;  %v9423_v30 = vmax.f32 %v9421_v34, %v9422_v55 }
 0x5cb   : > { %v9390_v11 = vmax.f32 %v9388_v23, %v9389_v9  ;;  %v9403_v12 = vrot.slane %v9402_v0, 2  ;;  %v9411_v1 = vmax.f32 %v9409_v62, %v9410_v36  ;;  %v9429_v53 = vrot.slane %v9428_v50, 4 }
 0x5cc   : > { %v9384_v46 = vrot.slane %v9383_v35, 1  ;;  %v9397_v58 = vmax.f32 %v9395_v28, %v9396_v42  ;;  %v9418_v3 = vmax.f32 %v9416_v61, %v9417_v16  ;;  %v9424_v33 = vrot.slane %v9423_v30, 2 }
 0x5cd   : > { %v9391_v15 = vrot.slane %v9390_v11, 1  ;;  %v9404_v13 = vmax.f32 %v9402_v0, %v9403_v12  ;;  %v9412_v14 = vrot.slane %v9411_v1, 1  ;;  %v9430_v22 = vmax.f32 %v9428_v50, %v9429_v53 }
 0x5ce   : > { %v9385_v47 = vmax.f32 %v9383_v35, %v9384_v46  ;;  %v9398_v6 = vrot.slane %v9397_v58, 1  ;;  %v9419_v18 = vrot.slane %v9418_v3, 1  ;;  %v9425_v52 = vmax.f32 %v9423_v30, %v9424_v33 }
 0x5cf   : > { %v9392_v38 = vmax.f32 %v9390_v11, %v9391_v15  ;;  %v9405_v43 = vrot.slane %v9404_v13, 1  ;;  %v9413_v19 = vmax.f32 %v9411_v1, %v9412_v14  ;;  %v9431_v59 = vrot.slane %v9430_v22, 2 }
 0x5d0   : > { %v9399_v32 = vmax.f32 %v9397_v58, %v9398_v6  ;;  %v9420_v8 = vmax.f32 %v9418_v3, %v9419_v18  ;;  %v9426_v45 = vrot.slane %v9425_v52, 1  ;;  %v9337_v48 = vrot.slane %v20934_v54, %v22087_v10 }
 0x5d1   : > { %v9406_v27 = vmax.f32 %v9404_v13, %v9405_v43  ;;  %v9432_v4 = vmax.f32 %v9430_v22, %v9431_v59  ;;  %v9345_v21 = vrot.slane %v9297_v29, %v22087_v10  ;;  %v9353_v41 = vrot.slane %v20937_v51, %v22087_v10 }
 0x5d2   : > { %v9427_v5 = vmax.f32 %v9425_v52, %v9426_v45  ;;  %v9513_v57 = vsel %vm4154_vm3, %v9399_v32, %v9385_v47  ;;  %v9338_v60 = vcombine.high %v9337_v48, %v9337_v48  ;;  %v9361_v7 = vrot.slane %v9298_v31, %v22087_v10 }
 0x5d3   : > { %v9433_v44 = vrot.slane %v9432_v4, 1  ;;  %v9514_v39 = vsel %vm4156_vm4, %v9413_v19, %v9513_v57  ;;  %v9520_v2 = vsel %vm4154_vm3, %v9406_v27, %v9392_v38  ;;  %v9346_v24 = vcombine.high %v9345_v21, %v9345_v21 }
 0x5d4   : > { %v9515_v54 = vsel %vm4158_vm5, %v9427_v5, %v9514_v39  ;;  %v9521_v37 = vsel %vm4156_vm4, %v9420_v8, %v9520_v2  ;;  %v9354_v29 = vcombine.high %v9353_v41, %v9353_v41  ;;  %v9362_v49 = vcombine.high %v9361_v7, %v9361_v7 }
 0x5d5   : > { %v9434_v25 = vmax.f32 %v9432_v4, %v9433_v44  ;;  %v9435_v51 = vsel %vm3625_vm2, %v9337_v48, -inf  ;;  %v9442_v23 = vsel %vm3625_vm2, %v9338_v60, -inf  ;;  %v9449_v56 = vsel %vm3625_vm2, %v9345_v21, -inf }
 0x5d6   : > { %v9436_v31 = vrot.slane %v9435_v51, 4  ;;  %v9443_v62 = vrot.slane %v9442_v23, 4  ;;  %v9450_v34 = vrot.slane %v9449_v56, 4  ;;  %v9456_v17 = vsel %vm3625_vm2, %v9346_v24, -inf }
 0x5d7   : > { %v9522_v28 = vsel %vm4158_vm5, %v9434_v25, %v9521_v37  ;;  %v9457_v61 = vrot.slane %v9456_v17, 4  ;;  %v9463_v55 = vsel %vm3625_vm2, %v9353_v41, -inf  ;;  %v9470_v9 = vsel %vm3625_vm2, %v9354_v29, -inf }
 0x5d8   : > { %v9437_v0 = vmax.f32 %v9435_v51, %v9436_v31  ;;  %v9444_v36 = vmax.f32 %v9442_v23, %v9443_v62  ;;  %v9451_v50 = vmax.f32 %v9449_v56, %v9450_v34  ;;  %v9464_v35 = vrot.slane %v9463_v55, 4 }
 0x5d9   : > { %v9458_v42 = vmax.f32 %v9456_v17, %v9457_v61  ;;  %v9471_v16 = vrot.slane %v9470_v9, 4  ;;  %v9477_v30 = vsel %vm3625_vm2, %v9361_v7, -inf  ;;  %v9484_v11 = vsel %vm3625_vm2, %v9362_v49, -inf }
 0x5da   : > { %v9438_v12 = vrot.slane %v9437_v0, 2  ;;  %v9445_v1 = vrot.slane %v9444_v36, 2  ;;  %v9452_v53 = vrot.slane %v9451_v50, 2  ;;  %v9465_v46 = vmax.f32 %v9463_v55, %v9464_v35 }
 0x5db   : > { %v9459_v58 = vrot.slane %v9458_v42, 2  ;;  %v9472_v3 = vmax.f32 %v9470_v9, %v9471_v16  ;;  %v9478_v33 = vrot.slane %v9477_v30, 4  ;;  %v9485_v15 = vrot.slane %v9484_v11, 4 }
 0x5dc   : > { %v9439_v13 = vmax.f32 %v9437_v0, %v9438_v12  ;;  %v9446_v14 = vmax.f32 %v9444_v36, %v9445_v1  ;;  %v9453_v22 = vmax.f32 %v9451_v50, %v9452_v53  ;;  %v9466_v47 = vrot.slane %v9465_v46, 2  ;;  %v9532_v36 = vld [vmem:[#allocation4 + $0x8] sm:$0xc0] }
 0x5dd   : > { %v9460_v6 = vmax.f32 %v9458_v42, %v9459_v58  ;;  %v9473_v18 = vrot.slane %v9472_v3, 2  ;;  %v9479_v52 = vmax.f32 %v9477_v30, %v9478_v33  ;;  %v9486_v38 = vmax.f32 %v9484_v11, %v9485_v15  ;;  %v16643_v33 = vld [vmem:[%s22051_s3 + $0x8] ss:$16 sps:$4 sm:$0xff]  }
 0x5de   : > { %v9440_v43 = vrot.slane %v9439_v13, 1  ;;  %v9447_v19 = vrot.slane %v9446_v14, 1  ;;  %v9454_v59 = vrot.slane %v9453_v22, 1  ;;  %v9467_v32 = vmax.f32 %v9465_v46, %v9466_v47  ;;  %v16646_v47 = vld [vmem:[%s22051_s3 + $0x20] ss:$16 sps:$4 sm:$0xff]  }
 0x5df   : > { %v9461_v8 = vrot.slane %v9460_v6, 1  ;;  %v9474_v45 = vmax.f32 %v9472_v3, %v9473_v18  ;;  %v9480_v48 = vrot.slane %v9479_v52, 2  ;;  %v9487_v27 = vrot.slane %v9486_v38, 2  ;;  %v16640_v3 = vld [vmem:[%s22051_s3] ss:$16 sps:$4 sm:$0xff]  }
 0x5e0   : > { %v9441_v4 = vmax.f32 %v9439_v13, %v9440_v43  ;;  %v9448_v21 = vmax.f32 %v9446_v14, %v9447_v19  ;;  %v9468_v41 = vrot.slane %v9467_v32, 1  ;;  %v9455_v5 = vmax.f32 %v9453_v22, %v9454_v59  ;;  %v16648_v13 = vld [vmem:[%s22051_s3 + $0x24] ss:$16 sps:$4 sm:$0xff]   ;;  %v16651_v14 = vld [vmem:[%s22051_s3 + $0x2c] ss:$16 sps:$4 sm:$0xff]  }
 0x5e1   : > { %v9475_v57 = vrot.slane %v9474_v45, 1  ;;  %v9481_v60 = vmax.f32 %v9479_v52, %v9480_v48  ;;  %v9488_v7 = vmax.f32 %v9486_v38, %v9487_v27  ;;  %v9462_v44 = vmax.f32 %v9460_v6, %v9461_v8  ;;  %v16649_v6 = vld [vmem:[%s22051_s3 + $0x28] ss:$16 sps:$4 sm:$0xff]   ;;  %v16654_v18 = vld [vmem:[%s22051_s3 + $0x44] ss:$16 sps:$4 sm:$0xff]  }
 0x5e2   : > { %v9469_v39 = vmax.f32 %v9467_v32, %v9468_v41  ;;  %v9516_v2 = vsel %vm4160_vm6, %v9441_v4, %v9515_v54  ;;  %v9523_v24 = vsel %vm4160_vm6, %v9448_v21, %v9522_v28  ;;  %v9602_v54 = vld [vmem:[#allocation4 + $0x8] sm:$0x80]  ;;  %v9601_v28 = vld [vmem:[#allocation4] sm:$0x80]  ;;  %v16652_v38 = vld [vmem:[%s22051_s3 + $0x40] ss:$16 sps:$4 sm:$0xff]  }
 0x5e3   : > { %v9476_v37 = vmax.f32 %v9474_v45, %v9475_v57  ;;  %v9482_v29 = vrot.slane %v9481_v60, 1  ;;  %v9489_v49 = vrot.slane %v9488_v7, 1  ;;  %v9517_v25 = vsel %vm4162_vm7, %v9455_v5, %v9516_v2  ;;  %v16657_v52 = vld [vmem:[%s22051_s3 + $0x4c] ss:$16 sps:$4 sm:$0xff]   ;;  %v16655_v43 = vld [vmem:[%s22051_s3 + $0x48] ss:$16 sps:$4 sm:$0xff]  }
 0x5e4   : > { %v9518_v51 = vsel %vm4164_vm8, %v9469_v39, %v9517_v25  ;;  %v9524_v23 = vsel %vm4162_vm7, %v9462_v44, %v9523_v24  ;;  %v16660_v19 = vld [vmem:[%s22051_s3 + $0x64] ss:$16 sps:$4 sm:$0xff]   ;;  %v16663_v59 = vld [vmem:[%s22051_s3 + $0x6c] ss:$16 sps:$4 sm:$0xff]   ;;  %v16658_v32 = vld [vmem:[%s22051_s3 + $0x60] ss:$16 sps:$4 sm:$0xff]  }
 0x5e5   : > { %v9483_v56 = vmax.f32 %v9481_v60, %v9482_v29  ;;  %v9490_v31 = vmax.f32 %v9488_v7, %v9489_v49  ;;  %v9525_v62 = vsel %vm4164_vm8, %v9476_v37, %v9524_v23  ;;  %v16661_v8 = vld [vmem:[%s22051_s3 + $0x68] ss:$16 sps:$4 sm:$0xff]   ;;  %v16666_v45 = vld [vmem:[%s22051_s3 + $0x84] ss:$16 sps:$4 sm:$0xff]   ;;  %v16669_v48 = vld [vmem:[%s22051_s3 + $0x8c] ss:$16 sps:$4 sm:$0xff]  }
 0x5e6   : > { %v16664_v27 = vld [vmem:[%s22051_s3 + $0x80] ss:$16 sps:$4 sm:$0xff]   ;;  %v16667_v4 = vld [vmem:[%s22051_s3 + $0x88] ss:$16 sps:$4 sm:$0xff]   ;;  %v16672_v21 = vld [vmem:[%s22051_s3 + $0xa4] ss:$16 sps:$4 sm:$0xff]  }
 0x5e7   : > { %v9519_v34 = vsel %vm4166_vm9, %v9483_v56, %v9518_v51  ;;  %v20981_v17 = vsel %vm4166_vm9, %v9490_v31, %v9525_v62  ;;  %v16675_v41 = vld [vmem:[%s22051_s3 + $0xac] ss:$16 sps:$4 sm:$0xff]   ;;  %v16670_v5 = vld [vmem:[%s22051_s3 + $0xa0] ss:$16 sps:$4 sm:$0xff]   ;;  %v16673_v57 = vld [vmem:[%s22051_s3 + $0xa8] ss:$16 sps:$4 sm:$0xff]  }
 0x5e8   : > { %9529 = vst [vmem:[#allocation4 + $0x10] sm:$0xff] %v9519_v34  ;;  %9530 = vst [vmem:[#allocation4 + $0x18] sm:$0xff] %v20981_v17  ;;  %v16678_v60 = vld [vmem:[%s22051_s3 + $0xc4] ss:$16 sps:$4 sm:$0xff]   ;;  %v16681_v7 = vld [vmem:[%s22051_s3 + $0xcc] ss:$16 sps:$4 sm:$0xff]  }
 0x5e9   : > { %v16676_v44 = vld [vmem:[%s22051_s3 + $0xc0] ss:$16 sps:$4 sm:$0xff]   ;;  %v16679_v39 = vld [vmem:[%s22051_s3 + $0xc8] ss:$16 sps:$4 sm:$0xff]   ;;  %v16684_v2 = vld [vmem:[%s22051_s3 + $0xe4] ss:$16 sps:$4 sm:$0xff]  }
 0x5ea   : > { %v16687_v24 = vld [vmem:[%s22051_s3 + $0xec] ss:$16 sps:$4 sm:$0xff]   ;;  %v16682_v37 = vld [vmem:[%s22051_s3 + $0xe0] ss:$16 sps:$4 sm:$0xff]   ;;  %v16685_v29 = vld [vmem:[%s22051_s3 + $0xe8] ss:$16 sps:$4 sm:$0xff]  }
 0x5eb   : > { %v16690_v49 = vld [vmem:[%s22051_s3 + $0x104] ss:$16 sps:$4 sm:$0xff]   ;;  %v16693_v25 = vld [vmem:[%s22051_s3 + $0x10c] ss:$16 sps:$4 sm:$0xff]   ;;  %v16688_v51 = vld [vmem:[%s22051_s3 + $0x100] ss:$16 sps:$4 sm:$0xff]  }
 0x5ec   : > { %v16691_v23 = vld [vmem:[%s22051_s3 + $0x108] ss:$16 sps:$4 sm:$0xff]   ;;  %v16696_v56 = vld [vmem:[%s22051_s3 + $0x124] ss:$16 sps:$4 sm:$0xff]   ;;  %v16699_v31 = vld [vmem:[%s22051_s3 + $0x12c] ss:$16 sps:$4 sm:$0xff]  }
 0x5ed   : > { %v16694_v62 = vld [vmem:[%s22051_s3 + $0x120] ss:$16 sps:$4 sm:$0xff]   ;;  %v16697_v34 = vld [vmem:[%s22051_s3 + $0x128] ss:$16 sps:$4 sm:$0xff]  }
 0x5ef   : > { %v9604_v61 = vld [vmem:[#allocation4 + $0x18] sm:$0x7f]  ;;  %v9603_v55 = vld [vmem:[#allocation4 + $0x10] sm:$0x7f] }
 0x5f0   : > { %v9606_v9 = vpack.c.bf16 %v9604_v61, %v9602_v54  ;;  %v9605_v0 = vpack.c.bf16 %v9603_v55, %v9601_v28  ;;  %v9534_v30 = vld [vmem:[#allocation4 + $0x18] sm:$0x3f]  ;;  %v16702_v54 = vld [vmem:[%s22051_s3 + $0x144] ss:$16 sps:$4 sm:$0xff]   ;;  %v16700_v61 = vld [vmem:[%s22051_s3 + $0x140] ss:$16 sps:$4 sm:$0xff]  }
 0x5f1   : > { %v9536_v46 = vpack.c.bf16 %v9534_v30, %v9532_v36  ;;  %v16705_v28 = vld [vmem:[%s22051_s3 + $0x14c] ss:$16 sps:$4 sm:$0xff]   ;;  %v16703_v55 = vld [vmem:[%s22051_s3 + $0x148] ss:$16 sps:$4 sm:$0xff]   ;;  %v16706_v36 = vld [vmem:[%s22051_s3 + $0x160] ss:$16 sps:$4 sm:$0xff]  }
 0x5f2   : > { %v9681_v50 = vshrl.u32 %v9606_v9, 16  ;;  %v9684_v35 = vshll.u32 %v9606_v9, 16  ;;  %v9673_v42 = vshrl.u32 %v9605_v0, 16  ;;  %v9676_v16 = vshll.u32 %v9605_v0, 16  ;;  %v16708_v9 = vld [vmem:[%s22051_s3 + $0x164] ss:$16 sps:$4 sm:$0xff]  }
 0x5f3   : > { %v10095_v22 = vrot.slane %v9536_v46, 3  ;;  %v16711_v0 = vld [vmem:[%s22051_s3 + $0x16c] ss:$16 sps:$4 sm:$0xff]   ;;  %v16715_v30 = vld [vmem:[%s22051_s3 + $0x188] ss:$16 sps:$4 sm:$0xff]  }
 0x5f4   : > { %v9683_v11 = vrot.slane %v9681_v50, 3  ;;  %v9686_v12 = vrot.slane %v9684_v35, 4  ;;  %v9675_v1 = vrot.slane %v9673_v42, 3  ;;  %v9678_v53 = vrot.slane %v9676_v16, 4  ;;  %v16709_v50 = vld [vmem:[%s22051_s3 + $0x168] ss:$16 sps:$4 sm:$0xff]  }
 0x5f5   : > { %v16714_v35 = vld [vmem:[%s22051_s3 + $0x184] ss:$16 sps:$4 sm:$0xff]   ;;  %v16717_v42 = vld [vmem:[%s22051_s3 + $0x18c] ss:$16 sps:$4 sm:$0xff]   ;;  %v16712_v16 = vld [vmem:[%s22051_s3 + $0x180] ss:$16 sps:$4 sm:$0xff]  }
 0x5f6   : > { %v9687_v58 = vor.u32 %v9686_v12, %v9683_v11  ;;  %v9679_v15 = vor.u32 %v9678_v53, %v9675_v1  ;;  %v16720_v11 = vld [vmem:[%s22051_s3 + $0x1a4] ss:$16 sps:$4 sm:$0xff]   ;;  %v16723_v12 = vld [vmem:[%s22051_s3 + $0x1ac] ss:$16 sps:$4 sm:$0xff]   ;;  %v16718_v1 = vld [vmem:[%s22051_s3 + $0x1a0] ss:$16 sps:$4 sm:$0xff]  }
 0x5f7   : > { %v16721_v53 = vld [vmem:[%s22051_s3 + $0x1a8] ss:$16 sps:$4 sm:$0xff]   ;;  %v16726_v46 = vld [vmem:[%s22051_s3 + $0x1c4] ss:$16 sps:$4 sm:$0xff]  }
 0x5f8   : > { %10042 = vmatprep.mubr.bf16.mxu0 %v9687_v58  ;;  %10083 = vmatprep.mubr.bf16.mxu1 %v9687_v58  ;;  %v16729_v58 = vld [vmem:[%s22051_s3 + $0x1cc] ss:$16 sps:$4 sm:$0xff]  }
 0x5f9   : > { %10043 = vmatmul.mubr.bf16.vlgmr.msra.gmra.mrb[20].mxu0 %v9679_v15  ;;  %10084 = vmatmul.mubr.bf16.vlgmr.msra.gmra.mrb[20].mxu1 %v9679_v15  ;;  %v16732_v15 = vld [vmem:[%s22051_s3 + $0x1e4] ss:$16 sps:$4 sm:$0xff]  }
 0x5fa   : > { %10419 = vmatpush1.bf16.msra.mxu0 %v16640_v3  ;;  %10460 = vmatpush1.bf16.msra.mxu1 %v16643_v33  ;;  %v16724_v3 = vld [vmem:[%s22051_s3 + $0x1c0] ss:$16 sps:$4 sm:$0xff]   ;;  %v16727_v33 = vld [vmem:[%s22051_s3 + $0x1c8] ss:$16 sps:$4 sm:$0xff]  }
 0x5fb   : > { %10450 = vmatprep.mubr.bf16.mxu0 %v10095_v22  ;;  %10491 = vmatprep.mubr.bf16.mxu1 %v10095_v22  ;;  %v9533_v22 = vld [vmem:[#allocation4 + $0x10] sm:$0x3f] }
 0x5fc   : > { %10420 = vmatprep.subr.bf16.mxu0 %v16648_v13  ;;  %10461 = vmatprep.subr.bf16.mxu1 %v16651_v14  ;;  %v16735_v13 = vld [vmem:[%s22051_s3 + $0x1ec] ss:$16 sps:$4 sm:$0xff]   ;;  %v9531_v14 = vld [vmem:[#allocation4] sm:$0xc0] }
 0x5fe   : > { %10421 = vmatpush1.bf16.msra.mxu0 %v16646_v47  ;;  %10462 = vmatpush1.bf16.msra.mxu1 %v16649_v6  ;;  %v16730_v47 = vld [vmem:[%s22051_s3 + $0x1e0] ss:$16 sps:$4 sm:$0xff]   ;;  %v16733_v6 = vld [vmem:[%s22051_s3 + $0x1e8] ss:$16 sps:$4 sm:$0xff]  }
 0x5ff   : > { %10422 = vmatprep.subr.bf16.mxu0 %v16654_v18  ;;  %10463 = vmatprep.subr.bf16.mxu1 %v16657_v52  ;;  %v9535_v18 = vpack.c.bf16 %v9533_v22, %v9531_v14  ;;  %v16738_v52 = vld [vmem:[%s22051_s3 + $0x404] ss:$16 sps:$4 sm:$0xff]   ;;  %v16819_v22 = vld [vmem:[%s22051_s3 + $0x5ac] ss:$16 sps:$4 sm:$0xff]  }
 0x600   : > { %v16816_v14 = vld [vmem:[%s22051_s3 + $0x5a4] ss:$16 sps:$4 sm:$0xff]  }
 0x602   : > { %10423 = vmatpush1.bf16.msra.mxu0 %v16652_v38  ;;  %10464 = vmatpush1.bf16.msra.mxu1 %v16655_v43  ;;  %v16741_v38 = vld [vmem:[%s22051_s3 + $0x40c] ss:$16 sps:$4 sm:$0xff]   ;;  %v16736_v43 = vld [vmem:[%s22051_s3 + $0x400] ss:$16 sps:$4 sm:$0xff]  }
 0x603   : > { %10424 = vmatprep.subr.bf16.mxu0 %v16660_v19  ;;  %10465 = vmatprep.subr.bf16.mxu1 %v16663_v59  ;;  %v10094_v19 = vrot.slane %v9535_v18, 3  ;;  %v16739_v59 = vld [vmem:[%s22051_s3 + $0x408] ss:$16 sps:$4 sm:$0xff]  }
 0x604   : > { %v10978_v18 = vld [vmem:[#allocation4 + $0x28] sm:$0x1] }
 0x606   : > { %10425 = vmatpush1.bf16.msra.mxu0 %v16658_v32  ;;  %10466 = vmatpush1.bf16.msra.mxu1 %v16661_v8  ;;  %v10503_v32 = vpack.c.bf16 %v20981_v17, %v20981_v17  ;;  %v16744_v8 = vld [vmem:[%s22051_s3 + $0x424] ss:$16 sps:$4 sm:$0xff]   ;;  %v16745_v17 = vld [vmem:[%s22051_s3 + $0x428] ss:$16 sps:$4 sm:$0xff]  }
 0x607   : > { %10426 = vmatprep.subr.bf16.mxu0 %v16666_v45  ;;  %10467 = vmatprep.subr.bf16.mxu1 %v16669_v48  ;;  %v16747_v45 = vld [vmem:[%s22051_s3 + $0x42c] ss:$16 sps:$4 sm:$0xff]   ;;  %v16742_v48 = vld [vmem:[%s22051_s3 + $0x420] ss:$16 sps:$4 sm:$0xff]  }
 0x60a   : > { %10427 = vmatpush1.bf16.msra.mxu0 %v16664_v27  ;;  %10468 = vmatpush1.bf16.msra.mxu1 %v16667_v4  ;;  %v16750_v27 = vld [vmem:[%s22051_s3 + $0x444] ss:$16 sps:$4 sm:$0xff]   ;;  %v16753_v4 = vld [vmem:[%s22051_s3 + $0x44c] ss:$16 sps:$4 sm:$0xff]  }
 0x60b   : > { %10428 = vmatprep.subr.bf16.mxu0 %v16672_v21  ;;  %10469 = vmatprep.subr.bf16.mxu1 %v16675_v41  ;;  %v16748_v21 = vld [vmem:[%s22051_s3 + $0x440] ss:$16 sps:$4 sm:$0xff]   ;;  %v16751_v41 = vld [vmem:[%s22051_s3 + $0x448] ss:$16 sps:$4 sm:$0xff]  }
 0x60e   : > { %10429 = vmatpush1.bf16.msra.mxu0 %v16670_v5  ;;  %10470 = vmatpush1.bf16.msra.mxu1 %v16673_v57  ;;  %v16756_v5 = vld [vmem:[%s22051_s3 + $0x464] ss:$16 sps:$4 sm:$0xff]   ;;  %v16759_v57 = vld [vmem:[%s22051_s3 + $0x46c] ss:$16 sps:$4 sm:$0xff]  }
 0x60f   : > { %10430 = vmatprep.subr.bf16.mxu0 %v16678_v60  ;;  %10471 = vmatprep.subr.bf16.mxu1 %v16681_v7  ;;  %v16754_v60 = vld [vmem:[%s22051_s3 + $0x460] ss:$16 sps:$4 sm:$0xff]   ;;  %v16757_v7 = vld [vmem:[%s22051_s3 + $0x468] ss:$16 sps:$4 sm:$0xff]  }
 0x612   : > { %10431 = vmatpush1.bf16.msra.mxu0 %v16676_v44  ;;  %10472 = vmatpush1.bf16.msra.mxu1 %v16679_v39  ;;  %v16762_v44 = vld [vmem:[%s22051_s3 + $0x484] ss:$16 sps:$4 sm:$0xff]   ;;  %v16765_v39 = vld [vmem:[%s22051_s3 + $0x48c] ss:$16 sps:$4 sm:$0xff]  }
 0x613   : > { %10432 = vmatprep.subr.bf16.mxu0 %v16684_v2  ;;  %10473 = vmatprep.subr.bf16.mxu1 %v16687_v24  ;;  %v16760_v2 = vld [vmem:[%s22051_s3 + $0x480] ss:$16 sps:$4 sm:$0xff]   ;;  %v16763_v24 = vld [vmem:[%s22051_s3 + $0x488] ss:$16 sps:$4 sm:$0xff]  }
 0x616   : > { %10433 = vmatpush1.bf16.msra.mxu0 %v16682_v37  ;;  %10474 = vmatpush1.bf16.msra.mxu1 %v16685_v29  ;;  %v16768_v37 = vld [vmem:[%s22051_s3 + $0x4a4] ss:$16 sps:$4 sm:$0xff]   ;;  %v16771_v29 = vld [vmem:[%s22051_s3 + $0x4ac] ss:$16 sps:$4 sm:$0xff]  }
 0x617   : > { %10434 = vmatprep.subr.bf16.mxu0 %v16690_v49  ;;  %10475 = vmatprep.subr.bf16.mxu1 %v16693_v25  ;;  %v16766_v49 = vld [vmem:[%s22051_s3 + $0x4a0] ss:$16 sps:$4 sm:$0xff]   ;;  %v16769_v25 = vld [vmem:[%s22051_s3 + $0x4a8] ss:$16 sps:$4 sm:$0xff]  }
 0x61a   : > { %10435 = vmatpush1.bf16.msra.mxu0 %v16688_v51  ;;  %10476 = vmatpush1.bf16.msra.mxu1 %v16691_v23  ;;  %v16774_v51 = vld [vmem:[%s22051_s3 + $0x4c4] ss:$16 sps:$4 sm:$0xff]   ;;  %v16777_v23 = vld [vmem:[%s22051_s3 + $0x4cc] ss:$16 sps:$4 sm:$0xff]  }
 0x61b   : > { %10436 = vmatprep.subr.bf16.mxu0 %v16696_v56  ;;  %10477 = vmatprep.subr.bf16.mxu1 %v16699_v31  ;;  %v16772_v56 = vld [vmem:[%s22051_s3 + $0x4c0] ss:$16 sps:$4 sm:$0xff]   ;;  %v16775_v31 = vld [vmem:[%s22051_s3 + $0x4c8] ss:$16 sps:$4 sm:$0xff]  }
 0x61e   : > { %10437 = vmatpush1.bf16.msra.mxu0 %v16694_v62  ;;  %10478 = vmatpush1.bf16.msra.mxu1 %v16697_v34  ;;  %v16780_v62 = vld [vmem:[%s22051_s3 + $0x4e4] ss:$16 sps:$4 sm:$0xff]   ;;  %v16783_v34 = vld [vmem:[%s22051_s3 + $0x4ec] ss:$16 sps:$4 sm:$0xff]  }
 0x61f   : > { %10438 = vmatprep.subr.bf16.mxu0 %v16702_v54  ;;  %10479 = vmatprep.subr.bf16.mxu1 %v16705_v28  ;;  %v16778_v54 = vld [vmem:[%s22051_s3 + $0x4e0] ss:$16 sps:$4 sm:$0xff]   ;;  %v16781_v28 = vld [vmem:[%s22051_s3 + $0x4e8] ss:$16 sps:$4 sm:$0xff]  }
 0x622   : > { %10439 = vmatpush1.bf16.msra.mxu0 %v16700_v61  ;;  %10480 = vmatpush1.bf16.msra.mxu1 %v16703_v55  ;;  %v16786_v61 = vld [vmem:[%s22051_s3 + $0x504] ss:$16 sps:$4 sm:$0xff]   ;;  %v16789_v55 = vld [vmem:[%s22051_s3 + $0x50c] ss:$16 sps:$4 sm:$0xff]  }
 0x623   : > { %10440 = vmatprep.subr.bf16.mxu0 %v16708_v9  ;;  %10481 = vmatprep.subr.bf16.mxu1 %v16711_v0  ;;  %v16784_v9 = vld [vmem:[%s22051_s3 + $0x500] ss:$16 sps:$4 sm:$0xff]   ;;  %v16787_v0 = vld [vmem:[%s22051_s3 + $0x508] ss:$16 sps:$4 sm:$0xff]  }
 0x626   : > { %10441 = vmatpush1.bf16.msra.mxu0 %v16706_v36  ;;  %10482 = vmatpush1.bf16.msra.mxu1 %v16709_v50  ;;  %v16792_v36 = vld [vmem:[%s22051_s3 + $0x524] ss:$16 sps:$4 sm:$0xff]   ;;  %v16795_v50 = vld [vmem:[%s22051_s3 + $0x52c] ss:$16 sps:$4 sm:$0xff]  }
 0x627   : > { %10442 = vmatprep.subr.bf16.mxu0 %v16714_v35  ;;  %10483 = vmatprep.subr.bf16.mxu1 %v16717_v42  ;;  %v16790_v35 = vld [vmem:[%s22051_s3 + $0x520] ss:$16 sps:$4 sm:$0xff]   ;;  %v16793_v42 = vld [vmem:[%s22051_s3 + $0x528] ss:$16 sps:$4 sm:$0xff]  }
 0x62a   : > { %10443 = vmatpush1.bf16.msra.mxu0 %v16712_v16  ;;  %10484 = vmatpush1.bf16.msra.mxu1 %v16715_v30  ;;  %v16798_v16 = vld [vmem:[%s22051_s3 + $0x544] ss:$16 sps:$4 sm:$0xff]   ;;  %v16801_v30 = vld [vmem:[%s22051_s3 + $0x54c] ss:$16 sps:$4 sm:$0xff]  }
 0x62b   : > { %10444 = vmatprep.subr.bf16.mxu0 %v16720_v11  ;;  %10485 = vmatprep.subr.bf16.mxu1 %v16723_v12  ;;  %v16796_v11 = vld [vmem:[%s22051_s3 + $0x540] ss:$16 sps:$4 sm:$0xff]   ;;  %v16799_v12 = vld [vmem:[%s22051_s3 + $0x548] ss:$16 sps:$4 sm:$0xff]  }
 0x62e   : > { %10445 = vmatpush1.bf16.msra.mxu0 %v16718_v1  ;;  %10486 = vmatpush1.bf16.msra.mxu1 %v16721_v53  ;;  %v16804_v1 = vld [vmem:[%s22051_s3 + $0x564] ss:$16 sps:$4 sm:$0xff]   ;;  %v16807_v53 = vld [vmem:[%s22051_s3 + $0x56c] ss:$16 sps:$4 sm:$0xff]  }
 0x62f   : > { %10446 = vmatprep.subr.bf16.mxu0 %v16726_v46  ;;  %10487 = vmatprep.subr.bf16.mxu1 %v16729_v58  ;;  %v16802_v46 = vld [vmem:[%s22051_s3 + $0x560] ss:$16 sps:$4 sm:$0xff]   ;;  %v16805_v58 = vld [vmem:[%s22051_s3 + $0x568] ss:$16 sps:$4 sm:$0xff]  }
 0x632   : > { %10447 = vmatpush1.bf16.msra.mxu0 %v16724_v3  ;;  %10488 = vmatpush1.bf16.msra.mxu1 %v16727_v33  ;;  %v16810_v3 = vld [vmem:[%s22051_s3 + $0x584] ss:$16 sps:$4 sm:$0xff]   ;;  %v16813_v33 = vld [vmem:[%s22051_s3 + $0x58c] ss:$16 sps:$4 sm:$0xff]  }
 0x633   : > { %10448 = vmatprep.subr.bf16.mxu0 %v16732_v15  ;;  %10489 = vmatprep.subr.bf16.mxu1 %v16735_v13  ;;  %v16808_v15 = vld [vmem:[%s22051_s3 + $0x580] ss:$16 sps:$4 sm:$0xff]   ;;  %v16811_v13 = vld [vmem:[%s22051_s3 + $0x588] ss:$16 sps:$4 sm:$0xff]  }
 0x636   : > { %10449 = vmatpush1.bf16.msra.mxu0 %v16730_v47  ;;  %10490 = vmatpush1.bf16.msra.mxu1 %v16733_v6  ;;  %v16814_v47 = vld [vmem:[%s22051_s3 + $0x5a0] ss:$16 sps:$4 sm:$0xff]   ;;  %v10976_v6 = vld [vmem:[#allocation4 + $0x18] sm:$0xfe] }
 0x637   : > { %10889 = vmatprep.subr.bf16.mxu0 %v16738_v52  ;;  %10930 = vmatprep.subr.bf16.mxu1 %v16741_v38  ;;  %v16817_v52 = vld [vmem:[%s22051_s3 + $0x5a8] ss:$16 sps:$4 sm:$0xff]   ;;  %v16822_v38 = vld [vmem:[%s22051_s3 + $0x5c4] ss:$16 sps:$4 sm:$0xff]  }
 0x639   : > { %10451 = vmatmul.mubr.bf16.vlgmr.msra.gmra.mrb[24].mxu0 %v10094_v19  ;;  %10492 = vmatmul.mubr.bf16.vlgmr.msra.gmra.mrb[24].mxu1 %v10094_v19  ;;  %v10980_v19 = vpack.c.bf16 %v10978_v18, %v10976_v6  ;;  %v16897_v6 = vld [vmem:[%s22051_s3 + $0x74c] ss:$16 sps:$4 sm:$0xff]   ;;  %v16892_v18 = vld [vmem:[%s22051_s3 + $0x740] ss:$16 sps:$4 sm:$0xff]  }
 0x63a   : > { %10890 = vmatpush1.bf16.msra.mxu0 %v16736_v43  ;;  %10921 = vmatprep.mubr.bf16.mxu0 %v10503_v32  ;;  %v16825_v43 = vld [vmem:[%s22051_s3 + $0x5cc] ss:$16 sps:$4 sm:$0xff]  }
 0x63b   : > { %10931 = vmatpush1.bf16.msra.mxu1 %v16739_v59  ;;  %10962 = vmatprep.mubr.bf16.mxu1 %v10503_v32  ;;  %v16820_v59 = vld [vmem:[%s22051_s3 + $0x5c0] ss:$16 sps:$4 sm:$0xff]   ;;  %v16823_v32 = vld [vmem:[%s22051_s3 + $0x5c8] ss:$16 sps:$4 sm:$0xff]  }
 0x63c   : > { %10891 = vmatprep.subr.bf16.mxu0 %v16744_v8  ;;  %10932 = vmatprep.subr.bf16.mxu1 %v16747_v45  ;;  %v16828_v8 = vld [vmem:[%s22051_s3 + $0x5e4] ss:$16 sps:$4 sm:$0xff]   ;;  %v16831_v45 = vld [vmem:[%s22051_s3 + $0x5ec] ss:$16 sps:$4 sm:$0xff]  }
 0x63e   : > { %10892 = vmatpush1.bf16.msra.mxu0 %v16742_v48  ;;  %v11056_v48 = vshll.u32 %v10980_v19, 16 }
 0x63f   : > { %10933 = vmatpush1.bf16.msra.mxu1 %v16745_v17  ;;  %10893 = vmatprep.subr.bf16.mxu0 %v16750_v27  ;;  %v16826_v17 = vld [vmem:[%s22051_s3 + $0x5e0] ss:$16 sps:$4 sm:$0xff]   ;;  %v16829_v27 = vld [vmem:[%s22051_s3 + $0x5e8] ss:$16 sps:$4 sm:$0xff]  }
 0x640   : > { %10934 = vmatprep.subr.bf16.mxu1 %v16753_v4  ;;  %v16834_v4 = vld [vmem:[%s22051_s3 + $0x604] ss:$16 sps:$4 sm:$0xff]  }
 0x642   : > { %10894 = vmatpush1.bf16.msra.mxu0 %v16748_v21  ;;  %v10500_v21 = vld [vmem:[#allocation4 + $0x10] sm:$0xff] }
 0x643   : > { %10935 = vmatpush1.bf16.msra.mxu1 %v16751_v41  ;;  %10895 = vmatprep.subr.bf16.mxu0 %v16756_v5  ;;  %v16837_v41 = vld [vmem:[%s22051_s3 + $0x60c] ss:$16 sps:$4 sm:$0xff]   ;;  %v11058_v5 = vrot.slane %v11056_v48, 1  ;;  %v16907_v48 = vld [vmem:[%s22051_s3 + $0x788] ss:$16 sps:$4 sm:$0xff]  }
 0x644   : > { %10936 = vmatprep.subr.bf16.mxu1 %v16759_v57  ;;  %v16832_v57 = vld [vmem:[%s22051_s3 + $0x600] ss:$16 sps:$4 sm:$0xff]  }
 0x646   : > { %10896 = vmatpush1.bf16.msra.mxu0 %v16754_v60  ;;  %v10502_v60 = vpack.c.bf16 %v10500_v21, %v10500_v21  ;;  %v10977_v21 = vld [vmem:[#allocation4 + $0x20] sm:$0x1] }
 0x647   : > { %10937 = vmatpush1.bf16.msra.mxu1 %v16757_v7  ;;  %10897 = vmatprep.subr.bf16.mxu0 %v16762_v44  ;;  %v16835_v7 = vld [vmem:[%s22051_s3 + $0x608] ss:$16 sps:$4 sm:$0xff]   ;;  %v11054_v44 = vshrl.u32 %v10980_v19, 16  ;;  %v16898_v19 = vld [vmem:[%s22051_s3 + $0x760] ss:$16 sps:$4 sm:$0xff]  }
 0x648   : > { %10938 = vmatprep.subr.bf16.mxu1 %v16765_v39  ;;  %v16840_v39 = vld [vmem:[%s22051_s3 + $0x624] ss:$16 sps:$4 sm:$0xff]  }
 0x64a   : > { %10898 = vmatpush1.bf16.msra.mxu0 %v16760_v2  ;;  %v11059_v2 = vor.u32 %v11058_v5, %v11054_v44  ;;  %v16913_v5 = vld [vmem:[%s22051_s3 + $0x7a8] ss:$16 sps:$4 sm:$0xff]   ;;  %v16916_v44 = vld [vmem:[%s22051_s3 + $0x7c0] ss:$16 sps:$4 sm:$0xff]  }
 0x64b   : > { %10939 = vmatpush1.bf16.msra.mxu1 %v16763_v24  ;;  %10899 = vmatprep.subr.bf16.mxu0 %v16768_v37  ;;  %v16843_v24 = vld [vmem:[%s22051_s3 + $0x62c] ss:$16 sps:$4 sm:$0xff]   ;;  %v16838_v37 = vld [vmem:[%s22051_s3 + $0x620] ss:$16 sps:$4 sm:$0xff]  }
 0x64c   : > { %10940 = vmatprep.subr.bf16.mxu1 %v16771_v29  ;;  %v16841_v29 = vld [vmem:[%s22051_s3 + $0x628] ss:$16 sps:$4 sm:$0xff]  }
 0x64e   : > { %10900 = vmatpush1.bf16.msra.mxu0 %v16766_v49  ;;  %v16846_v49 = vld [vmem:[%s22051_s3 + $0x644] ss:$16 sps:$4 sm:$0xff]  }
 0x64f   : > { %10941 = vmatpush1.bf16.msra.mxu1 %v16769_v25  ;;  %10901 = vmatprep.subr.bf16.mxu0 %v16774_v51  ;;  %v16849_v25 = vld [vmem:[%s22051_s3 + $0x64c] ss:$16 sps:$4 sm:$0xff]   ;;  %v16844_v51 = vld [vmem:[%s22051_s3 + $0x640] ss:$16 sps:$4 sm:$0xff]  }
 0x650   : > { %10942 = vmatprep.subr.bf16.mxu1 %v16777_v23  ;;  %v16847_v23 = vld [vmem:[%s22051_s3 + $0x648] ss:$16 sps:$4 sm:$0xff]  }
 0x652   : > { %10902 = vmatpush1.bf16.msra.mxu0 %v16772_v56  ;;  %v16852_v56 = vld [vmem:[%s22051_s3 + $0x664] ss:$16 sps:$4 sm:$0xff]  }
 0x653   : > { %10943 = vmatpush1.bf16.msra.mxu1 %v16775_v31  ;;  %10903 = vmatprep.subr.bf16.mxu0 %v16780_v62  ;;  %v16855_v31 = vld [vmem:[%s22051_s3 + $0x66c] ss:$16 sps:$4 sm:$0xff]   ;;  %v16850_v62 = vld [vmem:[%s22051_s3 + $0x660] ss:$16 sps:$4 sm:$0xff]  }
 0x654   : > { %10944 = vmatprep.subr.bf16.mxu1 %v16783_v34  ;;  %v16853_v34 = vld [vmem:[%s22051_s3 + $0x668] ss:$16 sps:$4 sm:$0xff]  }
 0x656   : > { %10904 = vmatpush1.bf16.msra.mxu0 %v16778_v54  ;;  %v16858_v54 = vld [vmem:[%s22051_s3 + $0x684] ss:$16 sps:$4 sm:$0xff]  }
 0x657   : > { %10945 = vmatpush1.bf16.msra.mxu1 %v16781_v28  ;;  %10905 = vmatprep.subr.bf16.mxu0 %v16786_v61  ;;  %v16861_v28 = vld [vmem:[%s22051_s3 + $0x68c] ss:$16 sps:$4 sm:$0xff]   ;;  %v16856_v61 = vld [vmem:[%s22051_s3 + $0x680] ss:$16 sps:$4 sm:$0xff]  }
 0x658   : > { %10946 = vmatprep.subr.bf16.mxu1 %v16789_v55  ;;  %v16859_v55 = vld [vmem:[%s22051_s3 + $0x688] ss:$16 sps:$4 sm:$0xff]  }
 0x65a   : > { %10906 = vmatpush1.bf16.msra.mxu0 %v16784_v9  ;;  %v16864_v9 = vld [vmem:[%s22051_s3 + $0x6a4] ss:$16 sps:$4 sm:$0xff]  }
 0x65b   : > { %10947 = vmatpush1.bf16.msra.mxu1 %v16787_v0  ;;  %10907 = vmatprep.subr.bf16.mxu0 %v16792_v36  ;;  %v16867_v0 = vld [vmem:[%s22051_s3 + $0x6ac] ss:$16 sps:$4 sm:$0xff]   ;;  %v16862_v36 = vld [vmem:[%s22051_s3 + $0x6a0] ss:$16 sps:$4 sm:$0xff]  }
 0x65c   : > { %10948 = vmatprep.subr.bf16.mxu1 %v16795_v50  ;;  %v16865_v50 = vld [vmem:[%s22051_s3 + $0x6a8] ss:$16 sps:$4 sm:$0xff]  }
 0x65e   : > { %10908 = vmatpush1.bf16.msra.mxu0 %v16790_v35  ;;  %v16870_v35 = vld [vmem:[%s22051_s3 + $0x6c4] ss:$16 sps:$4 sm:$0xff]  }
 0x65f   : > { %10949 = vmatpush1.bf16.msra.mxu1 %v16793_v42  ;;  %10909 = vmatprep.subr.bf16.mxu0 %v16798_v16  ;;  %v16873_v42 = vld [vmem:[%s22051_s3 + $0x6cc] ss:$16 sps:$4 sm:$0xff]   ;;  %v16868_v16 = vld [vmem:[%s22051_s3 + $0x6c0] ss:$16 sps:$4 sm:$0xff]  }
 0x660   : > { %10950 = vmatprep.subr.bf16.mxu1 %v16801_v30  ;;  %v16871_v30 = vld [vmem:[%s22051_s3 + $0x6c8] ss:$16 sps:$4 sm:$0xff]  }
 0x662   : > { %10910 = vmatpush1.bf16.msra.mxu0 %v16796_v11  ;;  %v16876_v11 = vld [vmem:[%s22051_s3 + $0x6e4] ss:$16 sps:$4 sm:$0xff]  }
 0x663   : > { %10951 = vmatpush1.bf16.msra.mxu1 %v16799_v12  ;;  %10911 = vmatprep.subr.bf16.mxu0 %v16804_v1  ;;  %v16879_v12 = vld [vmem:[%s22051_s3 + $0x6ec] ss:$16 sps:$4 sm:$0xff]   ;;  %v16874_v1 = vld [vmem:[%s22051_s3 + $0x6e0] ss:$16 sps:$4 sm:$0xff]  }
 0x664   : > { %10952 = vmatprep.subr.bf16.mxu1 %v16807_v53  ;;  %v16877_v53 = vld [vmem:[%s22051_s3 + $0x6e8] ss:$16 sps:$4 sm:$0xff]  }
 0x666   : > { %10912 = vmatpush1.bf16.msra.mxu0 %v16802_v46  ;;  %v16882_v46 = vld [vmem:[%s22051_s3 + $0x704] ss:$16 sps:$4 sm:$0xff]  }
 0x667   : > { %10953 = vmatpush1.bf16.msra.mxu1 %v16805_v58  ;;  %10913 = vmatprep.subr.bf16.mxu0 %v16810_v3  ;;  %v16885_v58 = vld [vmem:[%s22051_s3 + $0x70c] ss:$16 sps:$4 sm:$0xff]   ;;  %v16880_v3 = vld [vmem:[%s22051_s3 + $0x700] ss:$16 sps:$4 sm:$0xff]  }
 0x668   : > { %10954 = vmatprep.subr.bf16.mxu1 %v16813_v33  ;;  %v16883_v33 = vld [vmem:[%s22051_s3 + $0x708] ss:$16 sps:$4 sm:$0xff]  }
 0x66a   : > { %10914 = vmatpush1.bf16.msra.mxu0 %v16808_v15  ;;  %v16888_v15 = vld [vmem:[%s22051_s3 + $0x724] ss:$16 sps:$4 sm:$0xff]  }
 0x66b   : > { %10955 = vmatpush1.bf16.msra.mxu1 %v16811_v13  ;;  %10915 = vmatprep.subr.bf16.mxu0 %v16816_v14  ;;  %v16891_v13 = vld [vmem:[%s22051_s3 + $0x72c] ss:$16 sps:$4 sm:$0xff]   ;;  %v16886_v14 = vld [vmem:[%s22051_s3 + $0x720] ss:$16 sps:$4 sm:$0xff]  }
 0x66c   : > { %10956 = vmatprep.subr.bf16.mxu1 %v16819_v22  ;;  %v16889_v22 = vld [vmem:[%s22051_s3 + $0x728] ss:$16 sps:$4 sm:$0xff]  }
 0x66e   : > { %10916 = vmatpush1.bf16.msra.mxu0 %v16814_v47  ;;  %v16894_v47 = vld [vmem:[%s22051_s3 + $0x744] ss:$16 sps:$4 sm:$0xff]  }
 0x66f   : > { %10957 = vmatpush1.bf16.msra.mxu1 %v16817_v52  ;;  %10917 = vmatprep.subr.bf16.mxu0 %v16822_v38  ;;  %v16895_v52 = vld [vmem:[%s22051_s3 + $0x748] ss:$16 sps:$4 sm:$0xff]   ;;  %v16900_v38 = vld [vmem:[%s22051_s3 + $0x764] ss:$16 sps:$4 sm:$0xff]  }
 0x670   : > { %10958 = vmatprep.subr.bf16.mxu1 %v16825_v43  ;;  %v16903_v43 = vld [vmem:[%s22051_s3 + $0x76c] ss:$16 sps:$4 sm:$0xff]  }
 0x672   : > { %10918 = vmatpush1.bf16.msra.mxu0 %v16820_v59  ;;  %v16901_v59 = vld [vmem:[%s22051_s3 + $0x768] ss:$16 sps:$4 sm:$0xff]  }
 0x673   : > { %10959 = vmatpush1.bf16.msra.mxu1 %v16823_v32  ;;  %10919 = vmatprep.subr.bf16.mxu0 %v16828_v8  ;;  %v16906_v32 = vld [vmem:[%s22051_s3 + $0x784] ss:$16 sps:$4 sm:$0xff]   ;;  %v16909_v8 = vld [vmem:[%s22051_s3 + $0x78c] ss:$16 sps:$4 sm:$0xff]  }
 0x674   : > { %10960 = vmatprep.subr.bf16.mxu1 %v16831_v45  ;;  %v16904_v45 = vld [vmem:[%s22051_s3 + $0x780] ss:$16 sps:$4 sm:$0xff]  }
 0x676   : > { %10920 = vmatpush1.bf16.msra.mxu0 %v16826_v17  ;;  %v16912_v17 = vld [vmem:[%s22051_s3 + $0x7a4] ss:$16 sps:$4 sm:$0xff]  }
 0x677   : > { %10961 = vmatpush1.bf16.msra.mxu1 %v16829_v27  ;;  %11382 = vmatprep.subr.bf16.mxu0 %v16834_v4  ;;  %v16915_v27 = vld [vmem:[%s22051_s3 + $0x7ac] ss:$16 sps:$4 sm:$0xff]   ;;  %v10975_v4 = vld [vmem:[#allocation4 + $0x10] sm:$0xfe] }
 0x678   : > { %11423 = vmatprep.subr.bf16.mxu1 %v16837_v41  ;;  %v16910_v41 = vld [vmem:[%s22051_s3 + $0x7a0] ss:$16 sps:$4 sm:$0xff]  }
 0x679   : > { %10922 = vmatmul.mubr.bf16.vlgmr.msra.gmra.mrb[28].mxu0 %v10502_v60 }
 0x67a   : > { %10963 = vmatmul.mubr.bf16.vlgmr.msra.gmra.mrb[28].mxu1 %v10502_v60  ;;  %11383 = vmatpush1.bf16.msra.mxu0 %v16832_v57  ;;  %v16918_v57 = vld [vmem:[%s22051_s3 + $0x7c4] ss:$16 sps:$4 sm:$0xff]   ;;  %v10979_v60 = vpack.c.bf16 %v10977_v21, %v10975_v4  ;;  %v16970_v4 = vld [vmem:[%s22051_s3 + $0x8e0] ss:$16 sps:$4 sm:$0xff]   ;;  %v16973_v21 = vld [vmem:[%s22051_s3 + $0x8e8] ss:$16 sps:$4 sm:$0xff]  }
 0x67b   : > { %11414 = vmatprep.mubr.bf16.mxu0 %v11059_v2  ;;  %11424 = vmatpush1.bf16.msra.mxu1 %v16835_v7  ;;  %v16921_v7 = vld [vmem:[%s22051_s3 + $0x7cc] ss:$16 sps:$4 sm:$0xff]  }
 0x67c   : > { %11455 = vmatprep.mubr.bf16.mxu1 %v11059_v2  ;;  %11384 = vmatprep.subr.bf16.mxu0 %v16840_v39  ;;  %v16919_v39 = vld [vmem:[%s22051_s3 + $0x7c8] ss:$16 sps:$4 sm:$0xff]   ;;  %v16924_v2 = vld [vmem:[%s22051_s3 + $0x7e4] ss:$16 sps:$4 sm:$0xff]  }
 0x67d   : > { %11425 = vmatprep.subr.bf16.mxu1 %v16843_v24  ;;  %v11049_v24 = vshll.u32 %v10979_v60, 16 }
 0x67e   : > { %11385 = vmatpush1.bf16.msra.mxu0 %v16838_v37  ;;  %v16927_v37 = vld [vmem:[%s22051_s3 + $0x7ec] ss:$16 sps:$4 sm:$0xff]  }
 0x67f   : > { %11426 = vmatpush1.bf16.msra.mxu1 %v16841_v29  ;;  %11386 = vmatprep.subr.bf16.mxu0 %v16846_v49  ;;  %v16922_v29 = vld [vmem:[%s22051_s3 + $0x7e0] ss:$16 sps:$4 sm:$0xff]   ;;  %v11469_v49 = vld [vmem:[#allocation4 + $0x18] sm:$0xfc] }
 0x680   : > { %11427 = vmatprep.subr.bf16.mxu1 %v16849_v25  ;;  %v11471_v25 = vld [vmem:[#allocation4 + $0x28] sm:$0x3] }
 0x682   : > { %11387 = vmatpush1.bf16.msra.mxu0 %v16844_v51  ;;  %v16925_v51 = vld [vmem:[%s22051_s3 + $0x7e8] ss:$16 sps:$4 sm:$0xff]  }
 0x683   : > { %11428 = vmatpush1.bf16.msra.mxu1 %v16847_v23  ;;  %11388 = vmatprep.subr.bf16.mxu0 %v16852_v56  ;;  %v11051_v23 = vrot.slane %v11049_v24, 1  ;;  %v16930_v56 = vld [vmem:[%s22051_s3 + $0x804] ss:$16 sps:$4 sm:$0xff]  }
 0x684   : > { %11429 = vmatprep.subr.bf16.mxu1 %v16855_v31  ;;  %v16933_v31 = vld [vmem:[%s22051_s3 + $0x80c] ss:$16 sps:$4 sm:$0xff]   ;;  %v16990_v24 = vld [vmem:[%s22051_s3 + $0x944] ss:$16 sps:$4 sm:$0xff]  }
 0x686   : > { %11389 = vmatpush1.bf16.msra.mxu0 %v16850_v62  ;;  %v11047_v62 = vshrl.u32 %v10979_v60, 16  ;;  %v16979_v60 = vld [vmem:[%s22051_s3 + $0x908] ss:$16 sps:$4 sm:$0xff]  }
 0x687   : > { %11430 = vmatpush1.bf16.msra.mxu1 %v16853_v34  ;;  %11390 = vmatprep.subr.bf16.mxu0 %v16858_v54  ;;  %v11473_v34 = vpack.c.bf16 %v11471_v25, %v11469_v49  ;;  %v16928_v54 = vld [vmem:[%s22051_s3 + $0x800] ss:$16 sps:$4 sm:$0xff]   ;;  %v16991_v49 = vld [vmem:[%s22051_s3 + $0x948] ss:$16 sps:$4 sm:$0xff]   ;;  %v16996_v25 = vld [vmem:[%s22051_s3 + $0x964] ss:$16 sps:$4 sm:$0xff]  }
 0x688   : > { %11431 = vmatprep.subr.bf16.mxu1 %v16861_v28  ;;  %v11052_v28 = vor.u32 %v11051_v23, %v11047_v62  ;;  %v16994_v23 = vld [vmem:[%s22051_s3 + $0x960] ss:$16 sps:$4 sm:$0xff]   ;;  %v17005_v62 = vld [vmem:[%s22051_s3 + $0x98c] ss:$16 sps:$4 sm:$0xff]  }
 0x68a   : > { %11391 = vmatpush1.bf16.msra.mxu0 %v16856_v61  ;;  %v16931_v61 = vld [vmem:[%s22051_s3 + $0x808] ss:$16 sps:$4 sm:$0xff]  }
 0x68b   : > { %11432 = vmatpush1.bf16.msra.mxu1 %v16859_v55  ;;  %11392 = vmatprep.subr.bf16.mxu0 %v16864_v9  ;;  %v16936_v55 = vld [vmem:[%s22051_s3 + $0x824] ss:$16 sps:$4 sm:$0xff]   ;;  %v11542_v9 = vrot.slane %v11473_v34, 1  ;;  %v17000_v34 = vld [vmem:[%s22051_s3 + $0x980] ss:$16 sps:$4 sm:$0xff]  }
 0x68c   : > { %11433 = vmatprep.subr.bf16.mxu1 %v16867_v0  ;;  %v16939_v0 = vld [vmem:[%s22051_s3 + $0x82c] ss:$16 sps:$4 sm:$0xff]  }
 0x68e   : > { %11393 = vmatpush1.bf16.msra.mxu0 %v16862_v36  ;;  %v16934_v36 = vld [vmem:[%s22051_s3 + $0x820] ss:$16 sps:$4 sm:$0xff]  }
 0x68f   : > { %11434 = vmatpush1.bf16.msra.mxu1 %v16865_v50  ;;  %11394 = vmatprep.subr.bf16.mxu0 %v16870_v35  ;;  %v16937_v50 = vld [vmem:[%s22051_s3 + $0x828] ss:$16 sps:$4 sm:$0xff]   ;;  %v16942_v35 = vld [vmem:[%s22051_s3 + $0x844] ss:$16 sps:$4 sm:$0xff]  }
 0x690   : > { %11435 = vmatprep.subr.bf16.mxu1 %v16873_v42  ;;  %v16945_v42 = vld [vmem:[%s22051_s3 + $0x84c] ss:$16 sps:$4 sm:$0xff]  }
 0x692   : > { %11395 = vmatpush1.bf16.msra.mxu0 %v16868_v16  ;;  %v16940_v16 = vld [vmem:[%s22051_s3 + $0x840] ss:$16 sps:$4 sm:$0xff]  }
 0x693   : > { %11436 = vmatpush1.bf16.msra.mxu1 %v16871_v30  ;;  %11396 = vmatprep.subr.bf16.mxu0 %v16876_v11  ;;  %v16943_v30 = vld [vmem:[%s22051_s3 + $0x848] ss:$16 sps:$4 sm:$0xff]   ;;  %v16948_v11 = vld [vmem:[%s22051_s3 + $0x864] ss:$16 sps:$4 sm:$0xff]  }
 0x694   : > { %11437 = vmatprep.subr.bf16.mxu1 %v16879_v12  ;;  %v16951_v12 = vld [vmem:[%s22051_s3 + $0x86c] ss:$16 sps:$4 sm:$0xff]  }
 0x696   : > { %11397 = vmatpush1.bf16.msra.mxu0 %v16874_v1  ;;  %v16946_v1 = vld [vmem:[%s22051_s3 + $0x860] ss:$16 sps:$4 sm:$0xff]  }
 0x697   : > { %11438 = vmatpush1.bf16.msra.mxu1 %v16877_v53  ;;  %11398 = vmatprep.subr.bf16.mxu0 %v16882_v46  ;;  %v16949_v53 = vld [vmem:[%s22051_s3 + $0x868] ss:$16 sps:$4 sm:$0xff]   ;;  %v16954_v46 = vld [vmem:[%s22051_s3 + $0x884] ss:$16 sps:$4 sm:$0xff]  }
 0x698   : > { %11439 = vmatprep.subr.bf16.mxu1 %v16885_v58  ;;  %v16957_v58 = vld [vmem:[%s22051_s3 + $0x88c] ss:$16 sps:$4 sm:$0xff]  }
 0x69a   : > { %11399 = vmatpush1.bf16.msra.mxu0 %v16880_v3  ;;  %v16952_v3 = vld [vmem:[%s22051_s3 + $0x880] ss:$16 sps:$4 sm:$0xff]  }
 0x69b   : > { %11440 = vmatpush1.bf16.msra.mxu1 %v16883_v33  ;;  %11400 = vmatprep.subr.bf16.mxu0 %v16888_v15  ;;  %v16955_v33 = vld [vmem:[%s22051_s3 + $0x888] ss:$16 sps:$4 sm:$0xff]   ;;  %v16960_v15 = vld [vmem:[%s22051_s3 + $0x8a4] ss:$16 sps:$4 sm:$0xff]  }
 0x69c   : > { %11441 = vmatprep.subr.bf16.mxu1 %v16891_v13  ;;  %v16963_v13 = vld [vmem:[%s22051_s3 + $0x8ac] ss:$16 sps:$4 sm:$0xff]  }
 0x69e   : > { %11401 = vmatpush1.bf16.msra.mxu0 %v16886_v14  ;;  %v16958_v14 = vld [vmem:[%s22051_s3 + $0x8a0] ss:$16 sps:$4 sm:$0xff]  }
 0x69f   : > { %11442 = vmatpush1.bf16.msra.mxu1 %v16889_v22  ;;  %11402 = vmatprep.subr.bf16.mxu0 %v16894_v47  ;;  %v16961_v22 = vld [vmem:[%s22051_s3 + $0x8a8] ss:$16 sps:$4 sm:$0xff]   ;;  %v16966_v47 = vld [vmem:[%s22051_s3 + $0x8c4] ss:$16 sps:$4 sm:$0xff]  }
 0x6a0   : > { %11443 = vmatprep.subr.bf16.mxu1 %v16897_v6 }
 0x6a2   : > { %11403 = vmatpush1.bf16.msra.mxu0 %v16892_v18 }
 0x6a3   : > { %11444 = vmatpush1.bf16.msra.mxu1 %v16895_v52  ;;  %11404 = vmatprep.subr.bf16.mxu0 %v16900_v38  ;;  %v16969_v52 = vld [vmem:[%s22051_s3 + $0x8cc] ss:$16 sps:$4 sm:$0xff]  }
 0x6a4   : > { %11445 = vmatprep.subr.bf16.mxu1 %v16903_v43 }
 0x6a6   : > { %11405 = vmatpush1.bf16.msra.mxu0 %v16898_v19 }
 0x6a7   : > { %11446 = vmatpush1.bf16.msra.mxu1 %v16901_v59  ;;  %11406 = vmatprep.subr.bf16.mxu0 %v16906_v32  ;;  %v16964_v32 = vld [vmem:[%s22051_s3 + $0x8c0] ss:$16 sps:$4 sm:$0xff]  }
 0x6a8   : > { %11447 = vmatprep.subr.bf16.mxu1 %v16909_v8 }
 0x6aa   : > { %11407 = vmatpush1.bf16.msra.mxu0 %v16904_v45 }
 0x6ab   : > { %11448 = vmatpush1.bf16.msra.mxu1 %v16907_v48  ;;  %11408 = vmatprep.subr.bf16.mxu0 %v16912_v17  ;;  %v16967_v48 = vld [vmem:[%s22051_s3 + $0x8c8] ss:$16 sps:$4 sm:$0xff]   ;;  %v16972_v17 = vld [vmem:[%s22051_s3 + $0x8e4] ss:$16 sps:$4 sm:$0xff]  }
 0x6ac   : > { %11449 = vmatprep.subr.bf16.mxu1 %v16915_v27  ;;  %v16975_v27 = vld [vmem:[%s22051_s3 + $0x8ec] ss:$16 sps:$4 sm:$0xff]  }
 0x6ae   : > { %11409 = vmatpush1.bf16.msra.mxu0 %v16910_v41  ;;  %v16978_v41 = vld [vmem:[%s22051_s3 + $0x904] ss:$16 sps:$4 sm:$0xff]  }
 0x6af   : > { %11450 = vmatpush1.bf16.msra.mxu1 %v16913_v5  ;;  %11410 = vmatprep.subr.bf16.mxu0 %v16918_v57  ;;  %v16981_v5 = vld [vmem:[%s22051_s3 + $0x90c] ss:$16 sps:$4 sm:$0xff]   ;;  %v16976_v57 = vld [vmem:[%s22051_s3 + $0x900] ss:$16 sps:$4 sm:$0xff]  }
 0x6b0   : > { %11451 = vmatprep.subr.bf16.mxu1 %v16921_v7  ;;  %v16984_v7 = vld [vmem:[%s22051_s3 + $0x924] ss:$16 sps:$4 sm:$0xff]  }
 0x6b2   : > { %11411 = vmatpush1.bf16.msra.mxu0 %v16916_v44  ;;  %v16987_v44 = vld [vmem:[%s22051_s3 + $0x92c] ss:$16 sps:$4 sm:$0xff]  }
 0x6b3   : > { %11452 = vmatpush1.bf16.msra.mxu1 %v16919_v39  ;;  %11412 = vmatprep.subr.bf16.mxu0 %v16924_v2  ;;  %v16982_v39 = vld [vmem:[%s22051_s3 + $0x920] ss:$16 sps:$4 sm:$0xff]   ;;  %v16985_v2 = vld [vmem:[%s22051_s3 + $0x928] ss:$16 sps:$4 sm:$0xff]  }
 0x6b4   : > { %11453 = vmatprep.subr.bf16.mxu1 %v16927_v37  ;;  %v16993_v37 = vld [vmem:[%s22051_s3 + $0x94c] ss:$16 sps:$4 sm:$0xff]  }
 0x6b6   : > { %11413 = vmatpush1.bf16.msra.mxu0 %v16922_v29  ;;  %v16988_v29 = vld [vmem:[%s22051_s3 + $0x940] ss:$16 sps:$4 sm:$0xff]  }
 0x6b7   : > { %11454 = vmatpush1.bf16.msra.mxu1 %v16925_v51  ;;  %11865 = vmatprep.subr.bf16.mxu0 %v16930_v56  ;;  %v16999_v51 = vld [vmem:[%s22051_s3 + $0x96c] ss:$16 sps:$4 sm:$0xff]   ;;  %v16997_v56 = vld [vmem:[%s22051_s3 + $0x968] ss:$16 sps:$4 sm:$0xff]  }
 0x6b8   : > { %11906 = vmatprep.subr.bf16.mxu1 %v16933_v31  ;;  %v17002_v31 = vld [vmem:[%s22051_s3 + $0x984] ss:$16 sps:$4 sm:$0xff]  }
 0x6b9   : > { %11415 = vmatmul.mubr.bf16.vlgmr.msra.gmra.mrb[32].mxu0 %v11052_v28 }
 0x6ba   : > { %11456 = vmatmul.mubr.bf16.vlgmr.msra.gmra.mrb[32].mxu1 %v11052_v28  ;;  %11866 = vmatpush1.bf16.msra.mxu0 %v16928_v54  ;;  %v17003_v54 = vld [vmem:[%s22051_s3 + $0x988] ss:$16 sps:$4 sm:$0xff]   ;;  %v17008_v28 = vld [vmem:[%s22051_s3 + $0x9a4] ss:$16 sps:$4 sm:$0xff]  }
 0x6bb   : > { %11897 = vmatprep.mubr.bf16.mxu0 %v11542_v9  ;;  %11907 = vmatpush1.bf16.msra.mxu1 %v16931_v61  ;;  %v17011_v61 = vld [vmem:[%s22051_s3 + $0x9ac] ss:$16 sps:$4 sm:$0xff]  }
 0x6bc   : > { %11938 = vmatprep.mubr.bf16.mxu1 %v11542_v9  ;;  %11867 = vmatprep.subr.bf16.mxu0 %v16936_v55  ;;  %v17006_v55 = vld [vmem:[%s22051_s3 + $0x9a0] ss:$16 sps:$4 sm:$0xff]   ;;  %v17009_v9 = vld [vmem:[%s22051_s3 + $0x9a8] ss:$16 sps:$4 sm:$0xff]  }
 0x6bd   : > { %11908 = vmatprep.subr.bf16.mxu1 %v16939_v0  ;;  %v17014_v0 = vld [vmem:[%s22051_s3 + $0x9c4] ss:$16 sps:$4 sm:$0xff]  }
 0x6be   : > { %11868 = vmatpush1.bf16.msra.mxu0 %v16934_v36  ;;  %v17017_v36 = vld [vmem:[%s22051_s3 + $0x9cc] ss:$16 sps:$4 sm:$0xff]  }
 0x6bf   : > { %11909 = vmatpush1.bf16.msra.mxu1 %v16937_v50  ;;  %11869 = vmatprep.subr.bf16.mxu0 %v16942_v35  ;;  %v17012_v50 = vld [vmem:[%s22051_s3 + $0x9c0] ss:$16 sps:$4 sm:$0xff]   ;;  %v17015_v35 = vld [vmem:[%s22051_s3 + $0x9c8] ss:$16 sps:$4 sm:$0xff]  }
 0x6c0   : > { %11910 = vmatprep.subr.bf16.mxu1 %v16945_v42  ;;  %v17020_v42 = vld [vmem:[%s22051_s3 + $0x9e4] ss:$16 sps:$4 sm:$0xff]  }
 0x6c2   : > { %11870 = vmatpush1.bf16.msra.mxu0 %v16940_v16  ;;  %v17023_v16 = vld [vmem:[%s22051_s3 + $0x9ec] ss:$16 sps:$4 sm:$0xff]  }
 0x6c3   : > { %11911 = vmatpush1.bf16.msra.mxu1 %v16943_v30  ;;  %11871 = vmatprep.subr.bf16.mxu0 %v16948_v11  ;;  %v11468_v30 = vld [vmem:[#allocation4 + $0x10] sm:$0xfc]  ;;  %v11470_v11 = vld [vmem:[#allocation4 + $0x20] sm:$0x3] }
 0x6c4   : > { %11912 = vmatprep.subr.bf16.mxu1 %v16951_v12  ;;  %v17018_v12 = vld [vmem:[%s22051_s3 + $0x9e0] ss:$16 sps:$4 sm:$0xff]  }
 0x6c6   : > { %11872 = vmatpush1.bf16.msra.mxu0 %v16946_v1  ;;  %v17021_v1 = vld [vmem:[%s22051_s3 + $0x9e8] ss:$16 sps:$4 sm:$0xff]  }
 0x6c7   : > { %11913 = vmatpush1.bf16.msra.mxu1 %v16949_v53  ;;  %11873 = vmatprep.subr.bf16.mxu0 %v16954_v46  ;;  %v11472_v53 = vpack.c.bf16 %v11470_v11, %v11468_v30  ;;  %v17054_v30 = vld [vmem:[%s22052_s4 + $0xf8] sm:$0xff]  }
 0x6c8   : > { %11914 = vmatprep.subr.bf16.mxu1 %v16957_v58  ;;  %v17053_v11 = vld [vmem:[%s22052_s4 + $0x38] sm:$0xff]  }
 0x6c9   : > { %v11541_v46 = vrot.slane %v11472_v53, 1  ;;  %v17058_v53 = vld [vmem:[%s22052_s4 + $0x1c0] sm:$0xff]  }
 0x6ca   : > { %11874 = vmatpush1.bf16.msra.mxu0 %v16952_v3 }
 0x6cb   : > { %11915 = vmatpush1.bf16.msra.mxu1 %v16955_v33  ;;  %11875 = vmatprep.subr.bf16.mxu0 %v16960_v15 }
 0x6cc   : > { %v21631_v6 = vpop.f32.mrb[20].mxu0  ;;  %v21633_v18 = vpop.f32.mrb[20].mxu1  ;;  %11916 = vmatprep.subr.bf16.mxu1 %v16963_v13 }
 0x6cd   : > { %v21638_v38 = vpop.f32.mrb[21].mxu0  ;;  %v21640_v43 = vpop.f32.mrb[21].mxu1 }
 0x6ce   : > { %11876 = vmatpush1.bf16.msra.mxu0 %v16958_v14  ;;  %v10048_v19 = vpop.f32.mrb[22].mxu0  ;;  %v10089_v59 = vpop.f32.mrb[22].mxu1 }
 0x6cf   : > { %11917 = vmatpush1.bf16.msra.mxu1 %v16961_v22  ;;  %v10049_v8 = vpop.f32.mrb[23].mxu0  ;;  %v10090_v45 = vpop.f32.mrb[23].mxu1  ;;  %11877 = vmatprep.subr.bf16.mxu0 %v16966_v47 }
 0x6d0   : > { %11918 = vmatprep.subr.bf16.mxu1 %v16969_v52 }
 0x6d2   : > { %11878 = vmatpush1.bf16.msra.mxu0 %v16964_v32 }
 0x6d3   : > { %11919 = vmatpush1.bf16.msra.mxu1 %v16967_v48  ;;  %11879 = vmatprep.subr.bf16.mxu0 %v16972_v17 }
 0x6d4   : > { %11920 = vmatprep.subr.bf16.mxu1 %v16975_v27 }
 0x6d6   : > { %11880 = vmatpush1.bf16.msra.mxu0 %v16970_v4 }
 0x6d7   : > { %11921 = vmatpush1.bf16.msra.mxu1 %v16973_v21  ;;  %11881 = vmatprep.subr.bf16.mxu0 %v16978_v41 }
 0x6d8   : > { %11922 = vmatprep.subr.bf16.mxu1 %v16981_v5  ;;  %v17024_v5 = vld [vmem:[%s22052_s4 + $0x40] sm:$0xff]  }
 0x6da   : > { %11882 = vmatpush1.bf16.msra.mxu0 %v16976_v57  ;;  %v17025_v57 = vld [vmem:[%s22052_s4] sm:$0xff]  }
 0x6db   : > { %11923 = vmatpush1.bf16.msra.mxu1 %v16979_v60  ;;  %11883 = vmatprep.subr.bf16.mxu0 %v16984_v7  ;;  %v17026_v60 = vld [vmem:[%s22052_s4 + $0xc0] sm:$0xff]  }
 0x6dc   : > { %11924 = vmatprep.subr.bf16.mxu1 %v16987_v44  ;;  %v17027_v7 = vld [vmem:[%s22052_s4 + $0x80] sm:$0xff]   ;;  %v17028_v44 = vld [vmem:[%s22052_s4 + $0x48] sm:$0xff]  }
 0x6de   : > { %11884 = vmatpush1.bf16.msra.mxu0 %v16982_v39  ;;  %v17029_v39 = vld [vmem:[%s22052_s4 + $0x8] sm:$0xff]  }
 0x6df   : > { %11925 = vmatpush1.bf16.msra.mxu1 %v16985_v2  ;;  %11885 = vmatprep.subr.bf16.mxu0 %v16990_v24  ;;  %v17030_v2 = vld [vmem:[%s22052_s4 + $0xc8] sm:$0xff]  }
 0x6e0   : > { %11926 = vmatprep.subr.bf16.mxu1 %v16993_v37  ;;  %v17031_v24 = vld [vmem:[%s22052_s4 + $0x88] sm:$0xff]   ;;  %v17032_v37 = vld [vmem:[%s22052_s4 + $0x50] sm:$0xff]  }
 0x6e2   : > { %11886 = vmatpush1.bf16.msra.mxu0 %v16988_v29  ;;  %v17033_v29 = vld [vmem:[%s22052_s4 + $0x10] sm:$0xff]  }
 0x6e3   : > { %11927 = vmatpush1.bf16.msra.mxu1 %v16991_v49  ;;  %11887 = vmatprep.subr.bf16.mxu0 %v16996_v25  ;;  %v17034_v49 = vld [vmem:[%s22052_s4 + $0xd0] sm:$0xff]  }
 0x6e4   : > { %11928 = vmatprep.subr.bf16.mxu1 %v16999_v51  ;;  %v17035_v25 = vld [vmem:[%s22052_s4 + $0x90] sm:$0xff]   ;;  %v17036_v51 = vld [vmem:[%s22052_s4 + $0x58] sm:$0xff]  }
 0x6e6   : > { %11888 = vmatpush1.bf16.msra.mxu0 %v16994_v23  ;;  %v17037_v23 = vld [vmem:[%s22052_s4 + $0x18] sm:$0xff]  }
 0x6e7   : > { %11929 = vmatpush1.bf16.msra.mxu1 %v16997_v56  ;;  %11889 = vmatprep.subr.bf16.mxu0 %v17002_v31  ;;  %v17038_v56 = vld [vmem:[%s22052_s4 + $0xd8] sm:$0xff]   ;;  %v17040_v31 = vld [vmem:[%s22052_s4 + $0x60] sm:$0xff]  }
 0x6e8   : > { %11930 = vmatprep.subr.bf16.mxu1 %v17005_v62  ;;  %v17039_v62 = vld [vmem:[%s22052_s4 + $0x98] sm:$0xff]  }
 0x6ea   : > { %11890 = vmatpush1.bf16.msra.mxu0 %v17000_v34  ;;  %v17042_v34 = vld [vmem:[%s22052_s4 + $0xe0] sm:$0xff]  }
 0x6eb   : > { %11931 = vmatpush1.bf16.msra.mxu1 %v17003_v54  ;;  %11891 = vmatprep.subr.bf16.mxu0 %v17008_v28  ;;  %v17041_v54 = vld [vmem:[%s22052_s4 + $0x20] sm:$0xff]   ;;  %v17044_v28 = vld [vmem:[%s22052_s4 + $0x68] sm:$0xff]  }
 0x6ec   : > { %11932 = vmatprep.subr.bf16.mxu1 %v17011_v61  ;;  %v17043_v61 = vld [vmem:[%s22052_s4 + $0xa0] sm:$0xff]  }
 0x6ee   : > { %11892 = vmatpush1.bf16.msra.mxu0 %v17006_v55  ;;  %v17046_v55 = vld [vmem:[%s22052_s4 + $0xe8] sm:$0xff]  }
 0x6ef   : > { %11933 = vmatpush1.bf16.msra.mxu1 %v17009_v9  ;;  %11893 = vmatprep.subr.bf16.mxu0 %v17014_v0  ;;  %v17045_v9 = vld [vmem:[%s22052_s4 + $0x28] sm:$0xff]   ;;  %v17048_v0 = vld [vmem:[%s22052_s4 + $0x70] sm:$0xff]  }
 0x6f0   : > { %11934 = vmatprep.subr.bf16.mxu1 %v17017_v36  ;;  %v17047_v36 = vld [vmem:[%s22052_s4 + $0xa8] sm:$0xff]  }
 0x6f2   : > { %11894 = vmatpush1.bf16.msra.mxu0 %v17012_v50  ;;  %v17050_v50 = vld [vmem:[%s22052_s4 + $0xf0] sm:$0xff]  }
 0x6f3   : > { %11935 = vmatpush1.bf16.msra.mxu1 %v17015_v35  ;;  %11895 = vmatprep.subr.bf16.mxu0 %v17020_v42  ;;  %v17049_v35 = vld [vmem:[%s22052_s4 + $0x30] sm:$0xff]   ;;  %v17052_v42 = vld [vmem:[%s22052_s4 + $0x78] sm:$0xff]  }
 0x6f4   : > { %11936 = vmatprep.subr.bf16.mxu1 %v17023_v16  ;;  %v17051_v16 = vld [vmem:[%s22052_s4 + $0xb0] sm:$0xff]  }
 0x6f6   : > { %11896 = vmatpush1.bf16.msra.mxu0 %v17018_v12  ;;  %v17056_v12 = vld [vmem:[%s22052_s4 + $0x140] sm:$0xff]  }
 0x6f7   : > { %11937 = vmatpush1.bf16.msra.mxu1 %v17021_v1  ;;  %15254 = vmatprep.subr.bf16.mxu0 %v17024_v5  ;;  %v17055_v1 = vld [vmem:[%s22052_s4 + $0xb8] sm:$0xff]  }
 0x6f8   : > { %15276 = vmatprep.subr.bf16.mxu1 %v17026_v60 }
 0x6f9   : > { %11898 = vmatmul.mubr.bf16.vlgmr.msra.gmra.mrb[36].mxu0 %v11541_v46 }
 0x6fa   : > { %11939 = vmatmul.mubr.bf16.vlgmr.msra.gmra.mrb[36].mxu1 %v11541_v46  ;;  %15255 = vmatpush3.bf16.msra.mxu0 %v17025_v57 }
 0x6fb   : > { %15277 = vmatpush3.bf16.msra.mxu1 %v17027_v7  ;;  %15256 = vmatprep.subr.bf16.mxu0 %v17028_v44 }
 0x6fc   : > { %15278 = vmatprep.subr.bf16.mxu1 %v17030_v2 }
 0x6fe   : > { %15257 = vmatpush3.bf16.msra.mxu0 %v17029_v39 }
 0x6ff   : > { %15279 = vmatpush3.bf16.msra.mxu1 %v17031_v24  ;;  %15258 = vmatprep.subr.bf16.mxu0 %v17032_v37 }
 0x700   : > { %15280 = vmatprep.subr.bf16.mxu1 %v17034_v49 }
 0x702   : > { %15259 = vmatpush3.bf16.msra.mxu0 %v17033_v29 }
 0x703   : > { %15260 = vmatprep.subr.bf16.mxu0 %v17036_v51  ;;  %15281 = vmatpush3.bf16.msra.mxu1 %v17035_v25 }
 0x704   : > { %15282 = vmatprep.subr.bf16.mxu1 %v17038_v56 }
 0x706   : > { %15261 = vmatpush3.bf16.msra.mxu0 %v17037_v23 }
 0x707   : > { %15262 = vmatprep.subr.bf16.mxu0 %v17040_v31  ;;  %15283 = vmatpush3.bf16.msra.mxu1 %v17039_v62 }
 0x708   : > { %15284 = vmatprep.subr.bf16.mxu1 %v17042_v34 }
 0x70a   : > { %15263 = vmatpush3.bf16.msra.mxu0 %v17041_v54 }
 0x70b   : > { %15264 = vmatprep.subr.bf16.mxu0 %v17044_v28  ;;  %15285 = vmatpush3.bf16.msra.mxu1 %v17043_v61 }
 0x70c   : > { %v10452_v58 = vpop.f32.mrb[24].mxu0  ;;  %v10493_v3 = vpop.f32.mrb[24].mxu1  ;;  %15286 = vmatprep.subr.bf16.mxu1 %v17046_v55 }
 0x70d   : > { %v10453_v33 = vadd.f32 %v10452_v58, %v21631_v6  ;;  %v10494_v15 = vadd.f32 %v10493_v3, %v21633_v18  ;;  %v10454_v13 = vpop.f32.mrb[25].mxu0  ;;  %v10495_v14 = vpop.f32.mrb[25].mxu1 }
 0x70e   : > { %v10455_v22 = vadd.f32 %v10454_v13, %v21638_v38  ;;  %v10496_v47 = vadd.f32 %v10495_v14, %v21640_v43  ;;  %v10456_v52 = vpop.f32.mrb[26].mxu0  ;;  %v10497_v19 = vpop.f32.mrb[26].mxu1  ;;  %15265 = vmatpush3.bf16.msra.mxu0 %v17045_v9 }
 0x70f   : > { %v10457_v59 = vpop.f32.mrb[27].mxu0  ;;  %v10498_v32 = vpop.f32.mrb[27].mxu1  ;;  %15266 = vmatprep.subr.bf16.mxu0 %v17048_v0  ;;  %15287 = vmatpush3.bf16.msra.mxu1 %v17047_v36 }
 0x710   : > { %15288 = vmatprep.subr.bf16.mxu1 %v17050_v50  ;;  %v11951_v32 = vld [vmem:[%s22055_s7] sm:$0xf] }
 0x712   : > { %15267 = vmatpush3.bf16.msra.mxu0 %v17049_v35 }
 0x713   : > { %15268 = vmatprep.subr.bf16.mxu0 %v17052_v42  ;;  %15289 = vmatpush3.bf16.msra.mxu1 %v17051_v16 }
 0x714   : > { %15290 = vmatprep.subr.bf16.mxu1 %v17054_v30 }
 0x716   : > { %15269 = vmatpush3.bf16.msra.mxu0 %v17053_v11 }
 0x717   : > { %15298 = vmatprep.subr.bf16.mxu0 %v17056_v12  ;;  %15291 = vmatpush3.bf16.msra.mxu1 %v17055_v1 }
 0x718   : > { %15320 = vmatprep.subr.bf16.mxu1 %v17058_v53 }
 0x74c   : > { %v10923_v8 = vpop.f32.mrb[28].mxu0 }
 0x74d   : > { %v21760_v45 = vadd.f32 %v10923_v8, %v10453_v33  ;;  %v10964_v48 = vpop.f32.mrb[28].mxu1  ;;  %v10925_v17 = vpop.f32.mrb[29].mxu0  ;;  %v11956_v8 = vrot.slane %v11951_v32, %v22090_v40 }
 0x74e   : > { %v21762_v27 = vadd.f32 %v10964_v48, %v10494_v15  ;;  %v21764_v6 = vadd.f32 %v10925_v17, %v10455_v22  ;;  %v10966_v18 = vpop.f32.mrb[29].mxu1  ;;  %v10927_v4 = vpop.f32.mrb[30].mxu0  ;;  %v11964_v48 = vrot.slane %v11951_v32, %v22091_v20  ;;  %v11960_v17 = vrot.slane %v11951_v32, %v22092_v26 }
 0x74f   : > { %v21766_v21 = vadd.f32 %v10966_v18, %v10496_v47  ;;  %v10968_v38 = vpop.f32.mrb[30].mxu1  ;;  %v10928_v41 = vpop.f32.mrb[31].mxu0  ;;  %v11968_v4 = vrot.slane %v11951_v32, %v22093_v63 }
 0x750   : > { %v10969_v43 = vpop.f32.mrb[31].mxu1 }
 0x78c   : > { %v11416_v46 = vpop.f32.mrb[32].mxu0 }
 0x78d   : > { %v11464_v58 = vadd.f32 %v11416_v46, %v21760_v45  ;;  %v11457_v3 = vpop.f32.mrb[32].mxu1  ;;  %v11418_v33 = vpop.f32.mrb[33].mxu0 }
 0x78e   : > { %v11466_v15 = vadd.f32 %v11457_v3, %v21762_v27  ;;  %v11465_v13 = vadd.f32 %v11418_v33, %v21764_v6  ;;  %v11459_v14 = vpop.f32.mrb[33].mxu1  ;;  %v11420_v22 = vpop.f32.mrb[34].mxu0 }
 0x78f   : > { %v11467_v47 = vadd.f32 %v11459_v14, %v21766_v21  ;;  %v11461_v52 = vpop.f32.mrb[34].mxu1  ;;  %v11421_v19 = vpop.f32.mrb[35].mxu0 }
 0x790   : > { %v11462_v59 = vpop.f32.mrb[35].mxu1 }
 0x7cc   : > { %v11899_v45 = vpop.f32.mrb[36].mxu0 }
 0x7cd   : > { %v11947_v27 = vadd.f32 %v11899_v45, %v11464_v58  ;;  %v11940_v6 = vpop.f32.mrb[36].mxu1  ;;  %v11901_v18 = vpop.f32.mrb[37].mxu0 }
 0x7ce   : > { %v11949_v21 = vadd.f32 %v11940_v6, %v11466_v15  ;;  %v11948_v38 = vadd.f32 %v11901_v18, %v11465_v13  ;;  %v11942_v41 = vpop.f32.mrb[37].mxu1  ;;  %v11903_v43 = vpop.f32.mrb[38].mxu0 }
 0x7cf   : > { %v11973_v5 = vadd.f32 %v11956_v8, %v11947_v27  ;;  %v11950_v57 = vadd.f32 %v11942_v41, %v11467_v47  ;;  %v11944_v60 = vpop.f32.mrb[38].mxu1  ;;  %v11904_v7 = vpop.f32.mrb[39].mxu0 }
 0x7d0   : > { %v11975_v44 = vadd.f32 %v11964_v48, %v11949_v21  ;;  %v11974_v40 = vadd.f32 %v11960_v17, %v11948_v38  ;;  %v11945_v39 = vpop.f32.mrb[39].mxu1 }
 0x7d1   : > { %v11977_v2 = vmax.f32 %v11973_v5, 0.0  ;;  %v11976_v20 = vadd.f32 %v11968_v4, %v11950_v57 }
 0x7d2   : > { %v11979_v24 = vmax.f32 %v11975_v44, 0.0  ;;  %v11978_v26 = vmax.f32 %v11974_v40, 0.0  ;;  %v17057_v40 = vld [vmem:[%s22052_s4 + $0x100] sm:$0xff]  }
 0x7d3   : > { %v11980_v37 = vmax.f32 %v11976_v20, 0.0 }
 0x7d4   : > { %v11981_v29 = vmax.f32 %v11977_v2, %v11979_v24 }
 0x7d5   : > { %v11982_v49 = vmax.f32 %v11978_v26, %v11980_v37  ;;  %v17059_v26 = vld [vmem:[%s22052_s4 + $0x180] sm:$0xff]   ;;  %v17060_v37 = vld [vmem:[%s22052_s4 + $0x148] sm:$0xff]  }
 0x7d7   : > { %v11985_v25 = vcombine.low %v11981_v29, %v11982_v49  ;;  %v11986_v63 = vcombine.high %v11981_v29, %v11982_v49 }
 0x7d9   : > { %v11993_v51 = vrot.slane %v11985_v25, %v22087_v10  ;;  %v12000_v23 = vrot.slane %v11986_v63, %v22087_v10  ;;  %v17062_v25 = vld [vmem:[%s22052_s4 + $0x1c8] sm:$0xff]  }
 0x7da   : > { %v17061_v63 = vld [vmem:[%s22052_s4 + $0x108] sm:$0xff]  }
 0x7db   : > { %v12001_v56 = vcombine.high %v11993_v51, %v11993_v51  ;;  %v12002_v31 = vcombine.high %v12000_v23, %v12000_v23  ;;  %v12009_v62 = vrot.slane %v11993_v51, %v22087_v10  ;;  %v21885_v34 = vrot.slane %v12000_v23, %v22087_v10  ;;  %v17064_v23 = vld [vmem:[%s22052_s4 + $0x150] sm:$0xff]  }
 0x7dd   : > { %v12017_v54 = vrot.slane %v12001_v56, %v22087_v10  ;;  %v21889_v28 = vrot.slane %v12002_v31, %v22087_v10  ;;  %v12010_v61 = vcombine.high %v12009_v62, %v12009_v62  ;;  %v12043_v55 = vsel %vm3625_vm2, %v12009_v62, -inf  ;;  %v17063_v56 = vld [vmem:[%s22052_s4 + $0x188] sm:$0xff]   ;;  %v17066_v62 = vld [vmem:[%s22052_s4 + $0x1d0] sm:$0xff]  }
 0x7de   : > { %v12044_v9 = vrot.slane %v12043_v55, 4  ;;  %v12026_v0 = vcombine.high %v21885_v34, %v21885_v34  ;;  %v12071_v31 = vsel %vm3625_vm2, %v21885_v34, -inf }
 0x7df   : > { %v12050_v36 = vsel %vm3625_vm2, %v12010_v61, -inf  ;;  %v12018_v50 = vcombine.high %v12017_v54, %v12017_v54  ;;  %v12057_v35 = vsel %vm3625_vm2, %v12017_v54, -inf  ;;  %v12034_v42 = vcombine.high %v21889_v28, %v21889_v28  ;;  %v17065_v54 = vld [vmem:[%s22052_s4 + $0x110] sm:$0xff]  }
 0x7e0   : > { %v12051_v16 = vrot.slane %v12050_v36, 4  ;;  %v12045_v30 = vmax.f32 %v12043_v55, %v12044_v9  ;;  %v12078_v10 = vsel %vm3625_vm2, %v12026_v0, -inf  ;;  %v12058_v11 = vrot.slane %v12057_v35, 4  ;;  %v17068_v55 = vld [vmem:[%s22052_s4 + $0x158] sm:$0xff]   ;;  %v17067_v9 = vld [vmem:[%s22052_s4 + $0x190] sm:$0xff]  }
 0x7e1   : > { %v12064_v12 = vsel %vm3625_vm2, %v12018_v50, -inf  ;;  %v12079_v1 = vrot.slane %v12078_v10, 4  ;;  %v12092_v53 = vsel %vm3625_vm2, %v12034_v42, -inf  ;;  %v12085_v61 = vsel %vm3625_vm2, %v21889_v28, -inf  ;;  %v17070_v0 = vld [vmem:[%s22052_s4 + $0x1d8] sm:$0xff]   ;;  %v17072_v50 = vld [vmem:[%s22052_s4 + $0x160] sm:$0xff]  }
 0x7e2   : > { %v12052_v46 = vmax.f32 %v12050_v36, %v12051_v16  ;;  %v12046_v58 = vrot.slane %v12045_v30, 2  ;;  %v12065_v3 = vrot.slane %v12064_v12, 4  ;;  %v12059_v33 = vmax.f32 %v12057_v35, %v12058_v11  ;;  %v17069_v28 = vld [vmem:[%s22052_s4 + $0x118] sm:$0xff]   ;;  %v17074_v16 = vld [vmem:[%s22052_s4 + $0x1e0] sm:$0xff]   ;;  %v17076_v11 = vld [vmem:[%s22052_s4 + $0x168] sm:$0xff]  }
 0x7e3   : > { %v12080_v15 = vmax.f32 %v12078_v10, %v12079_v1  ;;  %v12093_v13 = vrot.slane %v12092_v53, 4  ;;  %v12072_v34 = vrot.slane %v12071_v31, 4  ;;  %v12086_v36 = vrot.slane %v12085_v61, 4  ;;  %v17071_v42 = vld [vmem:[%s22052_s4 + $0x198] sm:$0xff]   ;;  %v17073_v10 = vld [vmem:[%s22052_s4 + $0x120] sm:$0xff]  }
 0x7e4   : > { %v12053_v14 = vrot.slane %v12052_v46, 2  ;;  %v12047_v22 = vmax.f32 %v12045_v30, %v12046_v58  ;;  %v12066_v47 = vmax.f32 %v12064_v12, %v12065_v3  ;;  %v12060_v52 = vrot.slane %v12059_v33, 2  ;;  %v17075_v1 = vld [vmem:[%s22052_s4 + $0x1a0] sm:$0xff]   ;;  %v17077_v58 = vld [vmem:[%s22052_s4 + $0x128] sm:$0xff]   ;;  %v17080_v3 = vld [vmem:[%s22052_s4 + $0x170] sm:$0xff]  }
 0x7e5   : > { %v12081_v19 = vrot.slane %v12080_v15, 2  ;;  %v12094_v59 = vmax.f32 %v12092_v53, %v12093_v13  ;;  %v12073_v35 = vmax.f32 %v12071_v31, %v12072_v34  ;;  %v12087_v30 = vmax.f32 %v12085_v61, %v12086_v36  ;;  %v17078_v53 = vld [vmem:[%s22052_s4 + $0x1e8] sm:$0xff]   ;;  %v17082_v13 = vld [vmem:[%s22052_s4 + $0x1f0] sm:$0xff]  }
 0x7e6   : > { %v12054_v32 = vmax.f32 %v12052_v46, %v12053_v14  ;;  %v12048_v8 = vrot.slane %v12047_v22, 1  ;;  %v12067_v45 = vrot.slane %v12066_v47, 2  ;;  %v12061_v48 = vmax.f32 %v12059_v33, %v12060_v52 }
 0x7e7   : > { %v12082_v17 = vmax.f32 %v12080_v15, %v12081_v19  ;;  %v12095_v27 = vrot.slane %v12094_v59, 2  ;;  %v12074_v12 = vrot.slane %v12073_v35, 2  ;;  %v12088_v46 = vrot.slane %v12087_v30, 2  ;;  %v17079_v15 = vld [vmem:[%s22052_s4 + $0x1a8] sm:$0xff]   ;;  %v17083_v19 = vld [vmem:[%s22052_s4 + $0x1b0] sm:$0xff]  }
 0x7e8   : > { %v12055_v6 = vrot.slane %v12054_v32, 1  ;;  %v12068_v18 = vmax.f32 %v12066_v47, %v12067_v45  ;;  %v12062_v4 = vrot.slane %v12061_v48, 1  ;;  %v12049_v21 = vmax.f32 %v12047_v22, %v12048_v8  ;;  %v17081_v22 = vld [vmem:[%s22052_s4 + $0x130] sm:$0xff]   ;;  %v17084_v47 = vld [vmem:[%s22052_s4 + $0x178] sm:$0xff]  }
 0x7e9   : > { %v12083_v38 = vrot.slane %v12082_v17, 1  ;;  %v12096_v41 = vmax.f32 %v12094_v59, %v12095_v27  ;;  %v12075_v33 = vmax.f32 %v12073_v35, %v12074_v12  ;;  %v12089_v14 = vmax.f32 %v12087_v30, %v12088_v46  ;;  %v17086_v59 = vld [vmem:[%s22052_s4 + $0x1f8] sm:$0xff]  }
 0x7ea   : > { %v12056_v43 = vmax.f32 %v12054_v32, %v12055_v6  ;;  %v12069_v5 = vrot.slane %v12068_v18, 1  ;;  %v12063_v60 = vmax.f32 %v12061_v48, %v12062_v4  ;;  %v12100_v2 = vpack.c.bf16 %v12049_v21, %v12049_v21  ;;  %v17085_v8 = vld [vmem:[%s22052_s4 + $0x138] sm:$0xff]   ;;  %v12099_v4 = vld [vmem:[%s22056_s8] sm:$0x1] }
 0x7eb   : > { %v12084_v57 = vmax.f32 %v12082_v17, %v12083_v38  ;;  %v12097_v7 = vrot.slane %v12096_v41, 1  ;;  %v12076_v52 = vrot.slane %v12075_v33, 1  ;;  %v12090_v32 = vrot.slane %v12089_v14, 1  ;;  %v17087_v48 = vld [vmem:[%s22052_s4 + $0x1b8] sm:$0xff]  }
 0x7ec   : > { %v12101_v44 = vpack.c.bf16 %v12056_v43, %v12056_v43  ;;  %v12070_v39 = vmax.f32 %v12068_v18, %v12069_v5  ;;  %v12271_v49 = vpack.c.bf16 %v12063_v60, %v12063_v60 }
 0x7ed   : > { %v12098_v20 = vmax.f32 %v12096_v41, %v12097_v7  ;;  %v12444_v29 = vpack.c.bf16 %v12084_v57, %v12084_v57  ;;  %v12077_v45 = vmax.f32 %v12075_v33, %v12076_v52  ;;  %v12091_v17 = vmax.f32 %v12089_v14, %v12090_v32 }
 0x7ee   : > { %12262 = vmatprep.mubr.bf16.mxu0 %v12101_v44  ;;  %v12272_v24 = vpack.c.bf16 %v12070_v39, %v12070_v39 }
 0x7ef   : > { %12263 = vmatmul.mubr.bf16.vlgmr.msra.gmra.mrb[40].mxu0 %v12100_v2  ;;  %v12616_v51 = vpack.c.bf16 %v12098_v20, %v12098_v20  ;;  %v12443_v27 = vpack.c.bf16 %v12077_v45, %v12077_v45  ;;  %v12615_v6 = vpack.c.bf16 %v12091_v17, %v12091_v17 }
 0x7f0   : > { %15299 = vmatpush3.bf16.msra.mxu0 %v17057_v40  ;;  %12434 = vmatprep.mubr.bf16.mxu1 %v12272_v24 }
 0x7f1   : > { %12606 = vmatprep.mubr.bf16.mxu0 %v12444_v29  ;;  %12435 = vmatmul.mubr.bf16.vlgmr.msra.gmra.mrb[40].mxu1 %v12271_v49 }
 0x7f2   : > { %15321 = vmatpush3.bf16.msra.mxu1 %v17059_v26  ;;  %15300 = vmatprep.subr.bf16.mxu0 %v17060_v37 }
 0x7f3   : > { %12778 = vmatprep.mubr.bf16.mxu1 %v12616_v51  ;;  %15322 = vmatprep.subr.bf16.mxu1 %v17062_v25 }
 0x7f4   : > { %15301 = vmatpush3.bf16.msra.mxu0 %v17061_v63 }
 0x7f5   : > { %15302 = vmatprep.subr.bf16.mxu0 %v17064_v23 }
 0x7f6   : > { %15323 = vmatpush3.bf16.msra.mxu1 %v17063_v56 }
 0x7f7   : > { %15324 = vmatprep.subr.bf16.mxu1 %v17066_v62 }
 0x7f8   : > { %15303 = vmatpush3.bf16.msra.mxu0 %v17065_v54 }
 0x7f9   : > { %15304 = vmatprep.subr.bf16.mxu0 %v17068_v55 }
 0x7fa   : > { %15325 = vmatpush3.bf16.msra.mxu1 %v17067_v9 }
 0x7fb   : > { %15326 = vmatprep.subr.bf16.mxu1 %v17070_v0 }
 0x7fc   : > { %15305 = vmatpush3.bf16.msra.mxu0 %v17069_v28 }
 0x7fd   : > { %15306 = vmatprep.subr.bf16.mxu0 %v17072_v50 }
 0x7fe   : > { %15327 = vmatpush3.bf16.msra.mxu1 %v17071_v42 }
 0x7ff   : > { %15328 = vmatprep.subr.bf16.mxu1 %v17074_v16 }
 0x800   : > { %15307 = vmatpush3.bf16.msra.mxu0 %v17073_v10 }
 0x801   : > { %15308 = vmatprep.subr.bf16.mxu0 %v17076_v11 }
 0x802   : > { %15329 = vmatpush3.bf16.msra.mxu1 %v17075_v1 }
 0x803   : > { %15330 = vmatprep.subr.bf16.mxu1 %v17078_v53 }
 0x804   : > { %15309 = vmatpush3.bf16.msra.mxu0 %v17077_v58 }
 0x805   : > { %15310 = vmatprep.subr.bf16.mxu0 %v17080_v3 }
 0x806   : > { %15331 = vmatpush3.bf16.msra.mxu1 %v17079_v15 }
 0x807   : > { %15332 = vmatprep.subr.bf16.mxu1 %v17082_v13 }
 0x808   : > { %15311 = vmatpush3.bf16.msra.mxu0 %v17081_v22 }
 0x809   : > { %15312 = vmatprep.subr.bf16.mxu0 %v17084_v47 }
 0x80a   : > { %15333 = vmatpush3.bf16.msra.mxu1 %v17083_v19 }
 0x80b   : > { %15334 = vmatprep.subr.bf16.mxu1 %v17086_v59 }
 0x80c   : > { %15313 = vmatpush3.bf16.msra.mxu0 %v17085_v8 }
 0x80e   : > { %15335 = vmatpush3.bf16.msra.mxu1 %v17087_v48 }
 0x80f   : > { %12607 = vmatmul.mubr.bf16.vlgmr.msra.gmra.mrb[44].mxu0 %v12443_v27 }
 0x811   : > { %12779 = vmatmul.mubr.bf16.vlgmr.msra.gmra.mrb[44].mxu1 %v12615_v6 }
 0x8c2   : > { %v15270_v18 = vpop.f32.mrb[40].mxu0 }
 0x8c3   : > { %v15271_v21 = vpop.f32.mrb[41].mxu0 }
 0x8c4   : > { %v15272_v38 = vadd.f32 %v15271_v21, %v15270_v18  ;;  %v15273_v41 = vpop.f32.mrb[42].mxu0  ;;  %v15292_v43 = vpop.f32.mrb[40].mxu1 }
 0x8c5   : > { %v15274_v5 = vpop.f32.mrb[43].mxu0  ;;  %v15293_v57 = vpop.f32.mrb[41].mxu1 }
 0x8c6   : > { %v12270_v60 = vadd.f32 %v15272_v38, %v12099_v4  ;;  %v15294_v7 = vadd.f32 %v15293_v57, %v15292_v43  ;;  %v15295_v44 = vpop.f32.mrb[42].mxu1 }
 0x8c7   : > { %v15296_v40 = vpop.f32.mrb[43].mxu1 }
 0x8c8   : > { %v12442_v39 = vadd.f32 %v15294_v7, %v12270_v60 }
 0x8e2   : > { %v15314_v2 = vpop.f32.mrb[44].mxu0 }
 0x8e3   : > { %v15315_v20 = vpop.f32.mrb[45].mxu0 }
 0x8e4   : > { %v15316_v24 = vadd.f32 %v15315_v20, %v15314_v2  ;;  %v15317_v26 = vpop.f32.mrb[46].mxu0  ;;  %v15336_v37 = vpop.f32.mrb[44].mxu1 }
 0x8e5   : > { %v15318_v29 = vpop.f32.mrb[47].mxu0  ;;  %v15337_v49 = vpop.f32.mrb[45].mxu1 }
 0x8e6   : > { %v12614_v25 = vadd.f32 %v15316_v24, %v12442_v39  ;;  %v15338_v63 = vadd.f32 %v15337_v49, %v15336_v37  ;;  %v15339_v51 = vpop.f32.mrb[46].mxu1 }
 0x8e7   : > { %v15340_v23 = vpop.f32.mrb[47].mxu1 }
 0x8e8   : > { %v12786_v56 = vadd.f32 %v15338_v63, %v12614_v25 }
 0x8ea   : > { %v12788_v31 = vsel %vm12787_vm14, %v12786_v56, -inf }
 0x8eb   : > { %12789 = vmax.xlane.f32.xlu0 %v12788_v31 }
 0x978   : > { %v12790_v62 = vpop.xlane.xlu0 %12789 }
 0x979   : > { %v12791_v54 = vsub.f32 %v12786_v56, %v12790_v62 }
 0x97b   : > { %v12792_v61 = vmul.f32 1.442695, %v12791_v54 }
 0x97d   : > { %17088 = vpow2.f32 %v12792_v61 }
 0x987   : > { %v17089_v55 = vpop.eup %17088 }
 0x988   : > { %v12794_v34 = vsel %vm12787_vm14, %v17089_v55, 0.0 }
 0x989   : > { %12795 = vadd.xlane.f32.xlu0 %v12794_v34 }
 0xa16   : > { %v12796_v9 = vpop.xlane.xlu0 %12795 }
 0xa17   : > { %17090 = vrcp.f32 %v12796_v9 }
 0xa21   : > { %v17091_v0 = vpop.eup %17090 }
 0xa22   : > { %v12798_v36 = vmul.f32 %v17091_v0, %v17089_v55 }
 0xa24   : > { %12799 = vst.msk [vmem:[%s324_s21] sm:$0x1] %vm12787_vm14, %v12798_v36 }
 0xa25   : > { %17113 = shalt.err (!%p17110_p3)
}
 0xa26   : > { %s17114_s16 = scalar_lea.hbm %s22005_s25, 16  ;;  %s17118_s21 = scalar_lea.hbm %s22057_s9, 32 }
 0xa27   : > { %p17115_p4 = scmp.ne.s32.totalorder %s22005_s25, %s17114_s16  ;;  %p17119_p9 = scmp.lt.u32.totalorder %s22005_s25, %s22057_s9 }
 0xa28   : > { %p17120_p10 = scmp.lt.u32.totalorder %s17118_s21, %s17114_s16  ;;  %p17122_p12 = scmp.lt.u32.totalorder %s17114_s16, %s22005_s25 }
 0xa29   : > { %p17116_p7 = pnand %p17115_p4, %p17256_p5 }
 0xa2a   : > { %p17121_p11 = por %p17120_p10, %p17119_p9 }
 0xa2b   : > { %p17117_p8 = pneg %p17116_p7 }
 0xa2c   : > { %p17123_p13 = por %p17122_p12, %p17121_p11 }
 0xa2e   : > { %p17124_p0 = pnand %p17123_p13, %p17117_p8 }
 0xa30   : > { %17127 = shalt.err (!%p17124_p0)
}
 0xa31   : > { %15542 = dma.vmem_to_hbm [thread:$0]  (%p17256_p5), %s22007_s22, 16, %s22005_s25, %s12801_s26  }
 0xa32 PF: > { %p15548_p1 = scmp.ge.s32.totalorder %s17162_s12, 2  ;;  %s12825_s28 = sand.u32 1, %s17150_s30  }
 0xa33   : > { %s12826_s13 = scalar_lea.sflag [#allocation6], %s12825_s28 }
 0xa34   : > { %p15545_p2 = pnand %p15548_p1, %p17260_p6 }
 0xa36   : > { %17145 = dma.done.wait (!%p15545_p2), %s12826_s13, 16  }
 0xa37   : > { %17147 = vsyncadd (!%p15545_p2), %s12826_s13, 4294967280  ;;  %p19_p3 = scmp.ge.s32.totalorder %s17243_s15, 4   ;;  %s22094_s30 = smov %s17154_s10 }
 0xa38   : > { %s22095_s10 = smov %s17158_s11  ;;  %s22096_s11 = smov %s17254_s18 }
 0xa39   : > { %s22097_s12 = smov %s17243_s15  ;;  %21 = sbr.rel (!%p19_p3) target bundleno = 3 (0x3), region = 106 }
 0xa40   :  { %12830 = vsyncpa [#allocation6], 1 }
 0xa41   :  { %12832 = vsyncpa [#allocation6 + $0x1], 1 }

</bundles_post_ra>
